<compile_context>
chip_gen: v7x
topology: tpu7x:2x2x1
jax: 0.10.0
libtpu: 0.0.40
codegen_flags: <defaults>
</compile_context>

<pallas_src>
import jax
import jax.numpy as jnp
from jax.experimental import pallas as pl
from jax.experimental.pallas import tpu as pltpu

LANE = 128


def _round_up(x, m):
    return ((x + m - 1) // m) * m


def _softplus(x):
    # log(1 + exp(x)) without overflow (reference uses the naive formula).
    return jnp.maximum(x, 0.0) + jnp.log(1.0 + jnp.exp(-jnp.abs(x)))


def make_deepar_kernel(*, num_layers, hidden_pad, len_in, num_steps, train):
    """Build the single-tile DeepAR kernel (time loop unrolled; T up to a few dozen)."""
    Hp = hidden_pad

    def kernel(*refs):
        idx = 0
        teach_ref = refs[idx]; idx += 1                     # [bn, num_steps]
        noise_ref = None
        if not train:
            noise_ref = refs[idx]; idx += 1                 # [bn, num_steps]

        # ---- hoisted weight loads (once per grid step, off the time loop) ----
        w0 = refs[idx][...]; idx += 1                       # [1, 4*Hp]  f32 (folded embed)
        layer_w = []
        for l in range(num_layers):
            w_ih = None
            if l > 0:
                w_ih = refs[idx][...]; idx += 1             # [Hp, 4*Hp] bf16
            w_hh = refs[idx][...]; idx += 1                 # [Hp, 4*Hp] bf16
            b = refs[idx][...]; idx += 1                    # [1, 4*Hp]  f32
            layer_w.append((w_ih, w_hh, b))
        w_out = refs[idx][...]; idx += 1                    # [Hp, 2]    bf16
        b_out = refs[idx][...]; idx += 1                    # [1, 2]     f32
        mus_ref = refs[idx]; idx += 1                       # [bn, s_pad]
        sigmas_ref = refs[idx]; idx += 1                    # [bn, s_pad]

        teach = teach_ref[...]
        noise = noise_ref[...] if noise_ref is not None else None
        bn = teach.shape[0]

        # zero-init once so padded output lanes are deterministic (single dense pass)
        mus_ref[...] = jnp.zeros_like(mus_ref)
        sigmas_ref[...] = jnp.zeros_like(sigmas_ref)

        hs = [jnp.zeros((bn, Hp), jnp.float32) for _ in range(num_layers)]
        cs = [jnp.zeros((bn, Hp), jnp.float32) for _ in range(num_layers)]
        hs_bf = [jnp.zeros((bn, Hp), jnp.bfloat16) for _ in range(num_layers)]
        sample = None

        # TODO(synk): for horizons of a few hundred steps, turn this Python unroll
        # into two lax.fori_loop segments (teacher-forced / autoregressive) with
        # pl.ds column stores to bound code size and vreg live ranges.
        for g in range(num_steps):                          # g = t - 1, t in [1, T-1]
            t = g + 1
            if train or t <= len_in:
                xt = teach[:, g:g + 1]                      # teacher forcing, [bn, 1]
            else:
                xt = sample                                 # autoregressive feedback

            inp_bf = None
            for l in range(num_layers):
                w_ih, w_hh, b = layer_w[l]
                if l == 0:
                    ih = xt * w0                            # [bn,1]*[1,4Hp] broadcast (VPU)
                else:
                    ih = jnp.dot(inp_bf, w_ih, preferred_element_type=jnp.float32)
                gates = ih + jnp.dot(hs_bf[l], w_hh,
                                     preferred_element_type=jnp.float32) + b
                # torch gate order (i, f, g, o); Hp-wide, full-vreg-aligned slices
                i_g = jax.nn.sigmoid(gates[:, 0 * Hp:1 * Hp])
                f_g = jax.nn.sigmoid(gates[:, 1 * Hp:2 * Hp])
                g_g = jnp.tanh(gates[:, 2 * Hp:3 * Hp])
                o_g = jax.nn.sigmoid(gates[:, 3 * Hp:4 * Hp])
                cs[l] = f_g * cs[l] + i_g * g_g
                hs[l] = o_g * jnp.tanh(cs[l])
                hs_bf[l] = hs[l].astype(jnp.bfloat16)
                inp_bf = hs_bf[l]

            # Gaussian likelihood head on h of the last layer
            head = jnp.dot(hs_bf[-1], w_out,
                           preferred_element_type=jnp.float32) + b_out
            mu = head[:, 0:1]                               # [bn, 1]
            sigma = _softplus(head[:, 1:2]) + 1e-6          # [bn, 1]

            # static 1-lane column stores into the VMEM-resident output blocks
            mus_ref[:, g:g + 1] = mu
            sigmas_ref[:, g:g + 1] = sigma

            # sample only when it feeds the next (autoregressive) step; the dense
            # preds = mus + sigmas * noise are computed in the wrapper.
            if (not train) and (g + 1 < num_steps) and (g + 2 > len_in):
                sample = mu + sigma * noise[:, g:g + 1]

    return kernel


def _pad_gate_cols(w, h, h_pad):
    """[n, 4h] torch-gate-ordered (i,f,g,o) -> [n, 4*h_pad]; each gate block zero-padded."""
    n = w.shape[0]
    w4 = w.reshape(n, 4, h)
    w4 = jnp.pad(w4, ((0, 0), (0, 0), (0, h_pad - h)))
    return w4.reshape(n, 4 * h_pad)


def prepare_kernel_params(params, embedding_size, hidden_size, num_layers):
    """Pad H to 128 lanes, fold the input embedding into layer 0, cast MXU weights to bf16."""
    del embedding_size  # fully folded into layer 0
    H = hidden_size
    Hp = _round_up(H, LANE)
    w_emb, b_emb = params["w_emb"], params["b_emb"]          # [1, E], [1, E]

    kp = {"Hp": Hp, "lstm": []}
    for l in range(num_layers):
        w_ih, w_hh, b = params["lstm"][l]                    # [in_l,4H], [H,4H], [1,4H]
        if l == 0:
            # fold Linear(1->E): (x*w_emb + b_emb) @ W_ih0 = x*(w_emb@W_ih0) + b_emb@W_ih0
            w0 = w_emb @ w_ih                                # [1, 4H]
            b = b + b_emb @ w_ih                             # [1, 4H]
            kp["w0"] = _pad_gate_cols(w0, H, Hp)             # f32, used on the VPU
            w_ih_p = None
        else:
            w_ih_p = jnp.pad(_pad_gate_cols(w_ih, H, Hp),
                             ((0, Hp - H), (0, 0))).astype(jnp.bfloat16)
        w_hh_p = jnp.pad(_pad_gate_cols(w_hh, H, Hp),
                         ((0, Hp - H), (0, 0))).astype(jnp.bfloat16)
        b_p = _pad_gate_cols(b, H, Hp)                       # f32
        kp["lstm"].append((w_ih_p, w_hh_p, b_p))

    kp["w_out"] = jnp.pad(params["w_out"], ((0, Hp - H), (0, 0))).astype(jnp.bfloat16)
    kp["b_out"] = params["b_out"]
    return kp


def run_deepar_core(kp, teach, noise, *, train, num_layers, len_in, block_bn=None):
    """Run the Pallas kernel on flattened [BN, T-1] series (tiled over BN)."""
    BN, num_steps = teach.shape
    s_pad = _round_up(num_steps, LANE)
    Hp = kp["Hp"]

    if block_bn is None:
        # >= 2 BN tiles (v7x megacore) while keeping M large for the MXU and the
        # per-tile VMEM footprint bounded on v7x's smaller VMEM.
        block_bn = min(256, max(8, _round_up((BN + 1) // 2, 8)))
    block_bn = max(8, min(block_bn, _round_up(BN, 8)))
    bn_pad = _round_up(BN, block_bn)
    grid = (bn_pad // block_bn,)

    def pad_rows(x):
        if bn_pad == x.shape[0]:
            return x
        return jnp.concatenate(
            [x, jnp.zeros((bn_pad - x.shape[0], x.shape[1]), x.dtype)], axis=0)

    def tile_spec(ncols):
        return pl.BlockSpec((block_bn, ncols), lambda i: (i, 0))

    def full_spec(shape):
        nd = len(shape)
        return pl.BlockSpec(shape, lambda i, _nd=nd: (0,) * _nd)

    weights = [kp["w0"]]
    for l, (w_ih, w_hh, b) in enumerate(kp["lstm"]):
        if l > 0:
            weights.append(w_ih)
        weights += [w_hh, b]
    weights += [kp["w_out"], kp["b_out"]]

    series = [pad_rows(teach)] + ([] if train else [pad_rows(noise)])
    inputs = series + weights
    # NOTE: the weight blocks have a constant index_map so they are fetched once and
    # revisited; their footprint (<1 MiB bf16) makes the default buffering harmless.
    in_specs = ([tile_spec(num_steps)] * len(series)
                + [full_spec(w.shape) for w in weights])
    out_specs = (tile_spec(s_pad), tile_spec(s_pad))
    out_shape = (jax.ShapeDtypeStruct((bn_pad, s_pad), jnp.float32),
                 jax.ShapeDtypeStruct((bn_pad, s_pad), jnp.float32))

    kernel = make_deepar_kernel(
        num_layers=num_layers, hidden_pad=Hp, len_in=len_in,
        num_steps=num_steps, train=train)

    mus, sigmas = pl.pallas_call(
        kernel,
        grid=grid,
        in_specs=in_specs,
        out_specs=out_specs,
        out_shape=out_shape,
        compiler_params=pltpu.CompilerParams(
            dimension_semantics=("parallel",)),
    )(*inputs)
    return mus[:BN, :num_steps], sigmas[:BN, :num_steps]


def deepar_forward(params, history_data, future_data, train, history_mask,
                   future_mask, noise_key, *, embedding_size, hidden_size,
                   num_layers, block_bn=None):
    """Mirror of DeepAR.forward. history/future_data: [B, L, N, C]; masks: [B, L, N]."""
    B, L_in, N, C = history_data.shape
    L_out = future_data.shape[1]
    T = L_in + L_out
    num_steps = T - 1

    mask = jnp.concatenate([history_mask, future_mask], axis=1)[..., None][:, 1:, ...]
    means = jnp.mean(history_data, axis=1, keepdims=True)                   # [B,1,N,C]
    stdev = jnp.sqrt(jnp.var(history_data, axis=1, keepdims=True) + 1e-5)   # unbiased=False

    # channel-0 series flattened to [B*N, L] (row order b*N + n), pre-normalized here
    hist_c0 = jnp.transpose(history_data[..., 0], (0, 2, 1)).reshape(B * N, L_in)
    fut_c0 = jnp.transpose(future_data[..., 0], (0, 2, 1)).reshape(B * N, L_out)
    mean_c0 = means[:, 0, :, 0].reshape(B * N, 1)
    std_c0 = stdev[:, 0, :, 0].reshape(B * N, 1)
    hist_n = (hist_c0 - mean_c0) / std_c0
    fut_n = (fut_c0 - mean_c0) / std_c0
    # teacher-forcing inputs for steps t = 1..T-1 (normalized ground truth at t-1)
    teach = jnp.concatenate([hist_n, fut_n[:, :L_out - 1]], axis=1)         # [BN, T-1]

    # TODO(synk): torch.distributions.Normal.sample is stochastic; reproduced
    # deterministically as mu + sigma * eps with eps ~ N(0, 1) from a fixed key.
    noise = jax.random.normal(noise_key, (B * N, num_steps), jnp.float32)

    kp = prepare_kernel_params(params, embedding_size, hidden_size, num_layers)
    mus_n, sigmas_n = run_deepar_core(
        kp, teach, noise, train=train, num_layers=num_layers, len_in=L_in,
        block_bn=block_bn)

    # sampling hoisted off the serial recurrence: one dense op, identical to the
    # per-step feedback the kernel uses for the autoregressive tail (same noise).
    preds_n = mus_n + sigmas_n * noise

    def to_blnc(x):  # [BN, T-1] -> [B, T-1, N, 1]
        return jnp.transpose(x.reshape(B, N, num_steps), (0, 2, 1))[..., None]

    mus = to_blnc(mus_n)
    sigmas = to_blnc(sigmas_n)
    preds = to_blnc(preds_n)

    input_feat_full = jnp.concatenate(
        [history_data[:, :, :, 0:1], future_data[:, :, :, 0:1]], axis=1)
    reals = input_feat_full[:, -num_steps:, :, :]

    # NOTE: matches the reference, which also shifts sigma by `means` during
    # de-normalization (a pure scale would normally only be multiplied by stdev).
    preds = preds * stdev + means
    mus = mus * stdev + means
    sigmas = sigmas * stdev + means

    return {
        "prediction": preds * mask,
        "target": reals * mask,
        "mus": mus,
        "sigmas": sigmas,
        "mask_prior": mask,
    }


def init_params(key, embedding_size, hidden_size, num_layers):
    """Deterministic synthetic parameters with torch-Linear/LSTM-like uniform init."""
    H = hidden_size
    keys = jax.random.split(key, 4 + 4 * num_layers)

    def u(k, shape, fan_in):
        bound = float(1.0 / (fan_in ** 0.5))
        return jax.random.uniform(k, shape, jnp.float32, -bound, bound)

    params = {
        "w_emb": u(keys[0], (1, embedding_size), 1),     # Linear(1, E).weight^T
        "b_emb": u(keys[1], (1, embedding_size), 1),     # Linear(1, E).bias
        "w_out": u(keys[2], (H, 2), H),                  # [mu | sigma] head weights^T
        "b_out": u(keys[3], (1, 2), H),                  # [mu | sigma] head biases
        "lstm": [],
    }
    ki = 4
    for l in range(num_layers):
        in_l = embedding_size if l == 0 else H
        w_ih = u(keys[ki], (in_l, 4 * H), H); ki += 1    # W_ih^T, gate order (i,f,g,o)
        w_hh = u(keys[ki], (H, 4 * H), H); ki += 1       # W_hh^T
        b_ih = u(keys[ki], (1, 4 * H), H); ki += 1
        b_hh = u(keys[ki], (1, 4 * H), H); ki += 1
        params["lstm"].append((w_ih, w_hh, b_ih + b_hh))
    return params


if __name__ == "__main__":
    key = jax.random.PRNGKey(0)
    k_hist, k_fut, k_params, k_noise = jax.random.split(key, 4)

    # small shapes consistent with the module's forward
    B, N, C = 2, 4, 1
    L_in, L_out = 8, 4
    EMBED, HIDDEN, NUM_LAYERS = 16, 32, 2

    history_data = jax.random.normal(k_hist, (B, L_in, N, C), jnp.float32)
    future_data = jax.random.normal(k_fut, (B, L_out, N, C), jnp.float32)
    history_mask = jnp.ones((B, L_in, N), jnp.float32)
    future_mask = jnp.ones((B, L_out, N), jnp.float32)

    params = init_params(k_params, EMBED, HIDDEN, NUM_LAYERS)

    # train=True: teacher forcing for all steps
    out_train = deepar_forward(
        params, history_data, future_data, True, history_mask, future_mask,
        k_noise, embedding_size=EMBED, hidden_size=HIDDEN, num_layers=NUM_LAYERS)
    jax.block_until_ready(out_train)

    # train=False: autoregressive feedback past the history window
    out_eval = deepar_forward(
        params, history_data, future_data, False, history_mask, future_mask,
        k_noise, embedding_size=EMBED, hidden_size=HIDDEN, num_layers=NUM_LAYERS)
    jax.block_until_ready(out_eval)

    Tm1 = L_in + L_out - 1
    for out in (out_train, out_eval):
        assert out["prediction"].shape == (B, Tm1, N, 1)
        assert out["target"].shape == (B, Tm1, N, 1)
        assert out["mus"].shape == (B, Tm1, N, 1)
        assert out["sigmas"].shape == (B, Tm1, N, 1)
        for v in out.values():
            assert bool(jnp.all(jnp.isfinite(v)))
    print("KERNEL_OK")
</pallas_src>

<mosaic_0001>
module attributes {stable_mosaic.version = 11 : i64} {
  func.func @kernel(%arg0: i32, %arg1: memref<8x11xf32, #tpu.memory_space<vmem>>, %arg2: memref<1x512xf32, #tpu.memory_space<vmem>>, %arg3: memref<128x512xbf16, #tpu.memory_space<vmem>>, %arg4: memref<1x512xf32, #tpu.memory_space<vmem>>, %arg5: memref<128x512xbf16, #tpu.memory_space<vmem>>, %arg6: memref<128x512xbf16, #tpu.memory_space<vmem>>, %arg7: memref<1x512xf32, #tpu.memory_space<vmem>>, %arg8: memref<128x2xbf16, #tpu.memory_space<vmem>>, %arg9: memref<1x2xf32, #tpu.memory_space<vmem>>, %arg10: memref<8x128xf32, #tpu.memory_space<vmem>>, %arg11: memref<8x128xf32, #tpu.memory_space<vmem>>) attributes {dimension_semantics = [#tpu.dimension_semantics<parallel>], iteration_bounds = array<i64: 1>, scalar_prefetch = 0 : i64, scratch_operands = 0 : i64, tpu.core_type = #tpu.core_type<tc>, window_params = [{transform_indices = @transform_0, window_bounds = array<i64: 8, 11>}, {pipeline_mode = #tpu.pipeline_mode<synchronous>, transform_indices = @transform_1, window_bounds = array<i64: 1, 512>}, {pipeline_mode = #tpu.pipeline_mode<synchronous>, transform_indices = @transform_2, window_bounds = array<i64: 128, 512>}, {pipeline_mode = #tpu.pipeline_mode<synchronous>, transform_indices = @transform_3, window_bounds = array<i64: 1, 512>}, {pipeline_mode = #tpu.pipeline_mode<synchronous>, transform_indices = @transform_4, window_bounds = array<i64: 128, 512>}, {pipeline_mode = #tpu.pipeline_mode<synchronous>, transform_indices = @transform_5, window_bounds = array<i64: 128, 512>}, {pipeline_mode = #tpu.pipeline_mode<synchronous>, transform_indices = @transform_6, window_bounds = array<i64: 1, 512>}, {pipeline_mode = #tpu.pipeline_mode<synchronous>, transform_indices = @transform_7, window_bounds = array<i64: 128, 2>}, {pipeline_mode = #tpu.pipeline_mode<synchronous>, transform_indices = @transform_8, window_bounds = array<i64: 1, 2>}, {transform_indices = @transform_9, window_bounds = array<i64: 8, 128>}, {transform_indices = @transform_10, window_bounds = array<i64: 8, 128>}]} {
    %c0 = arith.constant 0 : index
    %c0_0 = arith.constant 0 : index
    %0 = vector.load %arg2[%c0, %c0_0] : memref<1x512xf32, #tpu.memory_space<vmem>>, vector<1x512xf32>
    %c0_1 = arith.constant 0 : index
    %c0_2 = arith.constant 0 : index
    %1 = vector.load %arg3[%c0_1, %c0_2] : memref<128x512xbf16, #tpu.memory_space<vmem>>, vector<128x512xbf16>
    %c0_3 = arith.constant 0 : index
    %c0_4 = arith.constant 0 : index
    %2 = vector.load %arg4[%c0_3, %c0_4] : memref<1x512xf32, #tpu.memory_space<vmem>>, vector<1x512xf32>
    %c0_5 = arith.constant 0 : index
    %c0_6 = arith.constant 0 : index
    %3 = vector.load %arg5[%c0_5, %c0_6] : memref<128x512xbf16, #tpu.memory_space<vmem>>, vector<128x512xbf16>
    %c0_7 = arith.constant 0 : index
    %c0_8 = arith.constant 0 : index
    %4 = vector.load %arg6[%c0_7, %c0_8] : memref<128x512xbf16, #tpu.memory_space<vmem>>, vector<128x512xbf16>
    %c0_9 = arith.constant 0 : index
    %c0_10 = arith.constant 0 : index
    %5 = vector.load %arg7[%c0_9, %c0_10] : memref<1x512xf32, #tpu.memory_space<vmem>>, vector<1x512xf32>
    %c0_11 = arith.constant 0 : index
    %c0_12 = arith.constant 0 : index
    %6 = vector.load %arg8[%c0_11, %c0_12] : memref<128x2xbf16, #tpu.memory_space<vmem>>, vector<128x2xbf16>
    %c0_13 = arith.constant 0 : index
    %c0_14 = arith.constant 0 : index
    %7 = vector.load %arg9[%c0_13, %c0_14] : memref<1x2xf32, #tpu.memory_space<vmem>>, vector<1x2xf32>
    %c0_15 = arith.constant 0 : index
    %c0_16 = arith.constant 0 : index
    %8 = vector.load %arg1[%c0_15, %c0_16] : memref<8x11xf32, #tpu.memory_space<vmem>>, vector<8x11xf32>
    %cst = arith.constant 0.000000e+00 : f32
    %9 = vector.broadcast %cst : f32 to vector<8x128xf32>
    %c0_17 = arith.constant 0 : index
    %c0_18 = arith.constant 0 : index
    %10 = vector.load %arg10[%c0_17, %c0_18] : memref<8x128xf32, #tpu.memory_space<vmem>>, vector<8x128xf32>
    tpu.vector_store %arg10[%c0_17, %c0_18], %9 {strides = array<i32>} : memref<8x128xf32, #tpu.memory_space<vmem>>, vector<8x128xf32>,
    %cst_19 = arith.constant 0.000000e+00 : f32
    %11 = vector.broadcast %cst_19 : f32 to vector<8x128xf32>
    %c0_20 = arith.constant 0 : index
    %c0_21 = arith.constant 0 : index
    %12 = vector.load %arg11[%c0_20, %c0_21] : memref<8x128xf32, #tpu.memory_space<vmem>>, vector<8x128xf32>
    tpu.vector_store %arg11[%c0_20, %c0_21], %11 {strides = array<i32>} : memref<8x128xf32, #tpu.memory_space<vmem>>, vector<8x128xf32>,
    %cst_22 = arith.constant 0.000000e+00 : f32
    %13 = vector.broadcast %cst_22 : f32 to vector<8x128xf32>
    %cst_23 = arith.constant 0.000000e+00 : f32
    %14 = vector.broadcast %cst_23 : f32 to vector<8x128xf32>
    %cst_24 = arith.constant 0.000000e+00 : bf16
    %15 = vector.broadcast %cst_24 : bf16 to vector<8x128xbf16>
    %cst_25 = arith.constant 0.000000e+00 : bf16
    %16 = vector.broadcast %cst_25 : bf16 to vector<8x128xbf16>
    %17 = vector.extract_strided_slice %8 {offsets = [0, 0], sizes = [8, 1], strides = [1, 1]} : vector<8x11xf32> to vector<8x1xf32>
    %18 = vector.broadcast %17 : vector<8x1xf32> to vector<8x512xf32>
    %19 = vector.broadcast %0 : vector<1x512xf32> to vector<8x512xf32>
    %20 = arith.mulf %18, %19 : vector<8x512xf32>
    %cst_26 = arith.constant dense<0.000000e+00> : vector<8x512xf32>
    %21 = tpu.matmul %15, %1, %cst_26 {dimension_numbers = #tpu.dot_dimension_numbers<[1], [0], [0], [1], [0, 0, 1, 1], [], []>} : vector<8x128xbf16>, vector<128x512xbf16>, vector<8x512xf32> -> vector<8x512xf32>
    %22 = arith.addf %20, %21 : vector<8x512xf32>
    %23 = vector.broadcast %2 : vector<1x512xf32> to vector<8x512xf32>
    %24 = arith.addf %22, %23 : vector<8x512xf32>
    %25 = vector.extract_strided_slice %24 {offsets = [0, 0], sizes = [8, 128], strides = [1, 1]} : vector<8x512xf32> to vector<8x128xf32>
    %26 = arith.negf %25 : vector<8x128xf32>
    %27 = math.exp %26 : vector<8x128xf32>
    %cst_27 = arith.constant 1.000000e+00 : f32
    %28 = vector.broadcast %cst_27 : f32 to vector<8x128xf32>
    %29 = arith.addf %28, %27 : vector<8x128xf32>
    %30 = arith.divf %28, %29 : vector<8x128xf32>
    %31 = vector.extract_strided_slice %24 {offsets = [0, 128], sizes = [8, 128], strides = [1, 1]} : vector<8x512xf32> to vector<8x128xf32>
    %32 = arith.negf %31 : vector<8x128xf32>
    %33 = math.exp %32 : vector<8x128xf32>
    %cst_28 = arith.constant 1.000000e+00 : f32
    %34 = vector.broadcast %cst_28 : f32 to vector<8x128xf32>
    %35 = arith.addf %34, %33 : vector<8x128xf32>
    %36 = arith.divf %34, %35 : vector<8x128xf32>
    %37 = vector.extract_strided_slice %24 {offsets = [0, 256], sizes = [8, 128], strides = [1, 1]} : vector<8x512xf32> to vector<8x128xf32>
    %38 = math.tanh %37 : vector<8x128xf32>
    %39 = vector.extract_strided_slice %24 {offsets = [0, 384], sizes = [8, 128], strides = [1, 1]} : vector<8x512xf32> to vector<8x128xf32>
    %40 = arith.negf %39 : vector<8x128xf32>
    %41 = math.exp %40 : vector<8x128xf32>
    %cst_29 = arith.constant 1.000000e+00 : f32
    %42 = vector.broadcast %cst_29 : f32 to vector<8x128xf32>
    %43 = arith.addf %42, %41 : vector<8x128xf32>
    %44 = arith.divf %42, %43 : vector<8x128xf32>
    %45 = arith.mulf %36, %13 : vector<8x128xf32>
    %46 = arith.mulf %30, %38 : vector<8x128xf32>
    %47 = arith.addf %45, %46 : vector<8x128xf32>
    %48 = math.tanh %47 : vector<8x128xf32>
    %49 = arith.mulf %44, %48 : vector<8x128xf32>
    %50 = arith.truncf %49 : vector<8x128xf32> to vector<8x128xbf16>
    %cst_30 = arith.constant dense<0.000000e+00> : vector<8x512xf32>
    %51 = tpu.matmul %50, %3, %cst_30 {dimension_numbers = #tpu.dot_dimension_numbers<[1], [0], [0], [1], [0, 0, 1, 1], [], []>} : vector<8x128xbf16>, vector<128x512xbf16>, vector<8x512xf32> -> vector<8x512xf32>
    %cst_31 = arith.constant dense<0.000000e+00> : vector<8x512xf32>
    %52 = tpu.matmul %16, %4, %cst_31 {dimension_numbers = #tpu.dot_dimension_numbers<[1], [0], [0], [1], [0, 0, 1, 1], [], []>} : vector<8x128xbf16>, vector<128x512xbf16>, vector<8x512xf32> -> vector<8x512xf32>
    %53 = arith.addf %51, %52 : vector<8x512xf32>
    %54 = vector.broadcast %5 : vector<1x512xf32> to vector<8x512xf32>
    %55 = arith.addf %53, %54 : vector<8x512xf32>
    %56 = vector.extract_strided_slice %55 {offsets = [0, 0], sizes = [8, 128], strides = [1, 1]} : vector<8x512xf32> to vector<8x128xf32>
    %57 = arith.negf %56 : vector<8x128xf32>
    %58 = math.exp %57 : vector<8x128xf32>
    %cst_32 = arith.constant 1.000000e+00 : f32
    %59 = vector.broadcast %cst_32 : f32 to vector<8x128xf32>
    %60 = arith.addf %59, %58 : vector<8x128xf32>
    %61 = arith.divf %59, %60 : vector<8x128xf32>
    %62 = vector.extract_strided_slice %55 {offsets = [0, 128], sizes = [8, 128], strides = [1, 1]} : vector<8x512xf32> to vector<8x128xf32>
    %63 = arith.negf %62 : vector<8x128xf32>
    %64 = math.exp %63 : vector<8x128xf32>
    %cst_33 = arith.constant 1.000000e+00 : f32
    %65 = vector.broadcast %cst_33 : f32 to vector<8x128xf32>
    %66 = arith.addf %65, %64 : vector<8x128xf32>
    %67 = arith.divf %65, %66 : vector<8x128xf32>
    %68 = vector.extract_strided_slice %55 {offsets = [0, 256], sizes = [8, 128], strides = [1, 1]} : vector<8x512xf32> to vector<8x128xf32>
    %69 = math.tanh %68 : vector<8x128xf32>
    %70 = vector.extract_strided_slice %55 {offsets = [0, 384], sizes = [8, 128], strides = [1, 1]} : vector<8x512xf32> to vector<8x128xf32>
    %71 = arith.negf %70 : vector<8x128xf32>
    %72 = math.exp %71 : vector<8x128xf32>
    %cst_34 = arith.constant 1.000000e+00 : f32
    %73 = vector.broadcast %cst_34 : f32 to vector<8x128xf32>
    %74 = arith.addf %73, %72 : vector<8x128xf32>
    %75 = arith.divf %73, %74 : vector<8x128xf32>
    %76 = arith.mulf %67, %14 : vector<8x128xf32>
    %77 = arith.mulf %61, %69 : vector<8x128xf32>
    %78 = arith.addf %76, %77 : vector<8x128xf32>
    %79 = math.tanh %78 : vector<8x128xf32>
    %80 = arith.mulf %75, %79 : vector<8x128xf32>
    %81 = arith.truncf %80 : vector<8x128xf32> to vector<8x128xbf16>
    %cst_35 = arith.constant dense<0.000000e+00> : vector<8x2xf32>
    %82 = tpu.matmul %81, %6, %cst_35 {dimension_numbers = #tpu.dot_dimension_numbers<[1], [0], [0], [1], [0, 0, 1, 1], [], []>} : vector<8x128xbf16>, vector<128x2xbf16>, vector<8x2xf32> -> vector<8x2xf32>
    %83 = vector.broadcast %7 : vector<1x2xf32> to vector<8x2xf32>
    %84 = arith.addf %82, %83 : vector<8x2xf32>
    %85 = vector.extract_strided_slice %84 {offsets = [0, 0], sizes = [8, 1], strides = [1, 1]} : vector<8x2xf32> to vector<8x1xf32>
    %86 = vector.extract_strided_slice %84 {offsets = [0, 1], sizes = [8, 1], strides = [1, 1]} : vector<8x2xf32> to vector<8x1xf32>
    %cst_36 = arith.constant 0.000000e+00 : f32
    %87 = vector.broadcast %cst_36 : f32 to vector<8x1xf32>
    %88 = arith.maximumf %86, %87 : vector<8x1xf32>
    %89 = math.absf %86 : vector<8x1xf32>
    %cst_37 = arith.constant 0.000000e+00 : f32
    %90 = vector.broadcast %cst_37 : f32 to vector<8x1xf32>
    %91 = arith.subf %90, %89 : vector<8x1xf32>
    %92 = math.exp %91 : vector<8x1xf32>
    %cst_38 = arith.constant 1.000000e+00 : f32
    %93 = vector.broadcast %cst_38 : f32 to vector<8x1xf32>
    %94 = arith.addf %93, %92 : vector<8x1xf32>
    %95 = math.log %94 : vector<8x1xf32>
    %96 = arith.addf %88, %95 : vector<8x1xf32>
    %cst_39 = arith.constant 9.99999997E-7 : f32
    %97 = vector.broadcast %cst_39 : f32 to vector<8x1xf32>
    %98 = arith.addf %96, %97 : vector<8x1xf32>
    %c0_40 = arith.constant 0 : index
    %c0_41 = arith.constant 0 : index
    %99 = vector.load %arg10[%c0_40, %c0_41] : memref<8x128xf32, #tpu.memory_space<vmem>>, vector<8x1xf32>
    tpu.vector_store %arg10[%c0_40, %c0_41], %85 {strides = array<i32>} : memref<8x128xf32, #tpu.memory_space<vmem>>, vector<8x1xf32>,
    %c0_42 = arith.constant 0 : index
    %c0_43 = arith.constant 0 : index
    %100 = vector.load %arg11[%c0_42, %c0_43] : memref<8x128xf32, #tpu.memory_space<vmem>>, vector<8x1xf32>
    tpu.vector_store %arg11[%c0_42, %c0_43], %98 {strides = array<i32>} : memref<8x128xf32, #tpu.memory_space<vmem>>, vector<8x1xf32>,
    %101 = vector.extract_strided_slice %8 {offsets = [0, 1], sizes = [8, 1], strides = [1, 1]} : vector<8x11xf32> to vector<8x1xf32>
    %102 = vector.broadcast %101 : vector<8x1xf32> to vector<8x512xf32>
    %103 = vector.broadcast %0 : vector<1x512xf32> to vector<8x512xf32>
    %104 = arith.mulf %102, %103 : vector<8x512xf32>
    %cst_44 = arith.constant dense<0.000000e+00> : vector<8x512xf32>
    %105 = tpu.matmul %50, %1, %cst_44 {dimension_numbers = #tpu.dot_dimension_numbers<[1], [0], [0], [1], [0, 0, 1, 1], [], []>} : vector<8x128xbf16>, vector<128x512xbf16>, vector<8x512xf32> -> vector<8x512xf32>
    %106 = arith.addf %104, %105 : vector<8x512xf32>
    %107 = vector.broadcast %2 : vector<1x512xf32> to vector<8x512xf32>
    %108 = arith.addf %106, %107 : vector<8x512xf32>
    %109 = vector.extract_strided_slice %108 {offsets = [0, 0], sizes = [8, 128], strides = [1, 1]} : vector<8x512xf32> to vector<8x128xf32>
    %110 = arith.negf %109 : vector<8x128xf32>
    %111 = math.exp %110 : vector<8x128xf32>
    %cst_45 = arith.constant 1.000000e+00 : f32
    %112 = vector.broadcast %cst_45 : f32 to vector<8x128xf32>
    %113 = arith.addf %112, %111 : vector<8x128xf32>
    %114 = arith.divf %112, %113 : vector<8x128xf32>
    %115 = vector.extract_strided_slice %108 {offsets = [0, 128], sizes = [8, 128], strides = [1, 1]} : vector<8x512xf32> to vector<8x128xf32>
    %116 = arith.negf %115 : vector<8x128xf32>
    %117 = math.exp %116 : vector<8x128xf32>
    %cst_46 = arith.constant 1.000000e+00 : f32
    %118 = vector.broadcast %cst_46 : f32 to vector<8x128xf32>
    %119 = arith.addf %118, %117 : vector<8x128xf32>
    %120 = arith.divf %118, %119 : vector<8x128xf32>
    %121 = vector.extract_strided_slice %108 {offsets = [0, 256], sizes = [8, 128], strides = [1, 1]} : vector<8x512xf32> to vector<8x128xf32>
    %122 = math.tanh %121 : vector<8x128xf32>
    %123 = vector.extract_strided_slice %108 {offsets = [0, 384], sizes = [8, 128], strides = [1, 1]} : vector<8x512xf32> to vector<8x128xf32>
    %124 = arith.negf %123 : vector<8x128xf32>
    %125 = math.exp %124 : vector<8x128xf32>
    %cst_47 = arith.constant 1.000000e+00 : f32
    %126 = vector.broadcast %cst_47 : f32 to vector<8x128xf32>
    %127 = arith.addf %126, %125 : vector<8x128xf32>
    %128 = arith.divf %126, %127 : vector<8x128xf32>
    %129 = arith.mulf %120, %47 : vector<8x128xf32>
    %130 = arith.mulf %114, %122 : vector<8x128xf32>
    %131 = arith.addf %129, %130 : vector<8x128xf32>
    %132 = math.tanh %131 : vector<8x128xf32>
    %133 = arith.mulf %128, %132 : vector<8x128xf32>
    %134 = arith.truncf %133 : vector<8x128xf32> to vector<8x128xbf16>
    %cst_48 = arith.constant dense<0.000000e+00> : vector<8x512xf32>
    %135 = tpu.matmul %134, %3, %cst_48 {dimension_numbers = #tpu.dot_dimension_numbers<[1], [0], [0], [1], [0, 0, 1, 1], [], []>} : vector<8x128xbf16>, vector<128x512xbf16>, vector<8x512xf32> -> vector<8x512xf32>
    %cst_49 = arith.constant dense<0.000000e+00> : vector<8x512xf32>
    %136 = tpu.matmul %81, %4, %cst_49 {dimension_numbers = #tpu.dot_dimension_numbers<[1], [0], [0], [1], [0, 0, 1, 1], [], []>} : vector<8x128xbf16>, vector<128x512xbf16>, vector<8x512xf32> -> vector<8x512xf32>
    %137 = arith.addf %135, %136 : vector<8x512xf32>
    %138 = vector.broadcast %5 : vector<1x512xf32> to vector<8x512xf32>
    %139 = arith.addf %137, %138 : vector<8x512xf32>
    %140 = vector.extract_strided_slice %139 {offsets = [0, 0], sizes = [8, 128], strides = [1, 1]} : vector<8x512xf32> to vector<8x128xf32>
    %141 = arith.negf %140 : vector<8x128xf32>
    %142 = math.exp %141 : vector<8x128xf32>
    %cst_50 = arith.constant 1.000000e+00 : f32
    %143 = vector.broadcast %cst_50 : f32 to vector<8x128xf32>
    %144 = arith.addf %143, %142 : vector<8x128xf32>
    %145 = arith.divf %143, %144 : vector<8x128xf32>
    %146 = vector.extract_strided_slice %139 {offsets = [0, 128], sizes = [8, 128], strides = [1, 1]} : vector<8x512xf32> to vector<8x128xf32>
    %147 = arith.negf %146 : vector<8x128xf32>
    %148 = math.exp %147 : vector<8x128xf32>
    %cst_51 = arith.constant 1.000000e+00 : f32
    %149 = vector.broadcast %cst_51 : f32 to vector<8x128xf32>
    %150 = arith.addf %149, %148 : vector<8x128xf32>
    %151 = arith.divf %149, %150 : vector<8x128xf32>
    %152 = vector.extract_strided_slice %139 {offsets = [0, 256], sizes = [8, 128], strides = [1, 1]} : vector<8x512xf32> to vector<8x128xf32>
    %153 = math.tanh %152 : vector<8x128xf32>
    %154 = vector.extract_strided_slice %139 {offsets = [0, 384], sizes = [8, 128], strides = [1, 1]} : vector<8x512xf32> to vector<8x128xf32>
    %155 = arith.negf %154 : vector<8x128xf32>
    %156 = math.exp %155 : vector<8x128xf32>
    %cst_52 = arith.constant 1.000000e+00 : f32
    %157 = vector.broadcast %cst_52 : f32 to vector<8x128xf32>
    %158 = arith.addf %157, %156 : vector<8x128xf32>
    %159 = arith.divf %157, %158 : vector<8x128xf32>
    %160 = arith.mulf %151, %78 : vector<8x128xf32>
    %161 = arith.mulf %145, %153 : vector<8x128xf32>
    %162 = arith.addf %160, %161 : vector<8x128xf32>
    %163 = math.tanh %162 : vector<8x128xf32>
    %164 = arith.mulf %159, %163 : vector<8x128xf32>
    %165 = arith.truncf %164 : vector<8x128xf32> to vector<8x128xbf16>
    %cst_53 = arith.constant dense<0.000000e+00> : vector<8x2xf32>
    %166 = tpu.matmul %165, %6, %cst_53 {dimension_numbers = #tpu.dot_dimension_numbers<[1], [0], [0], [1], [0, 0, 1, 1], [], []>} : vector<8x128xbf16>, vector<128x2xbf16>, vector<8x2xf32> -> vector<8x2xf32>
    %167 = vector.broadcast %7 : vector<1x2xf32> to vector<8x2xf32>
    %168 = arith.addf %166, %167 : vector<8x2xf32>
    %169 = vector.extract_strided_slice %168 {offsets = [0, 0], sizes = [8, 1], strides = [1, 1]} : vector<8x2xf32> to vector<8x1xf32>
    %170 = vector.extract_strided_slice %168 {offsets = [0, 1], sizes = [8, 1], strides = [1, 1]} : vector<8x2xf32> to vector<8x1xf32>
    %cst_54 = arith.constant 0.000000e+00 : f32
    %171 = vector.broadcast %cst_54 : f32 to vector<8x1xf32>
    %172 = arith.maximumf %170, %171 : vector<8x1xf32>
    %173 = math.absf %170 : vector<8x1xf32>
    %cst_55 = arith.constant 0.000000e+00 : f32
    %174 = vector.broadcast %cst_55 : f32 to vector<8x1xf32>
    %175 = arith.subf %174, %173 : vector<8x1xf32>
    %176 = math.exp %175 : vector<8x1xf32>
    %cst_56 = arith.constant 1.000000e+00 : f32
    %177 = vector.broadcast %cst_56 : f32 to vector<8x1xf32>
    %178 = arith.addf %177, %176 : vector<8x1xf32>
    %179 = math.log %178 : vector<8x1xf32>
    %180 = arith.addf %172, %179 : vector<8x1xf32>
    %cst_57 = arith.constant 9.99999997E-7 : f32
    %181 = vector.broadcast %cst_57 : f32 to vector<8x1xf32>
    %182 = arith.addf %180, %181 : vector<8x1xf32>
    %c0_58 = arith.constant 0 : index
    %c1 = arith.constant 1 : index
    %183 = vector.load %arg10[%c0_58, %c1] : memref<8x128xf32, #tpu.memory_space<vmem>>, vector<8x1xf32>
    tpu.vector_store %arg10[%c0_58, %c1], %169 {strides = array<i32>} : memref<8x128xf32, #tpu.memory_space<vmem>>, vector<8x1xf32>,
    %c0_59 = arith.constant 0 : index
    %c1_60 = arith.constant 1 : index
    %184 = vector.load %arg11[%c0_59, %c1_60] : memref<8x128xf32, #tpu.memory_space<vmem>>, vector<8x1xf32>
    tpu.vector_store %arg11[%c0_59, %c1_60], %182 {strides = array<i32>} : memref<8x128xf32, #tpu.memory_space<vmem>>, vector<8x1xf32>,
    %185 = vector.extract_strided_slice %8 {offsets = [0, 2], sizes = [8, 1], strides = [1, 1]} : vector<8x11xf32> to vector<8x1xf32>
    %186 = vector.broadcast %185 : vector<8x1xf32> to vector<8x512xf32>
    %187 = vector.broadcast %0 : vector<1x512xf32> to vector<8x512xf32>
    %188 = arith.mulf %186, %187 : vector<8x512xf32>
    %cst_61 = arith.constant dense<0.000000e+00> : vector<8x512xf32>
    %189 = tpu.matmul %134, %1, %cst_61 {dimension_numbers = #tpu.dot_dimension_numbers<[1], [0], [0], [1], [0, 0, 1, 1], [], []>} : vector<8x128xbf16>, vector<128x512xbf16>, vector<8x512xf32> -> vector<8x512xf32>
    %190 = arith.addf %188, %189 : vector<8x512xf32>
    %191 = vector.broadcast %2 : vector<1x512xf32> to vector<8x512xf32>
    %192 = arith.addf %190, %191 : vector<8x512xf32>
    %193 = vector.extract_strided_slice %192 {offsets = [0, 0], sizes = [8, 128], strides = [1, 1]} : vector<8x512xf32> to vector<8x128xf32>
    %194 = arith.negf %193 : vector<8x128xf32>
    %195 = math.exp %194 : vector<8x128xf32>
    %cst_62 = arith.constant 1.000000e+00 : f32
    %196 = vector.broadcast %cst_62 : f32 to vector<8x128xf32>
    %197 = arith.addf %196, %195 : vector<8x128xf32>
    %198 = arith.divf %196, %197 : vector<8x128xf32>
    %199 = vector.extract_strided_slice %192 {offsets = [0, 128], sizes = [8, 128], strides = [1, 1]} : vector<8x512xf32> to vector<8x128xf32>
    %200 = arith.negf %199 : vector<8x128xf32>
    %201 = math.exp %200 : vector<8x128xf32>
    %cst_63 = arith.constant 1.000000e+00 : f32
    %202 = vector.broadcast %cst_63 : f32 to vector<8x128xf32>
    %203 = arith.addf %202, %201 : vector<8x128xf32>
    %204 = arith.divf %202, %203 : vector<8x128xf32>
    %205 = vector.extract_strided_slice %192 {offsets = [0, 256], sizes = [8, 128], strides = [1, 1]} : vector<8x512xf32> to vector<8x128xf32>
    %206 = math.tanh %205 : vector<8x128xf32>
    %207 = vector.extract_strided_slice %192 {offsets = [0, 384], sizes = [8, 128], strides = [1, 1]} : vector<8x512xf32> to vector<8x128xf32>
    %208 = arith.negf %207 : vector<8x128xf32>
    %209 = math.exp %208 : vector<8x128xf32>
    %cst_64 = arith.constant 1.000000e+00 : f32
    %210 = vector.broadcast %cst_64 : f32 to vector<8x128xf32>
    %211 = arith.addf %210, %209 : vector<8x128xf32>
    %212 = arith.divf %210, %211 : vector<8x128xf32>
    %213 = arith.mulf %204, %131 : vector<8x128xf32>
    %214 = arith.mulf %198, %206 : vector<8x128xf32>
    %215 = arith.addf %213, %214 : vector<8x128xf32>
    %216 = math.tanh %215 : vector<8x128xf32>
    %217 = arith.mulf %212, %216 : vector<8x128xf32>
    %218 = arith.truncf %217 : vector<8x128xf32> to vector<8x128xbf16>
    %cst_65 = arith.constant dense<0.000000e+00> : vector<8x512xf32>
    %219 = tpu.matmul %218, %3, %cst_65 {dimension_numbers = #tpu.dot_dimension_numbers<[1], [0], [0], [1], [0, 0, 1, 1], [], []>} : vector<8x128xbf16>, vector<128x512xbf16>, vector<8x512xf32> -> vector<8x512xf32>
    %cst_66 = arith.constant dense<0.000000e+00> : vector<8x512xf32>
    %220 = tpu.matmul %165, %4, %cst_66 {dimension_numbers = #tpu.dot_dimension_numbers<[1], [0], [0], [1], [0, 0, 1, 1], [], []>} : vector<8x128xbf16>, vector<128x512xbf16>, vector<8x512xf32> -> vector<8x512xf32>
    %221 = arith.addf %219, %220 : vector<8x512xf32>
    %222 = vector.broadcast %5 : vector<1x512xf32> to vector<8x512xf32>
    %223 = arith.addf %221, %222 : vector<8x512xf32>
    %224 = vector.extract_strided_slice %223 {offsets = [0, 0], sizes = [8, 128], strides = [1, 1]} : vector<8x512xf32> to vector<8x128xf32>
    %225 = arith.negf %224 : vector<8x128xf32>
    %226 = math.exp %225 : vector<8x128xf32>
    %cst_67 = arith.constant 1.000000e+00 : f32
    %227 = vector.broadcast %cst_67 : f32 to vector<8x128xf32>
    %228 = arith.addf %227, %226 : vector<8x128xf32>
    %229 = arith.divf %227, %228 : vector<8x128xf32>
    %230 = vector.extract_strided_slice %223 {offsets = [0, 128], sizes = [8, 128], strides = [1, 1]} : vector<8x512xf32> to vector<8x128xf32>
    %231 = arith.negf %230 : vector<8x128xf32>
    %232 = math.exp %231 : vector<8x128xf32>
    %cst_68 = arith.constant 1.000000e+00 : f32
    %233 = vector.broadcast %cst_68 : f32 to vector<8x128xf32>
    %234 = arith.addf %233, %232 : vector<8x128xf32>
    %235 = arith.divf %233, %234 : vector<8x128xf32>
    %236 = vector.extract_strided_slice %223 {offsets = [0, 256], sizes = [8, 128], strides = [1, 1]} : vector<8x512xf32> to vector<8x128xf32>
    %237 = math.tanh %236 : vector<8x128xf32>
    %238 = vector.extract_strided_slice %223 {offsets = [0, 384], sizes = [8, 128], strides = [1, 1]} : vector<8x512xf32> to vector<8x128xf32>
    %239 = arith.negf %238 : vector<8x128xf32>
    %240 = math.exp %239 : vector<8x128xf32>
    %cst_69 = arith.constant 1.000000e+00 : f32
    %241 = vector.broadcast %cst_69 : f32 to vector<8x128xf32>
    %242 = arith.addf %241, %240 : vector<8x128xf32>
    %243 = arith.divf %241, %242 : vector<8x128xf32>
    %244 = arith.mulf %235, %162 : vector<8x128xf32>
    %245 = arith.mulf %229, %237 : vector<8x128xf32>
    %246 = arith.addf %244, %245 : vector<8x128xf32>
    %247 = math.tanh %246 : vector<8x128xf32>
    %248 = arith.mulf %243, %247 : vector<8x128xf32>
    %249 = arith.truncf %248 : vector<8x128xf32> to vector<8x128xbf16>
    %cst_70 = arith.constant dense<0.000000e+00> : vector<8x2xf32>
    %250 = tpu.matmul %249, %6, %cst_70 {dimension_numbers = #tpu.dot_dimension_numbers<[1], [0], [0], [1], [0, 0, 1, 1], [], []>} : vector<8x128xbf16>, vector<128x2xbf16>, vector<8x2xf32> -> vector<8x2xf32>
    %251 = vector.broadcast %7 : vector<1x2xf32> to vector<8x2xf32>
    %252 = arith.addf %250, %251 : vector<8x2xf32>
    %253 = vector.extract_strided_slice %252 {offsets = [0, 0], sizes = [8, 1], strides = [1, 1]} : vector<8x2xf32> to vector<8x1xf32>
    %254 = vector.extract_strided_slice %252 {offsets = [0, 1], sizes = [8, 1], strides = [1, 1]} : vector<8x2xf32> to vector<8x1xf32>
    %cst_71 = arith.constant 0.000000e+00 : f32
    %255 = vector.broadcast %cst_71 : f32 to vector<8x1xf32>
    %256 = arith.maximumf %254, %255 : vector<8x1xf32>
    %257 = math.absf %254 : vector<8x1xf32>
    %cst_72 = arith.constant 0.000000e+00 : f32
    %258 = vector.broadcast %cst_72 : f32 to vector<8x1xf32>
    %259 = arith.subf %258, %257 : vector<8x1xf32>
    %260 = math.exp %259 : vector<8x1xf32>
    %cst_73 = arith.constant 1.000000e+00 : f32
    %261 = vector.broadcast %cst_73 : f32 to vector<8x1xf32>
    %262 = arith.addf %261, %260 : vector<8x1xf32>
    %263 = math.log %262 : vector<8x1xf32>
    %264 = arith.addf %256, %263 : vector<8x1xf32>
    %cst_74 = arith.constant 9.99999997E-7 : f32
    %265 = vector.broadcast %cst_74 : f32 to vector<8x1xf32>
    %266 = arith.addf %264, %265 : vector<8x1xf32>
    %c0_75 = arith.constant 0 : index
    %c2 = arith.constant 2 : index
    %267 = vector.load %arg10[%c0_75, %c2] : memref<8x128xf32, #tpu.memory_space<vmem>>, vector<8x1xf32>
    tpu.vector_store %arg10[%c0_75, %c2], %253 {strides = array<i32>} : memref<8x128xf32, #tpu.memory_space<vmem>>, vector<8x1xf32>,
    %c0_76 = arith.constant 0 : index
    %c2_77 = arith.constant 2 : index
    %268 = vector.load %arg11[%c0_76, %c2_77] : memref<8x128xf32, #tpu.memory_space<vmem>>, vector<8x1xf32>
    tpu.vector_store %arg11[%c0_76, %c2_77], %266 {strides = array<i32>} : memref<8x128xf32, #tpu.memory_space<vmem>>, vector<8x1xf32>,
    %269 = vector.extract_strided_slice %8 {offsets = [0, 3], sizes = [8, 1], strides = [1, 1]} : vector<8x11xf32> to vector<8x1xf32>
    %270 = vector.broadcast %269 : vector<8x1xf32> to vector<8x512xf32>
    %271 = vector.broadcast %0 : vector<1x512xf32> to vector<8x512xf32>
    %272 = arith.mulf %270, %271 : vector<8x512xf32>
    %cst_78 = arith.constant dense<0.000000e+00> : vector<8x512xf32>
    %273 = tpu.matmul %218, %1, %cst_78 {dimension_numbers = #tpu.dot_dimension_numbers<[1], [0], [0], [1], [0, 0, 1, 1], [], []>} : vector<8x128xbf16>, vector<128x512xbf16>, vector<8x512xf32> -> vector<8x512xf32>
    %274 = arith.addf %272, %273 : vector<8x512xf32>
    %275 = vector.broadcast %2 : vector<1x512xf32> to vector<8x512xf32>
    %276 = arith.addf %274, %275 : vector<8x512xf32>
    %277 = vector.extract_strided_slice %276 {offsets = [0, 0], sizes = [8, 128], strides = [1, 1]} : vector<8x512xf32> to vector<8x128xf32>
    %278 = arith.negf %277 : vector<8x128xf32>
    %279 = math.exp %278 : vector<8x128xf32>
    %cst_79 = arith.constant 1.000000e+00 : f32
    %280 = vector.broadcast %cst_79 : f32 to vector<8x128xf32>
    %281 = arith.addf %280, %279 : vector<8x128xf32>
    %282 = arith.divf %280, %281 : vector<8x128xf32>
    %283 = vector.extract_strided_slice %276 {offsets = [0, 128], sizes = [8, 128], strides = [1, 1]} : vector<8x512xf32> to vector<8x128xf32>
    %284 = arith.negf %283 : vector<8x128xf32>
    %285 = math.exp %284 : vector<8x128xf32>
    %cst_80 = arith.constant 1.000000e+00 : f32
    %286 = vector.broadcast %cst_80 : f32 to vector<8x128xf32>
    %287 = arith.addf %286, %285 : vector<8x128xf32>
    %288 = arith.divf %286, %287 : vector<8x128xf32>
    %289 = vector.extract_strided_slice %276 {offsets = [0, 256], sizes = [8, 128], strides = [1, 1]} : vector<8x512xf32> to vector<8x128xf32>
    %290 = math.tanh %289 : vector<8x128xf32>
    %291 = vector.extract_strided_slice %276 {offsets = [0, 384], sizes = [8, 128], strides = [1, 1]} : vector<8x512xf32> to vector<8x128xf32>
    %292 = arith.negf %291 : vector<8x128xf32>
    %293 = math.exp %292 : vector<8x128xf32>
    %cst_81 = arith.constant 1.000000e+00 : f32
    %294 = vector.broadcast %cst_81 : f32 to vector<8x128xf32>
    %295 = arith.addf %294, %293 : vector<8x128xf32>
    %296 = arith.divf %294, %295 : vector<8x128xf32>
    %297 = arith.mulf %288, %215 : vector<8x128xf32>
    %298 = arith.mulf %282, %290 : vector<8x128xf32>
    %299 = arith.addf %297, %298 : vector<8x128xf32>
    %300 = math.tanh %299 : vector<8x128xf32>
    %301 = arith.mulf %296, %300 : vector<8x128xf32>
    %302 = arith.truncf %301 : vector<8x128xf32> to vector<8x128xbf16>
    %cst_82 = arith.constant dense<0.000000e+00> : vector<8x512xf32>
    %303 = tpu.matmul %302, %3, %cst_82 {dimension_numbers = #tpu.dot_dimension_numbers<[1], [0], [0], [1], [0, 0, 1, 1], [], []>} : vector<8x128xbf16>, vector<128x512xbf16>, vector<8x512xf32> -> vector<8x512xf32>
    %cst_83 = arith.constant dense<0.000000e+00> : vector<8x512xf32>
    %304 = tpu.matmul %249, %4, %cst_83 {dimension_numbers = #tpu.dot_dimension_numbers<[1], [0], [0], [1], [0, 0, 1, 1], [], []>} : vector<8x128xbf16>, vector<128x512xbf16>, vector<8x512xf32> -> vector<8x512xf32>
    %305 = arith.addf %303, %304 : vector<8x512xf32>
    %306 = vector.broadcast %5 : vector<1x512xf32> to vector<8x512xf32>
    %307 = arith.addf %305, %306 : vector<8x512xf32>
    %308 = vector.extract_strided_slice %307 {offsets = [0, 0], sizes = [8, 128], strides = [1, 1]} : vector<8x512xf32> to vector<8x128xf32>
    %309 = arith.negf %308 : vector<8x128xf32>
    %310 = math.exp %309 : vector<8x128xf32>
    %cst_84 = arith.constant 1.000000e+00 : f32
    %311 = vector.broadcast %cst_84 : f32 to vector<8x128xf32>
    %312 = arith.addf %311, %310 : vector<8x128xf32>
    %313 = arith.divf %311, %312 : vector<8x128xf32>
    %314 = vector.extract_strided_slice %307 {offsets = [0, 128], sizes = [8, 128], strides = [1, 1]} : vector<8x512xf32> to vector<8x128xf32>
    %315 = arith.negf %314 : vector<8x128xf32>
    %316 = math.exp %315 : vector<8x128xf32>
    %cst_85 = arith.constant 1.000000e+00 : f32
    %317 = vector.broadcast %cst_85 : f32 to vector<8x128xf32>
    %318 = arith.addf %317, %316 : vector<8x128xf32>
    %319 = arith.divf %317, %318 : vector<8x128xf32>
    %320 = vector.extract_strided_slice %307 {offsets = [0, 256], sizes = [8, 128], strides = [1, 1]} : vector<8x512xf32> to vector<8x128xf32>
    %321 = math.tanh %320 : vector<8x128xf32>
    %322 = vector.extract_strided_slice %307 {offsets = [0, 384], sizes = [8, 128], strides = [1, 1]} : vector<8x512xf32> to vector<8x128xf32>
    %323 = arith.negf %322 : vector<8x128xf32>
    %324 = math.exp %323 : vector<8x128xf32>
    %cst_86 = arith.constant 1.000000e+00 : f32
    %325 = vector.broadcast %cst_86 : f32 to vector<8x128xf32>
    %326 = arith.addf %325, %324 : vector<8x128xf32>
    %327 = arith.divf %325, %326 : vector<8x128xf32>
    %328 = arith.mulf %319, %246 : vector<8x128xf32>
    %329 = arith.mulf %313, %321 : vector<8x128xf32>
    %330 = arith.addf %328, %329 : vector<8x128xf32>
    %331 = math.tanh %330 : vector<8x128xf32>
    %332 = arith.mulf %327, %331 : vector<8x128xf32>
    %333 = arith.truncf %332 : vector<8x128xf32> to vector<8x128xbf16>
    %cst_87 = arith.constant dense<0.000000e+00> : vector<8x2xf32>
    %334 = tpu.matmul %333, %6, %cst_87 {dimension_numbers = #tpu.dot_dimension_numbers<[1], [0], [0], [1], [0, 0, 1, 1], [], []>} : vector<8x128xbf16>, vector<128x2xbf16>, vector<8x2xf32> -> vector<8x2xf32>
    %335 = vector.broadcast %7 : vector<1x2xf32> to vector<8x2xf32>
    %336 = arith.addf %334, %335 : vector<8x2xf32>
    %337 = vector.extract_strided_slice %336 {offsets = [0, 0], sizes = [8, 1], strides = [1, 1]} : vector<8x2xf32> to vector<8x1xf32>
    %338 = vector.extract_strided_slice %336 {offsets = [0, 1], sizes = [8, 1], strides = [1, 1]} : vector<8x2xf32> to vector<8x1xf32>
    %cst_88 = arith.constant 0.000000e+00 : f32
    %339 = vector.broadcast %cst_88 : f32 to vector<8x1xf32>
    %340 = arith.maximumf %338, %339 : vector<8x1xf32>
    %341 = math.absf %338 : vector<8x1xf32>
    %cst_89 = arith.constant 0.000000e+00 : f32
    %342 = vector.broadcast %cst_89 : f32 to vector<8x1xf32>
    %343 = arith.subf %342, %341 : vector<8x1xf32>
    %344 = math.exp %343 : vector<8x1xf32>
    %cst_90 = arith.constant 1.000000e+00 : f32
    %345 = vector.broadcast %cst_90 : f32 to vector<8x1xf32>
    %346 = arith.addf %345, %344 : vector<8x1xf32>
    %347 = math.log %346 : vector<8x1xf32>
    %348 = arith.addf %340, %347 : vector<8x1xf32>
    %cst_91 = arith.constant 9.99999997E-7 : f32
    %349 = vector.broadcast %cst_91 : f32 to vector<8x1xf32>
    %350 = arith.addf %348, %349 : vector<8x1xf32>
    %c0_92 = arith.constant 0 : index
    %c3 = arith.constant 3 : index
    %351 = vector.load %arg10[%c0_92, %c3] : memref<8x128xf32, #tpu.memory_space<vmem>>, vector<8x1xf32>
    tpu.vector_store %arg10[%c0_92, %c3], %337 {strides = array<i32>} : memref<8x128xf32, #tpu.memory_space<vmem>>, vector<8x1xf32>,
    %c0_93 = arith.constant 0 : index
    %c3_94 = arith.constant 3 : index
    %352 = vector.load %arg11[%c0_93, %c3_94] : memref<8x128xf32, #tpu.memory_space<vmem>>, vector<8x1xf32>
    tpu.vector_store %arg11[%c0_93, %c3_94], %350 {strides = array<i32>} : memref<8x128xf32, #tpu.memory_space<vmem>>, vector<8x1xf32>,
    %353 = vector.extract_strided_slice %8 {offsets = [0, 4], sizes = [8, 1], strides = [1, 1]} : vector<8x11xf32> to vector<8x1xf32>
    %354 = vector.broadcast %353 : vector<8x1xf32> to vector<8x512xf32>
    %355 = vector.broadcast %0 : vector<1x512xf32> to vector<8x512xf32>
    %356 = arith.mulf %354, %355 : vector<8x512xf32>
    %cst_95 = arith.constant dense<0.000000e+00> : vector<8x512xf32>
    %357 = tpu.matmul %302, %1, %cst_95 {dimension_numbers = #tpu.dot_dimension_numbers<[1], [0], [0], [1], [0, 0, 1, 1], [], []>} : vector<8x128xbf16>, vector<128x512xbf16>, vector<8x512xf32> -> vector<8x512xf32>
    %358 = arith.addf %356, %357 : vector<8x512xf32>
    %359 = vector.broadcast %2 : vector<1x512xf32> to vector<8x512xf32>
    %360 = arith.addf %358, %359 : vector<8x512xf32>
    %361 = vector.extract_strided_slice %360 {offsets = [0, 0], sizes = [8, 128], strides = [1, 1]} : vector<8x512xf32> to vector<8x128xf32>
    %362 = arith.negf %361 : vector<8x128xf32>
    %363 = math.exp %362 : vector<8x128xf32>
    %cst_96 = arith.constant 1.000000e+00 : f32
    %364 = vector.broadcast %cst_96 : f32 to vector<8x128xf32>
    %365 = arith.addf %364, %363 : vector<8x128xf32>
    %366 = arith.divf %364, %365 : vector<8x128xf32>
    %367 = vector.extract_strided_slice %360 {offsets = [0, 128], sizes = [8, 128], strides = [1, 1]} : vector<8x512xf32> to vector<8x128xf32>
    %368 = arith.negf %367 : vector<8x128xf32>
    %369 = math.exp %368 : vector<8x128xf32>
    %cst_97 = arith.constant 1.000000e+00 : f32
    %370 = vector.broadcast %cst_97 : f32 to vector<8x128xf32>
    %371 = arith.addf %370, %369 : vector<8x128xf32>
    %372 = arith.divf %370, %371 : vector<8x128xf32>
    %373 = vector.extract_strided_slice %360 {offsets = [0, 256], sizes = [8, 128], strides = [1, 1]} : vector<8x512xf32> to vector<8x128xf32>
    %374 = math.tanh %373 : vector<8x128xf32>
    %375 = vector.extract_strided_slice %360 {offsets = [0, 384], sizes = [8, 128], strides = [1, 1]} : vector<8x512xf32> to vector<8x128xf32>
    %376 = arith.negf %375 : vector<8x128xf32>
    %377 = math.exp %376 : vector<8x128xf32>
    %cst_98 = arith.constant 1.000000e+00 : f32
    %378 = vector.broadcast %cst_98 : f32 to vector<8x128xf32>
    %379 = arith.addf %378, %377 : vector<8x128xf32>
    %380 = arith.divf %378, %379 : vector<8x128xf32>
    %381 = arith.mulf %372, %299 : vector<8x128xf32>
    %382 = arith.mulf %366, %374 : vector<8x128xf32>
    %383 = arith.addf %381, %382 : vector<8x128xf32>
    %384 = math.tanh %383 : vector<8x128xf32>
    %385 = arith.mulf %380, %384 : vector<8x128xf32>
    %386 = arith.truncf %385 : vector<8x128xf32> to vector<8x128xbf16>
    %cst_99 = arith.constant dense<0.000000e+00> : vector<8x512xf32>
    %387 = tpu.matmul %386, %3, %cst_99 {dimension_numbers = #tpu.dot_dimension_numbers<[1], [0], [0], [1], [0, 0, 1, 1], [], []>} : vector<8x128xbf16>, vector<128x512xbf16>, vector<8x512xf32> -> vector<8x512xf32>
    %cst_100 = arith.constant dense<0.000000e+00> : vector<8x512xf32>
    %388 = tpu.matmul %333, %4, %cst_100 {dimension_numbers = #tpu.dot_dimension_numbers<[1], [0], [0], [1], [0, 0, 1, 1], [], []>} : vector<8x128xbf16>, vector<128x512xbf16>, vector<8x512xf32> -> vector<8x512xf32>
    %389 = arith.addf %387, %388 : vector<8x512xf32>
    %390 = vector.broadcast %5 : vector<1x512xf32> to vector<8x512xf32>
    %391 = arith.addf %389, %390 : vector<8x512xf32>
    %392 = vector.extract_strided_slice %391 {offsets = [0, 0], sizes = [8, 128], strides = [1, 1]} : vector<8x512xf32> to vector<8x128xf32>
    %393 = arith.negf %392 : vector<8x128xf32>
    %394 = math.exp %393 : vector<8x128xf32>
    %cst_101 = arith.constant 1.000000e+00 : f32
    %395 = vector.broadcast %cst_101 : f32 to vector<8x128xf32>
    %396 = arith.addf %395, %394 : vector<8x128xf32>
    %397 = arith.divf %395, %396 : vector<8x128xf32>
    %398 = vector.extract_strided_slice %391 {offsets = [0, 128], sizes = [8, 128], strides = [1, 1]} : vector<8x512xf32> to vector<8x128xf32>
    %399 = arith.negf %398 : vector<8x128xf32>
    %400 = math.exp %399 : vector<8x128xf32>
    %cst_102 = arith.constant 1.000000e+00 : f32
    %401 = vector.broadcast %cst_102 : f32 to vector<8x128xf32>
    %402 = arith.addf %401, %400 : vector<8x128xf32>
    %403 = arith.divf %401, %402 : vector<8x128xf32>
    %404 = vector.extract_strided_slice %391 {offsets = [0, 256], sizes = [8, 128], strides = [1, 1]} : vector<8x512xf32> to vector<8x128xf32>
    %405 = math.tanh %404 : vector<8x128xf32>
    %406 = vector.extract_strided_slice %391 {offsets = [0, 384], sizes = [8, 128], strides = [1, 1]} : vector<8x512xf32> to vector<8x128xf32>
    %407 = arith.negf %406 : vector<8x128xf32>
    %408 = math.exp %407 : vector<8x128xf32>
    %cst_103 = arith.constant 1.000000e+00 : f32
    %409 = vector.broadcast %cst_103 : f32 to vector<8x128xf32>
    %410 = arith.addf %409, %408 : vector<8x128xf32>
    %411 = arith.divf %409, %410 : vector<8x128xf32>
    %412 = arith.mulf %403, %330 : vector<8x128xf32>
    %413 = arith.mulf %397, %405 : vector<8x128xf32>
    %414 = arith.addf %412, %413 : vector<8x128xf32>
    %415 = math.tanh %414 : vector<8x128xf32>
    %416 = arith.mulf %411, %415 : vector<8x128xf32>
    %417 = arith.truncf %416 : vector<8x128xf32> to vector<8x128xbf16>
    %cst_104 = arith.constant dense<0.000000e+00> : vector<8x2xf32>
    %418 = tpu.matmul %417, %6, %cst_104 {dimension_numbers = #tpu.dot_dimension_numbers<[1], [0], [0], [1], [0, 0, 1, 1], [], []>} : vector<8x128xbf16>, vector<128x2xbf16>, vector<8x2xf32> -> vector<8x2xf32>
    %419 = vector.broadcast %7 : vector<1x2xf32> to vector<8x2xf32>
    %420 = arith.addf %418, %419 : vector<8x2xf32>
    %421 = vector.extract_strided_slice %420 {offsets = [0, 0], sizes = [8, 1], strides = [1, 1]} : vector<8x2xf32> to vector<8x1xf32>
    %422 = vector.extract_strided_slice %420 {offsets = [0, 1], sizes = [8, 1], strides = [1, 1]} : vector<8x2xf32> to vector<8x1xf32>
    %cst_105 = arith.constant 0.000000e+00 : f32
    %423 = vector.broadcast %cst_105 : f32 to vector<8x1xf32>
    %424 = arith.maximumf %422, %423 : vector<8x1xf32>
    %425 = math.absf %422 : vector<8x1xf32>
    %cst_106 = arith.constant 0.000000e+00 : f32
    %426 = vector.broadcast %cst_106 : f32 to vector<8x1xf32>
    %427 = arith.subf %426, %425 : vector<8x1xf32>
    %428 = math.exp %427 : vector<8x1xf32>
    %cst_107 = arith.constant 1.000000e+00 : f32
    %429 = vector.broadcast %cst_107 : f32 to vector<8x1xf32>
    %430 = arith.addf %429, %428 : vector<8x1xf32>
    %431 = math.log %430 : vector<8x1xf32>
    %432 = arith.addf %424, %431 : vector<8x1xf32>
    %cst_108 = arith.constant 9.99999997E-7 : f32
    %433 = vector.broadcast %cst_108 : f32 to vector<8x1xf32>
    %434 = arith.addf %432, %433 : vector<8x1xf32>
    %c0_109 = arith.constant 0 : index
    %c4 = arith.constant 4 : index
    %435 = vector.load %arg10[%c0_109, %c4] : memref<8x128xf32, #tpu.memory_space<vmem>>, vector<8x1xf32>
    tpu.vector_store %arg10[%c0_109, %c4], %421 {strides = array<i32>} : memref<8x128xf32, #tpu.memory_space<vmem>>, vector<8x1xf32>,
    %c0_110 = arith.constant 0 : index
    %c4_111 = arith.constant 4 : index
    %436 = vector.load %arg11[%c0_110, %c4_111] : memref<8x128xf32, #tpu.memory_space<vmem>>, vector<8x1xf32>
    tpu.vector_store %arg11[%c0_110, %c4_111], %434 {strides = array<i32>} : memref<8x128xf32, #tpu.memory_space<vmem>>, vector<8x1xf32>,
    %437 = vector.extract_strided_slice %8 {offsets = [0, 5], sizes = [8, 1], strides = [1, 1]} : vector<8x11xf32> to vector<8x1xf32>
    %438 = vector.broadcast %437 : vector<8x1xf32> to vector<8x512xf32>
    %439 = vector.broadcast %0 : vector<1x512xf32> to vector<8x512xf32>
    %440 = arith.mulf %438, %439 : vector<8x512xf32>
    %cst_112 = arith.constant dense<0.000000e+00> : vector<8x512xf32>
    %441 = tpu.matmul %386, %1, %cst_112 {dimension_numbers = #tpu.dot_dimension_numbers<[1], [0], [0], [1], [0, 0, 1, 1], [], []>} : vector<8x128xbf16>, vector<128x512xbf16>, vector<8x512xf32> -> vector<8x512xf32>
    %442 = arith.addf %440, %441 : vector<8x512xf32>
    %443 = vector.broadcast %2 : vector<1x512xf32> to vector<8x512xf32>
    %444 = arith.addf %442, %443 : vector<8x512xf32>
    %445 = vector.extract_strided_slice %444 {offsets = [0, 0], sizes = [8, 128], strides = [1, 1]} : vector<8x512xf32> to vector<8x128xf32>
    %446 = arith.negf %445 : vector<8x128xf32>
    %447 = math.exp %446 : vector<8x128xf32>
    %cst_113 = arith.constant 1.000000e+00 : f32
    %448 = vector.broadcast %cst_113 : f32 to vector<8x128xf32>
    %449 = arith.addf %448, %447 : vector<8x128xf32>
    %450 = arith.divf %448, %449 : vector<8x128xf32>
    %451 = vector.extract_strided_slice %444 {offsets = [0, 128], sizes = [8, 128], strides = [1, 1]} : vector<8x512xf32> to vector<8x128xf32>
    %452 = arith.negf %451 : vector<8x128xf32>
    %453 = math.exp %452 : vector<8x128xf32>
    %cst_114 = arith.constant 1.000000e+00 : f32
    %454 = vector.broadcast %cst_114 : f32 to vector<8x128xf32>
    %455 = arith.addf %454, %453 : vector<8x128xf32>
    %456 = arith.divf %454, %455 : vector<8x128xf32>
    %457 = vector.extract_strided_slice %444 {offsets = [0, 256], sizes = [8, 128], strides = [1, 1]} : vector<8x512xf32> to vector<8x128xf32>
    %458 = math.tanh %457 : vector<8x128xf32>
    %459 = vector.extract_strided_slice %444 {offsets = [0, 384], sizes = [8, 128], strides = [1, 1]} : vector<8x512xf32> to vector<8x128xf32>
    %460 = arith.negf %459 : vector<8x128xf32>
    %461 = math.exp %460 : vector<8x128xf32>
    %cst_115 = arith.constant 1.000000e+00 : f32
    %462 = vector.broadcast %cst_115 : f32 to vector<8x128xf32>
    %463 = arith.addf %462, %461 : vector<8x128xf32>
    %464 = arith.divf %462, %463 : vector<8x128xf32>
    %465 = arith.mulf %456, %383 : vector<8x128xf32>
    %466 = arith.mulf %450, %458 : vector<8x128xf32>
    %467 = arith.addf %465, %466 : vector<8x128xf32>
    %468 = math.tanh %467 : vector<8x128xf32>
    %469 = arith.mulf %464, %468 : vector<8x128xf32>
    %470 = arith.truncf %469 : vector<8x128xf32> to vector<8x128xbf16>
    %cst_116 = arith.constant dense<0.000000e+00> : vector<8x512xf32>
    %471 = tpu.matmul %470, %3, %cst_116 {dimension_numbers = #tpu.dot_dimension_numbers<[1], [0], [0], [1], [0, 0, 1, 1], [], []>} : vector<8x128xbf16>, vector<128x512xbf16>, vector<8x512xf32> -> vector<8x512xf32>
    %cst_117 = arith.constant dense<0.000000e+00> : vector<8x512xf32>
    %472 = tpu.matmul %417, %4, %cst_117 {dimension_numbers = #tpu.dot_dimension_numbers<[1], [0], [0], [1], [0, 0, 1, 1], [], []>} : vector<8x128xbf16>, vector<128x512xbf16>, vector<8x512xf32> -> vector<8x512xf32>
    %473 = arith.addf %471, %472 : vector<8x512xf32>
    %474 = vector.broadcast %5 : vector<1x512xf32> to vector<8x512xf32>
    %475 = arith.addf %473, %474 : vector<8x512xf32>
    %476 = vector.extract_strided_slice %475 {offsets = [0, 0], sizes = [8, 128], strides = [1, 1]} : vector<8x512xf32> to vector<8x128xf32>
    %477 = arith.negf %476 : vector<8x128xf32>
    %478 = math.exp %477 : vector<8x128xf32>
    %cst_118 = arith.constant 1.000000e+00 : f32
    %479 = vector.broadcast %cst_118 : f32 to vector<8x128xf32>
    %480 = arith.addf %479, %478 : vector<8x128xf32>
    %481 = arith.divf %479, %480 : vector<8x128xf32>
    %482 = vector.extract_strided_slice %475 {offsets = [0, 128], sizes = [8, 128], strides = [1, 1]} : vector<8x512xf32> to vector<8x128xf32>
    %483 = arith.negf %482 : vector<8x128xf32>
    %484 = math.exp %483 : vector<8x128xf32>
    %cst_119 = arith.constant 1.000000e+00 : f32
    %485 = vector.broadcast %cst_119 : f32 to vector<8x128xf32>
    %486 = arith.addf %485, %484 : vector<8x128xf32>
    %487 = arith.divf %485, %486 : vector<8x128xf32>
    %488 = vector.extract_strided_slice %475 {offsets = [0, 256], sizes = [8, 128], strides = [1, 1]} : vector<8x512xf32> to vector<8x128xf32>
    %489 = math.tanh %488 : vector<8x128xf32>
    %490 = vector.extract_strided_slice %475 {offsets = [0, 384], sizes = [8, 128], strides = [1, 1]} : vector<8x512xf32> to vector<8x128xf32>
    %491 = arith.negf %490 : vector<8x128xf32>
    %492 = math.exp %491 : vector<8x128xf32>
    %cst_120 = arith.constant 1.000000e+00 : f32
    %493 = vector.broadcast %cst_120 : f32 to vector<8x128xf32>
    %494 = arith.addf %493, %492 : vector<8x128xf32>
    %495 = arith.divf %493, %494 : vector<8x128xf32>
    %496 = arith.mulf %487, %414 : vector<8x128xf32>
    %497 = arith.mulf %481, %489 : vector<8x128xf32>
    %498 = arith.addf %496, %497 : vector<8x128xf32>
    %499 = math.tanh %498 : vector<8x128xf32>
    %500 = arith.mulf %495, %499 : vector<8x128xf32>
    %501 = arith.truncf %500 : vector<8x128xf32> to vector<8x128xbf16>
    %cst_121 = arith.constant dense<0.000000e+00> : vector<8x2xf32>
    %502 = tpu.matmul %501, %6, %cst_121 {dimension_numbers = #tpu.dot_dimension_numbers<[1], [0], [0], [1], [0, 0, 1, 1], [], []>} : vector<8x128xbf16>, vector<128x2xbf16>, vector<8x2xf32> -> vector<8x2xf32>
    %503 = vector.broadcast %7 : vector<1x2xf32> to vector<8x2xf32>
    %504 = arith.addf %502, %503 : vector<8x2xf32>
    %505 = vector.extract_strided_slice %504 {offsets = [0, 0], sizes = [8, 1], strides = [1, 1]} : vector<8x2xf32> to vector<8x1xf32>
    %506 = vector.extract_strided_slice %504 {offsets = [0, 1], sizes = [8, 1], strides = [1, 1]} : vector<8x2xf32> to vector<8x1xf32>
    %cst_122 = arith.constant 0.000000e+00 : f32
    %507 = vector.broadcast %cst_122 : f32 to vector<8x1xf32>
    %508 = arith.maximumf %506, %507 : vector<8x1xf32>
    %509 = math.absf %506 : vector<8x1xf32>
    %cst_123 = arith.constant 0.000000e+00 : f32
    %510 = vector.broadcast %cst_123 : f32 to vector<8x1xf32>
    %511 = arith.subf %510, %509 : vector<8x1xf32>
    %512 = math.exp %511 : vector<8x1xf32>
    %cst_124 = arith.constant 1.000000e+00 : f32
    %513 = vector.broadcast %cst_124 : f32 to vector<8x1xf32>
    %514 = arith.addf %513, %512 : vector<8x1xf32>
    %515 = math.log %514 : vector<8x1xf32>
    %516 = arith.addf %508, %515 : vector<8x1xf32>
    %cst_125 = arith.constant 9.99999997E-7 : f32
    %517 = vector.broadcast %cst_125 : f32 to vector<8x1xf32>
    %518 = arith.addf %516, %517 : vector<8x1xf32>
    %c0_126 = arith.constant 0 : index
    %c5 = arith.constant 5 : index
    %519 = vector.load %arg10[%c0_126, %c5] : memref<8x128xf32, #tpu.memory_space<vmem>>, vector<8x1xf32>
    tpu.vector_store %arg10[%c0_126, %c5], %505 {strides = array<i32>} : memref<8x128xf32, #tpu.memory_space<vmem>>, vector<8x1xf32>,
    %c0_127 = arith.constant 0 : index
    %c5_128 = arith.constant 5 : index
    %520 = vector.load %arg11[%c0_127, %c5_128] : memref<8x128xf32, #tpu.memory_space<vmem>>, vector<8x1xf32>
    tpu.vector_store %arg11[%c0_127, %c5_128], %518 {strides = array<i32>} : memref<8x128xf32, #tpu.memory_space<vmem>>, vector<8x1xf32>,
    %521 = vector.extract_strided_slice %8 {offsets = [0, 6], sizes = [8, 1], strides = [1, 1]} : vector<8x11xf32> to vector<8x1xf32>
    %522 = vector.broadcast %521 : vector<8x1xf32> to vector<8x512xf32>
    %523 = vector.broadcast %0 : vector<1x512xf32> to vector<8x512xf32>
    %524 = arith.mulf %522, %523 : vector<8x512xf32>
    %cst_129 = arith.constant dense<0.000000e+00> : vector<8x512xf32>
    %525 = tpu.matmul %470, %1, %cst_129 {dimension_numbers = #tpu.dot_dimension_numbers<[1], [0], [0], [1], [0, 0, 1, 1], [], []>} : vector<8x128xbf16>, vector<128x512xbf16>, vector<8x512xf32> -> vector<8x512xf32>
    %526 = arith.addf %524, %525 : vector<8x512xf32>
    %527 = vector.broadcast %2 : vector<1x512xf32> to vector<8x512xf32>
    %528 = arith.addf %526, %527 : vector<8x512xf32>
    %529 = vector.extract_strided_slice %528 {offsets = [0, 0], sizes = [8, 128], strides = [1, 1]} : vector<8x512xf32> to vector<8x128xf32>
    %530 = arith.negf %529 : vector<8x128xf32>
    %531 = math.exp %530 : vector<8x128xf32>
    %cst_130 = arith.constant 1.000000e+00 : f32
    %532 = vector.broadcast %cst_130 : f32 to vector<8x128xf32>
    %533 = arith.addf %532, %531 : vector<8x128xf32>
    %534 = arith.divf %532, %533 : vector<8x128xf32>
    %535 = vector.extract_strided_slice %528 {offsets = [0, 128], sizes = [8, 128], strides = [1, 1]} : vector<8x512xf32> to vector<8x128xf32>
    %536 = arith.negf %535 : vector<8x128xf32>
    %537 = math.exp %536 : vector<8x128xf32>
    %cst_131 = arith.constant 1.000000e+00 : f32
    %538 = vector.broadcast %cst_131 : f32 to vector<8x128xf32>
    %539 = arith.addf %538, %537 : vector<8x128xf32>
    %540 = arith.divf %538, %539 : vector<8x128xf32>
    %541 = vector.extract_strided_slice %528 {offsets = [0, 256], sizes = [8, 128], strides = [1, 1]} : vector<8x512xf32> to vector<8x128xf32>
    %542 = math.tanh %541 : vector<8x128xf32>
    %543 = vector.extract_strided_slice %528 {offsets = [0, 384], sizes = [8, 128], strides = [1, 1]} : vector<8x512xf32> to vector<8x128xf32>
    %544 = arith.negf %543 : vector<8x128xf32>
    %545 = math.exp %544 : vector<8x128xf32>
    %cst_132 = arith.constant 1.000000e+00 : f32
    %546 = vector.broadcast %cst_132 : f32 to vector<8x128xf32>
    %547 = arith.addf %546, %545 : vector<8x128xf32>
    %548 = arith.divf %546, %547 : vector<8x128xf32>
    %549 = arith.mulf %540, %467 : vector<8x128xf32>
    %550 = arith.mulf %534, %542 : vector<8x128xf32>
    %551 = arith.addf %549, %550 : vector<8x128xf32>
    %552 = math.tanh %551 : vector<8x128xf32>
    %553 = arith.mulf %548, %552 : vector<8x128xf32>
    %554 = arith.truncf %553 : vector<8x128xf32> to vector<8x128xbf16>
    %cst_133 = arith.constant dense<0.000000e+00> : vector<8x512xf32>
    %555 = tpu.matmul %554, %3, %cst_133 {dimension_numbers = #tpu.dot_dimension_numbers<[1], [0], [0], [1], [0, 0, 1, 1], [], []>} : vector<8x128xbf16>, vector<128x512xbf16>, vector<8x512xf32> -> vector<8x512xf32>
    %cst_134 = arith.constant dense<0.000000e+00> : vector<8x512xf32>
    %556 = tpu.matmul %501, %4, %cst_134 {dimension_numbers = #tpu.dot_dimension_numbers<[1], [0], [0], [1], [0, 0, 1, 1], [], []>} : vector<8x128xbf16>, vector<128x512xbf16>, vector<8x512xf32> -> vector<8x512xf32>
    %557 = arith.addf %555, %556 : vector<8x512xf32>
    %558 = vector.broadcast %5 : vector<1x512xf32> to vector<8x512xf32>
    %559 = arith.addf %557, %558 : vector<8x512xf32>
    %560 = vector.extract_strided_slice %559 {offsets = [0, 0], sizes = [8, 128], strides = [1, 1]} : vector<8x512xf32> to vector<8x128xf32>
    %561 = arith.negf %560 : vector<8x128xf32>
    %562 = math.exp %561 : vector<8x128xf32>
    %cst_135 = arith.constant 1.000000e+00 : f32
    %563 = vector.broadcast %cst_135 : f32 to vector<8x128xf32>
    %564 = arith.addf %563, %562 : vector<8x128xf32>
    %565 = arith.divf %563, %564 : vector<8x128xf32>
    %566 = vector.extract_strided_slice %559 {offsets = [0, 128], sizes = [8, 128], strides = [1, 1]} : vector<8x512xf32> to vector<8x128xf32>
    %567 = arith.negf %566 : vector<8x128xf32>
    %568 = math.exp %567 : vector<8x128xf32>
    %cst_136 = arith.constant 1.000000e+00 : f32
    %569 = vector.broadcast %cst_136 : f32 to vector<8x128xf32>
    %570 = arith.addf %569, %568 : vector<8x128xf32>
    %571 = arith.divf %569, %570 : vector<8x128xf32>
    %572 = vector.extract_strided_slice %559 {offsets = [0, 256], sizes = [8, 128], strides = [1, 1]} : vector<8x512xf32> to vector<8x128xf32>
    %573 = math.tanh %572 : vector<8x128xf32>
    %574 = vector.extract_strided_slice %559 {offsets = [0, 384], sizes = [8, 128], strides = [1, 1]} : vector<8x512xf32> to vector<8x128xf32>
    %575 = arith.negf %574 : vector<8x128xf32>
    %576 = math.exp %575 : vector<8x128xf32>
    %cst_137 = arith.constant 1.000000e+00 : f32
    %577 = vector.broadcast %cst_137 : f32 to vector<8x128xf32>
    %578 = arith.addf %577, %576 : vector<8x128xf32>
    %579 = arith.divf %577, %578 : vector<8x128xf32>
    %580 = arith.mulf %571, %498 : vector<8x128xf32>
    %581 = arith.mulf %565, %573 : vector<8x128xf32>
    %582 = arith.addf %580, %581 : vector<8x128xf32>
    %583 = math.tanh %582 : vector<8x128xf32>
    %584 = arith.mulf %579, %583 : vector<8x128xf32>
    %585 = arith.truncf %584 : vector<8x128xf32> to vector<8x128xbf16>
    %cst_138 = arith.constant dense<0.000000e+00> : vector<8x2xf32>
    %586 = tpu.matmul %585, %6, %cst_138 {dimension_numbers = #tpu.dot_dimension_numbers<[1], [0], [0], [1], [0, 0, 1, 1], [], []>} : vector<8x128xbf16>, vector<128x2xbf16>, vector<8x2xf32> -> vector<8x2xf32>
    %587 = vector.broadcast %7 : vector<1x2xf32> to vector<8x2xf32>
    %588 = arith.addf %586, %587 : vector<8x2xf32>
    %589 = vector.extract_strided_slice %588 {offsets = [0, 0], sizes = [8, 1], strides = [1, 1]} : vector<8x2xf32> to vector<8x1xf32>
    %590 = vector.extract_strided_slice %588 {offsets = [0, 1], sizes = [8, 1], strides = [1, 1]} : vector<8x2xf32> to vector<8x1xf32>
    %cst_139 = arith.constant 0.000000e+00 : f32
    %591 = vector.broadcast %cst_139 : f32 to vector<8x1xf32>
    %592 = arith.maximumf %590, %591 : vector<8x1xf32>
    %593 = math.absf %590 : vector<8x1xf32>
    %cst_140 = arith.constant 0.000000e+00 : f32
    %594 = vector.broadcast %cst_140 : f32 to vector<8x1xf32>
    %595 = arith.subf %594, %593 : vector<8x1xf32>
    %596 = math.exp %595 : vector<8x1xf32>
    %cst_141 = arith.constant 1.000000e+00 : f32
    %597 = vector.broadcast %cst_141 : f32 to vector<8x1xf32>
    %598 = arith.addf %597, %596 : vector<8x1xf32>
    %599 = math.log %598 : vector<8x1xf32>
    %600 = arith.addf %592, %599 : vector<8x1xf32>
    %cst_142 = arith.constant 9.99999997E-7 : f32
    %601 = vector.broadcast %cst_142 : f32 to vector<8x1xf32>
    %602 = arith.addf %600, %601 : vector<8x1xf32>
    %c0_143 = arith.constant 0 : index
    %c6 = arith.constant 6 : index
    %603 = vector.load %arg10[%c0_143, %c6] : memref<8x128xf32, #tpu.memory_space<vmem>>, vector<8x1xf32>
    tpu.vector_store %arg10[%c0_143, %c6], %589 {strides = array<i32>} : memref<8x128xf32, #tpu.memory_space<vmem>>, vector<8x1xf32>,
    %c0_144 = arith.constant 0 : index
    %c6_145 = arith.constant 6 : index
    %604 = vector.load %arg11[%c0_144, %c6_145] : memref<8x128xf32, #tpu.memory_space<vmem>>, vector<8x1xf32>
    tpu.vector_store %arg11[%c0_144, %c6_145], %602 {strides = array<i32>} : memref<8x128xf32, #tpu.memory_space<vmem>>, vector<8x1xf32>,
    %605 = vector.extract_strided_slice %8 {offsets = [0, 7], sizes = [8, 1], strides = [1, 1]} : vector<8x11xf32> to vector<8x1xf32>
    %606 = vector.broadcast %605 : vector<8x1xf32> to vector<8x512xf32>
    %607 = vector.broadcast %0 : vector<1x512xf32> to vector<8x512xf32>
    %608 = arith.mulf %606, %607 : vector<8x512xf32>
    %cst_146 = arith.constant dense<0.000000e+00> : vector<8x512xf32>
    %609 = tpu.matmul %554, %1, %cst_146 {dimension_numbers = #tpu.dot_dimension_numbers<[1], [0], [0], [1], [0, 0, 1, 1], [], []>} : vector<8x128xbf16>, vector<128x512xbf16>, vector<8x512xf32> -> vector<8x512xf32>
    %610 = arith.addf %608, %609 : vector<8x512xf32>
    %611 = vector.broadcast %2 : vector<1x512xf32> to vector<8x512xf32>
    %612 = arith.addf %610, %611 : vector<8x512xf32>
    %613 = vector.extract_strided_slice %612 {offsets = [0, 0], sizes = [8, 128], strides = [1, 1]} : vector<8x512xf32> to vector<8x128xf32>
    %614 = arith.negf %613 : vector<8x128xf32>
    %615 = math.exp %614 : vector<8x128xf32>
    %cst_147 = arith.constant 1.000000e+00 : f32
    %616 = vector.broadcast %cst_147 : f32 to vector<8x128xf32>
    %617 = arith.addf %616, %615 : vector<8x128xf32>
    %618 = arith.divf %616, %617 : vector<8x128xf32>
    %619 = vector.extract_strided_slice %612 {offsets = [0, 128], sizes = [8, 128], strides = [1, 1]} : vector<8x512xf32> to vector<8x128xf32>
    %620 = arith.negf %619 : vector<8x128xf32>
    %621 = math.exp %620 : vector<8x128xf32>
    %cst_148 = arith.constant 1.000000e+00 : f32
    %622 = vector.broadcast %cst_148 : f32 to vector<8x128xf32>
    %623 = arith.addf %622, %621 : vector<8x128xf32>
    %624 = arith.divf %622, %623 : vector<8x128xf32>
    %625 = vector.extract_strided_slice %612 {offsets = [0, 256], sizes = [8, 128], strides = [1, 1]} : vector<8x512xf32> to vector<8x128xf32>
    %626 = math.tanh %625 : vector<8x128xf32>
    %627 = vector.extract_strided_slice %612 {offsets = [0, 384], sizes = [8, 128], strides = [1, 1]} : vector<8x512xf32> to vector<8x128xf32>
    %628 = arith.negf %627 : vector<8x128xf32>
    %629 = math.exp %628 : vector<8x128xf32>
    %cst_149 = arith.constant 1.000000e+00 : f32
    %630 = vector.broadcast %cst_149 : f32 to vector<8x128xf32>
    %631 = arith.addf %630, %629 : vector<8x128xf32>
    %632 = arith.divf %630, %631 : vector<8x128xf32>
    %633 = arith.mulf %624, %551 : vector<8x128xf32>
    %634 = arith.mulf %618, %626 : vector<8x128xf32>
    %635 = arith.addf %633, %634 : vector<8x128xf32>
    %636 = math.tanh %635 : vector<8x128xf32>
    %637 = arith.mulf %632, %636 : vector<8x128xf32>
    %638 = arith.truncf %637 : vector<8x128xf32> to vector<8x128xbf16>
    %cst_150 = arith.constant dense<0.000000e+00> : vector<8x512xf32>
    %639 = tpu.matmul %638, %3, %cst_150 {dimension_numbers = #tpu.dot_dimension_numbers<[1], [0], [0], [1], [0, 0, 1, 1], [], []>} : vector<8x128xbf16>, vector<128x512xbf16>, vector<8x512xf32> -> vector<8x512xf32>
    %cst_151 = arith.constant dense<0.000000e+00> : vector<8x512xf32>
    %640 = tpu.matmul %585, %4, %cst_151 {dimension_numbers = #tpu.dot_dimension_numbers<[1], [0], [0], [1], [0, 0, 1, 1], [], []>} : vector<8x128xbf16>, vector<128x512xbf16>, vector<8x512xf32> -> vector<8x512xf32>
    %641 = arith.addf %639, %640 : vector<8x512xf32>
    %642 = vector.broadcast %5 : vector<1x512xf32> to vector<8x512xf32>
    %643 = arith.addf %641, %642 : vector<8x512xf32>
    %644 = vector.extract_strided_slice %643 {offsets = [0, 0], sizes = [8, 128], strides = [1, 1]} : vector<8x512xf32> to vector<8x128xf32>
    %645 = arith.negf %644 : vector<8x128xf32>
    %646 = math.exp %645 : vector<8x128xf32>
    %cst_152 = arith.constant 1.000000e+00 : f32
    %647 = vector.broadcast %cst_152 : f32 to vector<8x128xf32>
    %648 = arith.addf %647, %646 : vector<8x128xf32>
    %649 = arith.divf %647, %648 : vector<8x128xf32>
    %650 = vector.extract_strided_slice %643 {offsets = [0, 128], sizes = [8, 128], strides = [1, 1]} : vector<8x512xf32> to vector<8x128xf32>
    %651 = arith.negf %650 : vector<8x128xf32>
    %652 = math.exp %651 : vector<8x128xf32>
    %cst_153 = arith.constant 1.000000e+00 : f32
    %653 = vector.broadcast %cst_153 : f32 to vector<8x128xf32>
    %654 = arith.addf %653, %652 : vector<8x128xf32>
    %655 = arith.divf %653, %654 : vector<8x128xf32>
    %656 = vector.extract_strided_slice %643 {offsets = [0, 256], sizes = [8, 128], strides = [1, 1]} : vector<8x512xf32> to vector<8x128xf32>
    %657 = math.tanh %656 : vector<8x128xf32>
    %658 = vector.extract_strided_slice %643 {offsets = [0, 384], sizes = [8, 128], strides = [1, 1]} : vector<8x512xf32> to vector<8x128xf32>
    %659 = arith.negf %658 : vector<8x128xf32>
    %660 = math.exp %659 : vector<8x128xf32>
    %cst_154 = arith.constant 1.000000e+00 : f32
    %661 = vector.broadcast %cst_154 : f32 to vector<8x128xf32>
    %662 = arith.addf %661, %660 : vector<8x128xf32>
    %663 = arith.divf %661, %662 : vector<8x128xf32>
    %664 = arith.mulf %655, %582 : vector<8x128xf32>
    %665 = arith.mulf %649, %657 : vector<8x128xf32>
    %666 = arith.addf %664, %665 : vector<8x128xf32>
    %667 = math.tanh %666 : vector<8x128xf32>
    %668 = arith.mulf %663, %667 : vector<8x128xf32>
    %669 = arith.truncf %668 : vector<8x128xf32> to vector<8x128xbf16>
    %cst_155 = arith.constant dense<0.000000e+00> : vector<8x2xf32>
    %670 = tpu.matmul %669, %6, %cst_155 {dimension_numbers = #tpu.dot_dimension_numbers<[1], [0], [0], [1], [0, 0, 1, 1], [], []>} : vector<8x128xbf16>, vector<128x2xbf16>, vector<8x2xf32> -> vector<8x2xf32>
    %671 = vector.broadcast %7 : vector<1x2xf32> to vector<8x2xf32>
    %672 = arith.addf %670, %671 : vector<8x2xf32>
    %673 = vector.extract_strided_slice %672 {offsets = [0, 0], sizes = [8, 1], strides = [1, 1]} : vector<8x2xf32> to vector<8x1xf32>
    %674 = vector.extract_strided_slice %672 {offsets = [0, 1], sizes = [8, 1], strides = [1, 1]} : vector<8x2xf32> to vector<8x1xf32>
    %cst_156 = arith.constant 0.000000e+00 : f32
    %675 = vector.broadcast %cst_156 : f32 to vector<8x1xf32>
    %676 = arith.maximumf %674, %675 : vector<8x1xf32>
    %677 = math.absf %674 : vector<8x1xf32>
    %cst_157 = arith.constant 0.000000e+00 : f32
    %678 = vector.broadcast %cst_157 : f32 to vector<8x1xf32>
    %679 = arith.subf %678, %677 : vector<8x1xf32>
    %680 = math.exp %679 : vector<8x1xf32>
    %cst_158 = arith.constant 1.000000e+00 : f32
    %681 = vector.broadcast %cst_158 : f32 to vector<8x1xf32>
    %682 = arith.addf %681, %680 : vector<8x1xf32>
    %683 = math.log %682 : vector<8x1xf32>
    %684 = arith.addf %676, %683 : vector<8x1xf32>
    %cst_159 = arith.constant 9.99999997E-7 : f32
    %685 = vector.broadcast %cst_159 : f32 to vector<8x1xf32>
    %686 = arith.addf %684, %685 : vector<8x1xf32>
    %c0_160 = arith.constant 0 : index
    %c7 = arith.constant 7 : index
    %687 = vector.load %arg10[%c0_160, %c7] : memref<8x128xf32, #tpu.memory_space<vmem>>, vector<8x1xf32>
    tpu.vector_store %arg10[%c0_160, %c7], %673 {strides = array<i32>} : memref<8x128xf32, #tpu.memory_space<vmem>>, vector<8x1xf32>,
    %c0_161 = arith.constant 0 : index
    %c7_162 = arith.constant 7 : index
    %688 = vector.load %arg11[%c0_161, %c7_162] : memref<8x128xf32, #tpu.memory_space<vmem>>, vector<8x1xf32>
    tpu.vector_store %arg11[%c0_161, %c7_162], %686 {strides = array<i32>} : memref<8x128xf32, #tpu.memory_space<vmem>>, vector<8x1xf32>,
    %689 = vector.extract_strided_slice %8 {offsets = [0, 8], sizes = [8, 1], strides = [1, 1]} : vector<8x11xf32> to vector<8x1xf32>
    %690 = vector.broadcast %689 : vector<8x1xf32> to vector<8x512xf32>
    %691 = vector.broadcast %0 : vector<1x512xf32> to vector<8x512xf32>
    %692 = arith.mulf %690, %691 : vector<8x512xf32>
    %cst_163 = arith.constant dense<0.000000e+00> : vector<8x512xf32>
    %693 = tpu.matmul %638, %1, %cst_163 {dimension_numbers = #tpu.dot_dimension_numbers<[1], [0], [0], [1], [0, 0, 1, 1], [], []>} : vector<8x128xbf16>, vector<128x512xbf16>, vector<8x512xf32> -> vector<8x512xf32>
    %694 = arith.addf %692, %693 : vector<8x512xf32>
    %695 = vector.broadcast %2 : vector<1x512xf32> to vector<8x512xf32>
    %696 = arith.addf %694, %695 : vector<8x512xf32>
    %697 = vector.extract_strided_slice %696 {offsets = [0, 0], sizes = [8, 128], strides = [1, 1]} : vector<8x512xf32> to vector<8x128xf32>
    %698 = arith.negf %697 : vector<8x128xf32>
    %699 = math.exp %698 : vector<8x128xf32>
    %cst_164 = arith.constant 1.000000e+00 : f32
    %700 = vector.broadcast %cst_164 : f32 to vector<8x128xf32>
    %701 = arith.addf %700, %699 : vector<8x128xf32>
    %702 = arith.divf %700, %701 : vector<8x128xf32>
    %703 = vector.extract_strided_slice %696 {offsets = [0, 128], sizes = [8, 128], strides = [1, 1]} : vector<8x512xf32> to vector<8x128xf32>
    %704 = arith.negf %703 : vector<8x128xf32>
    %705 = math.exp %704 : vector<8x128xf32>
    %cst_165 = arith.constant 1.000000e+00 : f32
    %706 = vector.broadcast %cst_165 : f32 to vector<8x128xf32>
    %707 = arith.addf %706, %705 : vector<8x128xf32>
    %708 = arith.divf %706, %707 : vector<8x128xf32>
    %709 = vector.extract_strided_slice %696 {offsets = [0, 256], sizes = [8, 128], strides = [1, 1]} : vector<8x512xf32> to vector<8x128xf32>
    %710 = math.tanh %709 : vector<8x128xf32>
    %711 = vector.extract_strided_slice %696 {offsets = [0, 384], sizes = [8, 128], strides = [1, 1]} : vector<8x512xf32> to vector<8x128xf32>
    %712 = arith.negf %711 : vector<8x128xf32>
    %713 = math.exp %712 : vector<8x128xf32>
    %cst_166 = arith.constant 1.000000e+00 : f32
    %714 = vector.broadcast %cst_166 : f32 to vector<8x128xf32>
    %715 = arith.addf %714, %713 : vector<8x128xf32>
    %716 = arith.divf %714, %715 : vector<8x128xf32>
    %717 = arith.mulf %708, %635 : vector<8x128xf32>
    %718 = arith.mulf %702, %710 : vector<8x128xf32>
    %719 = arith.addf %717, %718 : vector<8x128xf32>
    %720 = math.tanh %719 : vector<8x128xf32>
    %721 = arith.mulf %716, %720 : vector<8x128xf32>
    %722 = arith.truncf %721 : vector<8x128xf32> to vector<8x128xbf16>
    %cst_167 = arith.constant dense<0.000000e+00> : vector<8x512xf32>
    %723 = tpu.matmul %722, %3, %cst_167 {dimension_numbers = #tpu.dot_dimension_numbers<[1], [0], [0], [1], [0, 0, 1, 1], [], []>} : vector<8x128xbf16>, vector<128x512xbf16>, vector<8x512xf32> -> vector<8x512xf32>
    %cst_168 = arith.constant dense<0.000000e+00> : vector<8x512xf32>
    %724 = tpu.matmul %669, %4, %cst_168 {dimension_numbers = #tpu.dot_dimension_numbers<[1], [0], [0], [1], [0, 0, 1, 1], [], []>} : vector<8x128xbf16>, vector<128x512xbf16>, vector<8x512xf32> -> vector<8x512xf32>
    %725 = arith.addf %723, %724 : vector<8x512xf32>
    %726 = vector.broadcast %5 : vector<1x512xf32> to vector<8x512xf32>
    %727 = arith.addf %725, %726 : vector<8x512xf32>
    %728 = vector.extract_strided_slice %727 {offsets = [0, 0], sizes = [8, 128], strides = [1, 1]} : vector<8x512xf32> to vector<8x128xf32>
    %729 = arith.negf %728 : vector<8x128xf32>
    %730 = math.exp %729 : vector<8x128xf32>
    %cst_169 = arith.constant 1.000000e+00 : f32
    %731 = vector.broadcast %cst_169 : f32 to vector<8x128xf32>
    %732 = arith.addf %731, %730 : vector<8x128xf32>
    %733 = arith.divf %731, %732 : vector<8x128xf32>
    %734 = vector.extract_strided_slice %727 {offsets = [0, 128], sizes = [8, 128], strides = [1, 1]} : vector<8x512xf32> to vector<8x128xf32>
    %735 = arith.negf %734 : vector<8x128xf32>
    %736 = math.exp %735 : vector<8x128xf32>
    %cst_170 = arith.constant 1.000000e+00 : f32
    %737 = vector.broadcast %cst_170 : f32 to vector<8x128xf32>
    %738 = arith.addf %737, %736 : vector<8x128xf32>
    %739 = arith.divf %737, %738 : vector<8x128xf32>
    %740 = vector.extract_strided_slice %727 {offsets = [0, 256], sizes = [8, 128], strides = [1, 1]} : vector<8x512xf32> to vector<8x128xf32>
    %741 = math.tanh %740 : vector<8x128xf32>
    %742 = vector.extract_strided_slice %727 {offsets = [0, 384], sizes = [8, 128], strides = [1, 1]} : vector<8x512xf32> to vector<8x128xf32>
    %743 = arith.negf %742 : vector<8x128xf32>
    %744 = math.exp %743 : vector<8x128xf32>
    %cst_171 = arith.constant 1.000000e+00 : f32
    %745 = vector.broadcast %cst_171 : f32 to vector<8x128xf32>
    %746 = arith.addf %745, %744 : vector<8x128xf32>
    %747 = arith.divf %745, %746 : vector<8x128xf32>
    %748 = arith.mulf %739, %666 : vector<8x128xf32>
    %749 = arith.mulf %733, %741 : vector<8x128xf32>
    %750 = arith.addf %748, %749 : vector<8x128xf32>
    %751 = math.tanh %750 : vector<8x128xf32>
    %752 = arith.mulf %747, %751 : vector<8x128xf32>
    %753 = arith.truncf %752 : vector<8x128xf32> to vector<8x128xbf16>
    %cst_172 = arith.constant dense<0.000000e+00> : vector<8x2xf32>
    %754 = tpu.matmul %753, %6, %cst_172 {dimension_numbers = #tpu.dot_dimension_numbers<[1], [0], [0], [1], [0, 0, 1, 1], [], []>} : vector<8x128xbf16>, vector<128x2xbf16>, vector<8x2xf32> -> vector<8x2xf32>
    %755 = vector.broadcast %7 : vector<1x2xf32> to vector<8x2xf32>
    %756 = arith.addf %754, %755 : vector<8x2xf32>
    %757 = vector.extract_strided_slice %756 {offsets = [0, 0], sizes = [8, 1], strides = [1, 1]} : vector<8x2xf32> to vector<8x1xf32>
    %758 = vector.extract_strided_slice %756 {offsets = [0, 1], sizes = [8, 1], strides = [1, 1]} : vector<8x2xf32> to vector<8x1xf32>
    %cst_173 = arith.constant 0.000000e+00 : f32
    %759 = vector.broadcast %cst_173 : f32 to vector<8x1xf32>
    %760 = arith.maximumf %758, %759 : vector<8x1xf32>
    %761 = math.absf %758 : vector<8x1xf32>
    %cst_174 = arith.constant 0.000000e+00 : f32
    %762 = vector.broadcast %cst_174 : f32 to vector<8x1xf32>
    %763 = arith.subf %762, %761 : vector<8x1xf32>
    %764 = math.exp %763 : vector<8x1xf32>
    %cst_175 = arith.constant 1.000000e+00 : f32
    %765 = vector.broadcast %cst_175 : f32 to vector<8x1xf32>
    %766 = arith.addf %765, %764 : vector<8x1xf32>
    %767 = math.log %766 : vector<8x1xf32>
    %768 = arith.addf %760, %767 : vector<8x1xf32>
    %cst_176 = arith.constant 9.99999997E-7 : f32
    %769 = vector.broadcast %cst_176 : f32 to vector<8x1xf32>
    %770 = arith.addf %768, %769 : vector<8x1xf32>
    %c0_177 = arith.constant 0 : index
    %c8 = arith.constant 8 : index
    %771 = vector.load %arg10[%c0_177, %c8] : memref<8x128xf32, #tpu.memory_space<vmem>>, vector<8x1xf32>
    tpu.vector_store %arg10[%c0_177, %c8], %757 {strides = array<i32>} : memref<8x128xf32, #tpu.memory_space<vmem>>, vector<8x1xf32>,
    %c0_178 = arith.constant 0 : index
    %c8_179 = arith.constant 8 : index
    %772 = vector.load %arg11[%c0_178, %c8_179] : memref<8x128xf32, #tpu.memory_space<vmem>>, vector<8x1xf32>
    tpu.vector_store %arg11[%c0_178, %c8_179], %770 {strides = array<i32>} : memref<8x128xf32, #tpu.memory_space<vmem>>, vector<8x1xf32>,
    %773 = vector.extract_strided_slice %8 {offsets = [0, 9], sizes = [8, 1], strides = [1, 1]} : vector<8x11xf32> to vector<8x1xf32>
    %774 = vector.broadcast %773 : vector<8x1xf32> to vector<8x512xf32>
    %775 = vector.broadcast %0 : vector<1x512xf32> to vector<8x512xf32>
    %776 = arith.mulf %774, %775 : vector<8x512xf32>
    %cst_180 = arith.constant dense<0.000000e+00> : vector<8x512xf32>
    %777 = tpu.matmul %722, %1, %cst_180 {dimension_numbers = #tpu.dot_dimension_numbers<[1], [0], [0], [1], [0, 0, 1, 1], [], []>} : vector<8x128xbf16>, vector<128x512xbf16>, vector<8x512xf32> -> vector<8x512xf32>
    %778 = arith.addf %776, %777 : vector<8x512xf32>
    %779 = vector.broadcast %2 : vector<1x512xf32> to vector<8x512xf32>
    %780 = arith.addf %778, %779 : vector<8x512xf32>
    %781 = vector.extract_strided_slice %780 {offsets = [0, 0], sizes = [8, 128], strides = [1, 1]} : vector<8x512xf32> to vector<8x128xf32>
    %782 = arith.negf %781 : vector<8x128xf32>
    %783 = math.exp %782 : vector<8x128xf32>
    %cst_181 = arith.constant 1.000000e+00 : f32
    %784 = vector.broadcast %cst_181 : f32 to vector<8x128xf32>
    %785 = arith.addf %784, %783 : vector<8x128xf32>
    %786 = arith.divf %784, %785 : vector<8x128xf32>
    %787 = vector.extract_strided_slice %780 {offsets = [0, 128], sizes = [8, 128], strides = [1, 1]} : vector<8x512xf32> to vector<8x128xf32>
    %788 = arith.negf %787 : vector<8x128xf32>
    %789 = math.exp %788 : vector<8x128xf32>
    %cst_182 = arith.constant 1.000000e+00 : f32
    %790 = vector.broadcast %cst_182 : f32 to vector<8x128xf32>
    %791 = arith.addf %790, %789 : vector<8x128xf32>
    %792 = arith.divf %790, %791 : vector<8x128xf32>
    %793 = vector.extract_strided_slice %780 {offsets = [0, 256], sizes = [8, 128], strides = [1, 1]} : vector<8x512xf32> to vector<8x128xf32>
    %794 = math.tanh %793 : vector<8x128xf32>
    %795 = vector.extract_strided_slice %780 {offsets = [0, 384], sizes = [8, 128], strides = [1, 1]} : vector<8x512xf32> to vector<8x128xf32>
    %796 = arith.negf %795 : vector<8x128xf32>
    %797 = math.exp %796 : vector<8x128xf32>
    %cst_183 = arith.constant 1.000000e+00 : f32
    %798 = vector.broadcast %cst_183 : f32 to vector<8x128xf32>
    %799 = arith.addf %798, %797 : vector<8x128xf32>
    %800 = arith.divf %798, %799 : vector<8x128xf32>
    %801 = arith.mulf %792, %719 : vector<8x128xf32>
    %802 = arith.mulf %786, %794 : vector<8x128xf32>
    %803 = arith.addf %801, %802 : vector<8x128xf32>
    %804 = math.tanh %803 : vector<8x128xf32>
    %805 = arith.mulf %800, %804 : vector<8x128xf32>
    %806 = arith.truncf %805 : vector<8x128xf32> to vector<8x128xbf16>
    %cst_184 = arith.constant dense<0.000000e+00> : vector<8x512xf32>
    %807 = tpu.matmul %806, %3, %cst_184 {dimension_numbers = #tpu.dot_dimension_numbers<[1], [0], [0], [1], [0, 0, 1, 1], [], []>} : vector<8x128xbf16>, vector<128x512xbf16>, vector<8x512xf32> -> vector<8x512xf32>
    %cst_185 = arith.constant dense<0.000000e+00> : vector<8x512xf32>
    %808 = tpu.matmul %753, %4, %cst_185 {dimension_numbers = #tpu.dot_dimension_numbers<[1], [0], [0], [1], [0, 0, 1, 1], [], []>} : vector<8x128xbf16>, vector<128x512xbf16>, vector<8x512xf32> -> vector<8x512xf32>
    %809 = arith.addf %807, %808 : vector<8x512xf32>
    %810 = vector.broadcast %5 : vector<1x512xf32> to vector<8x512xf32>
    %811 = arith.addf %809, %810 : vector<8x512xf32>
    %812 = vector.extract_strided_slice %811 {offsets = [0, 0], sizes = [8, 128], strides = [1, 1]} : vector<8x512xf32> to vector<8x128xf32>
    %813 = arith.negf %812 : vector<8x128xf32>
    %814 = math.exp %813 : vector<8x128xf32>
    %cst_186 = arith.constant 1.000000e+00 : f32
    %815 = vector.broadcast %cst_186 : f32 to vector<8x128xf32>
    %816 = arith.addf %815, %814 : vector<8x128xf32>
    %817 = arith.divf %815, %816 : vector<8x128xf32>
    %818 = vector.extract_strided_slice %811 {offsets = [0, 128], sizes = [8, 128], strides = [1, 1]} : vector<8x512xf32> to vector<8x128xf32>
    %819 = arith.negf %818 : vector<8x128xf32>
    %820 = math.exp %819 : vector<8x128xf32>
    %cst_187 = arith.constant 1.000000e+00 : f32
    %821 = vector.broadcast %cst_187 : f32 to vector<8x128xf32>
    %822 = arith.addf %821, %820 : vector<8x128xf32>
    %823 = arith.divf %821, %822 : vector<8x128xf32>
    %824 = vector.extract_strided_slice %811 {offsets = [0, 256], sizes = [8, 128], strides = [1, 1]} : vector<8x512xf32> to vector<8x128xf32>
    %825 = math.tanh %824 : vector<8x128xf32>
    %826 = vector.extract_strided_slice %811 {offsets = [0, 384], sizes = [8, 128], strides = [1, 1]} : vector<8x512xf32> to vector<8x128xf32>
    %827 = arith.negf %826 : vector<8x128xf32>
    %828 = math.exp %827 : vector<8x128xf32>
    %cst_188 = arith.constant 1.000000e+00 : f32
    %829 = vector.broadcast %cst_188 : f32 to vector<8x128xf32>
    %830 = arith.addf %829, %828 : vector<8x128xf32>
    %831 = arith.divf %829, %830 : vector<8x128xf32>
    %832 = arith.mulf %823, %750 : vector<8x128xf32>
    %833 = arith.mulf %817, %825 : vector<8x128xf32>
    %834 = arith.addf %832, %833 : vector<8x128xf32>
    %835 = math.tanh %834 : vector<8x128xf32>
    %836 = arith.mulf %831, %835 : vector<8x128xf32>
    %837 = arith.truncf %836 : vector<8x128xf32> to vector<8x128xbf16>
    %cst_189 = arith.constant dense<0.000000e+00> : vector<8x2xf32>
    %838 = tpu.matmul %837, %6, %cst_189 {dimension_numbers = #tpu.dot_dimension_numbers<[1], [0], [0], [1], [0, 0, 1, 1], [], []>} : vector<8x128xbf16>, vector<128x2xbf16>, vector<8x2xf32> -> vector<8x2xf32>
    %839 = vector.broadcast %7 : vector<1x2xf32> to vector<8x2xf32>
    %840 = arith.addf %838, %839 : vector<8x2xf32>
    %841 = vector.extract_strided_slice %840 {offsets = [0, 0], sizes = [8, 1], strides = [1, 1]} : vector<8x2xf32> to vector<8x1xf32>
    %842 = vector.extract_strided_slice %840 {offsets = [0, 1], sizes = [8, 1], strides = [1, 1]} : vector<8x2xf32> to vector<8x1xf32>
    %cst_190 = arith.constant 0.000000e+00 : f32
    %843 = vector.broadcast %cst_190 : f32 to vector<8x1xf32>
    %844 = arith.maximumf %842, %843 : vector<8x1xf32>
    %845 = math.absf %842 : vector<8x1xf32>
    %cst_191 = arith.constant 0.000000e+00 : f32
    %846 = vector.broadcast %cst_191 : f32 to vector<8x1xf32>
    %847 = arith.subf %846, %845 : vector<8x1xf32>
    %848 = math.exp %847 : vector<8x1xf32>
    %cst_192 = arith.constant 1.000000e+00 : f32
    %849 = vector.broadcast %cst_192 : f32 to vector<8x1xf32>
    %850 = arith.addf %849, %848 : vector<8x1xf32>
    %851 = math.log %850 : vector<8x1xf32>
    %852 = arith.addf %844, %851 : vector<8x1xf32>
    %cst_193 = arith.constant 9.99999997E-7 : f32
    %853 = vector.broadcast %cst_193 : f32 to vector<8x1xf32>
    %854 = arith.addf %852, %853 : vector<8x1xf32>
    %c0_194 = arith.constant 0 : index
    %c9 = arith.constant 9 : index
    %855 = vector.load %arg10[%c0_194, %c9] : memref<8x128xf32, #tpu.memory_space<vmem>>, vector<8x1xf32>
    tpu.vector_store %arg10[%c0_194, %c9], %841 {strides = array<i32>} : memref<8x128xf32, #tpu.memory_space<vmem>>, vector<8x1xf32>,
    %c0_195 = arith.constant 0 : index
    %c9_196 = arith.constant 9 : index
    %856 = vector.load %arg11[%c0_195, %c9_196] : memref<8x128xf32, #tpu.memory_space<vmem>>, vector<8x1xf32>
    tpu.vector_store %arg11[%c0_195, %c9_196], %854 {strides = array<i32>} : memref<8x128xf32, #tpu.memory_space<vmem>>, vector<8x1xf32>,
    %857 = vector.extract_strided_slice %8 {offsets = [0, 10], sizes = [8, 1], strides = [1, 1]} : vector<8x11xf32> to vector<8x1xf32>
    %858 = vector.broadcast %857 : vector<8x1xf32> to vector<8x512xf32>
    %859 = vector.broadcast %0 : vector<1x512xf32> to vector<8x512xf32>
    %860 = arith.mulf %858, %859 : vector<8x512xf32>
    %cst_197 = arith.constant dense<0.000000e+00> : vector<8x512xf32>
    %861 = tpu.matmul %806, %1, %cst_197 {dimension_numbers = #tpu.dot_dimension_numbers<[1], [0], [0], [1], [0, 0, 1, 1], [], []>} : vector<8x128xbf16>, vector<128x512xbf16>, vector<8x512xf32> -> vector<8x512xf32>
    %862 = arith.addf %860, %861 : vector<8x512xf32>
    %863 = vector.broadcast %2 : vector<1x512xf32> to vector<8x512xf32>
    %864 = arith.addf %862, %863 : vector<8x512xf32>
    %865 = vector.extract_strided_slice %864 {offsets = [0, 0], sizes = [8, 128], strides = [1, 1]} : vector<8x512xf32> to vector<8x128xf32>
    %866 = arith.negf %865 : vector<8x128xf32>
    %867 = math.exp %866 : vector<8x128xf32>
    %cst_198 = arith.constant 1.000000e+00 : f32
    %868 = vector.broadcast %cst_198 : f32 to vector<8x128xf32>
    %869 = arith.addf %868, %867 : vector<8x128xf32>
    %870 = arith.divf %868, %869 : vector<8x128xf32>
    %871 = vector.extract_strided_slice %864 {offsets = [0, 128], sizes = [8, 128], strides = [1, 1]} : vector<8x512xf32> to vector<8x128xf32>
    %872 = arith.negf %871 : vector<8x128xf32>
    %873 = math.exp %872 : vector<8x128xf32>
    %cst_199 = arith.constant 1.000000e+00 : f32
    %874 = vector.broadcast %cst_199 : f32 to vector<8x128xf32>
    %875 = arith.addf %874, %873 : vector<8x128xf32>
    %876 = arith.divf %874, %875 : vector<8x128xf32>
    %877 = vector.extract_strided_slice %864 {offsets = [0, 256], sizes = [8, 128], strides = [1, 1]} : vector<8x512xf32> to vector<8x128xf32>
    %878 = math.tanh %877 : vector<8x128xf32>
    %879 = vector.extract_strided_slice %864 {offsets = [0, 384], sizes = [8, 128], strides = [1, 1]} : vector<8x512xf32> to vector<8x128xf32>
    %880 = arith.negf %879 : vector<8x128xf32>
    %881 = math.exp %880 : vector<8x128xf32>
    %cst_200 = arith.constant 1.000000e+00 : f32
    %882 = vector.broadcast %cst_200 : f32 to vector<8x128xf32>
    %883 = arith.addf %882, %881 : vector<8x128xf32>
    %884 = arith.divf %882, %883 : vector<8x128xf32>
    %885 = arith.mulf %876, %803 : vector<8x128xf32>
    %886 = arith.mulf %870, %878 : vector<8x128xf32>
    %887 = arith.addf %885, %886 : vector<8x128xf32>
    %888 = math.tanh %887 : vector<8x128xf32>
    %889 = arith.mulf %884, %888 : vector<8x128xf32>
    %890 = arith.truncf %889 : vector<8x128xf32> to vector<8x128xbf16>
    %cst_201 = arith.constant dense<0.000000e+00> : vector<8x512xf32>
    %891 = tpu.matmul %890, %3, %cst_201 {dimension_numbers = #tpu.dot_dimension_numbers<[1], [0], [0], [1], [0, 0, 1, 1], [], []>} : vector<8x128xbf16>, vector<128x512xbf16>, vector<8x512xf32> -> vector<8x512xf32>
    %cst_202 = arith.constant dense<0.000000e+00> : vector<8x512xf32>
    %892 = tpu.matmul %837, %4, %cst_202 {dimension_numbers = #tpu.dot_dimension_numbers<[1], [0], [0], [1], [0, 0, 1, 1], [], []>} : vector<8x128xbf16>, vector<128x512xbf16>, vector<8x512xf32> -> vector<8x512xf32>
    %893 = arith.addf %891, %892 : vector<8x512xf32>
    %894 = vector.broadcast %5 : vector<1x512xf32> to vector<8x512xf32>
    %895 = arith.addf %893, %894 : vector<8x512xf32>
    %896 = vector.extract_strided_slice %895 {offsets = [0, 0], sizes = [8, 128], strides = [1, 1]} : vector<8x512xf32> to vector<8x128xf32>
    %897 = arith.negf %896 : vector<8x128xf32>
    %898 = math.exp %897 : vector<8x128xf32>
    %cst_203 = arith.constant 1.000000e+00 : f32
    %899 = vector.broadcast %cst_203 : f32 to vector<8x128xf32>
    %900 = arith.addf %899, %898 : vector<8x128xf32>
    %901 = arith.divf %899, %900 : vector<8x128xf32>
    %902 = vector.extract_strided_slice %895 {offsets = [0, 128], sizes = [8, 128], strides = [1, 1]} : vector<8x512xf32> to vector<8x128xf32>
    %903 = arith.negf %902 : vector<8x128xf32>
    %904 = math.exp %903 : vector<8x128xf32>
    %cst_204 = arith.constant 1.000000e+00 : f32
    %905 = vector.broadcast %cst_204 : f32 to vector<8x128xf32>
    %906 = arith.addf %905, %904 : vector<8x128xf32>
    %907 = arith.divf %905, %906 : vector<8x128xf32>
    %908 = vector.extract_strided_slice %895 {offsets = [0, 256], sizes = [8, 128], strides = [1, 1]} : vector<8x512xf32> to vector<8x128xf32>
    %909 = math.tanh %908 : vector<8x128xf32>
    %910 = vector.extract_strided_slice %895 {offsets = [0, 384], sizes = [8, 128], strides = [1, 1]} : vector<8x512xf32> to vector<8x128xf32>
    %911 = arith.negf %910 : vector<8x128xf32>
    %912 = math.exp %911 : vector<8x128xf32>
    %cst_205 = arith.constant 1.000000e+00 : f32
    %913 = vector.broadcast %cst_205 : f32 to vector<8x128xf32>
    %914 = arith.addf %913, %912 : vector<8x128xf32>
    %915 = arith.divf %913, %914 : vector<8x128xf32>
    %916 = arith.mulf %907, %834 : vector<8x128xf32>
    %917 = arith.mulf %901, %909 : vector<8x128xf32>
    %918 = arith.addf %916, %917 : vector<8x128xf32>
    %919 = math.tanh %918 : vector<8x128xf32>
    %920 = arith.mulf %915, %919 : vector<8x128xf32>
    %921 = arith.truncf %920 : vector<8x128xf32> to vector<8x128xbf16>
    %cst_206 = arith.constant dense<0.000000e+00> : vector<8x2xf32>
    %922 = tpu.matmul %921, %6, %cst_206 {dimension_numbers = #tpu.dot_dimension_numbers<[1], [0], [0], [1], [0, 0, 1, 1], [], []>} : vector<8x128xbf16>, vector<128x2xbf16>, vector<8x2xf32> -> vector<8x2xf32>
    %923 = vector.broadcast %7 : vector<1x2xf32> to vector<8x2xf32>
    %924 = arith.addf %922, %923 : vector<8x2xf32>
    %925 = vector.extract_strided_slice %924 {offsets = [0, 0], sizes = [8, 1], strides = [1, 1]} : vector<8x2xf32> to vector<8x1xf32>
    %926 = vector.extract_strided_slice %924 {offsets = [0, 1], sizes = [8, 1], strides = [1, 1]} : vector<8x2xf32> to vector<8x1xf32>
    %cst_207 = arith.constant 0.000000e+00 : f32
    %927 = vector.broadcast %cst_207 : f32 to vector<8x1xf32>
    %928 = arith.maximumf %926, %927 : vector<8x1xf32>
    %929 = math.absf %926 : vector<8x1xf32>
    %cst_208 = arith.constant 0.000000e+00 : f32
    %930 = vector.broadcast %cst_208 : f32 to vector<8x1xf32>
    %931 = arith.subf %930, %929 : vector<8x1xf32>
    %932 = math.exp %931 : vector<8x1xf32>
    %cst_209 = arith.constant 1.000000e+00 : f32
    %933 = vector.broadcast %cst_209 : f32 to vector<8x1xf32>
    %934 = arith.addf %933, %932 : vector<8x1xf32>
    %935 = math.log %934 : vector<8x1xf32>
    %936 = arith.addf %928, %935 : vector<8x1xf32>
    %cst_210 = arith.constant 9.99999997E-7 : f32
    %937 = vector.broadcast %cst_210 : f32 to vector<8x1xf32>
    %938 = arith.addf %936, %937 : vector<8x1xf32>
    %c0_211 = arith.constant 0 : index
    %c10 = arith.constant 10 : index
    %939 = vector.load %arg10[%c0_211, %c10] : memref<8x128xf32, #tpu.memory_space<vmem>>, vector<8x1xf32>
    tpu.vector_store %arg10[%c0_211, %c10], %925 {strides = array<i32>} : memref<8x128xf32, #tpu.memory_space<vmem>>, vector<8x1xf32>,
    %c0_212 = arith.constant 0 : index
    %c10_213 = arith.constant 10 : index
    %940 = vector.load %arg11[%c0_212, %c10_213] : memref<8x128xf32, #tpu.memory_space<vmem>>, vector<8x1xf32>
    tpu.vector_store %arg11[%c0_212, %c10_213], %938 {strides = array<i32>} : memref<8x128xf32, #tpu.memory_space<vmem>>, vector<8x1xf32>,
    return
  }
  func.func @transform_0(%arg0: i32) -> (i32, i32) {
    %c0_i32 = arith.constant 0 : i32
    %c0_i32_0 = arith.constant 0 : i32
    return %arg0, %c0_i32 : i32, i32
  }
  func.func @transform_1(%arg0: i32) -> (i32, i32) {
    %c0_i32 = arith.constant 0 : i32
    %c0_i32_0 = arith.constant 0 : i32
    %c0_i32_1 = arith.constant 0 : i32
    return %c0_i32, %c0_i32_0 : i32, i32
  }
  func.func @transform_2(%arg0: i32) -> (i32, i32) {
    %c0_i32 = arith.constant 0 : i32
    %c0_i32_0 = arith.constant 0 : i32
    %c0_i32_1 = arith.constant 0 : i32
    return %c0_i32, %c0_i32_0 : i32, i32
  }
  func.func @transform_3(%arg0: i32) -> (i32, i32) {
    %c0_i32 = arith.constant 0 : i32
    %c0_i32_0 = arith.constant 0 : i32
    %c0_i32_1 = arith.constant 0 : i32
    return %c0_i32, %c0_i32_0 : i32, i32
  }
  func.func @transform_4(%arg0: i32) -> (i32, i32) {
    %c0_i32 = arith.constant 0 : i32
    %c0_i32_0 = arith.constant 0 : i32
    %c0_i32_1 = arith.constant 0 : i32
    return %c0_i32, %c0_i32_0 : i32, i32
  }
  func.func @transform_5(%arg0: i32) -> (i32, i32) {
    %c0_i32 = arith.constant 0 : i32
    %c0_i32_0 = arith.constant 0 : i32
    %c0_i32_1 = arith.constant 0 : i32
    return %c0_i32, %c0_i32_0 : i32, i32
  }
  func.func @transform_6(%arg0: i32) -> (i32, i32) {
    %c0_i32 = arith.constant 0 : i32
    %c0_i32_0 = arith.constant 0 : i32
    %c0_i32_1 = arith.constant 0 : i32
    return %c0_i32, %c0_i32_0 : i32, i32
  }
  func.func @transform_7(%arg0: i32) -> (i32, i32) {
    %c0_i32 = arith.constant 0 : i32
    %c0_i32_0 = arith.constant 0 : i32
    %c0_i32_1 = arith.constant 0 : i32
    return %c0_i32, %c0_i32_0 : i32, i32
  }
  func.func @transform_8(%arg0: i32) -> (i32, i32) {
    %c0_i32 = arith.constant 0 : i32
    %c0_i32_0 = arith.constant 0 : i32
    %c0_i32_1 = arith.constant 0 : i32
    return %c0_i32, %c0_i32_0 : i32, i32
  }
  func.func @transform_9(%arg0: i32) -> (i32, i32) {
    %c0_i32 = arith.constant 0 : i32
    %c0_i32_0 = arith.constant 0 : i32
    return %arg0, %c0_i32 : i32, i32
  }
  func.func @transform_10(%arg0: i32) -> (i32, i32) {
    %c0_i32 = arith.constant 0 : i32
    %c0_i32_0 = arith.constant 0 : i32
    return %arg0, %c0_i32 : i32, i32
  }
}

</mosaic_0001>

<bundles_post_ra>
// kernel: tpu_custom_call.1
= control target key start
LH: loop header
LB: loop body
LE: loop exit
PB: predicated region body
PF: predicated region fallthrough
CT: control target
= control target key end

     0   :  { %16 = vsyncpa [#allocation3], 0  ;;  %s9538_s0 = inlined_call_operand.vmem [shape: f32[8,11], index: 0, kind: input, shape index: {}]   ;;  %s9539_s1 = inlined_call_operand.vmem [shape: f32[1,512], index: 1, kind: input, shape index: {}]   ;;  %s9540_s2 = inlined_call_operand.hbm [shape: bf16[128,512], index: 2, kind: input, shape index: {}]   ;;  %s9541_s3 = inlined_call_operand.vmem [shape: f32[1,512], index: 3, kind: input, shape index: {}]   ;;  %s9542_s4 = inlined_call_operand.hbm [shape: bf16[128,512], index: 4, kind: input, shape index: {}]   ;;  %s9543_s5 = inlined_call_operand.hbm [shape: bf16[128,512], index: 5, kind: input, shape index: {}]   ;;  %s9544_s6 = inlined_call_operand.vmem [shape: f32[1,512], index: 6, kind: input, shape index: {}]   ;;  %s9545_s7 = inlined_call_operand.vmem [shape: bf16[128,2], index: 7, kind: input, shape index: {}]   ;;  %s9546_s8 = inlined_call_operand.vmem [shape: f32[1,2], index: 8, kind: input, shape index: {}]   ;;  %s9547_s9 = inlined_call_operand.hbm [shape: f32[8,128], index: 9, kind: output, shape index: {0}]   ;;  %s9548_s10 = inlined_call_operand.hbm [shape: f32[8,128], index: 10, kind: output, shape index: {1}]  }
   0x1   :  { %17 = vsyncpa [#allocation6], 0 }
   0x2   :  { %18 = vsyncpa [#allocation4], 0 }
   0x3   :  { %19 = vsyncpa [#allocation10], 0  ;;  %s6504_s13 = smov [#allocation5]   ;;  %s6505_s15 = smov [#allocation2]  }
   0x4   :  { %s43_s14 = sshll.u32 %s6504_s13, 4  ;;  %s29_s16 = sshll.u32 %s6505_s15, 4  ;;  %s44_s14 = int_to_ptr.vmem [resolvable:$true] %s43_s14  ;;  %s6590_s16 = int_to_ptr.vmem [resolvable:$true] %s29_s16 }
   0x5   :  { %s6386_s19 = scalar_lea.hbm %s9542_s4, 4096 }
   0x6   :  { %p6387_p0 = scmp.ne.s32.totalorder %s9542_s4, %s6386_s19  ;;  %p6390_p1 = scmp.lt.u32.totalorder %s6386_s19, %s9542_s4 }
   0x8   :  { %p6392_p2 = pnand %p6390_p1, %p6387_p0 }
   0xa   :  { %6395 = shalt.err (!%p6392_p2)
}
   0xb   :  { %s6396_s24 = scalar_lea.vmem %s44_s14, 4096  ;;  %p6401_p4 = scmp.lt.s32.totalorder %s44_s14, %s44_s14 }
   0xc   :  { %p6397_p3 = scmp.ne.s32.totalorder %s44_s14, %s6396_s24  ;;  %p6402_p5 = scmp.lt.s32.totalorder %s6396_s24, %s6396_s24 }
   0xe   :  { %p6403_p6 = por %p6402_p5, %p6401_p4 }
  0x10   :  { %p6404_p7 = pnand %p6403_p6, %p6397_p3 }
  0x12   :  { %6407 = shalt.err (!%p6404_p7)
}
  0x13   :  { %s6506_s25 = smov 256   ;;  %s6507_s26 = smov 16  }
  0x14   :  { %49 = dma.hbm_to_vmem [thread:$0]  %s9542_s4, 4096, %s44_s14, [#allocation6], %s6506_s25, %s6506_s25, %s6507_s26  }
  0x15   :  { %s6408_s11 = scalar_lea.hbm %s9540_s2, 4096 }
  0x16   :  { %p6409_p8 = scmp.ne.s32.totalorder %s9540_s2, %s6408_s11  ;;  %p6412_p9 = scmp.lt.u32.totalorder %s6408_s11, %s9540_s2 }
  0x18   :  { %p6414_p10 = pnand %p6412_p9, %p6409_p8 }
  0x1a   :  { %6417 = shalt.err (!%p6414_p10)
}
  0x1b   :  { %s6418_s18 = scalar_lea.vmem %s6590_s16, 4096  ;;  %p6423_p12 = scmp.lt.s32.totalorder %s6590_s16, %s6590_s16 }
  0x1c   :  { %p6419_p11 = scmp.ne.s32.totalorder %s6590_s16, %s6418_s18  ;;  %p6424_p13 = scmp.lt.s32.totalorder %s6418_s18, %s6418_s18 }
  0x1e   :  { %p6425_p0 = por %p6424_p13, %p6423_p12 }
  0x20   :  { %p6426_p1 = pnand %p6425_p0, %p6419_p11 }
  0x22   :  { %6429 = shalt.err (!%p6426_p1)
}
  0x23   :  { %35 = dma.hbm_to_vmem [thread:$0]  %s9540_s2, 4096, %s6590_s16, [#allocation3], %s6506_s25, %s6506_s25, %s6507_s26  }
  0x24   :  { %s6508_s19 = smov [#allocation7]   ;;  %s6430_s23 = scalar_lea.hbm %s9543_s5, 4096 }
  0x25   :  { %s55_s20 = sshll.u32 %s6508_s19, 4  ;;  %p6431_p2 = scmp.ne.s32.totalorder %s9543_s5, %s6430_s23  ;;  %s56_s20 = int_to_ptr.vmem [resolvable:$true] %s55_s20 }
  0x26   :  { %p6434_p3 = scmp.lt.u32.totalorder %s6430_s23, %s9543_s5 }
  0x28   :  { %p6436_p4 = pnand %p6434_p3, %p6431_p2 }
  0x2a   :  { %6439 = shalt.err (!%p6436_p4)
}
  0x2b   :  { %s6440_s30 = scalar_lea.vmem %s56_s20, 4096  ;;  %p6445_p6 = scmp.lt.s32.totalorder %s56_s20, %s56_s20 }
  0x2c   :  { %p6441_p5 = scmp.ne.s32.totalorder %s56_s20, %s6440_s30  ;;  %p6446_p7 = scmp.lt.s32.totalorder %s6440_s30, %s6440_s30 }
  0x2e   :  { %p6447_p8 = por %p6446_p7, %p6445_p6 }
  0x30   :  { %p6448_p9 = pnand %p6447_p8, %p6441_p5 }
  0x32   :  { %6451 = shalt.err (!%p6448_p9)
}
  0x33   :  { %61 = dma.hbm_to_vmem [thread:$0]  %s9543_s5, 4096, %s56_s20, [#allocation6], %s6506_s25, %s6506_s25, %s6507_s26  }
  0x34   :  { %6496 = dma.done.wait [#allocation3], 4096  }
  0x35   :  { %6497 = vsyncadd [#allocation3], 4294963200 }
  0x36   :  { %6498 = dma.done.wait [#allocation6], 8192  }
  0x37   :  { %6499 = vsyncadd [#allocation6], 4294959104  ;;  %v9549_v0 = vmov 0   ;;  %v6645_v1 = vld [vmem:[#allocation2 + $0x4] ss:$16 sps:$4 sm:$0xff]   ;;  %vm6512_vm0 = vmmov 0  }
  0x38   :  { %419 = vmatprep.mubr.bf16.mxu0 %v9549_v0  ;;  %460 = vmatprep.mubr.bf16.mxu1 %v9549_v0  ;;  %v6647_v2 = vld [vmem:[#allocation2 + $0xc] ss:$16 sps:$4 sm:$0xff]   ;;  %v6650_v3 = vld [vmem:[#allocation2] ss:$16 sps:$4 sm:$0xff]   ;;  %v6652_v4 = vld [vmem:[#allocation2 + $0x8] ss:$16 sps:$4 sm:$0xff]  }
  0x39   :  { %5485 = vset.pattern.permute.xlu0 %v9549_v0  ;;  %387 = vmatprep.subr.bf16.mxu0 %v6645_v1  ;;  %v6655_v5 = vld [vmem:[#allocation2 + $0x24] ss:$16 sps:$4 sm:$0xff]   ;;  %v6659_v6 = vld [vmem:[#allocation2 + $0x2c] ss:$16 sps:$4 sm:$0xff]   ;;  %v6661_v7 = vld [vmem:[#allocation2 + $0x20] ss:$16 sps:$4 sm:$0xff]  }
  0x3a   :  { %428 = vmatprep.subr.bf16.mxu1 %v6647_v2  ;;  %388 = vmatpush1.bf16.msra.mxu0 %v6650_v3  ;;  %10077 = vst [vmem:[#allocation15_spill] sm:$0xff] %v6659_v6  ;;  %v6664_v8 = vld [vmem:[#allocation2 + $0x28] ss:$16 sps:$4 sm:$0xff]   ;;  %v6667_v9 = vld [vmem:[#allocation2 + $0x44] ss:$16 sps:$4 sm:$0xff]   ;;  %vm1161_vm1 = vcmask 7168  }
  0x3b   :  { %429 = vmatpush1.bf16.msra.mxu1 %v6652_v4  ;;  %389 = vmatprep.subr.bf16.mxu0 %v6655_v5  ;;  %10078 = vst [vmem:[#allocation16_spill] sm:$0xff] %v6664_v8  ;;  %v6669_v10 = vld [vmem:[#allocation2 + $0x4c] ss:$16 sps:$4 sm:$0xff]   ;;  %v6671_v11 = vld [vmem:[#allocation2 + $0x40] ss:$16 sps:$4 sm:$0xff]   ;;  %s6523_s26 = smov 1  }
  0x3c   :  { %430 = vmatprep.subr.bf16.mxu1 %v6659_v6  ;;  %10079 = vst [vmem:[#allocation17_spill] sm:$0xff] %v6669_v10  ;;  %v6673_v12 = vld [vmem:[#allocation2 + $0x48] ss:$16 sps:$4 sm:$0xff]   ;;  %v6677_v13 = vld [vmem:[#allocation2 + $0x64] ss:$16 sps:$4 sm:$0xff]   ;;  %vm1538_vm2 = vcmask 15368  }
  0x3d   :  { %10080 = vst [vmem:[#allocation18_spill] sm:$0xff] %v6673_v12  ;;  %v6681_v14 = vld [vmem:[#allocation2 + $0x6c] ss:$16 sps:$4 sm:$0xff]   ;;  %v6683_v15 = vld [vmem:[#allocation2 + $0x60] ss:$16 sps:$4 sm:$0xff]   ;;  %s6524_s21 = smov 2  }
  0x3e   :  { %390 = vmatpush1.bf16.msra.mxu0 %v6661_v7  ;;  %10081 = vst [vmem:[#allocation19_spill] sm:$0xff] %v6681_v14  ;;  %v6687_v16 = vld [vmem:[#allocation2 + $0x68] ss:$16 sps:$4 sm:$0xff]   ;;  %v6689_v17 = vld [vmem:[#allocation2 + $0x84] ss:$16 sps:$4 sm:$0xff]   ;;  %vm1911_vm3 = vcmask 23568  }
  0x3f   :  { %431 = vmatpush1.bf16.msra.mxu1 %v6664_v8  ;;  %391 = vmatprep.subr.bf16.mxu0 %v6667_v9  ;;  %10082 = vst [vmem:[#allocation20_spill] sm:$0xff] %v6687_v16  ;;  %v6693_v18 = vld [vmem:[#allocation2 + $0x8c] ss:$16 sps:$4 sm:$0xff]   ;;  %v6695_v19 = vld [vmem:[#allocation2 + $0x80] ss:$16 sps:$4 sm:$0xff]   ;;  %s6525_s30 = smov 3  }
  0x40   :  { %432 = vmatprep.subr.bf16.mxu1 %v6669_v10  ;;  %10083 = vst [vmem:[#allocation21_spill] sm:$0xff] %v6693_v18  ;;  %v6697_v20 = vld [vmem:[#allocation2 + $0x88] ss:$16 sps:$4 sm:$0xff]   ;;  %v6701_v21 = vld [vmem:[#allocation2 + $0xa4] ss:$16 sps:$4 sm:$0xff]   ;;  %vm2288_vm4 = vcmask 31768  }
  0x41   :  { %10084 = vst [vmem:[#allocation22_spill] sm:$0xff] %v6697_v20  ;;  %v6705_v22 = vld [vmem:[#allocation2 + $0xac] ss:$16 sps:$4 sm:$0xff]   ;;  %v6707_v23 = vld [vmem:[#allocation2 + $0xa0] ss:$16 sps:$4 sm:$0xff]   ;;  %s6526_s2 = smov 4  }
  0x42   :  { %392 = vmatpush1.bf16.msra.mxu0 %v6671_v11  ;;  %10085 = vst [vmem:[#allocation23_spill] sm:$0xff] %v6705_v22  ;;  %v6711_v24 = vld [vmem:[#allocation2 + $0xa8] ss:$16 sps:$4 sm:$0xff]   ;;  %v6713_v25 = vld [vmem:[#allocation2 + $0xc4] ss:$16 sps:$4 sm:$0xff]   ;;  %vm2665_vm5 = vcmask 39968  }
  0x43   :  { %433 = vmatpush1.bf16.msra.mxu1 %v6673_v12  ;;  %393 = vmatprep.subr.bf16.mxu0 %v6677_v13  ;;  %10086 = vst [vmem:[#allocation24_spill] sm:$0xff] %v6711_v24  ;;  %v6717_v26 = vld [vmem:[#allocation2 + $0xcc] ss:$16 sps:$4 sm:$0xff]   ;;  %v6722_v27 = vld [vmem:[%s9538_s0] sm:$0xff]  ;;  %v6729_v29 = vld [vmem:[#allocation2 + $0xc8] ss:$16 sps:$4 sm:$0xff]  }
  0x44   :  { %434 = vmatprep.subr.bf16.mxu1 %v6681_v14  ;;  %10087 = vst [vmem:[#allocation25_spill] sm:$0xff] %v6717_v26  ;;  %10088 = vst [vmem:[#allocation26_spill] sm:$0xff] %v6722_v27  ;;  %199 = vperm.xlu0 %5485, %v6722_v27   ;;  %v6725_v28 = vld [vmem:[#allocation2 + $0xc0] ss:$16 sps:$4 sm:$0xff]   ;;  %v6733_v30 = vld [vmem:[#allocation2 + $0xe4] ss:$16 sps:$4 sm:$0xff]  }
  0x45   :  { %10089 = vst [vmem:[#allocation27_spill] sm:$0xff] %v6729_v29  ;;  %v6735_v31 = vld [vmem:[#allocation2 + $0xec] ss:$16 sps:$4 sm:$0xff]   ;;  %v6737_v32 = vld [vmem:[#allocation2 + $0xe0] ss:$16 sps:$4 sm:$0xff]   ;;  %s6527_s17 = smov 5  }
  0x46   :  { %394 = vmatpush1.bf16.msra.mxu0 %v6683_v15  ;;  %10090 = vst [vmem:[#allocation28_spill] sm:$0xff] %v6735_v31  ;;  %v6741_v33 = vld [vmem:[#allocation2 + $0xe8] ss:$16 sps:$4 sm:$0xff]   ;;  %v6745_v34 = vld [vmem:[#allocation7 + $0x4] ss:$16 sps:$4 sm:$0xff]   ;;  %vm3042_vm6 = vcmask 48168  }
  0x47   :  { %435 = vmatpush1.bf16.msra.mxu1 %v6687_v16  ;;  %395 = vmatprep.subr.bf16.mxu0 %v6689_v17  ;;  %10091 = vst [vmem:[#allocation29_spill] sm:$0xff] %v6741_v33  ;;  %v6747_v35 = vld [vmem:[#allocation7 + $0xc] ss:$16 sps:$4 sm:$0xff]   ;;  %v6749_v36 = vld [vmem:[#allocation7] ss:$16 sps:$4 sm:$0xff]   ;;  %s6528_s22 = smov 6  }
  0x48   :  { %436 = vmatprep.subr.bf16.mxu1 %v6693_v18  ;;  %10092 = vst [vmem:[#allocation30_spill] sm:$0xff] %v6747_v35  ;;  %v6753_v37 = vld [vmem:[#allocation7 + $0x8] ss:$16 sps:$4 sm:$0xff]   ;;  %v6755_v38 = vld [vmem:[#allocation7 + $0x24] ss:$16 sps:$4 sm:$0xff]   ;;  %vm3419_vm7 = vcmask 56368  }
  0x49   :  { %10093 = vst [vmem:[#allocation31_spill] sm:$0xff] %v6753_v37  ;;  %v6757_v39 = vld [vmem:[#allocation7 + $0x2c] ss:$16 sps:$4 sm:$0xff]   ;;  %v6761_v40 = vld [vmem:[#allocation7 + $0x20] ss:$16 sps:$4 sm:$0xff]   ;;  %s6529_s23 = smov 7  }
  0x4a   :  { %396 = vmatpush1.bf16.msra.mxu0 %v6695_v19  ;;  %10094 = vst [vmem:[#allocation32_spill] sm:$0xff] %v6757_v39  ;;  %v6763_v41 = vld [vmem:[#allocation7 + $0x28] ss:$16 sps:$4 sm:$0xff]   ;;  %v6767_v42 = vld [vmem:[#allocation7 + $0x44] ss:$16 sps:$4 sm:$0xff]   ;;  %vm3796_vm8 = vcmask 64568  }
  0x4b   :  { %437 = vmatpush1.bf16.msra.mxu1 %v6697_v20  ;;  %397 = vmatprep.subr.bf16.mxu0 %v6701_v21  ;;  %10095 = vst [vmem:[#allocation33_spill] sm:$0xff] %v6763_v41  ;;  %v6769_v43 = vld [vmem:[#allocation7 + $0x4c] ss:$16 sps:$4 sm:$0xff]   ;;  %v6775_v44 = vld [vmem:[#allocation7 + $0x40] ss:$16 sps:$4 sm:$0xff]   ;;  %s6530_s11 = smov 8  }
  0x4c   :  { %438 = vmatprep.subr.bf16.mxu1 %v6705_v22  ;;  %10096 = vst [vmem:[#allocation34_spill] sm:$0xff] %v6769_v43  ;;  %v6777_v45 = vld [vmem:[#allocation7 + $0x48] ss:$16 sps:$4 sm:$0xff]   ;;  %v6781_v46 = vld [vmem:[#allocation7 + $0x64] ss:$16 sps:$4 sm:$0xff]   ;;  %vm4173_vm9 = vcmask 72768  }
  0x4d   :  { %10097 = vst [vmem:[#allocation35_spill] sm:$0xff] %v6777_v45  ;;  %v6783_v47 = vld [vmem:[#allocation7 + $0x6c] ss:$16 sps:$4 sm:$0xff]   ;;  %v6789_v48 = vld [vmem:[#allocation7 + $0x60] ss:$16 sps:$4 sm:$0xff]   ;;  %vm4550_vm10 = vcmask 80968  }
  0x4e   :  { %398 = vmatpush1.bf16.msra.mxu0 %v6707_v23  ;;  %10098 = vst [vmem:[#allocation36_spill] sm:$0xff] %v6783_v47  ;;  %v6791_v49 = vld [vmem:[#allocation7 + $0x68] ss:$16 sps:$4 sm:$0xff]   ;;  %v6799_v50 = vld [vmem:[#allocation7 + $0x84] ss:$16 sps:$4 sm:$0xff]   ;;  %s6533_s18 = smov [#allocation8]  }
  0x4f   :  { %439 = vmatpush1.bf16.msra.mxu1 %v6711_v24  ;;  %399 = vmatprep.subr.bf16.mxu0 %v6713_v25  ;;  %10099 = vst [vmem:[#allocation37_spill] sm:$0xff] %v6791_v49  ;;  %v6801_v51 = vld [vmem:[#allocation7 + $0x80] ss:$16 sps:$4 sm:$0xff]   ;;  %v6803_v52 = vld [vmem:[#allocation7 + $0x8c] ss:$16 sps:$4 sm:$0xff]   ;;  %s4940_s4 = sshll.u32 %s6533_s18, 4  ;;  %s4941_s4 = int_to_ptr.vmem [resolvable:$true] %s4940_s4 }
  0x50   :  { %440 = vmatprep.subr.bf16.mxu1 %v6717_v26  ;;  %10100 = vst [vmem:[#allocation38_spill] sm:$0xff] %v6803_v52  ;;  %v6806_v53 = vld [vmem:[#allocation7 + $0x88] ss:$16 sps:$4 sm:$0xff]   ;;  %v6811_v54 = vld [vmem:[#allocation7 + $0xa4] ss:$16 sps:$4 sm:$0xff]   ;;  %vm4927_vm11 = vcmask 89168   ;;  %p6457_p11 = scmp.lt.s32.totalorder %s4941_s4, %s4941_s4 }
  0x51   :  { %10101 = vst [vmem:[#allocation39_spill] sm:$0xff] %v6806_v53  ;;  %v6813_v55 = vld [vmem:[#allocation7 + $0xa0] ss:$16 sps:$4 sm:$0xff]   ;;  %v6815_v56 = vld [vmem:[#allocation7 + $0xac] ss:$16 sps:$4 sm:$0xff]   ;;  %s6452_s14 = scalar_lea.vmem %s4941_s4, 128 }
  0x52   :  { %400 = vmatpush1.bf16.msra.mxu0 %v6725_v28  ;;  %10102 = vst [vmem:[#allocation40_spill] sm:$0xff] %v6815_v56  ;;  %v6818_v57 = vld [vmem:[#allocation7 + $0xa8] ss:$16 sps:$4 sm:$0xff]   ;;  %v6823_v58 = vld [vmem:[#allocation7 + $0xc4] ss:$16 sps:$4 sm:$0xff]   ;;  %p6453_p10 = scmp.ne.s32.totalorder %s4941_s4, %s6452_s14  ;;  %p6458_p12 = scmp.lt.s32.totalorder %s6452_s14, %s6452_s14 }
  0x53   :  { %441 = vmatpush1.bf16.msra.mxu1 %v6729_v29  ;;  %401 = vmatprep.subr.bf16.mxu0 %v6733_v30  ;;  %10103 = vst [vmem:[#allocation41_spill] sm:$0xff] %v6818_v57  ;;  %v6825_v59 = vld [vmem:[#allocation7 + $0xc0] ss:$16 sps:$4 sm:$0xff]   ;;  %v6827_v60 = vld [vmem:[#allocation7 + $0xcc] ss:$16 sps:$4 sm:$0xff]  }
  0x54   :  { %442 = vmatprep.subr.bf16.mxu1 %v6735_v31  ;;  %10104 = vst [vmem:[#allocation42_spill] sm:$0xff] %v6827_v60  ;;  %v6830_v61 = vld [vmem:[#allocation7 + $0xc8] ss:$16 sps:$4 sm:$0xff]   ;;  %v6835_v62 = vld [vmem:[#allocation7 + $0xe4] ss:$16 sps:$4 sm:$0xff]   ;;  %p6459_p13 = por %p6458_p12, %p6457_p11 }
  0x55   :  { %10105 = vst [vmem:[#allocation43_spill] sm:$0xff] %v6830_v61  ;;  %v6837_v63 = vld [vmem:[#allocation7 + $0xe0] ss:$16 sps:$4 sm:$0xff]   ;;  %v6923_v29 = vld [vmem:[#allocation5 + $0xc4] ss:$16 sps:$4 sm:$0xff]  }
  0x56   :  { %402 = vmatpush1.bf16.msra.mxu0 %v6737_v32  ;;  %v6917_v31 = vld [vmem:[#allocation5 + $0xa0] ss:$16 sps:$4 sm:$0xff]   ;;  %10133 = vst [vmem:[#allocation70_spill] sm:$0xff] %v6923_v29  ;;  %v6927_v26 = vld [vmem:[#allocation5 + $0xc8] ss:$16 sps:$4 sm:$0xff]   ;;  %p6460_p0 = pnand %p6459_p13, %p6453_p10 }
  0x57   :  { %443 = vmatpush1.bf16.msra.mxu1 %v6741_v33  ;;  %683 = vmatprep.subr.bf16.mxu0 %v6745_v34  ;;  %v6911_v33 = vld [vmem:[#allocation5 + $0xa4] ss:$16 sps:$4 sm:$0xff]   ;;  %10131 = vst [vmem:[#allocation68_spill] sm:$0xff] %v6917_v31  ;;  %10134 = vst [vmem:[#allocation71_spill] sm:$0xff] %v6927_v26  ;;  %v6933_v24 = vld [vmem:[#allocation5 + $0xec] ss:$16 sps:$4 sm:$0xff]  }
  0x58   :  { %724 = vmatprep.subr.bf16.mxu1 %v6747_v35  ;;  %v6906_v35 = vld [vmem:[#allocation5 + $0x80] ss:$16 sps:$4 sm:$0xff]   ;;  %10129 = vst [vmem:[#allocation66_spill] sm:$0xff] %v6911_v33  ;;  %10136 = vst [vmem:[#allocation73_spill] sm:$0xff] %v6933_v24 }
  0x59   :  { %420 = vmatmul.mubr.bf16.vlgmr.msra.gmra.mrb[0].mxu0 %v9549_v0  ;;  %10127 = vst [vmem:[#allocation64_spill] sm:$0xff] %v6906_v35 }
  0x5a   :  { %461 = vmatmul.mubr.bf16.vlgmr.msra.gmra.mrb[0].mxu1 %v9549_v0  ;;  %684 = vmatpush1.bf16.msra.mxu0 %v6749_v36 }
  0x5b   :  { %725 = vmatpush1.bf16.msra.mxu1 %v6753_v37  ;;  %685 = vmatprep.subr.bf16.mxu0 %v6755_v38  ;;  %v6903_v37 = vld [vmem:[#allocation5 + $0x88] ss:$16 sps:$4 sm:$0xff]  }
  0x5c   :  { %726 = vmatprep.subr.bf16.mxu1 %v6757_v39  ;;  %715 = vmatprep.mubr.bf16.mxu0 %v9549_v0  ;;  %v6894_v39 = vld [vmem:[#allocation5 + $0x60] ss:$16 sps:$4 sm:$0xff]   ;;  %10126 = vst [vmem:[#allocation63_spill] sm:$0xff] %v6903_v37 }
  0x5d   :  { %756 = vmatprep.mubr.bf16.mxu1 %v9549_v0  ;;  %v6839_v0 = vld [vmem:[#allocation7 + $0xec] ss:$16 sps:$4 sm:$0xff]   ;;  %10123 = vst [vmem:[#allocation60_spill] sm:$0xff] %v6894_v39 }
  0x5e   :  { %686 = vmatpush1.bf16.msra.mxu0 %v6761_v40  ;;  %10106 = vst [vmem:[#allocation44_spill] sm:$0xff] %v6839_v0 }
  0x5f   :  { %727 = vmatpush1.bf16.msra.mxu1 %v6763_v41  ;;  %687 = vmatprep.subr.bf16.mxu0 %v6767_v42  ;;  %v6891_v41 = vld [vmem:[#allocation5 + $0x68] ss:$16 sps:$4 sm:$0xff]  }
  0x60   :  { %728 = vmatprep.subr.bf16.mxu1 %v6769_v43  ;;  %v6882_v43 = vld [vmem:[#allocation5 + $0x40] ss:$16 sps:$4 sm:$0xff]   ;;  %10122 = vst [vmem:[#allocation59_spill] sm:$0xff] %v6891_v41 }
  0x61   :  { %10119 = vst [vmem:[#allocation56_spill] sm:$0xff] %v6882_v43 }
  0x62   :  { %688 = vmatpush1.bf16.msra.mxu0 %v6775_v44 }
  0x63   :  { %729 = vmatpush1.bf16.msra.mxu1 %v6777_v45  ;;  %689 = vmatprep.subr.bf16.mxu0 %v6781_v46  ;;  %v6879_v45 = vld [vmem:[#allocation5 + $0x48] ss:$16 sps:$4 sm:$0xff]  }
  0x64   :  { %730 = vmatprep.subr.bf16.mxu1 %v6783_v47  ;;  %v6877_v47 = vld [vmem:[#allocation5 + $0x44] ss:$16 sps:$4 sm:$0xff]   ;;  %10118 = vst [vmem:[#allocation55_spill] sm:$0xff] %v6879_v45 }
  0x65   :  { %10117 = vst [vmem:[#allocation54_spill] sm:$0xff] %v6877_v47 }
  0x66   :  { %690 = vmatpush1.bf16.msra.mxu0 %v6789_v48 }
  0x67   :  { %731 = vmatpush1.bf16.msra.mxu1 %v6791_v49  ;;  %691 = vmatprep.subr.bf16.mxu0 %v6799_v50  ;;  %v6866_v49 = vld [vmem:[#allocation5 + $0x28] ss:$16 sps:$4 sm:$0xff]  }
  0x68   :  { %732 = vmatprep.subr.bf16.mxu1 %v6803_v52  ;;  %v6856_v52 = vld [vmem:[#allocation5] ss:$16 sps:$4 sm:$0xff]   ;;  %10114 = vst [vmem:[#allocation51_spill] sm:$0xff] %v6866_v49 }
  0x69   :  { %10111 = vst [vmem:[#allocation48_spill] sm:$0xff] %v6856_v52 }
  0x6a   :  { %692 = vmatpush1.bf16.msra.mxu0 %v6801_v51 }
  0x6b   :  { %733 = vmatpush1.bf16.msra.mxu1 %v6806_v53  ;;  %693 = vmatprep.subr.bf16.mxu0 %v6811_v54  ;;  %v6852_v53 = vld [vmem:[#allocation5 + $0x8] ss:$16 sps:$4 sm:$0xff]  }
  0x6c   :  { %734 = vmatprep.subr.bf16.mxu1 %v6815_v56  ;;  %v6847_v56 = vld [vmem:[#allocation5 + $0xc] ss:$16 sps:$4 sm:$0xff]   ;;  %10110 = vst [vmem:[#allocation47_spill] sm:$0xff] %v6852_v53 }
  0x6d   :  { %10108 = vst [vmem:[#allocation46_spill] sm:$0xff] %v6847_v56 }
  0x6e   :  { %694 = vmatpush1.bf16.msra.mxu0 %v6813_v55 }
  0x6f   :  { %735 = vmatpush1.bf16.msra.mxu1 %v6818_v57  ;;  %695 = vmatprep.subr.bf16.mxu0 %v6823_v58  ;;  %v6842_v57 = vld [vmem:[#allocation7 + $0xe8] ss:$16 sps:$4 sm:$0xff]  }
  0x70   :  { %736 = vmatprep.subr.bf16.mxu1 %v6827_v60  ;;  %10107 = vst [vmem:[#allocation45_spill] sm:$0xff] %v6842_v57  ;;  %v10109_v60 = vmov 0  }
  0x72   :  { %696 = vmatpush1.bf16.msra.mxu0 %v6825_v59 }
  0x73   :  { %737 = vmatpush1.bf16.msra.mxu1 %v6830_v61  ;;  %697 = vmatprep.subr.bf16.mxu0 %v6835_v62  ;;  %v6850_v61 = vld [vmem:[#allocation5 + $0x4] ss:$16 sps:$4 sm:$0xff]  }
  0x74   :  { %738 = vmatprep.subr.bf16.mxu1 %v6839_v0  ;;  %v6864_v0 = vld [vmem:[#allocation5 + $0x24] ss:$16 sps:$4 sm:$0xff]  }
  0x75   :  { %10113 = vst [vmem:[#allocation50_spill] sm:$0xff] %v6864_v0 }
  0x76   :  { %698 = vmatpush1.bf16.msra.mxu0 %v6837_v63 }
  0x77   :  { %739 = vmatpush1.bf16.msra.mxu1 %v6842_v57  ;;  %925 = vmatprep.subr.bf16.mxu0 %v6850_v61  ;;  %v6861_v57 = vld [vmem:[#allocation5 + $0x2c] ss:$16 sps:$4 sm:$0xff]  }
  0x78   :  { %966 = vmatprep.subr.bf16.mxu1 %v6847_v56  ;;  %10112 = vst [vmem:[#allocation49_spill] sm:$0xff] %v6861_v57  ;;  %v6870_v56 = vld [vmem:[#allocation5 + $0x20] ss:$16 sps:$4 sm:$0xff]  }
  0x79   :  { %716 = vmatmul.mubr.bf16.vlgmr.msra.gmra.mrb[4].mxu0 %v10109_v60  ;;  %10115 = vst [vmem:[#allocation52_spill] sm:$0xff] %v6870_v56 }
  0x7a   :  { %757 = vmatmul.mubr.bf16.vlgmr.msra.gmra.mrb[4].mxu1 %v10109_v60  ;;  %926 = vmatpush1.bf16.msra.mxu0 %v6856_v52 }
  0x7b   :  { %967 = vmatpush1.bf16.msra.mxu1 %v6852_v53  ;;  %957 = vmatprep.mubr.bf16.mxu0 %v10109_v60  ;;  %v6875_v53 = vld [vmem:[#allocation5 + $0x4c] ss:$16 sps:$4 sm:$0xff]  }
  0x7c   :  { %998 = vmatprep.mubr.bf16.mxu1 %v10109_v60  ;;  %968 = vmatprep.subr.bf16.mxu1 %v6861_v57  ;;  %10116 = vst [vmem:[#allocation53_spill] sm:$0xff] %v6875_v53  ;;  %v6887_v57 = vld [vmem:[#allocation5 + $0x6c] ss:$16 sps:$4 sm:$0xff]  }
  0x7d   :  { %927 = vmatprep.subr.bf16.mxu0 %v6864_v0  ;;  %10120 = vst [vmem:[#allocation57_spill] sm:$0xff] %v6887_v57 }
  0x7e   :  { %928 = vmatpush1.bf16.msra.mxu0 %v6870_v56 }
  0x7f   :  { %969 = vmatpush1.bf16.msra.mxu1 %v6866_v49  ;;  %929 = vmatprep.subr.bf16.mxu0 %v6877_v47  ;;  %v6889_v49 = vld [vmem:[#allocation5 + $0x64] ss:$16 sps:$4 sm:$0xff]  }
  0x80   :  { %970 = vmatprep.subr.bf16.mxu1 %v6875_v53  ;;  %10121 = vst [vmem:[#allocation58_spill] sm:$0xff] %v6889_v49  ;;  %v6899_v53 = vld [vmem:[#allocation5 + $0x8c] ss:$16 sps:$4 sm:$0xff]  }
  0x81   :  { %10124 = vst [vmem:[#allocation61_spill] sm:$0xff] %v6899_v53 }
  0x82   :  { %930 = vmatpush1.bf16.msra.mxu0 %v6882_v43 }
  0x83   :  { %971 = vmatpush1.bf16.msra.mxu1 %v6879_v45  ;;  %931 = vmatprep.subr.bf16.mxu0 %v6889_v49  ;;  %v6901_v45 = vld [vmem:[#allocation5 + $0x84] ss:$16 sps:$4 sm:$0xff]  }
  0x84   :  { %972 = vmatprep.subr.bf16.mxu1 %v6887_v57  ;;  %10125 = vst [vmem:[#allocation62_spill] sm:$0xff] %v6901_v45  ;;  %v6909_v57 = vld [vmem:[#allocation5 + $0xac] ss:$16 sps:$4 sm:$0xff]  }
  0x85   :  { %10128 = vst [vmem:[#allocation65_spill] sm:$0xff] %v6909_v57 }
  0x86   :  { %932 = vmatpush1.bf16.msra.mxu0 %v6894_v39 }
  0x87   :  { %973 = vmatpush1.bf16.msra.mxu1 %v6891_v41  ;;  %933 = vmatprep.subr.bf16.mxu0 %v6901_v45  ;;  %v6915_v41 = vld [vmem:[#allocation5 + $0xa8] ss:$16 sps:$4 sm:$0xff]  }
  0x88   :  { %974 = vmatprep.subr.bf16.mxu1 %v6899_v53  ;;  %10130 = vst [vmem:[#allocation67_spill] sm:$0xff] %v6915_v41  ;;  %v6921_v53 = vld [vmem:[#allocation5 + $0xcc] ss:$16 sps:$4 sm:$0xff]  }
  0x89   :  { %10132 = vst [vmem:[#allocation69_spill] sm:$0xff] %v6921_v53 }
  0x8a   :  { %934 = vmatpush1.bf16.msra.mxu0 %v6906_v35 }
  0x8b   :  { %975 = vmatpush1.bf16.msra.mxu1 %v6903_v37  ;;  %935 = vmatprep.subr.bf16.mxu0 %v6911_v33  ;;  %v6929_v37 = vld [vmem:[#allocation5 + $0xc0] ss:$16 sps:$4 sm:$0xff]   ;;  %v6939_v33 = vld [vmem:[#allocation5 + $0xe8] ss:$16 sps:$4 sm:$0xff]  }
  0x8c   :  { %976 = vmatprep.subr.bf16.mxu1 %v6909_v57  ;;  %10135 = vst [vmem:[#allocation72_spill] sm:$0xff] %v6929_v37  ;;  %v6935_v57 = vld [vmem:[#allocation5 + $0xe4] ss:$16 sps:$4 sm:$0xff]   ;;  %10138 = vst [vmem:[#allocation75_spill] sm:$0xff] %v6939_v33 }
  0x8d   :  { %10137 = vst [vmem:[#allocation74_spill] sm:$0xff] %v6935_v57 }
  0x8e   :  { %936 = vmatpush1.bf16.msra.mxu0 %v6917_v31 }
  0x8f   :  { %977 = vmatpush1.bf16.msra.mxu1 %v6915_v41  ;;  %937 = vmatprep.subr.bf16.mxu0 %v6923_v29  ;;  %v6941_v41 = vld [vmem:[#allocation5 + $0xe0] ss:$16 sps:$4 sm:$0xff]  }
  0x90   :  { %978 = vmatprep.subr.bf16.mxu1 %v6921_v53  ;;  %10139 = vst [vmem:[#allocation76_spill] sm:$0xff] %v6941_v41  ;;  %v6510_v53 = vmov 1  }
  0x91   :  { %5486 = vset.pattern.permute.xlu0 %v6510_v53 }
  0x92   :  { %938 = vmatpush1.bf16.msra.mxu0 %v6929_v37  ;;  %1169 = vperm.xlu0 %5486, %v6722_v27  }
  0x93   :  { %979 = vmatpush1.bf16.msra.mxu1 %v6927_v26  ;;  %939 = vmatprep.subr.bf16.mxu0 %v6935_v57  ;;  %v203_v26 = vlaneseq }
  0x94   :  { %980 = vmatprep.subr.bf16.mxu1 %v6933_v24  ;;  %v78_v24 = vld [vmem:[%s9539_s1] sm:$0xf] }
  0x95   :  { %v204_v37 = vshrl.u32 %v203_v26, 7  ;;  %v111_v26 = vld [vmem:[%s9541_s3] sm:$0xf] }
  0x96   :  { %940 = vmatpush1.bf16.msra.mxu0 %v6941_v41 }
  0x97   :  { %981 = vmatpush1.bf16.msra.mxu1 %v6939_v33  ;;  %v6949_v29 = vsub.s32 0, %v204_v37  ;;  %v6954_v31 = vsub.s32 1, %v204_v37  ;;  %v6962_v53 = vsub.s32 3, %v204_v37  ;;  %v6975_v20 = vsub.s32 2, %v204_v37 }
  0x98   :  { %1176 = vmatprep.subr.bf16.mxu1 %v6645_v1 }
  0x99   :  { %v6957_v33 = vrot.slane %v78_v24, %v6949_v29  ;;  %v6960_v1 = vrot.slane %v78_v24, %v6954_v31  ;;  %v6970_v35 = vrot.slane %v78_v24, %v6962_v53  ;;  %v6973_v22 = vrot.slane %v111_v26, %v6949_v29 }
  0x9a   :  { %v6978_v18 = vrot.slane %v111_v26, %v6954_v31  ;;  %v6983_v56 = vrot.slane %v78_v24, %v6975_v20  ;;  %v6992_v24 = vrot.slane %v111_v26, %v6975_v20 }
  0x9b   :  { %10140 = vst [vmem:[#allocation77_spill] sm:$0xff] %v6957_v33  ;;  %10141 = vst [vmem:[#allocation78_spill] sm:$0xff] %v6960_v1 }
  0x9c   :  { %10142 = vst [vmem:[#allocation79_spill] sm:$0xff] %v6983_v56 }
  0xc3   :  { %v200_v41 = vpop.permute.xlu0 %199 }
  0xc4   :  { %v223_v27 = vmul.f32 %v6957_v33, %v200_v41  ;;  %v224_v57 = vmul.f32 %v6960_v1, %v200_v41  ;;  %v226_v33 = vmul.f32 %v6970_v35, %v200_v41 }
 0x12c   :  { %v421_v45 = vpop.f32.mrb[0].mxu0 }
 0x12d   :  { %v462_v39 = vpop.f32.mrb[0].mxu1  ;;  %v469_v16 = vadd.f32 %v421_v45, %v223_v27  ;;  %v423_v49 = vpop.f32.mrb[1].mxu0  ;;  %v6987_v27 = vrot.slane %v111_v26, %v6962_v53  ;;  %v225_v45 = vmul.f32 %v6983_v56, %v200_v41 }
 0x12e   :  { %v464_v43 = vpop.f32.mrb[1].mxu1  ;;  %v470_v14 = vadd.f32 %v423_v49, %v224_v57  ;;  %v425_v1 = vpop.f32.mrb[2].mxu0 }
 0x12f   :  { %v466_v12 = vpop.f32.mrb[2].mxu1  ;;  %v494_v47 = vadd.f32 %v6973_v22, %v469_v16  ;;  %v426_v37 = vpop.f32.mrb[3].mxu0  ;;  %v472_v6 = vadd.f32 %v464_v43, %v226_v33  ;;  %v471_v16 = vadd.f32 %v462_v39, %v225_v45 }
 0x130   :  { %v467_v10 = vpop.f32.mrb[3].mxu1  ;;  %v495_v8 = vadd.f32 %v6978_v18, %v470_v14 }
 0x131   :  { %v4996_v0 = vmul.f32 -1.442695, %v494_v47  ;;  %v497_v12 = vadd.f32 %v6987_v27, %v472_v6  ;;  %v496_v10 = vadd.f32 %v6992_v24, %v471_v16 }
 0x132   :  { %v4997_v52 = vmul.f32 -1.442695, %v495_v8 }
 0x133   :  { %5649 = vpow2.f32 %v4996_v0  ;;  %v4998_v49 = vmul.f32 -1.442695, %v497_v12 }
 0x134   :  { %5651 = vpow2.f32 %v4997_v52 }
 0x135   :  { %5653 = vpow2.f32 %v4998_v49 }
 0x136   :  { %5655 = vtanh.f32 %v496_v10 }
 0x13d   :  { %v5650_v14 = vpop.eup %5649 }
 0x13e   :  { %v5652_v47 = vpop.eup %5651  ;;  %v501_v8 = vadd.f32 1.0, %v5650_v14 }
 0x13f   :  { %v507_v33 = vadd.f32 1.0, %v5652_v47  ;;  %v5654_v0 = vpop.eup %5653 }
 0x140   :  { %5657 = vrcp.f32 %v501_v8  ;;  %v5656_v41 = vpop.eup %5655  ;;  %v514_v39 = vadd.f32 1.0, %v5654_v0 }
 0x141   :  { %5659 = vrcp.f32 %v507_v33 }
 0x142   :  { %5661 = vrcp.f32 %v514_v39 }
 0x14a   :  { %v5658_v43 = vpop.eup %5657 }
 0x14b   :  { %v5660_v52 = vpop.eup %5659  ;;  %v518_v6 = vmul.f32 %v5658_v43, %v5656_v41 }
 0x14c   :  { %v517_v57 = vmul.f32 0.0, %v5660_v52  ;;  %v5662_v26 = vpop.eup %5661 }
 0x14e   :  { %v6995_v1 = vadd.f32 %v518_v6, %v517_v57 }
 0x150   :  { %5663 = vtanh.f32 %v6995_v1 }
 0x15a   :  { %v5664_v37 = vpop.eup %5663 }
 0x15b   :  { %v521_v45 = vmul.f32 %v5664_v37, %v5662_v26 }
 0x15d   :  { %v6998_v12 = vpack.c.bf16 %v521_v45, %v521_v45 }
 0x15f   :  { %958 = vmatmul.mubr.bf16.vlgmr.msra.gmra.mrb[8].mxu0 %v6998_v12  ;;  %999 = vmatmul.mubr.bf16.vlgmr.msra.gmra.mrb[8].mxu1 %v6998_v12 }
 0x160   :  { %1177 = vmatpush1.bf16.msra.mxu1 %v6650_v3  ;;  %1208 = vmatprep.mubr.bf16.mxu1 %v10109_v60  ;;  %v717_v3 = vpop.f32.mrb[4].mxu0 }
 0x161   :  { %1178 = vmatprep.subr.bf16.mxu1 %v6655_v5  ;;  %v719_v5 = vpop.f32.mrb[5].mxu0 }
 0x164   :  { %1179 = vmatpush1.bf16.msra.mxu1 %v6661_v7  ;;  %v758_v7 = vpop.f32.mrb[4].mxu1 }
 0x165   :  { %1180 = vmatprep.subr.bf16.mxu1 %v6667_v9  ;;  %v721_v9 = vpop.f32.mrb[6].mxu0 }
 0x168   :  { %1181 = vmatpush1.bf16.msra.mxu1 %v6671_v11  ;;  %v760_v11 = vpop.f32.mrb[5].mxu1 }
 0x169   :  { %1182 = vmatprep.subr.bf16.mxu1 %v6677_v13  ;;  %v722_v13 = vpop.f32.mrb[7].mxu0 }
 0x16c   :  { %1183 = vmatpush1.bf16.msra.mxu1 %v6683_v15  ;;  %v762_v15 = vpop.f32.mrb[6].mxu1 }
 0x16d   :  { %1184 = vmatprep.subr.bf16.mxu1 %v6689_v17  ;;  %v763_v17 = vpop.f32.mrb[7].mxu1 }
 0x170   :  { %1185 = vmatpush1.bf16.msra.mxu1 %v6695_v19  ;;  %v7040_v19 = vld [vmem:[%s9545_s7] sm:$0xff]  }
 0x171   :  { %1186 = vmatprep.subr.bf16.mxu1 %v6701_v21  ;;  %v9618_v21 = vmov 0.0  }
 0x172   :  { %5234 = vmatprep.subr.bf16.mxu0 %v9618_v21  ;;  %195 = vst [vmem:[#allocation8] sm:$0xff] %v9618_v21  ;;  %196 = vst [vmem:[#allocation9] sm:$0xff] %v9618_v21  ;;  %5250 = vmatprep.mubr.msk.bf16.mxu0 %vm6512_vm0, %v9618_v21 }
 0x173   :  { %5235 = vmatpush3.bf16.msra.mxu0 %v7040_v19 }
 0x174   :  { %1187 = vmatpush1.bf16.msra.mxu1 %v6707_v23  ;;  %5236 = vmatprep.subr.bf16.mxu0 %v9618_v21  ;;  %v7050_v23 = vld [vmem:[%s9545_s7 + $0x8] sm:$0xff]  }
 0x175   :  { %1188 = vmatprep.subr.bf16.mxu1 %v6713_v25  ;;  %v7057_v25 = vld [vmem:[%s9545_s7 + $0x10] sm:$0xff]  }
 0x177   :  { %5237 = vmatpush3.bf16.msra.mxu0 %v7050_v23 }
 0x178   :  { %1189 = vmatpush1.bf16.msra.mxu1 %v6725_v28  ;;  %5238 = vmatprep.subr.bf16.mxu0 %v9618_v21  ;;  %v7064_v28 = vld [vmem:[%s9545_s7 + $0x18] sm:$0xff]  }
 0x179   :  { %1190 = vmatprep.subr.bf16.mxu1 %v6733_v30  ;;  %v7071_v30 = vld [vmem:[%s9545_s7 + $0x20] sm:$0xff]  }
 0x17b   :  { %5239 = vmatpush3.bf16.msra.mxu0 %v7057_v25 }
 0x17c   :  { %1191 = vmatpush1.bf16.msra.mxu1 %v6737_v32  ;;  %5240 = vmatprep.subr.bf16.mxu0 %v9618_v21  ;;  %v7078_v32 = vld [vmem:[%s9545_s7 + $0x28] sm:$0xff]  }
 0x17d   :  { %1291 = vmatprep.subr.bf16.mxu1 %v6745_v34  ;;  %v7085_v34 = vld [vmem:[%s9545_s7 + $0x30] sm:$0xff]  }
 0x17f   :  { %1209 = vmatmul.mubr.bf16.vlgmr.msra.gmra.mrb[12].mxu1 %v6998_v12  ;;  %5241 = vmatpush3.bf16.msra.mxu0 %v7064_v28 }
 0x180   :  { %1292 = vmatpush1.bf16.msra.mxu1 %v6749_v36  ;;  %1323 = vmatprep.mubr.bf16.mxu1 %v10109_v60  ;;  %v7092_v36 = vld [vmem:[%s9545_s7 + $0x38] sm:$0xff]  }
 0x181   :  { %1293 = vmatprep.subr.bf16.mxu1 %v6755_v38  ;;  %5242 = vmatprep.subr.bf16.mxu0 %v9618_v21  ;;  %v176_v38 = vld [vmem:[%s9544_s6] sm:$0xf] }
 0x182   :  { %v7110_v6 = vrot.slane %v176_v38, %v6962_v53  ;;  %v7114_v39 = vrot.slane %v176_v38, %v6975_v20 }
 0x183   :  { %5243 = vmatpush3.bf16.msra.mxu0 %v7071_v30 }
 0x184   :  { %1294 = vmatpush1.bf16.msra.mxu1 %v6761_v40  ;;  %5244 = vmatprep.subr.bf16.mxu0 %v9618_v21  ;;  %v7102_v40 = vrot.slane %v176_v38, %v6949_v29 }
 0x185   :  { %1295 = vmatprep.subr.bf16.mxu1 %v6767_v42 }
 0x187   :  { %5245 = vmatpush3.bf16.msra.mxu0 %v7078_v32 }
 0x188   :  { %1296 = vmatpush1.bf16.msra.mxu1 %v6775_v44  ;;  %5246 = vmatprep.subr.bf16.mxu0 %v9618_v21 }
 0x189   :  { %1297 = vmatprep.subr.bf16.mxu1 %v6781_v46  ;;  %v7105_v46 = vrot.slane %v176_v38, %v6954_v31 }
 0x18b   :  { %5247 = vmatpush3.bf16.msra.mxu0 %v7085_v34 }
 0x18c   :  { %1298 = vmatpush1.bf16.msra.mxu1 %v6789_v48  ;;  %5248 = vmatprep.subr.bf16.mxu0 %v9618_v21 }
 0x18d   :  { %1299 = vmatprep.subr.bf16.mxu1 %v6799_v50 }
 0x18f   :  { %5249 = vmatpush3.bf16.msra.mxu0 %v7092_v36 }
 0x190   :  { %1300 = vmatpush1.bf16.msra.mxu1 %v6801_v51  ;;  %1217 = vmatprep.subr.bf16.mxu0 %v6647_v2 }
 0x191   :  { %1301 = vmatprep.subr.bf16.mxu1 %v6811_v54 }
 0x194   :  { %1302 = vmatpush1.bf16.msra.mxu1 %v6813_v55 }
 0x195   :  { %1303 = vmatprep.subr.bf16.mxu1 %v6823_v58 }
 0x198   :  { %1304 = vmatpush1.bf16.msra.mxu1 %v6825_v59 }
 0x199   :  { %1305 = vmatprep.subr.bf16.mxu1 %v6835_v62 }
 0x19c   :  { %1306 = vmatpush1.bf16.msra.mxu1 %v6837_v63 }
 0x19d   :  { %1373 = vmatprep.subr.bf16.mxu1 %v6850_v61 }
 0x232   :  { %v959_v42 = vpop.f32.mrb[8].mxu0  ;;  %v1000_v44 = vpop.f32.mrb[8].mxu1 }
 0x233   :  { %v960_v48 = vadd.f32 %v959_v42, %v717_v3  ;;  %v1001_v16 = vadd.f32 %v1000_v44, %v758_v7  ;;  %v961_v49 = vpop.f32.mrb[9].mxu0  ;;  %v1002_v2 = vpop.f32.mrb[9].mxu1 }
 0x234   :  { %v962_v10 = vadd.f32 %v961_v49, %v719_v5  ;;  %v1003_v14 = vadd.f32 %v1002_v2, %v760_v11  ;;  %v963_v47 = vpop.f32.mrb[10].mxu0  ;;  %v1004_v8 = vpop.f32.mrb[10].mxu1 }
 0x235   :  { %v1028_v33 = vadd.f32 %v7102_v40, %v960_v48  ;;  %v964_v0 = vpop.f32.mrb[11].mxu0  ;;  %v1005_v41 = vpop.f32.mrb[11].mxu1  ;;  %v1030_v26 = vadd.f32 %v7114_v39, %v1001_v16  ;;  %v10144_v47 = vld [vmem:[#allocation48_spill] sm:$0xff]  ;;  %v10145_v8 = vld [vmem:[#allocation50_spill] sm:$0xff] }
 0x236   :  { %v1029_v29 = vadd.f32 %v7105_v46, %v962_v10  ;;  %v1031_v31 = vadd.f32 %v7110_v6, %v1003_v14  ;;  %v10143_v14 = vld [vmem:[#allocation15_spill] sm:$0xff]  ;;  %v10147_v0 = vld [vmem:[#allocation17_spill] sm:$0xff]  ;;  %v10148_v41 = vld [vmem:[#allocation52_spill] sm:$0xff] }
 0x237   :  { %v5063_v43 = vmul.f32 -1.442695, %v1028_v33  ;;  %v10146_v33 = vld [vmem:[#allocation16_spill] sm:$0xff] }
 0x238   :  { %v5064_v52 = vmul.f32 -1.442695, %v1029_v29  ;;  %v5065_v57 = vmul.f32 -1.442695, %v1031_v31  ;;  %v10149_v29 = vld [vmem:[#allocation54_spill] sm:$0xff] }
 0x239   :  { %5665 = vpow2.f32 %v5063_v43  ;;  %v10150_v43 = vld [vmem:[#allocation18_spill] sm:$0xff] }
 0x23a   :  { %5667 = vpow2.f32 %v5064_v52  ;;  %v10152_v52 = vld [vmem:[#allocation56_spill] sm:$0xff]  ;;  %v10153_v31 = vld [vmem:[#allocation58_spill] sm:$0xff] }
 0x23b   :  { %5669 = vpow2.f32 %v5065_v57  ;;  %v10154_v57 = vld [vmem:[#allocation20_spill] sm:$0xff] }
 0x23c   :  { %5671 = vtanh.f32 %v1030_v26  ;;  %v10155_v26 = vld [vmem:[#allocation21_spill] sm:$0xff] }
 0x243   :  { %v5666_v37 = vpop.eup %5665 }
 0x244   :  { %v5668_v45 = vpop.eup %5667  ;;  %v1035_v3 = vadd.f32 1.0, %v5666_v37  ;;  %v10156_v37 = vld [vmem:[#allocation60_spill] sm:$0xff] }
 0x245   :  { %v1041_v5 = vadd.f32 1.0, %v5668_v45  ;;  %v5670_v53 = vpop.eup %5669  ;;  %v10157_v45 = vld [vmem:[#allocation62_spill] sm:$0xff] }
 0x246   :  { %5673 = vrcp.f32 %v1035_v3  ;;  %v5672_v7 = vpop.eup %5671  ;;  %v1048_v15 = vadd.f32 1.0, %v5670_v53  ;;  %v10158_v3 = vld [vmem:[#allocation22_spill] sm:$0xff]  ;;  %v10160_v53 = vld [vmem:[#allocation64_spill] sm:$0xff] }
 0x247   :  { %5675 = vrcp.f32 %v1041_v5  ;;  %v10159_v5 = vld [vmem:[#allocation23_spill] sm:$0xff] }
 0x248   :  { %5677 = vrcp.f32 %v1048_v15  ;;  %v10165_v15 = vld [vmem:[#allocation70_spill] sm:$0xff] }
 0x250   :  { %v5674_v9 = vpop.eup %5673 }
 0x251   :  { %v5676_v11 = vpop.eup %5675  ;;  %v1052_v13 = vmul.f32 %v5674_v9, %v5672_v7  ;;  %v10161_v7 = vld [vmem:[#allocation66_spill] sm:$0xff]  ;;  %v10162_v9 = vld [vmem:[#allocation24_spill] sm:$0xff] }
 0x252   :  { %v1051_v17 = vmul.f32 0.0, %v5676_v11  ;;  %v7117_v20 = vpop.f32.mrb[12].mxu1  ;;  %v5678_v16 = vpop.eup %5677  ;;  %v10163_v11 = vld [vmem:[#allocation25_spill] sm:$0xff] }
 0x253   :  { %v7119_v38 = vpop.f32.mrb[13].mxu1 }
 0x254   :  { %v7121_v42 = vadd.f32 %v1052_v13, %v1051_v17  ;;  %v1214_v44 = vpop.f32.mrb[14].mxu1  ;;  %v10164_v13 = vld [vmem:[#allocation68_spill] sm:$0xff]  ;;  %v10166_v17 = vld [vmem:[#allocation27_spill] sm:$0xff] }
 0x255   :  { %v1215_v48 = vpop.f32.mrb[15].mxu1  ;;  %v10167_v44 = vld [vmem:[#allocation28_spill] sm:$0xff] }
 0x256   :  { %5679 = vtanh.f32 %v7121_v42  ;;  %v10168_v48 = vld [vmem:[#allocation72_spill] sm:$0xff] }
 0x260   :  { %v5680_v49 = vpop.eup %5679 }
 0x261   :  { %v1055_v2 = vmul.f32 %v5680_v49, %v5678_v16  ;;  %v10169_v16 = vld [vmem:[#allocation74_spill] sm:$0xff]  ;;  %v10170_v49 = vld [vmem:[#allocation29_spill] sm:$0xff] }
 0x263   :  { %v1056_v10 = vpack.c.bf16 %v1055_v2, %v1055_v2  ;;  %v10171_v2 = vld [vmem:[#allocation30_spill] sm:$0xff] }
 0x265   :  { %5251 = vmatmul.mubr.bf16.vlgmr.msra.gmra.mrb[12].mxu0 %v1056_v10  ;;  %1324 = vmatmul.mubr.bf16.vlgmr.msra.gmra.mrb[16].mxu1 %v1056_v10 }
 0x266   :  { %1218 = vmatpush1.bf16.msra.mxu0 %v6652_v4  ;;  %1249 = vmatprep.mubr.bf16.mxu0 %v10109_v60  ;;  %v10151_v4 = vld [vmem:[#allocation19_spill] sm:$0xff] }
 0x267   :  { %1219 = vmatprep.subr.bf16.mxu0 %v10143_v14  ;;  %1374 = vmatpush1.bf16.msra.mxu1 %v10144_v47  ;;  %v10172_v14 = vld [vmem:[#allocation76_spill] sm:$0xff]  ;;  %v10173_v47 = vld [vmem:[#allocation31_spill] sm:$0xff] }
 0x268   :  { %1375 = vmatprep.subr.bf16.mxu1 %v10145_v8  ;;  %1405 = vmatprep.mubr.bf16.mxu1 %v10109_v60  ;;  %v10174_v8 = vld [vmem:[#allocation32_spill] sm:$0xff] }
 0x26a   :  { %1220 = vmatpush1.bf16.msra.mxu0 %v10146_v33  ;;  %v10175_v33 = vld [vmem:[#allocation33_spill] sm:$0xff] }
 0x26b   :  { %1221 = vmatprep.subr.bf16.mxu0 %v10147_v0  ;;  %1376 = vmatpush1.bf16.msra.mxu1 %v10148_v41  ;;  %v10176_v0 = vld [vmem:[#allocation34_spill] sm:$0xff]  ;;  %v10177_v41 = vld [vmem:[#allocation35_spill] sm:$0xff] }
 0x26c   :  { %1377 = vmatprep.subr.bf16.mxu1 %v10149_v29  ;;  %v10178_v29 = vld [vmem:[#allocation36_spill] sm:$0xff] }
 0x26e   :  { %1222 = vmatpush1.bf16.msra.mxu0 %v10150_v43  ;;  %v10179_v43 = vld [vmem:[#allocation37_spill] sm:$0xff] }
 0x26f   :  { %1223 = vmatprep.subr.bf16.mxu0 %v10151_v4  ;;  %1378 = vmatpush1.bf16.msra.mxu1 %v10152_v52  ;;  %v10180_v4 = vld [vmem:[#allocation38_spill] sm:$0xff]  ;;  %v10181_v52 = vld [vmem:[#allocation39_spill] sm:$0xff] }
 0x270   :  { %1379 = vmatprep.subr.bf16.mxu1 %v10153_v31  ;;  %v10183_v31 = vld [vmem:[#allocation41_spill] sm:$0xff] }
 0x272   :  { %1224 = vmatpush1.bf16.msra.mxu0 %v10154_v57  ;;  %v10184_v57 = vld [vmem:[#allocation42_spill] sm:$0xff] }
 0x273   :  { %1225 = vmatprep.subr.bf16.mxu0 %v10155_v26  ;;  %1380 = vmatpush1.bf16.msra.mxu1 %v10156_v37  ;;  %v10185_v26 = vld [vmem:[#allocation43_spill] sm:$0xff]  ;;  %v10186_v37 = vld [vmem:[#allocation44_spill] sm:$0xff] }
 0x274   :  { %1381 = vmatprep.subr.bf16.mxu1 %v10157_v45  ;;  %v10187_v45 = vld [vmem:[#allocation45_spill] sm:$0xff] }
 0x276   :  { %1226 = vmatpush1.bf16.msra.mxu0 %v10158_v3  ;;  %v10188_v3 = vld [vmem:[#allocation46_spill] sm:$0xff] }
 0x277   :  { %1227 = vmatprep.subr.bf16.mxu0 %v10159_v5  ;;  %1382 = vmatpush1.bf16.msra.mxu1 %v10160_v53  ;;  %v10189_v5 = vld [vmem:[#allocation47_spill] sm:$0xff]  ;;  %v10190_v53 = vld [vmem:[#allocation49_spill] sm:$0xff] }
 0x278   :  { %1383 = vmatprep.subr.bf16.mxu1 %v10161_v7  ;;  %v10191_v7 = vld [vmem:[#allocation51_spill] sm:$0xff] }
 0x27a   :  { %1228 = vmatpush1.bf16.msra.mxu0 %v10162_v9  ;;  %v10192_v9 = vld [vmem:[#allocation53_spill] sm:$0xff] }
 0x27b   :  { %1229 = vmatprep.subr.bf16.mxu0 %v10163_v11  ;;  %1384 = vmatpush1.bf16.msra.mxu1 %v10164_v13  ;;  %v10193_v11 = vld [vmem:[#allocation55_spill] sm:$0xff]  ;;  %v10194_v13 = vld [vmem:[#allocation57_spill] sm:$0xff] }
 0x27c   :  { %1385 = vmatprep.subr.bf16.mxu1 %v10165_v15  ;;  %v10195_v15 = vld [vmem:[#allocation59_spill] sm:$0xff] }
 0x27e   :  { %1230 = vmatpush1.bf16.msra.mxu0 %v10166_v17  ;;  %v10196_v17 = vld [vmem:[#allocation61_spill] sm:$0xff] }
 0x27f   :  { %1231 = vmatprep.subr.bf16.mxu0 %v10167_v44  ;;  %1386 = vmatpush1.bf16.msra.mxu1 %v10168_v48  ;;  %v10197_v44 = vld [vmem:[#allocation63_spill] sm:$0xff] }
 0x280   :  { %1387 = vmatprep.subr.bf16.mxu1 %v10169_v16  ;;  %v10199_v48 = vld [vmem:[#allocation67_spill] sm:$0xff]  ;;  %v10200_v16 = vld [vmem:[#allocation69_spill] sm:$0xff] }
 0x282   :  { %1232 = vmatpush1.bf16.msra.mxu0 %v10170_v49  ;;  %v10201_v49 = vld [vmem:[#allocation71_spill] sm:$0xff] }
 0x283   :  { %1332 = vmatprep.subr.bf16.mxu0 %v10171_v2  ;;  %1388 = vmatpush1.bf16.msra.mxu1 %v10172_v14  ;;  %v10202_v2 = vld [vmem:[#allocation73_spill] sm:$0xff]  ;;  %v10203_v14 = vld [vmem:[#allocation75_spill] sm:$0xff] }
 0x284   :  { %5254 = vmatprep.subr.bf16.mxu1 %v9618_v21 }
 0x285   :  { %1250 = vmatmul.mubr.bf16.vlgmr.msra.gmra.mrb[16].mxu0 %v6998_v12  ;;  %v10182_v12 = vld [vmem:[#allocation40_spill] sm:$0xff] }
 0x286   :  { %1333 = vmatpush1.bf16.msra.mxu0 %v10173_v47  ;;  %1364 = vmatprep.mubr.bf16.mxu0 %v10109_v60  ;;  %v7192_v47 = vld [vmem:[#allocation2 + $0x4] ss:$16 sps:$4 sm:$0xff]  }
 0x287   :  { %1334 = vmatprep.subr.bf16.mxu0 %v10174_v8  ;;  %v6513_v8 = vmov 5  }
 0x288   :  { %5490 = vset.pattern.permute.xlu0 %v6513_v8 }
 0x28a   :  { %1335 = vmatpush1.bf16.msra.mxu0 %v10175_v33  ;;  %v10204_v33 = vld [vmem:[#allocation26_spill] sm:$0xff] }
 0x28b   :  { %1336 = vmatprep.subr.bf16.mxu0 %v10176_v0  ;;  %2673 = vperm.xlu0 %5490, %v10204_v33   ;;  %v6514_v0 = vmov 8  }
 0x28e   :  { %1337 = vmatpush1.bf16.msra.mxu0 %v10177_v41  ;;  %v7200_v41 = vld [vmem:[%s9546_s8] ss:$0 sm:$0xff] }
 0x28f   :  { %1338 = vmatprep.subr.bf16.mxu0 %v10178_v29  ;;  %5493 = vset.pattern.permute.xlu0 %v6514_v0  ;;  %v1170_v29 = vpop.permute.xlu0 %1169 }
 0x290   :  { %3804 = vperm.xlu0 %5493, %v10204_v33   ;;  %v1174_v0 = vmul.f32 %v1170_v29, %v6983_v56 }
 0x292   :  { %1339 = vmatpush1.bf16.msra.mxu0 %v10179_v43 }
 0x293   :  { %1340 = vmatprep.subr.bf16.mxu0 %v10180_v4 }
 0x296   :  { %1341 = vmatpush1.bf16.msra.mxu0 %v10181_v52 }
 0x297   :  { %1342 = vmatprep.subr.bf16.mxu0 %v10182_v12 }
 0x29a   :  { %1343 = vmatpush1.bf16.msra.mxu0 %v10183_v31 }
 0x29b   :  { %1344 = vmatprep.subr.bf16.mxu0 %v10184_v57  ;;  %v10205_v57 = vld [vmem:[#allocation78_spill] sm:$0xff] }
 0x29e   :  { %1345 = vmatpush1.bf16.msra.mxu0 %v10185_v26  ;;  %v1173_v26 = vmul.f32 %v1170_v29, %v10205_v57 }
 0x29f   :  { %1346 = vmatprep.subr.bf16.mxu0 %v10186_v37 }
 0x2a2   :  { %1347 = vmatpush1.bf16.msra.mxu0 %v10187_v45 }
 0x2a3   :  { %1414 = vmatprep.subr.bf16.mxu0 %v10188_v3  ;;  %v10206_v3 = vld [vmem:[#allocation77_spill] sm:$0xff] }
 0x2a5   :  { %1365 = vmatmul.mubr.bf16.vlgmr.msra.gmra.mrb[20].mxu0 %v1056_v10  ;;  %v10198_v10 = vld [vmem:[#allocation65_spill] sm:$0xff] }
 0x2a6   :  { %1415 = vmatpush1.bf16.msra.mxu0 %v10189_v5  ;;  %1446 = vmatprep.mubr.bf16.mxu0 %v10109_v60  ;;  %v1172_v5 = vmul.f32 %v1170_v29, %v10206_v3 }
 0x2a7   :  { %1416 = vmatprep.subr.bf16.mxu0 %v10190_v53 }
 0x2aa   :  { %1417 = vmatpush1.bf16.msra.mxu0 %v10191_v7 }
 0x2ab   :  { %1418 = vmatprep.subr.bf16.mxu0 %v10192_v9 }
 0x2ae   :  { %1419 = vmatpush1.bf16.msra.mxu0 %v10193_v11 }
 0x2af   :  { %1420 = vmatprep.subr.bf16.mxu0 %v10194_v13  ;;  %v1259_v13 = vadd.f32 %v7119_v38, %v1173_v26 }
 0x2b2   :  { %1421 = vmatpush1.bf16.msra.mxu0 %v10195_v15  ;;  %v1258_v15 = vadd.f32 %v7117_v20, %v1172_v5  ;;  %v7217_v20 = vld [vmem:[%s9538_s0] sm:$0xff]  ;;  %s6516_s0 = smov 127  }
 0x2b3   :  { %1422 = vmatprep.subr.bf16.mxu0 %v10196_v17 }
 0x2b6   :  { %1423 = vmatpush1.bf16.msra.mxu0 %v10197_v44  ;;  %v1263_v44 = vadd.f32 %v1259_v13, %v6978_v18 }
 0x2b7   :  { %1424 = vmatprep.subr.bf16.mxu0 %v10198_v10  ;;  %v1262_v10 = vadd.f32 %v1258_v15, %v6973_v22 }
 0x2ba   :  { %1425 = vmatpush1.bf16.msra.mxu0 %v10199_v48  ;;  %v5076_v48 = vmul.f32 -1.442695, %v1263_v44 }
 0x2bb   :  { %1426 = vmatprep.subr.bf16.mxu0 %v10200_v16  ;;  %v5075_v16 = vmul.f32 -1.442695, %v1262_v10 }
 0x2be   :  { %1427 = vmatpush1.bf16.msra.mxu0 %v10201_v49 }
 0x2bf   :  { %1428 = vmatprep.subr.bf16.mxu0 %v10202_v2 }
 0x2c2   :  { %1429 = vmatpush1.bf16.msra.mxu0 %v10203_v14  ;;  %v6515_v14 = vmov 2  }
 0x2c3   :  { %1549 = vmatprep.subr.bf16.mxu0 %v7192_v47  ;;  %5487 = vset.pattern.permute.xlu1 %v6515_v14 }
 0x2c4   :  { %1542 = vperm.xlu1 %5487, %v7217_v20  }
 0x338   :  { %v1145_v43 = vpop.f32.mrb[12].mxu0  ;;  %v7202_v4 = vpop.f32.mrb[16].mxu1 }
 0x339   :  { %v1146_v52 = vadd.f32 %v7200_v41, %v1145_v43  ;;  %v5252_v12 = vpop.f32.mrb[13].mxu0  ;;  %v7205_v31 = vpop.f32.mrb[17].mxu1 }
 0x33a   :  { %v1148_v37 = vpop.f32.mrb[14].mxu0  ;;  %v1329_v45 = vpop.f32.mrb[18].mxu1 }
 0x33b   :  { %v1152_v53 = vand.u32 2147483647, %v1146_v52  ;;  %v5253_v7 = vpop.f32.mrb[15].mxu0  ;;  %v1330_v9 = vpop.f32.mrb[19].mxu1  ;;  %1162 = vst.msk [vmem:[#allocation8] sm:$0xff] %vm1161_vm1, %v1146_v52  ;;  %v1175_v37 = vmul.f32 %v1170_v29, %v6970_v35  ;;  %v1151_v45 = vmax.f32 %v1146_v52, 0.0 }
 0x33d   :  { %v1153_v11 = vsub.f32 0.0, %v1152_v53 }
 0x33f   :  { %v1154_v17 = vmul.f32 1.442695, %v1153_v11 }
 0x341   :  { %5681 = vpow2.f32 %v1154_v17 }
 0x342   :  { %5683 = vpow2.f32 %v5076_v48 }
 0x343   :  { %5685 = vpow2.f32 %v5075_v16 }
 0x34b   :  { %v5682_v49 = vpop.eup %5681 }
 0x34c   :  { %v1156_v2 = vadd.f32 1.0, %v5682_v49  ;;  %v5684_v8 = vpop.eup %5683 }
 0x34d   :  { %v5686_v38 = vpop.eup %5685  ;;  %v1275_v33 = vadd.f32 1.0, %v5684_v8 }
 0x34e   :  { %5687 = vlog2.f32 %v1156_v2  ;;  %v1269_v12 = vadd.f32 1.0, %v5686_v38 }
 0x34f   :  { %5689 = vrcp.f32 %v1275_v33 }
 0x350   :  { %5691 = vrcp.f32 %v1269_v12 }
 0x358   :  { %v5688_v43 = vpop.eup %5687  ;;  %v1251_v26 = vpop.f32.mrb[16].mxu0 }
 0x359   :  { %v1260_v5 = vadd.f32 %v1251_v26, %v1174_v0  ;;  %v1253_v53 = vpop.f32.mrb[17].mxu0  ;;  %v1158_v7 = vmul.f32 0.6931472, %v5688_v43  ;;  %v5690_v29 = vpop.eup %5689 }
 0x35a   :  { %v1261_v9 = vadd.f32 %v1253_v53, %v1175_v37  ;;  %v1255_v11 = vpop.f32.mrb[18].mxu0  ;;  %v5692_v52 = vpop.eup %5691  ;;  %v1285_v49 = vmul.f32 %v5690_v29, %v6995_v1  ;;  %v7236_v1 = vld [vmem:[#allocation2] ss:$16 sps:$4 sm:$0xff]   ;;  %v7240_v53 = vld [vmem:[#allocation2 + $0x24] ss:$16 sps:$4 sm:$0xff]  }
 0x35b   :  { %v1264_v13 = vadd.f32 %v1260_v5, %v6992_v24  ;;  %v1256_v15 = vpop.f32.mrb[19].mxu0  ;;  %v1159_v17 = vadd.f32 %v1158_v7, %v1151_v45  ;;  %v7247_v7 = vld [vmem:[#allocation2 + $0x20] ss:$16 sps:$4 sm:$0xff]   ;;  %v7282_v29 = vld [vmem:[#allocation2 + $0xc4] ss:$16 sps:$4 sm:$0xff]  }
 0x35c   :  { %v1265_v44 = vadd.f32 %v1261_v9, %v6987_v27  ;;  %v7250_v9 = vld [vmem:[#allocation2 + $0x44] ss:$16 sps:$4 sm:$0xff]   ;;  %v7255_v11 = vld [vmem:[#allocation2 + $0x40] ss:$16 sps:$4 sm:$0xff]  }
 0x35d   :  { %5693 = vtanh.f32 %v1264_v13  ;;  %v1160_v10 = vadd.f32 1e-06, %v1159_v17  ;;  %v7258_v13 = vld [vmem:[#allocation2 + $0x64] ss:$16 sps:$4 sm:$0xff]   ;;  %v7263_v15 = vld [vmem:[#allocation2 + $0x60] ss:$16 sps:$4 sm:$0xff]  }
 0x35e   :  { %v5077_v48 = vmul.f32 -1.442695, %v1265_v44  ;;  %v7266_v17 = vld [vmem:[#allocation2 + $0x84] ss:$16 sps:$4 sm:$0xff]   ;;  %v7271_v44 = vld [vmem:[#allocation2 + $0x80] ss:$16 sps:$4 sm:$0xff]  }
 0x35f   :  { %1164 = vrot.lane.b32.xlu0 %v1160_v10, %s6516_s0  ;;  %v7274_v10 = vld [vmem:[#allocation2 + $0xa4] ss:$16 sps:$4 sm:$0xff]  }
 0x360   :  { %5695 = vpow2.f32 %v5077_v48  ;;  %v7279_v48 = vld [vmem:[#allocation2 + $0xa0] ss:$16 sps:$4 sm:$0xff]  }
 0x367   :  { %v5694_v16 = vpop.eup %5693 }
 0x368   :  { %v1286_v2 = vmul.f32 %v5694_v16, %v5692_v52  ;;  %v7290_v52 = vld [vmem:[#allocation2 + $0xe4] ss:$16 sps:$4 sm:$0xff]  }
 0x369   :  { %v7298_v16 = vld [vmem:[#allocation7 + $0x4] ss:$16 sps:$4 sm:$0xff]  }
 0x36a   :  { %v5696_v14 = vpop.eup %5695  ;;  %v7225_v8 = vadd.f32 %v1286_v2, %v1285_v49  ;;  %v7306_v49 = vld [vmem:[#allocation7] ss:$16 sps:$4 sm:$0xff]  }
 0x36b   :  { %v1282_v38 = vadd.f32 1.0, %v5696_v14  ;;  %v7313_v2 = vld [vmem:[#allocation7 + $0x20] ss:$16 sps:$4 sm:$0xff]  }
 0x36c   :  { %5697 = vtanh.f32 %v7225_v8  ;;  %v7319_v14 = vld [vmem:[#allocation7 + $0x40] ss:$16 sps:$4 sm:$0xff]  }
 0x36d   :  { %5699 = vrcp.f32 %v1282_v38  ;;  %v7322_v38 = vld [vmem:[#allocation7 + $0x64] ss:$16 sps:$4 sm:$0xff]  }
 0x36e   :  { %10207 = vst [vmem:[#allocation15_spill] sm:$0xff] %v7322_v38 }
 0x376   :  { %v5698_v33 = vpop.eup %5697 }
 0x377   :  { %v5700_v0 = vpop.eup %5699 }
 0x378   :  { %v7228_v43 = vpop.f32.mrb[20].mxu0  ;;  %v1289_v12 = vmul.f32 %v5700_v0, %v5698_v33  ;;  %v7325_v33 = vld [vmem:[#allocation7 + $0x60] ss:$16 sps:$4 sm:$0xff]   ;;  %v7337_v0 = vpop.permute.xlu0 %2673 }
 0x379   :  { %v7230_v26 = vpop.f32.mrb[21].mxu0  ;;  %10208 = vst [vmem:[#allocation48_spill] sm:$0xff] %v7325_v33  ;;  %10209 = vst [vmem:[#allocation50_spill] sm:$0xff] %v7337_v0 }
 0x37a   :  { %v1370_v37 = vpop.f32.mrb[22].mxu0  ;;  %v7232_v45 = vpack.c.bf16 %v1289_v12, %v1289_v12 }
 0x37b   :  { %v1371_v5 = vpop.f32.mrb[23].mxu0 }
 0x37c   :  { %1406 = vmatmul.mubr.bf16.vlgmr.msra.gmra.mrb[20].mxu1 %v7232_v45  ;;  %1447 = vmatmul.mubr.bf16.vlgmr.msra.gmra.mrb[24].mxu0 %v7232_v45  ;;  %v7339_v12 = vpop.permute.xlu0 %3804 }
 0x37d   :  { %1550 = vmatpush1.bf16.msra.mxu0 %v7236_v1  ;;  %1581 = vmatprep.mubr.bf16.mxu0 %v10109_v60  ;;  %10210 = vst [vmem:[#allocation16_spill] sm:$0xff] %v7339_v12 }
 0x37e   :  { %1551 = vmatprep.subr.bf16.mxu0 %v7240_v53  ;;  %5255 = vmatpush3.bf16.msra.mxu1 %v7040_v19 }
 0x37f   :  { %5256 = vmatprep.subr.bf16.mxu1 %v9618_v21  ;;  %5270 = vmatprep.mubr.msk.bf16.mxu1 %vm6512_vm0, %v9618_v21 }
 0x381   :  { %1552 = vmatpush1.bf16.msra.mxu0 %v7247_v7 }
 0x382   :  { %1553 = vmatprep.subr.bf16.mxu0 %v7250_v9  ;;  %5257 = vmatpush3.bf16.msra.mxu1 %v7050_v23 }
 0x383   :  { %5258 = vmatprep.subr.bf16.mxu1 %v9618_v21 }
 0x385   :  { %1554 = vmatpush1.bf16.msra.mxu0 %v7255_v11 }
 0x386   :  { %1555 = vmatprep.subr.bf16.mxu0 %v7258_v13  ;;  %5259 = vmatpush3.bf16.msra.mxu1 %v7057_v25 }
 0x387   :  { %5260 = vmatprep.subr.bf16.mxu1 %v9618_v21 }
 0x389   :  { %1556 = vmatpush1.bf16.msra.mxu0 %v7263_v15 }
 0x38a   :  { %1557 = vmatprep.subr.bf16.mxu0 %v7266_v17  ;;  %5261 = vmatpush3.bf16.msra.mxu1 %v7064_v28  ;;  %v7287_v28 = vld [vmem:[#allocation2 + $0xc0] ss:$16 sps:$4 sm:$0xff]  }
 0x38b   :  { %5262 = vmatprep.subr.bf16.mxu1 %v9618_v21 }
 0x38d   :  { %1558 = vmatpush1.bf16.msra.mxu0 %v7271_v44 }
 0x38e   :  { %1559 = vmatprep.subr.bf16.mxu0 %v7274_v10  ;;  %5263 = vmatpush3.bf16.msra.mxu1 %v7071_v30  ;;  %v7295_v30 = vld [vmem:[#allocation2 + $0xe0] ss:$16 sps:$4 sm:$0xff]  }
 0x38f   :  { %5264 = vmatprep.subr.bf16.mxu1 %v9618_v21 }
 0x391   :  { %1560 = vmatpush1.bf16.msra.mxu0 %v7279_v48 }
 0x392   :  { %1561 = vmatprep.subr.bf16.mxu0 %v7282_v29  ;;  %5265 = vmatpush3.bf16.msra.mxu1 %v7078_v32  ;;  %v7302_v32 = vld [vmem:[#allocation2 + $0xc] ss:$16 sps:$4 sm:$0xff]  }
 0x393   :  { %5266 = vmatprep.subr.bf16.mxu1 %v9618_v21 }
 0x395   :  { %1562 = vmatpush1.bf16.msra.mxu0 %v7287_v28 }
 0x396   :  { %1563 = vmatprep.subr.bf16.mxu0 %v7290_v52  ;;  %5267 = vmatpush3.bf16.msra.mxu1 %v7085_v34  ;;  %v7310_v34 = vld [vmem:[#allocation7 + $0x24] ss:$16 sps:$4 sm:$0xff]  }
 0x397   :  { %5268 = vmatprep.subr.bf16.mxu1 %v9618_v21 }
 0x399   :  { %1564 = vmatpush1.bf16.msra.mxu0 %v7295_v30 }
 0x39a   :  { %1664 = vmatprep.subr.bf16.mxu0 %v7298_v16  ;;  %5269 = vmatpush3.bf16.msra.mxu1 %v7092_v36  ;;  %v7316_v36 = vld [vmem:[#allocation7 + $0x44] ss:$16 sps:$4 sm:$0xff]  }
 0x39b   :  { %1590 = vmatprep.subr.bf16.mxu1 %v7302_v32 }
 0x39c   :  { %1582 = vmatmul.mubr.bf16.vlgmr.msra.gmra.mrb[28].mxu0 %v7232_v45 }
 0x39d   :  { %1665 = vmatpush1.bf16.msra.mxu0 %v7306_v49  ;;  %1696 = vmatprep.mubr.bf16.mxu0 %v10109_v60 }
 0x39e   :  { %1666 = vmatprep.subr.bf16.mxu0 %v7310_v34 }
 0x3a1   :  { %1667 = vmatpush1.bf16.msra.mxu0 %v7313_v2 }
 0x3a2   :  { %1668 = vmatprep.subr.bf16.mxu0 %v7316_v36 }
 0x3a5   :  { %1669 = vmatpush1.bf16.msra.mxu0 %v7319_v14 }
 0x3a6   :  { %1670 = vmatprep.subr.bf16.mxu0 %v7322_v38 }
 0x3a9   :  { %1671 = vmatpush1.bf16.msra.mxu0 %v7325_v33  ;;  %v6521_v33 = vmov 7  }
 0x3aa   :  { %1672 = vmatprep.subr.bf16.mxu0 %v6799_v50 }
 0x3ad   :  { %1673 = vmatpush1.bf16.msra.mxu0 %v6801_v51  ;;  %v6517_v51 = vmov 3  }
 0x3ae   :  { %1674 = vmatprep.subr.bf16.mxu0 %v6811_v54  ;;  %5488 = vset.pattern.permute.xlu1 %v6517_v51  ;;  %v6518_v54 = vmov 10  }
 0x3af   :  { %1919 = vperm.xlu1 %5488, %v7217_v20   ;;  %5496 = vset.pattern.permute.xlu0 %v6518_v54 }
 0x3b1   :  { %1675 = vmatpush1.bf16.msra.mxu0 %v6813_v55  ;;  %v6519_v55 = vmov 4  }
 0x3b2   :  { %1676 = vmatprep.subr.bf16.mxu0 %v6823_v58  ;;  %v6520_v58 = vmov 6  }
 0x3b3   :  { %5489 = vset.pattern.permute.xlu1 %v6519_v55 }
 0x3b4   :  { %2296 = vperm.xlu1 %5489, %v7217_v20  }
 0x3b5   :  { %1677 = vmatpush1.bf16.msra.mxu0 %v6825_v59 }
 0x3b6   :  { %1678 = vmatprep.subr.bf16.mxu0 %v6835_v62 }
 0x3b8   :  { %5491 = vset.pattern.permute.xlu1 %v6520_v58 }
 0x3b9   :  { %1679 = vmatpush1.bf16.msra.mxu0 %v6837_v63  ;;  %3050 = vperm.xlu1 %5491, %v7217_v20  }
 0x3ba   :  { %1746 = vmatprep.subr.bf16.mxu0 %v6850_v61 }
 0x3bd   :  { %5492 = vset.pattern.permute.xlu1 %v6521_v33 }
 0x3be   :  { %3427 = vperm.xlu1 %5492, %v7217_v20  }
 0x3d1   :  { %v1165_v50 = vpop.permute.xlu0 %1164 }
 0x3d2   :  { %1167 = vst.msk [vmem:[#allocation9] sm:$0xff] %vm1161_vm1, %v1165_v50 }
 0x44f   :  { %v1407_v59 = vpop.f32.mrb[20].mxu1  ;;  %v1448_v61 = vpop.f32.mrb[24].mxu0 }
 0x450   :  { %v1408_v62 = vadd.f32 %v1407_v59, %v7202_v4  ;;  %v1449_v63 = vadd.f32 %v1448_v61, %v7228_v43  ;;  %v1409_v37 = vpop.f32.mrb[21].mxu1  ;;  %v1450_v5 = vpop.f32.mrb[25].mxu0  ;;  %v6522_v59 = vmov 9  }
 0x451   :  { %v1410_v50 = vadd.f32 %v1409_v37, %v7205_v31  ;;  %v1451_v51 = vadd.f32 %v1450_v5, %v7230_v26  ;;  %v1411_v21 = vpop.f32.mrb[22].mxu1  ;;  %v1452_v55 = vpop.f32.mrb[26].mxu0  ;;  %5494 = vset.pattern.permute.xlu1 %v6522_v59 }
 0x452   :  { %v1455_v12 = vadd.f32 %v1408_v62, %v7102_v40  ;;  %v1412_v0 = vpop.f32.mrb[23].mxu1  ;;  %v1453_v58 = vpop.f32.mrb[27].mxu0  ;;  %4181 = vperm.xlu1 %5494, %v7217_v20   ;;  %v1457_v26 = vadd.f32 %v1449_v63, %v7114_v39 }
 0x453   :  { %v1456_v38 = vadd.f32 %v1410_v50, %v7105_v46  ;;  %v1458_v21 = vadd.f32 %v1451_v51, %v7110_v6 }
 0x454   :  { %v5078_v4 = vmul.f32 -1.442695, %v1455_v12 }
 0x455   :  { %v5079_v43 = vmul.f32 -1.442695, %v1456_v38  ;;  %v5080_v31 = vmul.f32 -1.442695, %v1458_v21 }
 0x456   :  { %5701 = vpow2.f32 %v5078_v4  ;;  %5495 = vset.pattern.permute.xlu1 %v6518_v54 }
 0x457   :  { %5703 = vpow2.f32 %v5079_v43  ;;  %4558 = vperm.xlu1 %5495, %v7217_v20  }
 0x458   :  { %5705 = vpow2.f32 %v5080_v31 }
 0x459   :  { %5707 = vtanh.f32 %v1457_v26  ;;  %v7372_v26 = vld [vmem:[#allocation2 + $0x2c] ss:$16 sps:$4 sm:$0xff]  }
 0x460   :  { %v5702_v33 = vpop.eup %5701 }
 0x461   :  { %v5704_v0 = vpop.eup %5703  ;;  %v1462_v61 = vadd.f32 1.0, %v5702_v33  ;;  %v7375_v33 = vld [vmem:[#allocation5] ss:$16 sps:$4 sm:$0xff]  }
 0x462   :  { %v1468_v38 = vadd.f32 1.0, %v5704_v0  ;;  %v5706_v12 = vpop.eup %5705  ;;  %v7378_v0 = vld [vmem:[#allocation5 + $0x24] ss:$16 sps:$4 sm:$0xff]  }
 0x463   :  { %5709 = vrcp.f32 %v1462_v61  ;;  %v5708_v62 = vpop.eup %5707  ;;  %v1475_v51 = vadd.f32 1.0, %v5706_v12  ;;  %v7382_v61 = vld [vmem:[#allocation2 + $0x28] ss:$16 sps:$4 sm:$0xff]   ;;  %v7388_v12 = vld [vmem:[#allocation5 + $0x20] ss:$16 sps:$4 sm:$0xff]  }
 0x464   :  { %5711 = vrcp.f32 %v1468_v38  ;;  %10211 = vst [vmem:[#allocation17_spill] sm:$0xff] %v7382_v61  ;;  %v7385_v38 = vld [vmem:[#allocation2 + $0x4c] ss:$16 sps:$4 sm:$0xff]   ;;  %10213 = vst [vmem:[#allocation54_spill] sm:$0xff] %v7388_v12 }
 0x465   :  { %5713 = vrcp.f32 %v1475_v51  ;;  %10212 = vst [vmem:[#allocation52_spill] sm:$0xff] %v7385_v38  ;;  %v7403_v51 = vld [vmem:[#allocation5 + $0x64] ss:$16 sps:$4 sm:$0xff]  }
 0x466   :  { %10218 = vst [vmem:[#allocation20_spill] sm:$0xff] %v7403_v51 }
 0x46d   :  { %v5710_v37 = vpop.eup %5709 }
 0x46e   :  { %v5712_v5 = vpop.eup %5711  ;;  %v1479_v50 = vmul.f32 %v5710_v37, %v5708_v62  ;;  %v7391_v62 = vld [vmem:[#allocation5 + $0x44] ss:$16 sps:$4 sm:$0xff]   ;;  %v7394_v37 = vld [vmem:[#allocation2 + $0x48] ss:$16 sps:$4 sm:$0xff]  }
 0x46f   :  { %v1478_v54 = vmul.f32 %v5712_v5, %v7121_v42  ;;  %v7357_v55 = vpop.f32.mrb[28].mxu0  ;;  %v5714_v43 = vpop.eup %5713  ;;  %v7368_v42 = vld [vmem:[#allocation2 + $0x8] ss:$16 sps:$4 sm:$0xff]   ;;  %10214 = vst [vmem:[#allocation18_spill] sm:$0xff] %v7391_v62  ;;  %10215 = vst [vmem:[#allocation19_spill] sm:$0xff] %v7394_v37 }
 0x470   :  { %v7359_v20 = vpop.f32.mrb[29].mxu0  ;;  %v7397_v5 = vld [vmem:[#allocation2 + $0x6c] ss:$16 sps:$4 sm:$0xff]  }
 0x471   :  { %v7361_v63 = vadd.f32 %v1479_v50, %v1478_v54  ;;  %v1587_v58 = vpop.f32.mrb[30].mxu0  ;;  %10216 = vst [vmem:[#allocation56_spill] sm:$0xff] %v7397_v5  ;;  %v7400_v50 = vld [vmem:[#allocation5 + $0x40] ss:$16 sps:$4 sm:$0xff]   ;;  %v7406_v54 = vld [vmem:[#allocation2 + $0x68] ss:$16 sps:$4 sm:$0xff]  }
 0x472   :  { %v1588_v4 = vpop.f32.mrb[31].mxu0  ;;  %10217 = vst [vmem:[#allocation58_spill] sm:$0xff] %v7400_v50  ;;  %10219 = vst [vmem:[#allocation21_spill] sm:$0xff] %v7406_v54  ;;  %v7409_v58 = vld [vmem:[#allocation2 + $0x8c] ss:$16 sps:$4 sm:$0xff]  }
 0x473   :  { %5715 = vtanh.f32 %v7361_v63  ;;  %10220 = vst [vmem:[#allocation60_spill] sm:$0xff] %v7409_v58  ;;  %v7412_v4 = vld [vmem:[#allocation5 + $0x60] ss:$16 sps:$4 sm:$0xff]  }
 0x474   :  { %10221 = vst [vmem:[#allocation62_spill] sm:$0xff] %v7412_v4 }
 0x47d   :  { %v5716_v59 = vpop.eup %5715 }
 0x47e   :  { %v1482_v21 = vmul.f32 %v5716_v59, %v5714_v43  ;;  %v7415_v43 = vld [vmem:[#allocation5 + $0x84] ss:$16 sps:$4 sm:$0xff]   ;;  %v7418_v59 = vld [vmem:[#allocation2 + $0x88] ss:$16 sps:$4 sm:$0xff]  }
 0x47f   :  { %10222 = vst [vmem:[#allocation22_spill] sm:$0xff] %v7415_v43  ;;  %10223 = vst [vmem:[#allocation23_spill] sm:$0xff] %v7418_v59 }
 0x480   :  { %v7364_v31 = vpack.c.bf16 %v1482_v21, %v1482_v21  ;;  %v7421_v21 = vld [vmem:[#allocation2 + $0xac] ss:$16 sps:$4 sm:$0xff]  }
 0x481   :  { %10224 = vst [vmem:[#allocation64_spill] sm:$0xff] %v7421_v21 }
 0x482   :  { %5271 = vmatmul.mubr.bf16.vlgmr.msra.gmra.mrb[24].mxu1 %v7364_v31  ;;  %1697 = vmatmul.mubr.bf16.vlgmr.msra.gmra.mrb[32].mxu0 %v7364_v31 }
 0x483   :  { %1591 = vmatpush1.bf16.msra.mxu1 %v7368_v42  ;;  %1622 = vmatprep.mubr.bf16.mxu1 %v10109_v60 }
 0x484   :  { %1592 = vmatprep.subr.bf16.mxu1 %v7372_v26  ;;  %1747 = vmatpush1.bf16.msra.mxu0 %v7375_v33 }
 0x485   :  { %1748 = vmatprep.subr.bf16.mxu0 %v7378_v0  ;;  %1778 = vmatprep.mubr.bf16.mxu0 %v10109_v60 }
 0x487   :  { %1593 = vmatpush1.bf16.msra.mxu1 %v7382_v61 }
 0x488   :  { %1594 = vmatprep.subr.bf16.mxu1 %v7385_v38  ;;  %1749 = vmatpush1.bf16.msra.mxu0 %v7388_v12 }
 0x489   :  { %1750 = vmatprep.subr.bf16.mxu0 %v7391_v62 }
 0x48b   :  { %1595 = vmatpush1.bf16.msra.mxu1 %v7394_v37 }
 0x48c   :  { %1596 = vmatprep.subr.bf16.mxu1 %v7397_v5  ;;  %1751 = vmatpush1.bf16.msra.mxu0 %v7400_v50 }
 0x48d   :  { %1752 = vmatprep.subr.bf16.mxu0 %v7403_v51 }
 0x48f   :  { %1597 = vmatpush1.bf16.msra.mxu1 %v7406_v54  ;;  %v7424_v54 = vld [vmem:[#allocation5 + $0x80] ss:$16 sps:$4 sm:$0xff]  }
 0x490   :  { %1598 = vmatprep.subr.bf16.mxu1 %v7409_v58  ;;  %1753 = vmatpush1.bf16.msra.mxu0 %v7412_v4  ;;  %10225 = vst [vmem:[#allocation66_spill] sm:$0xff] %v7424_v54  ;;  %v7427_v58 = vld [vmem:[#allocation5 + $0xa4] ss:$16 sps:$4 sm:$0xff]   ;;  %v7430_v4 = vld [vmem:[#allocation2 + $0xa8] ss:$16 sps:$4 sm:$0xff]  }
 0x491   :  { %1754 = vmatprep.subr.bf16.mxu0 %v7415_v43  ;;  %10226 = vst [vmem:[#allocation24_spill] sm:$0xff] %v7427_v58  ;;  %10227 = vst [vmem:[#allocation25_spill] sm:$0xff] %v7430_v4  ;;  %v7433_v43 = vld [vmem:[#allocation2 + $0xcc] ss:$16 sps:$4 sm:$0xff]  }
 0x492   :  { %10228 = vst [vmem:[#allocation68_spill] sm:$0xff] %v7433_v43 }
 0x493   :  { %1599 = vmatpush1.bf16.msra.mxu1 %v7418_v59  ;;  %v7436_v59 = vld [vmem:[#allocation5 + $0xa0] ss:$16 sps:$4 sm:$0xff]  }
 0x494   :  { %1600 = vmatprep.subr.bf16.mxu1 %v7421_v21  ;;  %1755 = vmatpush1.bf16.msra.mxu0 %v7424_v54  ;;  %10229 = vst [vmem:[#allocation70_spill] sm:$0xff] %v7436_v59  ;;  %v7439_v21 = vld [vmem:[#allocation5 + $0xc4] ss:$16 sps:$4 sm:$0xff]   ;;  %v7442_v54 = vld [vmem:[#allocation2 + $0xc8] ss:$16 sps:$4 sm:$0xff]  }
 0x495   :  { %1756 = vmatprep.subr.bf16.mxu0 %v7427_v58  ;;  %10230 = vst [vmem:[#allocation27_spill] sm:$0xff] %v7439_v21  ;;  %10231 = vst [vmem:[#allocation28_spill] sm:$0xff] %v7442_v54  ;;  %v7445_v58 = vld [vmem:[#allocation2 + $0xec] ss:$16 sps:$4 sm:$0xff]  }
 0x496   :  { %10232 = vst [vmem:[#allocation72_spill] sm:$0xff] %v7445_v58 }
 0x497   :  { %1601 = vmatpush1.bf16.msra.mxu1 %v7430_v4  ;;  %v7448_v4 = vld [vmem:[#allocation5 + $0xc0] ss:$16 sps:$4 sm:$0xff]  }
 0x498   :  { %1602 = vmatprep.subr.bf16.mxu1 %v7433_v43  ;;  %1757 = vmatpush1.bf16.msra.mxu0 %v7436_v59  ;;  %10233 = vst [vmem:[#allocation74_spill] sm:$0xff] %v7448_v4  ;;  %v7451_v43 = vld [vmem:[#allocation5 + $0xe4] ss:$16 sps:$4 sm:$0xff]   ;;  %v7454_v59 = vld [vmem:[#allocation2 + $0xe8] ss:$16 sps:$4 sm:$0xff]  }
 0x499   :  { %1758 = vmatprep.subr.bf16.mxu0 %v7439_v21  ;;  %10234 = vst [vmem:[#allocation29_spill] sm:$0xff] %v7451_v43  ;;  %10235 = vst [vmem:[#allocation30_spill] sm:$0xff] %v7454_v59  ;;  %v7457_v21 = vld [vmem:[#allocation7 + $0xc] ss:$16 sps:$4 sm:$0xff]  }
 0x49a   :  { %10236 = vst [vmem:[#allocation76_spill] sm:$0xff] %v7457_v21 }
 0x49b   :  { %1603 = vmatpush1.bf16.msra.mxu1 %v7442_v54  ;;  %v7460_v54 = vld [vmem:[#allocation5 + $0xe0] ss:$16 sps:$4 sm:$0xff]  }
 0x49c   :  { %1604 = vmatprep.subr.bf16.mxu1 %v7445_v58  ;;  %1759 = vmatpush1.bf16.msra.mxu0 %v7448_v4  ;;  %10237 = vst [vmem:[#allocation31_spill] sm:$0xff] %v7460_v54  ;;  %v10238_v58 = vmov 0.0   ;;  %v7465_v4 = vld [vmem:[#allocation7 + $0x8] ss:$16 sps:$4 sm:$0xff]  }
 0x49d   :  { %1760 = vmatprep.subr.bf16.mxu0 %v7451_v43  ;;  %10239 = vst [vmem:[#allocation32_spill] sm:$0xff] %v7465_v4  ;;  %v7469_v43 = vld [vmem:[#allocation7 + $0x2c] ss:$16 sps:$4 sm:$0xff]  }
 0x49e   :  { %10240 = vst [vmem:[#allocation33_spill] sm:$0xff] %v7469_v43 }
 0x49f   :  { %1605 = vmatpush1.bf16.msra.mxu1 %v7454_v59  ;;  %v7472_v59 = vld [vmem:[#allocation7 + $0x28] ss:$16 sps:$4 sm:$0xff]  }
 0x4a0   :  { %1705 = vmatprep.subr.bf16.mxu1 %v7457_v21  ;;  %1761 = vmatpush1.bf16.msra.mxu0 %v7460_v54  ;;  %10241 = vst [vmem:[#allocation34_spill] sm:$0xff] %v7472_v59  ;;  %v7475_v21 = vld [vmem:[#allocation7 + $0x4c] ss:$16 sps:$4 sm:$0xff]   ;;  %v7478_v54 = vld [vmem:[#allocation7 + $0x48] ss:$16 sps:$4 sm:$0xff]  }
 0x4a1   :  { %5274 = vmatprep.subr.bf16.mxu0 %v10238_v58  ;;  %10242 = vst [vmem:[#allocation35_spill] sm:$0xff] %v7475_v21  ;;  %10243 = vst [vmem:[#allocation36_spill] sm:$0xff] %v7478_v54 }
 0x4a2   :  { %1623 = vmatmul.mubr.bf16.vlgmr.msra.gmra.mrb[28].mxu1 %v7232_v45  ;;  %v7481_v45 = vld [vmem:[#allocation7 + $0x6c] ss:$16 sps:$4 sm:$0xff]  }
 0x4a3   :  { %1706 = vmatpush1.bf16.msra.mxu1 %v7465_v4  ;;  %1737 = vmatprep.mubr.bf16.mxu1 %v10109_v60  ;;  %10244 = vst [vmem:[#allocation37_spill] sm:$0xff] %v7481_v45  ;;  %v7484_v4 = vld [vmem:[#allocation7 + $0x68] ss:$16 sps:$4 sm:$0xff]  }
 0x4a4   :  { %1707 = vmatprep.subr.bf16.mxu1 %v7469_v43  ;;  %10245 = vst [vmem:[#allocation38_spill] sm:$0xff] %v7484_v4  ;;  %v7487_v43 = vld [vmem:[#allocation7 + $0x8c] ss:$16 sps:$4 sm:$0xff]  }
 0x4a5   :  { %10246 = vst [vmem:[#allocation39_spill] sm:$0xff] %v7487_v43 }
 0x4a7   :  { %1708 = vmatpush1.bf16.msra.mxu1 %v7472_v59  ;;  %v7490_v59 = vld [vmem:[#allocation7 + $0x88] ss:$16 sps:$4 sm:$0xff]  }
 0x4a8   :  { %1709 = vmatprep.subr.bf16.mxu1 %v7475_v21  ;;  %10247 = vst [vmem:[#allocation40_spill] sm:$0xff] %v7490_v59  ;;  %v7493_v21 = vld [vmem:[#allocation7 + $0xac] ss:$16 sps:$4 sm:$0xff]  }
 0x4a9   :  { %10248 = vst [vmem:[#allocation41_spill] sm:$0xff] %v7493_v21 }
 0x4ab   :  { %1710 = vmatpush1.bf16.msra.mxu1 %v7478_v54  ;;  %v7496_v54 = vld [vmem:[#allocation7 + $0xa8] ss:$16 sps:$4 sm:$0xff]  }
 0x4ac   :  { %1711 = vmatprep.subr.bf16.mxu1 %v7481_v45  ;;  %10249 = vst [vmem:[#allocation42_spill] sm:$0xff] %v7496_v54  ;;  %v7499_v45 = vld [vmem:[#allocation7 + $0xcc] ss:$16 sps:$4 sm:$0xff]  }
 0x4ad   :  { %10250 = vst [vmem:[#allocation43_spill] sm:$0xff] %v7499_v45 }
 0x4af   :  { %1712 = vmatpush1.bf16.msra.mxu1 %v7484_v4  ;;  %v7502_v4 = vld [vmem:[#allocation7 + $0xc8] ss:$16 sps:$4 sm:$0xff]  }
 0x4b0   :  { %1713 = vmatprep.subr.bf16.mxu1 %v7487_v43  ;;  %10251 = vst [vmem:[#allocation44_spill] sm:$0xff] %v7502_v4  ;;  %v7505_v43 = vld [vmem:[#allocation7 + $0xec] ss:$16 sps:$4 sm:$0xff]  }
 0x4b1   :  { %10252 = vst [vmem:[#allocation45_spill] sm:$0xff] %v7505_v43 }
 0x4b3   :  { %1714 = vmatpush1.bf16.msra.mxu1 %v7490_v59  ;;  %v7508_v59 = vld [vmem:[#allocation7 + $0xe8] ss:$16 sps:$4 sm:$0xff]  }
 0x4b4   :  { %1715 = vmatprep.subr.bf16.mxu1 %v7493_v21  ;;  %10253 = vst [vmem:[#allocation46_spill] sm:$0xff] %v7508_v59  ;;  %v7511_v21 = vld [vmem:[#allocation5 + $0xc] ss:$16 sps:$4 sm:$0xff]  }
 0x4b5   :  { %10254 = vst [vmem:[#allocation47_spill] sm:$0xff] %v7511_v21 }
 0x4b7   :  { %1716 = vmatpush1.bf16.msra.mxu1 %v7496_v54  ;;  %v7515_v54 = vld [vmem:[#allocation5 + $0x8] ss:$16 sps:$4 sm:$0xff]  }
 0x4b8   :  { %1717 = vmatprep.subr.bf16.mxu1 %v7499_v45  ;;  %10255 = vst [vmem:[#allocation49_spill] sm:$0xff] %v7515_v54 }
 0x4bb   :  { %1718 = vmatpush1.bf16.msra.mxu1 %v7502_v4  ;;  %v7519_v4 = vld [vmem:[#allocation5 + $0x2c] ss:$16 sps:$4 sm:$0xff]  }
 0x4bc   :  { %1719 = vmatprep.subr.bf16.mxu1 %v7505_v43  ;;  %10256 = vst [vmem:[#allocation51_spill] sm:$0xff] %v7519_v4  ;;  %v7522_v43 = vld [vmem:[#allocation5 + $0x28] ss:$16 sps:$4 sm:$0xff]  }
 0x4bd   :  { %10257 = vst [vmem:[#allocation53_spill] sm:$0xff] %v7522_v43 }
 0x4bf   :  { %1720 = vmatpush1.bf16.msra.mxu1 %v7508_v59  ;;  %v7525_v59 = vld [vmem:[#allocation5 + $0x4c] ss:$16 sps:$4 sm:$0xff]  }
 0x4c0   :  { %1787 = vmatprep.subr.bf16.mxu1 %v7511_v21  ;;  %10258 = vst [vmem:[#allocation55_spill] sm:$0xff] %v7525_v59  ;;  %v7528_v21 = vld [vmem:[#allocation5 + $0x48] ss:$16 sps:$4 sm:$0xff]  }
 0x4c1   :  { %10259 = vst [vmem:[#allocation57_spill] sm:$0xff] %v7528_v21 }
 0x4c2   :  { %1738 = vmatmul.mubr.bf16.vlgmr.msra.gmra.mrb[32].mxu1 %v7364_v31  ;;  %v7531_v31 = vld [vmem:[#allocation5 + $0x6c] ss:$16 sps:$4 sm:$0xff]  }
 0x4c3   :  { %1788 = vmatpush1.bf16.msra.mxu1 %v7515_v54  ;;  %1819 = vmatprep.mubr.bf16.mxu1 %v10109_v60  ;;  %10260 = vst [vmem:[#allocation59_spill] sm:$0xff] %v7531_v31  ;;  %v7534_v54 = vld [vmem:[#allocation5 + $0x68] ss:$16 sps:$4 sm:$0xff]  }
 0x4c4   :  { %1789 = vmatprep.subr.bf16.mxu1 %v7519_v4  ;;  %10261 = vst [vmem:[#allocation61_spill] sm:$0xff] %v7534_v54  ;;  %v7537_v4 = vld [vmem:[#allocation5 + $0x8c] ss:$16 sps:$4 sm:$0xff]  }
 0x4c5   :  { %10262 = vst [vmem:[#allocation63_spill] sm:$0xff] %v7537_v4 }
 0x4c7   :  { %1790 = vmatpush1.bf16.msra.mxu1 %v7522_v43  ;;  %v7540_v43 = vld [vmem:[#allocation5 + $0x88] ss:$16 sps:$4 sm:$0xff]  }
 0x4c8   :  { %1791 = vmatprep.subr.bf16.mxu1 %v7525_v59  ;;  %10263 = vst [vmem:[#allocation65_spill] sm:$0xff] %v7540_v43  ;;  %v7543_v59 = vld [vmem:[#allocation5 + $0xac] ss:$16 sps:$4 sm:$0xff]  }
 0x4c9   :  { %10264 = vst [vmem:[#allocation67_spill] sm:$0xff] %v7543_v59 }
 0x4cb   :  { %1792 = vmatpush1.bf16.msra.mxu1 %v7528_v21  ;;  %v7546_v21 = vld [vmem:[#allocation5 + $0xa8] ss:$16 sps:$4 sm:$0xff]  }
 0x4cc   :  { %1793 = vmatprep.subr.bf16.mxu1 %v7531_v31  ;;  %10265 = vst [vmem:[#allocation69_spill] sm:$0xff] %v7546_v21  ;;  %v7549_v31 = vld [vmem:[#allocation5 + $0xcc] ss:$16 sps:$4 sm:$0xff]  }
 0x4cd   :  { %10266 = vst [vmem:[#allocation71_spill] sm:$0xff] %v7549_v31 }
 0x4cf   :  { %1794 = vmatpush1.bf16.msra.mxu1 %v7534_v54  ;;  %v7552_v54 = vld [vmem:[#allocation5 + $0xc8] ss:$16 sps:$4 sm:$0xff]  }
 0x4d0   :  { %1795 = vmatprep.subr.bf16.mxu1 %v7537_v4  ;;  %10267 = vst [vmem:[#allocation73_spill] sm:$0xff] %v7552_v54  ;;  %v7555_v4 = vld [vmem:[#allocation5 + $0xec] ss:$16 sps:$4 sm:$0xff]  }
 0x4d1   :  { %10268 = vst [vmem:[#allocation75_spill] sm:$0xff] %v7555_v4 }
 0x4d3   :  { %1796 = vmatpush1.bf16.msra.mxu1 %v7540_v43  ;;  %v7558_v43 = vld [vmem:[#allocation5 + $0xe8] ss:$16 sps:$4 sm:$0xff]  }
 0x4d4   :  { %1797 = vmatprep.subr.bf16.mxu1 %v7543_v59  ;;  %10269 = vst [vmem:[#allocation26_spill] sm:$0xff] %v7558_v43  ;;  %v1543_v59 = vpop.permute.xlu1 %1542 }
 0x4d7   :  { %1798 = vmatpush1.bf16.msra.mxu1 %v7546_v21 }
 0x4d8   :  { %1799 = vmatprep.subr.bf16.mxu1 %v7549_v31 }
 0x4db   :  { %1800 = vmatpush1.bf16.msra.mxu1 %v7552_v54  ;;  %v1546_v54 = vmul.f32 %v1543_v59, %v10205_v57 }
 0x4dc   :  { %1801 = vmatprep.subr.bf16.mxu1 %v7555_v4  ;;  %v1545_v4 = vmul.f32 %v1543_v59, %v10206_v3 }
 0x4dd   :  { %v1632_v38 = vadd.f32 %v7359_v20, %v1546_v54  ;;  %v1547_v20 = vmul.f32 %v1543_v59, %v6983_v56 }
 0x4df   :  { %1802 = vmatpush1.bf16.msra.mxu1 %v7558_v43 }
 0x4e0   :  { %1926 = vmatprep.subr.bf16.mxu1 %v7192_v47 }
 0x555   :  { %v1518_v21 = vpop.f32.mrb[24].mxu1  ;;  %v7562_v45 = vpop.f32.mrb[32].mxu0 }
 0x556   :  { %v1519_v31 = vadd.f32 %v7200_v41, %v1518_v21  ;;  %v5272_v51 = vpop.f32.mrb[25].mxu1  ;;  %v7565_v50 = vpop.f32.mrb[33].mxu0  ;;  %v1631_v41 = vadd.f32 %v7357_v55, %v1545_v4  ;;  %v1636_v21 = vadd.f32 %v1632_v38, %v6978_v18 }
 0x557   :  { %v1521_v5 = vpop.f32.mrb[26].mxu1  ;;  %v1702_v37 = vpop.f32.mrb[34].mxu0 }
 0x558   :  { %v1525_v62 = vand.u32 2147483647, %v1519_v31  ;;  %v1703_v12 = vpop.f32.mrb[35].mxu0  ;;  %1535 = vrot.lane.b32.xlu1 %v1519_v31, %s6523_s26  ;;  %v5273_v47 = vpop.f32.mrb[27].mxu1  ;;  %v1635_v5 = vadd.f32 %v1631_v41, %v6973_v22  ;;  %v5082_v37 = vmul.f32 -1.442695, %v1636_v21 }
 0x559   :  { %v1524_v38 = vmax.f32 %v1519_v31, 0.0 }
 0x55a   :  { %v1526_v43 = vsub.f32 0.0, %v1525_v62  ;;  %v5081_v57 = vmul.f32 -1.442695, %v1635_v5 }
 0x55c   :  { %v1527_v51 = vmul.f32 1.442695, %v1526_v43  ;;  %v1548_v43 = vmul.f32 %v1543_v59, %v6970_v35 }
 0x55e   :  { %5717 = vpow2.f32 %v1527_v51 }
 0x55f   :  { %5719 = vpow2.f32 %v5082_v37 }
 0x560   :  { %5721 = vpow2.f32 %v5081_v57 }
 0x568   :  { %v5718_v3 = vpop.eup %5717 }
 0x569   :  { %v1529_v12 = vadd.f32 1.0, %v5718_v3  ;;  %v5720_v61 = vpop.eup %5719 }
 0x56a   :  { %v5722_v47 = vpop.eup %5721  ;;  %v1648_v62 = vadd.f32 1.0, %v5720_v61 }
 0x56b   :  { %5723 = vlog2.f32 %v1529_v12  ;;  %v1642_v55 = vadd.f32 1.0, %v5722_v47 }
 0x56c   :  { %5725 = vrcp.f32 %v1648_v62 }
 0x56d   :  { %5727 = vrcp.f32 %v1642_v55 }
 0x575   :  { %v5724_v54 = vpop.eup %5723  ;;  %v1624_v4 = vpop.f32.mrb[28].mxu1 }
 0x576   :  { %v1531_v51 = vmul.f32 0.6931472, %v5724_v54  ;;  %v1633_v41 = vadd.f32 %v1624_v4, %v1547_v20  ;;  %v1626_v21 = vpop.f32.mrb[29].mxu1  ;;  %v5726_v59 = vpop.eup %5725 }
 0x577   :  { %v1634_v5 = vadd.f32 %v1626_v21, %v1548_v43  ;;  %v1628_v37 = vpop.f32.mrb[30].mxu1  ;;  %v5728_v31 = vpop.eup %5727  ;;  %v1658_v54 = vmul.f32 %v5726_v59, %v7225_v8 }
 0x578   :  { %v1532_v57 = vadd.f32 %v1531_v51, %v1524_v38  ;;  %v1637_v3 = vadd.f32 %v1633_v41, %v6992_v24  ;;  %v1629_v12 = vpop.f32.mrb[31].mxu1 }
 0x579   :  { %v1638_v61 = vadd.f32 %v1634_v5, %v6987_v27 }
 0x57a   :  { %v1533_v56 = vadd.f32 1e-06, %v1532_v57  ;;  %5729 = vtanh.f32 %v1637_v3 }
 0x57b   :  { %v5083_v47 = vmul.f32 -1.442695, %v1638_v61 }
 0x57c   :  { %1540 = vst.msk [vmem:[#allocation9] sm:$0xff] %vm1538_vm2, %v1533_v56 }
 0x57d   :  { %5731 = vpow2.f32 %v5083_v47 }
 0x584   :  { %v5730_v20 = vpop.eup %5729 }
 0x585   :  { %v1659_v62 = vmul.f32 %v5730_v20, %v5728_v31 }
 0x587   :  { %v5732_v4 = vpop.eup %5731  ;;  %v7580_v43 = vadd.f32 %v1659_v62, %v1658_v54 }
 0x588   :  { %v1655_v38 = vadd.f32 1.0, %v5732_v4 }
 0x589   :  { %5733 = vtanh.f32 %v7580_v43 }
 0x58a   :  { %5735 = vrcp.f32 %v1655_v38 }
 0x593   :  { %v5734_v55 = vpop.eup %5733 }
 0x594   :  { %v5736_v51 = vpop.eup %5735 }
 0x595   :  { %v7583_v41 = vpop.f32.mrb[32].mxu1  ;;  %v1662_v21 = vmul.f32 %v5736_v51, %v5734_v55 }
 0x596   :  { %v7585_v56 = vpop.f32.mrb[33].mxu1 }
 0x597   :  { %v1743_v5 = vpop.f32.mrb[34].mxu1  ;;  %v7587_v37 = vpack.c.bf16 %v1662_v21, %v1662_v21 }
 0x598   :  { %v1744_v57 = vpop.f32.mrb[35].mxu1 }
 0x599   :  { %1779 = vmatmul.mubr.bf16.vlgmr.msra.gmra.mrb[36].mxu0 %v7587_v37  ;;  %1820 = vmatmul.mubr.bf16.vlgmr.msra.gmra.mrb[36].mxu1 %v7587_v37 }
 0x59a   :  { %1927 = vmatpush1.bf16.msra.mxu1 %v7236_v1  ;;  %1958 = vmatprep.mubr.bf16.mxu1 %v10109_v60  ;;  %v7633_v1 = vld [vmem:[%s9545_s7 + $0x28] sm:$0xff]  }
 0x59b   :  { %1928 = vmatprep.subr.bf16.mxu1 %v7240_v53  ;;  %5275 = vmatpush3.bf16.msra.mxu0 %v7040_v19  ;;  %v7607_v19 = vpop.permute.xlu1 %1919  ;;  %10271 = vst [vmem:[#allocation81_spill] sm:$0xff] %v7633_v1 }
 0x59c   :  { %5276 = vmatprep.subr.bf16.mxu0 %v10238_v58  ;;  %5290 = vmatprep.mubr.msk.bf16.mxu0 %vm6512_vm0, %v10238_v58 }
 0x59e   :  { %1929 = vmatpush1.bf16.msra.mxu1 %v7247_v7  ;;  %v7644_v7 = vld [vmem:[%s9545_s7 + $0x30] sm:$0xff]  }
 0x59f   :  { %1930 = vmatprep.subr.bf16.mxu1 %v7250_v9  ;;  %5277 = vmatpush3.bf16.msra.mxu0 %v7050_v23  ;;  %v7613_v23 = vld [vmem:[%s9545_s7 + $0x18] sm:$0xff]   ;;  %v7625_v8 = vpop.permute.xlu1 %2296  ;;  %10273 = vst [vmem:[#allocation83_spill] sm:$0xff] %v7644_v7 }
 0x5a0   :  { %5278 = vmatprep.subr.bf16.mxu0 %v10238_v58  ;;  %10270 = vst [vmem:[#allocation80_spill] sm:$0xff] %v7625_v8  ;;  %v7653_v9 = vld [vmem:[%s9545_s7 + $0x38] sm:$0xff]  }
 0x5a1   :  { %10274 = vst [vmem:[#allocation84_spill] sm:$0xff] %v7653_v9  ;;  %v10316_v8 = vld [vmem:[#allocation32_spill] sm:$0xff] }
 0x5a2   :  { %1931 = vmatpush1.bf16.msra.mxu1 %v7255_v11 }
 0x5a3   :  { %1932 = vmatprep.subr.bf16.mxu1 %v7258_v13  ;;  %5279 = vmatpush3.bf16.msra.mxu0 %v7057_v25  ;;  %v7622_v25 = vld [vmem:[%s9545_s7 + $0x20] sm:$0xff]   ;;  %v7638_v53 = vpop.permute.xlu1 %3050 }
 0x5a4   :  { %5280 = vmatprep.subr.bf16.mxu0 %v10238_v58  ;;  %10272 = vst [vmem:[#allocation82_spill] sm:$0xff] %v7638_v53  ;;  %v10315_v53 = vld [vmem:[#allocation31_spill] sm:$0xff] }
 0x5a6   :  { %1933 = vmatpush1.bf16.msra.mxu1 %v7263_v15  ;;  %v10277_v15 = vld [vmem:[#allocation15_spill] sm:$0xff] }
 0x5a7   :  { %1934 = vmatprep.subr.bf16.mxu1 %v7266_v17  ;;  %5281 = vmatpush3.bf16.msra.mxu0 %v7613_v23  ;;  %v7656_v11 = vpop.permute.xlu1 %3427 }
 0x5a8   :  { %5282 = vmatprep.subr.bf16.mxu0 %v10238_v58  ;;  %10275 = vst [vmem:[#allocation85_spill] sm:$0xff] %v7656_v11  ;;  %v10314_v11 = vld [vmem:[#allocation76_spill] sm:$0xff] }
 0x5aa   :  { %1935 = vmatpush1.bf16.msra.mxu1 %v7271_v44  ;;  %v10279_v44 = vld [vmem:[#allocation48_spill] sm:$0xff] }
 0x5ab   :  { %1936 = vmatprep.subr.bf16.mxu1 %v7274_v10  ;;  %5283 = vmatpush3.bf16.msra.mxu0 %v7622_v25  ;;  %v7663_v13 = vpop.permute.xlu1 %4181  ;;  %v7672_v10 = vld [vmem:[#allocation7 + $0x84] ss:$16 sps:$4 sm:$0xff]  }
 0x5ac   :  { %5284 = vmatprep.subr.bf16.mxu0 %v10238_v58  ;;  %10276 = vst [vmem:[#allocation86_spill] sm:$0xff] %v7663_v13  ;;  %10280 = vst [vmem:[#allocation48_spill] sm:$0xff] %v7672_v10  ;;  %v10313_v13 = vld [vmem:[#allocation30_spill] sm:$0xff] }
 0x5ae   :  { %1937 = vmatpush1.bf16.msra.mxu1 %v7279_v48 }
 0x5af   :  { %1938 = vmatprep.subr.bf16.mxu1 %v7282_v29  ;;  %5285 = vmatpush3.bf16.msra.mxu0 %v7633_v1  ;;  %v7669_v17 = vpop.permute.xlu1 %4558  ;;  %v7675_v29 = vld [vmem:[#allocation7 + $0x80] ss:$16 sps:$4 sm:$0xff]  }
 0x5b0   :  { %5286 = vmatprep.subr.bf16.mxu0 %v10238_v58  ;;  %10278 = vst [vmem:[#allocation15_spill] sm:$0xff] %v7669_v17  ;;  %10281 = vst [vmem:[#allocation87_spill] sm:$0xff] %v7675_v29  ;;  %v10312_v17 = vld [vmem:[#allocation29_spill] sm:$0xff] }
 0x5b2   :  { %1939 = vmatpush1.bf16.msra.mxu1 %v7287_v28  ;;  %v7679_v28 = vld [vmem:[#allocation7 + $0xa4] ss:$16 sps:$4 sm:$0xff]  }
 0x5b3   :  { %1940 = vmatprep.subr.bf16.mxu1 %v7290_v52  ;;  %5287 = vmatpush3.bf16.msra.mxu0 %v7644_v7  ;;  %10282 = vst [vmem:[#allocation88_spill] sm:$0xff] %v7679_v28  ;;  %v7682_v52 = vld [vmem:[#allocation7 + $0xa0] ss:$16 sps:$4 sm:$0xff]  }
 0x5b4   :  { %5288 = vmatprep.subr.bf16.mxu0 %v10238_v58  ;;  %10283 = vst [vmem:[#allocation89_spill] sm:$0xff] %v7682_v52 }
 0x5b6   :  { %1941 = vmatpush1.bf16.msra.mxu1 %v7295_v30  ;;  %v7685_v30 = vld [vmem:[#allocation7 + $0xc4] ss:$16 sps:$4 sm:$0xff]  }
 0x5b7   :  { %2041 = vmatprep.subr.bf16.mxu1 %v7298_v16  ;;  %5289 = vmatpush3.bf16.msra.mxu0 %v7653_v9  ;;  %10284 = vst [vmem:[#allocation90_spill] sm:$0xff] %v7685_v30  ;;  %v7688_v16 = vld [vmem:[#allocation7 + $0xc0] ss:$16 sps:$4 sm:$0xff]  }
 0x5b8   :  { %1967 = vmatprep.subr.bf16.mxu0 %v7302_v32  ;;  %10285 = vst [vmem:[#allocation91_spill] sm:$0xff] %v7688_v16  ;;  %v7691_v32 = vld [vmem:[#allocation7 + $0xe4] ss:$16 sps:$4 sm:$0xff]  }
 0x5b9   :  { %1959 = vmatmul.mubr.bf16.vlgmr.msra.gmra.mrb[40].mxu1 %v7587_v37  ;;  %10286 = vst [vmem:[#allocation92_spill] sm:$0xff] %v7691_v32 }
 0x5ba   :  { %2042 = vmatpush1.bf16.msra.mxu1 %v7306_v49  ;;  %2073 = vmatprep.mubr.bf16.mxu1 %v10109_v60  ;;  %v7694_v49 = vld [vmem:[#allocation7 + $0xe0] ss:$16 sps:$4 sm:$0xff]  }
 0x5bb   :  { %2043 = vmatprep.subr.bf16.mxu1 %v7310_v34  ;;  %10287 = vst [vmem:[#allocation93_spill] sm:$0xff] %v7694_v49  ;;  %v7697_v34 = vld [vmem:[#allocation5 + $0x4] ss:$16 sps:$4 sm:$0xff]  }
 0x5bc   :  { %10288 = vst [vmem:[#allocation94_spill] sm:$0xff] %v7697_v34 }
 0x5be   :  { %2044 = vmatpush1.bf16.msra.mxu1 %v7313_v2 }
 0x5bf   :  { %2045 = vmatprep.subr.bf16.mxu1 %v7316_v36 }
 0x5c2   :  { %2046 = vmatpush1.bf16.msra.mxu1 %v7319_v14 }
 0x5c3   :  { %2047 = vmatprep.subr.bf16.mxu1 %v10277_v15 }
 0x5c6   :  { %2048 = vmatpush1.bf16.msra.mxu1 %v10279_v44 }
 0x5c7   :  { %2049 = vmatprep.subr.bf16.mxu1 %v7672_v10 }
 0x5ca   :  { %v1536_v48 = vpop.permute.xlu1 %1535  ;;  %2050 = vmatpush1.bf16.msra.mxu1 %v7675_v29 }
 0x5cb   :  { %1539 = vst.msk [vmem:[#allocation8] sm:$0xff] %vm1538_vm2, %v1536_v48  ;;  %2051 = vmatprep.subr.bf16.mxu1 %v7679_v28 }
 0x5ce   :  { %2052 = vmatpush1.bf16.msra.mxu1 %v7682_v52 }
 0x5cf   :  { %2053 = vmatprep.subr.bf16.mxu1 %v7685_v30 }
 0x5d2   :  { %2054 = vmatpush1.bf16.msra.mxu1 %v7688_v16 }
 0x5d3   :  { %2055 = vmatprep.subr.bf16.mxu1 %v7691_v32 }
 0x5d6   :  { %2056 = vmatpush1.bf16.msra.mxu1 %v7694_v49 }
 0x5d7   :  { %2123 = vmatprep.subr.bf16.mxu1 %v7697_v34 }
 0x66c   :  { %v1780_v2 = vpop.f32.mrb[36].mxu0  ;;  %v1821_v36 = vpop.f32.mrb[36].mxu1 }
 0x66d   :  { %v1781_v14 = vadd.f32 %v1780_v2, %v7562_v45  ;;  %v1822_v3 = vadd.f32 %v1821_v36, %v7583_v41  ;;  %v1782_v12 = vpop.f32.mrb[37].mxu0  ;;  %v1823_v61 = vpop.f32.mrb[37].mxu1 }
 0x66e   :  { %v1783_v47 = vadd.f32 %v1782_v12, %v7565_v50  ;;  %v1824_v59 = vadd.f32 %v1823_v61, %v7585_v56  ;;  %v1784_v31 = vpop.f32.mrb[38].mxu0  ;;  %v1825_v20 = vpop.f32.mrb[38].mxu1 }
 0x66f   :  { %v1828_v54 = vadd.f32 %v1781_v14, %v7102_v40  ;;  %v1785_v62 = vpop.f32.mrb[39].mxu0  ;;  %v1826_v4 = vpop.f32.mrb[39].mxu1  ;;  %v1830_v21 = vadd.f32 %v1822_v3, %v7114_v39 }
 0x670   :  { %v1829_v38 = vadd.f32 %v1783_v47, %v7105_v46  ;;  %v1831_v45 = vadd.f32 %v1824_v59, %v7110_v6 }
 0x671   :  { %v5084_v55 = vmul.f32 -1.442695, %v1828_v54 }
 0x672   :  { %v5085_v51 = vmul.f32 -1.442695, %v1829_v38  ;;  %v5086_v41 = vmul.f32 -1.442695, %v1831_v45  ;;  %v10290_v38 = vld [vmem:[#allocation52_spill] sm:$0xff]  ;;  %v10293_v45 = vld [vmem:[#allocation19_spill] sm:$0xff] }
 0x673   :  { %5737 = vpow2.f32 %v5084_v55  ;;  %v10291_v55 = vld [vmem:[#allocation54_spill] sm:$0xff] }
 0x674   :  { %5739 = vpow2.f32 %v5085_v51  ;;  %v10292_v51 = vld [vmem:[#allocation18_spill] sm:$0xff] }
 0x675   :  { %5741 = vpow2.f32 %v5086_v41  ;;  %v10294_v41 = vld [vmem:[#allocation56_spill] sm:$0xff] }
 0x676   :  { %5743 = vtanh.f32 %v1830_v21  ;;  %v10295_v21 = vld [vmem:[#allocation58_spill] sm:$0xff] }
 0x67d   :  { %v5738_v50 = vpop.eup %5737 }
 0x67e   :  { %v5740_v5 = vpop.eup %5739  ;;  %v1835_v56 = vadd.f32 1.0, %v5738_v50  ;;  %v10296_v50 = vld [vmem:[#allocation20_spill] sm:$0xff] }
 0x67f   :  { %v1841_v57 = vadd.f32 1.0, %v5740_v5  ;;  %v5742_v15 = vpop.eup %5741  ;;  %v10297_v5 = vld [vmem:[#allocation21_spill] sm:$0xff] }
 0x680   :  { %5745 = vrcp.f32 %v1835_v56  ;;  %v5744_v44 = vpop.eup %5743  ;;  %v1848_v14 = vadd.f32 1.0, %v5742_v15  ;;  %v10298_v56 = vld [vmem:[#allocation60_spill] sm:$0xff]  ;;  %v10300_v15 = vld [vmem:[#allocation22_spill] sm:$0xff] }
 0x681   :  { %5747 = vrcp.f32 %v1841_v57  ;;  %v10299_v57 = vld [vmem:[#allocation62_spill] sm:$0xff] }
 0x682   :  { %5749 = vrcp.f32 %v1848_v14  ;;  %v10305_v14 = vld [vmem:[#allocation25_spill] sm:$0xff] }
 0x68a   :  { %v5746_v48 = vpop.eup %5745 }
 0x68b   :  { %v5748_v2 = vpop.eup %5747  ;;  %v1852_v36 = vmul.f32 %v5746_v48, %v5744_v44  ;;  %v10301_v44 = vld [vmem:[#allocation23_spill] sm:$0xff]  ;;  %v10302_v48 = vld [vmem:[#allocation64_spill] sm:$0xff] }
 0x68c   :  { %v1851_v12 = vmul.f32 %v5748_v2, %v7361_v63  ;;  %v7709_v61 = vpop.f32.mrb[40].mxu1  ;;  %v5750_v20 = vpop.eup %5749  ;;  %v10289_v63 = vld [vmem:[#allocation17_spill] sm:$0xff]  ;;  %v10303_v2 = vld [vmem:[#allocation66_spill] sm:$0xff] }
 0x68d   :  { %v7711_v47 = vpop.f32.mrb[41].mxu1 }
 0x68e   :  { %v7713_v3 = vadd.f32 %v1852_v36, %v1851_v12  ;;  %v1964_v59 = vpop.f32.mrb[42].mxu1  ;;  %v10304_v36 = vld [vmem:[#allocation24_spill] sm:$0xff] }
 0x68f   :  { %v1965_v31 = vpop.f32.mrb[43].mxu1  ;;  %v10306_v12 = vld [vmem:[#allocation68_spill] sm:$0xff]  ;;  %v10307_v59 = vld [vmem:[#allocation70_spill] sm:$0xff] }
 0x690   :  { %5751 = vtanh.f32 %v7713_v3  ;;  %v10308_v31 = vld [vmem:[#allocation27_spill] sm:$0xff] }
 0x69a   :  { %v5752_v54 = vpop.eup %5751 }
 0x69b   :  { %v1855_v62 = vmul.f32 %v5752_v54, %v5750_v20  ;;  %v10309_v20 = vld [vmem:[#allocation28_spill] sm:$0xff] }
 0x69c   :  { %v10310_v54 = vld [vmem:[#allocation72_spill] sm:$0xff] }
 0x69d   :  { %v1856_v4 = vpack.c.bf16 %v1855_v62, %v1855_v62  ;;  %v10311_v62 = vld [vmem:[#allocation74_spill] sm:$0xff] }
 0x69f   :  { %5291 = vmatmul.mubr.bf16.vlgmr.msra.gmra.mrb[40].mxu0 %v1856_v4  ;;  %2074 = vmatmul.mubr.bf16.vlgmr.msra.gmra.mrb[44].mxu1 %v1856_v4 }
 0x6a0   :  { %1968 = vmatpush1.bf16.msra.mxu0 %v7368_v42  ;;  %1999 = vmatprep.mubr.bf16.mxu0 %v10109_v60 }
 0x6a1   :  { %1969 = vmatprep.subr.bf16.mxu0 %v7372_v26  ;;  %2124 = vmatpush1.bf16.msra.mxu1 %v7375_v33 }
 0x6a2   :  { %2125 = vmatprep.subr.bf16.mxu1 %v7378_v0  ;;  %2155 = vmatprep.mubr.bf16.mxu1 %v10109_v60 }
 0x6a4   :  { %1970 = vmatpush1.bf16.msra.mxu0 %v10289_v63 }
 0x6a5   :  { %1971 = vmatprep.subr.bf16.mxu0 %v10290_v38  ;;  %2126 = vmatpush1.bf16.msra.mxu1 %v10291_v55 }
 0x6a6   :  { %2127 = vmatprep.subr.bf16.mxu1 %v10292_v51 }
 0x6a8   :  { %1972 = vmatpush1.bf16.msra.mxu0 %v10293_v45 }
 0x6a9   :  { %1973 = vmatprep.subr.bf16.mxu0 %v10294_v41  ;;  %2128 = vmatpush1.bf16.msra.mxu1 %v10295_v21 }
 0x6aa   :  { %2129 = vmatprep.subr.bf16.mxu1 %v10296_v50 }
 0x6ac   :  { %1974 = vmatpush1.bf16.msra.mxu0 %v10297_v5 }
 0x6ad   :  { %1975 = vmatprep.subr.bf16.mxu0 %v10298_v56  ;;  %2130 = vmatpush1.bf16.msra.mxu1 %v10299_v57 }
 0x6ae   :  { %2131 = vmatprep.subr.bf16.mxu1 %v10300_v15  ;;  %v10351_v15 = vld [vmem:[#allocation79_spill] sm:$0xff] }
 0x6b0   :  { %1976 = vmatpush1.bf16.msra.mxu0 %v10301_v44 }
 0x6b1   :  { %1977 = vmatprep.subr.bf16.mxu0 %v10302_v48  ;;  %2132 = vmatpush1.bf16.msra.mxu1 %v10303_v2 }
 0x6b2   :  { %2133 = vmatprep.subr.bf16.mxu1 %v10304_v36 }
 0x6b4   :  { %1978 = vmatpush1.bf16.msra.mxu0 %v10305_v14 }
 0x6b5   :  { %1979 = vmatprep.subr.bf16.mxu0 %v10306_v12  ;;  %2134 = vmatpush1.bf16.msra.mxu1 %v10307_v59  ;;  %v10327_v59 = vld [vmem:[#allocation43_spill] sm:$0xff] }
 0x6b6   :  { %2135 = vmatprep.subr.bf16.mxu1 %v10308_v31  ;;  %v10324_v31 = vld [vmem:[#allocation40_spill] sm:$0xff] }
 0x6b8   :  { %1980 = vmatpush1.bf16.msra.mxu0 %v10309_v20  ;;  %v10317_v20 = vld [vmem:[#allocation33_spill] sm:$0xff] }
 0x6b9   :  { %1981 = vmatprep.subr.bf16.mxu0 %v10310_v54  ;;  %2136 = vmatpush1.bf16.msra.mxu1 %v10311_v62  ;;  %v10318_v54 = vld [vmem:[#allocation34_spill] sm:$0xff]  ;;  %v10319_v62 = vld [vmem:[#allocation35_spill] sm:$0xff] }
 0x6ba   :  { %2137 = vmatprep.subr.bf16.mxu1 %v10312_v17  ;;  %v10320_v17 = vld [vmem:[#allocation36_spill] sm:$0xff] }
 0x6bc   :  { %1982 = vmatpush1.bf16.msra.mxu0 %v10313_v13  ;;  %v10321_v13 = vld [vmem:[#allocation37_spill] sm:$0xff] }
 0x6bd   :  { %2082 = vmatprep.subr.bf16.mxu0 %v10314_v11  ;;  %2138 = vmatpush1.bf16.msra.mxu1 %v10315_v53  ;;  %v10322_v11 = vld [vmem:[#allocation38_spill] sm:$0xff]  ;;  %v10323_v53 = vld [vmem:[#allocation39_spill] sm:$0xff] }
 0x6be   :  { %5294 = vmatprep.subr.bf16.mxu1 %v10238_v58 }
 0x6bf   :  { %2000 = vmatmul.mubr.bf16.vlgmr.msra.gmra.mrb[44].mxu0 %v7587_v37  ;;  %v10325_v37 = vld [vmem:[#allocation41_spill] sm:$0xff] }
 0x6c0   :  { %2083 = vmatpush1.bf16.msra.mxu0 %v10316_v8  ;;  %2114 = vmatprep.mubr.bf16.mxu0 %v10109_v60  ;;  %v10326_v8 = vld [vmem:[#allocation42_spill] sm:$0xff] }
 0x6c1   :  { %2084 = vmatprep.subr.bf16.mxu0 %v10317_v20  ;;  %v10328_v20 = vld [vmem:[#allocation44_spill] sm:$0xff] }
 0x6c4   :  { %2085 = vmatpush1.bf16.msra.mxu0 %v10318_v54  ;;  %v10329_v54 = vld [vmem:[#allocation45_spill] sm:$0xff] }
 0x6c5   :  { %2086 = vmatprep.subr.bf16.mxu0 %v10319_v62  ;;  %v10330_v62 = vld [vmem:[#allocation46_spill] sm:$0xff] }
 0x6c8   :  { %2087 = vmatpush1.bf16.msra.mxu0 %v10320_v17  ;;  %v10331_v17 = vld [vmem:[#allocation47_spill] sm:$0xff] }
 0x6c9   :  { %2088 = vmatprep.subr.bf16.mxu0 %v10321_v13  ;;  %v10350_v13 = vld [vmem:[#allocation77_spill] sm:$0xff] }
 0x6cc   :  { %2089 = vmatpush1.bf16.msra.mxu0 %v10322_v11  ;;  %v10332_v11 = vld [vmem:[#allocation49_spill] sm:$0xff] }
 0x6cd   :  { %2090 = vmatprep.subr.bf16.mxu0 %v10323_v53  ;;  %v10343_v53 = vld [vmem:[#allocation71_spill] sm:$0xff] }
 0x6d0   :  { %2091 = vmatpush1.bf16.msra.mxu0 %v10324_v31  ;;  %v10333_v31 = vld [vmem:[#allocation51_spill] sm:$0xff] }
 0x6d1   :  { %2092 = vmatprep.subr.bf16.mxu0 %v10325_v37  ;;  %v10334_v37 = vld [vmem:[#allocation53_spill] sm:$0xff] }
 0x6d4   :  { %2093 = vmatpush1.bf16.msra.mxu0 %v10326_v8  ;;  %v10335_v8 = vld [vmem:[#allocation55_spill] sm:$0xff] }
 0x6d5   :  { %2094 = vmatprep.subr.bf16.mxu0 %v10327_v59  ;;  %v10336_v59 = vld [vmem:[#allocation57_spill] sm:$0xff] }
 0x6d8   :  { %2095 = vmatpush1.bf16.msra.mxu0 %v10328_v20  ;;  %v10337_v20 = vld [vmem:[#allocation59_spill] sm:$0xff] }
 0x6d9   :  { %2096 = vmatprep.subr.bf16.mxu0 %v10329_v54  ;;  %v10338_v54 = vld [vmem:[#allocation61_spill] sm:$0xff] }
 0x6dc   :  { %2097 = vmatpush1.bf16.msra.mxu0 %v10330_v62  ;;  %v10339_v62 = vld [vmem:[#allocation63_spill] sm:$0xff] }
 0x6dd   :  { %2164 = vmatprep.subr.bf16.mxu0 %v10331_v17  ;;  %v10340_v17 = vld [vmem:[#allocation65_spill] sm:$0xff] }
 0x6df   :  { %2115 = vmatmul.mubr.bf16.vlgmr.msra.gmra.mrb[48].mxu0 %v1856_v4  ;;  %v10341_v4 = vld [vmem:[#allocation67_spill] sm:$0xff] }
 0x6e0   :  { %2165 = vmatpush1.bf16.msra.mxu0 %v10332_v11  ;;  %2196 = vmatprep.mubr.bf16.mxu0 %v10109_v60  ;;  %v10342_v11 = vld [vmem:[#allocation69_spill] sm:$0xff] }
 0x6e1   :  { %2166 = vmatprep.subr.bf16.mxu0 %v10333_v31  ;;  %v10344_v31 = vld [vmem:[#allocation73_spill] sm:$0xff] }
 0x6e4   :  { %2167 = vmatpush1.bf16.msra.mxu0 %v10334_v37  ;;  %v10345_v37 = vld [vmem:[#allocation75_spill] sm:$0xff] }
 0x6e5   :  { %2168 = vmatprep.subr.bf16.mxu0 %v10335_v8  ;;  %v10346_v8 = vld [vmem:[#allocation26_spill] sm:$0xff] }
 0x6e8   :  { %2169 = vmatpush1.bf16.msra.mxu0 %v10336_v59  ;;  %v7784_v59 = vld [vmem:[#allocation2 + $0x4] ss:$16 sps:$4 sm:$0xff]  }
 0x6e9   :  { %2170 = vmatprep.subr.bf16.mxu0 %v10337_v20  ;;  %10347 = vst [vmem:[#allocation17_spill] sm:$0xff] %v7784_v59 }
 0x6ec   :  { %2171 = vmatpush1.bf16.msra.mxu0 %v10338_v54 }
 0x6ed   :  { %2172 = vmatprep.subr.bf16.mxu0 %v10339_v62 }
 0x6f0   :  { %2173 = vmatpush1.bf16.msra.mxu0 %v10340_v17 }
 0x6f1   :  { %2174 = vmatprep.subr.bf16.mxu0 %v10341_v4  ;;  %v7792_v4 = vld [vmem:[%s9546_s8] ss:$0 sm:$0xff] }
 0x6f2   :  { %10348 = vst [vmem:[#allocation52_spill] sm:$0xff] %v7792_v4 }
 0x6f4   :  { %2175 = vmatpush1.bf16.msra.mxu0 %v10342_v11 }
 0x6f5   :  { %2176 = vmatprep.subr.bf16.mxu0 %v10343_v53 }
 0x6f8   :  { %2177 = vmatpush1.bf16.msra.mxu0 %v10344_v31 }
 0x6f9   :  { %2178 = vmatprep.subr.bf16.mxu0 %v10345_v37  ;;  %v10349_v37 = vld [vmem:[#allocation78_spill] sm:$0xff] }
 0x6fc   :  { %2179 = vmatpush1.bf16.msra.mxu0 %v10346_v8  ;;  %v1923_v8 = vmul.f32 %v7607_v19, %v10349_v37 }
 0x6fd   :  { %2303 = vmatprep.subr.bf16.mxu0 %v7784_v59  ;;  %v1922_v59 = vmul.f32 %v7607_v19, %v10350_v13 }
 0x772   :  { %v1891_v54 = vpop.f32.mrb[40].mxu0  ;;  %v7787_v62 = vpop.f32.mrb[44].mxu1 }
 0x773   :  { %v1892_v53 = vadd.f32 %v7792_v4, %v1891_v54  ;;  %v5292_v11 = vpop.f32.mrb[41].mxu0  ;;  %v7795_v31 = vpop.f32.mrb[45].mxu1  ;;  %v2009_v54 = vadd.f32 %v7711_v47, %v1923_v8  ;;  %v1924_v8 = vmul.f32 %v7607_v19, %v10351_v15 }
 0x774   :  { %v1894_v17 = vpop.f32.mrb[42].mxu0  ;;  %v2079_v20 = vpop.f32.mrb[46].mxu1  ;;  %v2008_v11 = vadd.f32 %v7709_v61, %v1922_v59  ;;  %v1925_v59 = vmul.f32 %v7607_v19, %v6970_v35 }
 0x775   :  { %v1898_v12 = vand.u32 2147483647, %v1892_v53  ;;  %v2080_v14 = vpop.f32.mrb[47].mxu1  ;;  %1908 = vrot.lane.b32.xlu0 %v1892_v53, %s6524_s21  ;;  %v5293_v36 = vpop.f32.mrb[43].mxu0  ;;  %v2013_v37 = vadd.f32 %v2009_v54, %v6978_v18 }
 0x776   :  { %v2012_v17 = vadd.f32 %v2008_v11, %v6973_v22 }
 0x777   :  { %v1899_v2 = vsub.f32 0.0, %v1898_v12  ;;  %v5088_v20 = vmul.f32 -1.442695, %v2013_v37 }
 0x778   :  { %v5087_v48 = vmul.f32 -1.442695, %v2012_v17 }
 0x779   :  { %v1900_v4 = vmul.f32 1.442695, %v1899_v2 }
 0x77b   :  { %5753 = vpow2.f32 %v1900_v4  ;;  %v1897_v4 = vmax.f32 %v1892_v53, 0.0 }
 0x77c   :  { %5755 = vpow2.f32 %v5088_v20 }
 0x77d   :  { %5757 = vpow2.f32 %v5087_v48 }
 0x785   :  { %v5754_v13 = vpop.eup %5753 }
 0x786   :  { %v1902_v14 = vadd.f32 1.0, %v5754_v13  ;;  %v5756_v44 = vpop.eup %5755 }
 0x787   :  { %v5758_v36 = vpop.eup %5757  ;;  %v2025_v12 = vadd.f32 1.0, %v5756_v44 }
 0x788   :  { %5759 = vlog2.f32 %v1902_v14  ;;  %v2019_v47 = vadd.f32 1.0, %v5758_v36 }
 0x789   :  { %5761 = vrcp.f32 %v2025_v12 }
 0x78a   :  { %5763 = vrcp.f32 %v2019_v47 }
 0x792   :  { %v5760_v61 = vpop.eup %5759  ;;  %v2001_v2 = vpop.f32.mrb[44].mxu0 }
 0x793   :  { %v2010_v37 = vadd.f32 %v2001_v2, %v1924_v8  ;;  %v2003_v54 = vpop.f32.mrb[45].mxu0  ;;  %v1904_v11 = vmul.f32 0.6931472, %v5760_v61  ;;  %v5762_v19 = vpop.eup %5761 }
 0x794   :  { %v2011_v17 = vadd.f32 %v2003_v54, %v1925_v59  ;;  %v2005_v48 = vpop.f32.mrb[46].mxu0  ;;  %v5764_v53 = vpop.eup %5763  ;;  %v2035_v61 = vmul.f32 %v5762_v19, %v7580_v43  ;;  %v7825_v43 = vld [vmem:[#allocation2] ss:$16 sps:$4 sm:$0xff]   ;;  %v7850_v19 = vld [vmem:[%s9545_s7 + $0x8] sm:$0xff]  }
 0x795   :  { %v2014_v13 = vadd.f32 %v2010_v37, %v6992_v24  ;;  %v2006_v20 = vpop.f32.mrb[47].mxu0  ;;  %v1905_v44 = vadd.f32 %v1904_v11, %v1897_v4 }
 0x796   :  { %v2015_v14 = vadd.f32 %v2011_v17, %v6987_v27  ;;  %v7829_v20 = vld [vmem:[#allocation2 + $0x24] ss:$16 sps:$4 sm:$0xff]  }
 0x797   :  { %5765 = vtanh.f32 %v2014_v13  ;;  %v1906_v36 = vadd.f32 1e-06, %v1905_v44  ;;  %v7835_v44 = vld [vmem:[%s9545_s7] sm:$0xff]  }
 0x798   :  { %v5089_v15 = vmul.f32 -1.442695, %v2015_v14  ;;  %v7841_v14 = vld [vmem:[#allocation2 + $0x20] ss:$16 sps:$4 sm:$0xff]  }
 0x799   :  { %1914 = vrot.lane.b32.xlu1 %v1906_v36, %s6523_s26  ;;  %v7844_v36 = vld [vmem:[#allocation2 + $0x44] ss:$16 sps:$4 sm:$0xff]  }
 0x79a   :  { %5767 = vpow2.f32 %v5089_v15 }
 0x7a1   :  { %v5766_v8 = vpop.eup %5765 }
 0x7a2   :  { %v2036_v2 = vmul.f32 %v5766_v8, %v5764_v53  ;;  %v7854_v53 = vld [vmem:[#allocation2 + $0x40] ss:$16 sps:$4 sm:$0xff]   ;;  %v7857_v8 = vld [vmem:[#allocation2 + $0x64] ss:$16 sps:$4 sm:$0xff]  }
 0x7a4   :  { %v5768_v12 = vpop.eup %5767  ;;  %v7814_v59 = vadd.f32 %v2036_v2, %v2035_v61  ;;  %v7863_v61 = vld [vmem:[%s9545_s7 + $0x10] sm:$0xff]  }
 0x7a5   :  { %v2032_v37 = vadd.f32 1.0, %v5768_v12  ;;  %v7867_v2 = vld [vmem:[#allocation2 + $0x60] ss:$16 sps:$4 sm:$0xff]   ;;  %v7870_v12 = vld [vmem:[#allocation2 + $0x84] ss:$16 sps:$4 sm:$0xff]  }
 0x7a6   :  { %5769 = vtanh.f32 %v7814_v59 }
 0x7a7   :  { %5771 = vrcp.f32 %v2032_v37  ;;  %v7875_v37 = vld [vmem:[#allocation2 + $0x80] ss:$16 sps:$4 sm:$0xff]  }
 0x7b0   :  { %v5770_v47 = vpop.eup %5769 }
 0x7b1   :  { %v5772_v4 = vpop.eup %5771 }
 0x7b2   :  { %v7817_v54 = vpop.f32.mrb[48].mxu0  ;;  %v2039_v11 = vmul.f32 %v5772_v4, %v5770_v47  ;;  %v7878_v47 = vld [vmem:[#allocation2 + $0xa4] ss:$16 sps:$4 sm:$0xff]   ;;  %v7883_v4 = vld [vmem:[#allocation2 + $0xa0] ss:$16 sps:$4 sm:$0xff]  }
 0x7b3   :  { %v7819_v17 = vpop.f32.mrb[49].mxu0  ;;  %10352 = vst [vmem:[#allocation54_spill] sm:$0xff] %v7883_v4 }
 0x7b4   :  { %v2120_v15 = vpop.f32.mrb[50].mxu0  ;;  %v7821_v48 = vpack.c.bf16 %v2039_v11, %v2039_v11  ;;  %v7886_v11 = vld [vmem:[#allocation2 + $0xc4] ss:$16 sps:$4 sm:$0xff]  }
 0x7b5   :  { %v2121_v13 = vpop.f32.mrb[51].mxu0  ;;  %10353 = vst [vmem:[#allocation18_spill] sm:$0xff] %v7886_v11  ;;  %v7891_v15 = vld [vmem:[#allocation2 + $0xc0] ss:$16 sps:$4 sm:$0xff]  }
 0x7b6   :  { %2156 = vmatmul.mubr.bf16.vlgmr.msra.gmra.mrb[48].mxu1 %v7821_v48  ;;  %2197 = vmatmul.mubr.bf16.vlgmr.msra.gmra.mrb[52].mxu0 %v7821_v48  ;;  %10354 = vst [vmem:[#allocation19_spill] sm:$0xff] %v7891_v15  ;;  %v7894_v13 = vld [vmem:[#allocation2 + $0xe4] ss:$16 sps:$4 sm:$0xff]  }
 0x7b7   :  { %2304 = vmatpush1.bf16.msra.mxu0 %v7825_v43  ;;  %2335 = vmatprep.mubr.bf16.mxu0 %v10109_v60  ;;  %10355 = vst [vmem:[#allocation56_spill] sm:$0xff] %v7894_v13 }
 0x7b8   :  { %2305 = vmatprep.subr.bf16.mxu0 %v7829_v20  ;;  %5295 = vmatpush3.bf16.msra.mxu1 %v7835_v44 }
 0x7b9   :  { %5296 = vmatprep.subr.bf16.mxu1 %v10238_v58  ;;  %5310 = vmatprep.mubr.msk.bf16.mxu1 %vm6512_vm0, %v10238_v58 }
 0x7bb   :  { %2306 = vmatpush1.bf16.msra.mxu0 %v7841_v14 }
 0x7bc   :  { %2307 = vmatprep.subr.bf16.mxu0 %v7844_v36  ;;  %5297 = vmatpush3.bf16.msra.mxu1 %v7850_v19 }
 0x7bd   :  { %5298 = vmatprep.subr.bf16.mxu1 %v10238_v58 }
 0x7bf   :  { %2308 = vmatpush1.bf16.msra.mxu0 %v7854_v53 }
 0x7c0   :  { %2309 = vmatprep.subr.bf16.mxu0 %v7857_v8  ;;  %5299 = vmatpush3.bf16.msra.mxu1 %v7863_v61 }
 0x7c1   :  { %5300 = vmatprep.subr.bf16.mxu1 %v10238_v58 }
 0x7c3   :  { %2310 = vmatpush1.bf16.msra.mxu0 %v7867_v2 }
 0x7c4   :  { %2311 = vmatprep.subr.bf16.mxu0 %v7870_v12  ;;  %5301 = vmatpush3.bf16.msra.mxu1 %v7613_v23 }
 0x7c5   :  { %5302 = vmatprep.subr.bf16.mxu1 %v10238_v58 }
 0x7c7   :  { %2312 = vmatpush1.bf16.msra.mxu0 %v7875_v37 }
 0x7c8   :  { %2313 = vmatprep.subr.bf16.mxu0 %v7878_v47  ;;  %5303 = vmatpush3.bf16.msra.mxu1 %v7622_v25 }
 0x7c9   :  { %5304 = vmatprep.subr.bf16.mxu1 %v10238_v58 }
 0x7cb   :  { %2314 = vmatpush1.bf16.msra.mxu0 %v7883_v4  ;;  %v7899_v4 = vld [vmem:[#allocation2 + $0xe0] ss:$16 sps:$4 sm:$0xff]  }
 0x7cc   :  { %2315 = vmatprep.subr.bf16.mxu0 %v7886_v11  ;;  %5305 = vmatpush3.bf16.msra.mxu1 %v7633_v1  ;;  %10356 = vst [vmem:[#allocation58_spill] sm:$0xff] %v7899_v4  ;;  %v7902_v11 = vld [vmem:[#allocation7 + $0x4] ss:$16 sps:$4 sm:$0xff]   ;;  %v7906_v1 = vld [vmem:[#allocation2 + $0xc] ss:$16 sps:$4 sm:$0xff]  }
 0x7cd   :  { %5306 = vmatprep.subr.bf16.mxu1 %v10238_v58  ;;  %10357 = vst [vmem:[#allocation20_spill] sm:$0xff] %v7902_v11  ;;  %10358 = vst [vmem:[#allocation21_spill] sm:$0xff] %v7906_v1 }
 0x7cf   :  { %2316 = vmatpush1.bf16.msra.mxu0 %v7891_v15 }
 0x7d0   :  { %2317 = vmatprep.subr.bf16.mxu0 %v7894_v13  ;;  %5307 = vmatpush3.bf16.msra.mxu1 %v7644_v7  ;;  %v7910_v13 = vld [vmem:[#allocation7] ss:$16 sps:$4 sm:$0xff]   ;;  %v7914_v7 = vld [vmem:[#allocation7 + $0x24] ss:$16 sps:$4 sm:$0xff]  }
 0x7d1   :  { %5308 = vmatprep.subr.bf16.mxu1 %v10238_v58  ;;  %10359 = vst [vmem:[#allocation60_spill] sm:$0xff] %v7910_v13  ;;  %10360 = vst [vmem:[#allocation62_spill] sm:$0xff] %v7914_v7 }
 0x7d3   :  { %2318 = vmatpush1.bf16.msra.mxu0 %v7899_v4  ;;  %v7917_v4 = vld [vmem:[#allocation7 + $0x20] ss:$16 sps:$4 sm:$0xff]  }
 0x7d4   :  { %2418 = vmatprep.subr.bf16.mxu0 %v7902_v11  ;;  %5309 = vmatpush3.bf16.msra.mxu1 %v7653_v9  ;;  %10361 = vst [vmem:[#allocation95_spill] sm:$0xff] %v7917_v4  ;;  %v7920_v9 = vld [vmem:[#allocation7 + $0x44] ss:$16 sps:$4 sm:$0xff]  }
 0x7d5   :  { %2344 = vmatprep.subr.bf16.mxu1 %v7906_v1  ;;  %10362 = vst [vmem:[#allocation96_spill] sm:$0xff] %v7920_v9  ;;  %v7923_v1 = vld [vmem:[#allocation7 + $0x40] ss:$16 sps:$4 sm:$0xff]   ;;  %v7926_v11 = vld [vmem:[#allocation7 + $0x64] ss:$16 sps:$4 sm:$0xff]  }
 0x7d6   :  { %2336 = vmatmul.mubr.bf16.vlgmr.msra.gmra.mrb[56].mxu0 %v7821_v48  ;;  %10363 = vst [vmem:[#allocation97_spill] sm:$0xff] %v7923_v1  ;;  %10364 = vst [vmem:[#allocation98_spill] sm:$0xff] %v7926_v11 }
 0x7d7   :  { %2419 = vmatpush1.bf16.msra.mxu0 %v7910_v13  ;;  %2450 = vmatprep.mubr.bf16.mxu0 %v10109_v60  ;;  %v7929_v13 = vld [vmem:[#allocation7 + $0x60] ss:$16 sps:$4 sm:$0xff]  }
 0x7d8   :  { %2420 = vmatprep.subr.bf16.mxu0 %v7914_v7  ;;  %10365 = vst [vmem:[#allocation99_spill] sm:$0xff] %v7929_v13 }
 0x7db   :  { %2421 = vmatpush1.bf16.msra.mxu0 %v7917_v4 }
 0x7dc   :  { %2422 = vmatprep.subr.bf16.mxu0 %v7920_v9 }
 0x7df   :  { %2423 = vmatpush1.bf16.msra.mxu0 %v7923_v1 }
 0x7e0   :  { %2424 = vmatprep.subr.bf16.mxu0 %v7926_v11 }
 0x7e3   :  { %2425 = vmatpush1.bf16.msra.mxu0 %v7929_v13 }
 0x7e4   :  { %2426 = vmatprep.subr.bf16.mxu0 %v7672_v10 }
 0x7e7   :  { %v1909_v4 = vpop.permute.xlu0 %1908  ;;  %2427 = vmatpush1.bf16.msra.mxu0 %v7675_v29 }
 0x7e8   :  { %1912 = vst.msk [vmem:[#allocation8] sm:$0xff] %vm1911_vm3, %v1909_v4  ;;  %2428 = vmatprep.subr.bf16.mxu0 %v7679_v28 }
 0x7eb   :  { %2429 = vmatpush1.bf16.msra.mxu0 %v7682_v52 }
 0x7ec   :  { %2430 = vmatprep.subr.bf16.mxu0 %v7685_v30 }
 0x7ef   :  { %2431 = vmatpush1.bf16.msra.mxu0 %v7688_v16 }
 0x7f0   :  { %2432 = vmatprep.subr.bf16.mxu0 %v7691_v32 }
 0x7f3   :  { %2433 = vmatpush1.bf16.msra.mxu0 %v7694_v49 }
 0x7f4   :  { %2500 = vmatprep.subr.bf16.mxu0 %v7697_v34 }
 0x80b   :  { %v1915_v10 = vpop.permute.xlu1 %1914 }
 0x80c   :  { %1917 = vst.msk [vmem:[#allocation9] sm:$0xff] %vm1911_vm3, %v1915_v10 }
 0x889   :  { %v2157_v13 = vpop.f32.mrb[48].mxu1  ;;  %v2198_v11 = vpop.f32.mrb[52].mxu0 }
 0x88a   :  { %v2158_v4 = vadd.f32 %v2157_v13, %v7787_v62  ;;  %v2199_v28 = vadd.f32 %v2198_v11, %v7817_v54  ;;  %v2159_v29 = vpop.f32.mrb[49].mxu1  ;;  %v2200_v52 = vpop.f32.mrb[53].mxu0 }
 0x88b   :  { %v2160_v30 = vadd.f32 %v2159_v29, %v7795_v31  ;;  %v2201_v16 = vadd.f32 %v2200_v52, %v7819_v17  ;;  %v2161_v1 = vpop.f32.mrb[50].mxu1  ;;  %v2202_v32 = vpop.f32.mrb[54].mxu0 }
 0x88c   :  { %v2205_v49 = vadd.f32 %v2158_v4, %v7102_v40  ;;  %v2162_v9 = vpop.f32.mrb[51].mxu1  ;;  %v2203_v34 = vpop.f32.mrb[55].mxu0  ;;  %v2207_v11 = vadd.f32 %v2199_v28, %v7114_v39 }
 0x88d   :  { %v2206_v10 = vadd.f32 %v2160_v30, %v7105_v46  ;;  %v2208_v62 = vadd.f32 %v2201_v16, %v7110_v6 }
 0x88e   :  { %v5090_v7 = vmul.f32 -1.442695, %v2205_v49 }
 0x88f   :  { %v5091_v15 = vmul.f32 -1.442695, %v2206_v10  ;;  %v5092_v54 = vmul.f32 -1.442695, %v2208_v62 }
 0x890   :  { %5773 = vpow2.f32 %v5090_v7 }
 0x891   :  { %5775 = vpow2.f32 %v5091_v15 }
 0x892   :  { %5777 = vpow2.f32 %v5092_v54 }
 0x893   :  { %5779 = vtanh.f32 %v2207_v11 }
 0x89a   :  { %v5774_v29 = vpop.eup %5773 }
 0x89b   :  { %v5776_v31 = vpop.eup %5775  ;;  %v2212_v52 = vadd.f32 1.0, %v5774_v29  ;;  %v10382_v29 = vld [vmem:[#allocation32_spill] sm:$0xff] }
 0x89c   :  { %v2218_v1 = vadd.f32 1.0, %v5776_v31  ;;  %v5778_v9 = vpop.eup %5777  ;;  %v10383_v31 = vld [vmem:[#allocation33_spill] sm:$0xff] }
 0x89d   :  { %5781 = vrcp.f32 %v2212_v52  ;;  %v5780_v32 = vpop.eup %5779  ;;  %v2225_v7 = vadd.f32 1.0, %v5778_v9  ;;  %v10384_v52 = vld [vmem:[#allocation34_spill] sm:$0xff]  ;;  %v10386_v9 = vld [vmem:[#allocation36_spill] sm:$0xff] }
 0x89e   :  { %5783 = vrcp.f32 %v2218_v1  ;;  %v10385_v1 = vld [vmem:[#allocation35_spill] sm:$0xff] }
 0x89f   :  { %5785 = vrcp.f32 %v2225_v7  ;;  %v10392_v7 = vld [vmem:[#allocation42_spill] sm:$0xff] }
 0x8a7   :  { %v5782_v30 = vpop.eup %5781 }
 0x8a8   :  { %v5784_v49 = vpop.eup %5783  ;;  %v2229_v34 = vmul.f32 %v5782_v30, %v5780_v32  ;;  %v10387_v32 = vld [vmem:[#allocation37_spill] sm:$0xff]  ;;  %v10388_v30 = vld [vmem:[#allocation38_spill] sm:$0xff] }
 0x8a9   :  { %v2228_v17 = vmul.f32 %v5784_v49, %v7713_v3  ;;  %v7950_v16 = vpop.f32.mrb[56].mxu0  ;;  %v5786_v10 = vpop.eup %5785  ;;  %v10370_v3 = vld [vmem:[#allocation24_spill] sm:$0xff]  ;;  %v10389_v49 = vld [vmem:[#allocation39_spill] sm:$0xff] }
 0x8aa   :  { %v7952_v15 = vpop.f32.mrb[57].mxu0 }
 0x8ab   :  { %v7954_v28 = vadd.f32 %v2229_v34, %v2228_v17  ;;  %v2341_v13 = vpop.f32.mrb[58].mxu0  ;;  %v10390_v34 = vld [vmem:[#allocation40_spill] sm:$0xff]  ;;  %v10393_v17 = vld [vmem:[#allocation43_spill] sm:$0xff] }
 0x8ac   :  { %v2342_v4 = vpop.f32.mrb[59].mxu0  ;;  %v10394_v13 = vld [vmem:[#allocation44_spill] sm:$0xff] }
 0x8ad   :  { %5787 = vtanh.f32 %v7954_v28  ;;  %v10395_v4 = vld [vmem:[#allocation45_spill] sm:$0xff] }
 0x8b7   :  { %v5788_v62 = vpop.eup %5787 }
 0x8b8   :  { %v2232_v54 = vmul.f32 %v5788_v62, %v5786_v10  ;;  %v10396_v10 = vld [vmem:[#allocation46_spill] sm:$0xff]  ;;  %v10397_v62 = vld [vmem:[#allocation47_spill] sm:$0xff] }
 0x8ba   :  { %v2233_v11 = vpack.c.bf16 %v2232_v54, %v2232_v54  ;;  %v10398_v54 = vld [vmem:[#allocation49_spill] sm:$0xff] }
 0x8bc   :  { %5311 = vmatmul.mubr.bf16.vlgmr.msra.gmra.mrb[52].mxu1 %v2233_v11  ;;  %2451 = vmatmul.mubr.bf16.vlgmr.msra.gmra.mrb[60].mxu0 %v2233_v11 }
 0x8bd   :  { %2345 = vmatpush1.bf16.msra.mxu1 %v7368_v42  ;;  %2376 = vmatprep.mubr.bf16.mxu1 %v10109_v60  ;;  %v10366_v42 = vld [vmem:[#allocation22_spill] sm:$0xff] }
 0x8be   :  { %2346 = vmatprep.subr.bf16.mxu1 %v7372_v26  ;;  %2501 = vmatpush1.bf16.msra.mxu0 %v7375_v33  ;;  %v10367_v26 = vld [vmem:[#allocation23_spill] sm:$0xff]  ;;  %v10368_v33 = vld [vmem:[#allocation64_spill] sm:$0xff] }
 0x8bf   :  { %2502 = vmatprep.subr.bf16.mxu0 %v7378_v0  ;;  %2532 = vmatprep.mubr.bf16.mxu0 %v10109_v60  ;;  %v10369_v0 = vld [vmem:[#allocation66_spill] sm:$0xff] }
 0x8c1   :  { %2347 = vmatpush1.bf16.msra.mxu1 %v10289_v63  ;;  %v10371_v63 = vld [vmem:[#allocation25_spill] sm:$0xff] }
 0x8c2   :  { %2348 = vmatprep.subr.bf16.mxu1 %v10290_v38  ;;  %2503 = vmatpush1.bf16.msra.mxu0 %v10291_v55  ;;  %v10372_v38 = vld [vmem:[#allocation68_spill] sm:$0xff]  ;;  %v10373_v55 = vld [vmem:[#allocation70_spill] sm:$0xff] }
 0x8c3   :  { %2504 = vmatprep.subr.bf16.mxu0 %v10292_v51  ;;  %v10374_v51 = vld [vmem:[#allocation27_spill] sm:$0xff] }
 0x8c5   :  { %2349 = vmatpush1.bf16.msra.mxu1 %v10293_v45  ;;  %v10375_v45 = vld [vmem:[#allocation28_spill] sm:$0xff] }
 0x8c6   :  { %2350 = vmatprep.subr.bf16.mxu1 %v10294_v41  ;;  %2505 = vmatpush1.bf16.msra.mxu0 %v10295_v21  ;;  %v10376_v41 = vld [vmem:[#allocation72_spill] sm:$0xff]  ;;  %v10377_v21 = vld [vmem:[#allocation74_spill] sm:$0xff] }
 0x8c7   :  { %2506 = vmatprep.subr.bf16.mxu0 %v10296_v50  ;;  %v10378_v50 = vld [vmem:[#allocation29_spill] sm:$0xff] }
 0x8c9   :  { %2351 = vmatpush1.bf16.msra.mxu1 %v10297_v5  ;;  %v10379_v5 = vld [vmem:[#allocation30_spill] sm:$0xff] }
 0x8ca   :  { %2352 = vmatprep.subr.bf16.mxu1 %v10298_v56  ;;  %2507 = vmatpush1.bf16.msra.mxu0 %v10299_v57  ;;  %v10380_v56 = vld [vmem:[#allocation76_spill] sm:$0xff]  ;;  %v10381_v57 = vld [vmem:[#allocation31_spill] sm:$0xff] }
 0x8cb   :  { %2508 = vmatprep.subr.bf16.mxu0 %v10366_v42  ;;  %v10399_v42 = vld [vmem:[#allocation51_spill] sm:$0xff] }
 0x8cd   :  { %2353 = vmatpush1.bf16.msra.mxu1 %v10367_v26  ;;  %v10400_v26 = vld [vmem:[#allocation53_spill] sm:$0xff] }
 0x8ce   :  { %2354 = vmatprep.subr.bf16.mxu1 %v10368_v33  ;;  %2509 = vmatpush1.bf16.msra.mxu0 %v10369_v0  ;;  %v10401_v33 = vld [vmem:[#allocation55_spill] sm:$0xff]  ;;  %v10402_v0 = vld [vmem:[#allocation57_spill] sm:$0xff] }
 0x8cf   :  { %2510 = vmatprep.subr.bf16.mxu0 %v10370_v3  ;;  %v10403_v3 = vld [vmem:[#allocation59_spill] sm:$0xff] }
 0x8d1   :  { %2355 = vmatpush1.bf16.msra.mxu1 %v10371_v63  ;;  %v10404_v63 = vld [vmem:[#allocation61_spill] sm:$0xff] }
 0x8d2   :  { %2356 = vmatprep.subr.bf16.mxu1 %v10372_v38  ;;  %2511 = vmatpush1.bf16.msra.mxu0 %v10373_v55  ;;  %v10405_v38 = vld [vmem:[#allocation63_spill] sm:$0xff]  ;;  %v10406_v55 = vld [vmem:[#allocation65_spill] sm:$0xff] }
 0x8d3   :  { %2512 = vmatprep.subr.bf16.mxu0 %v10374_v51  ;;  %v10408_v51 = vld [vmem:[#allocation69_spill] sm:$0xff] }
 0x8d5   :  { %2357 = vmatpush1.bf16.msra.mxu1 %v10375_v45  ;;  %v10409_v45 = vld [vmem:[#allocation71_spill] sm:$0xff] }
 0x8d6   :  { %2358 = vmatprep.subr.bf16.mxu1 %v10376_v41  ;;  %2513 = vmatpush1.bf16.msra.mxu0 %v10377_v21  ;;  %v10410_v41 = vld [vmem:[#allocation73_spill] sm:$0xff]  ;;  %v10411_v21 = vld [vmem:[#allocation75_spill] sm:$0xff] }
 0x8d7   :  { %2514 = vmatprep.subr.bf16.mxu0 %v10378_v50  ;;  %v10412_v50 = vld [vmem:[#allocation26_spill] sm:$0xff] }
 0x8d9   :  { %2359 = vmatpush1.bf16.msra.mxu1 %v10379_v5  ;;  %v10413_v5 = vld [vmem:[#allocation17_spill] sm:$0xff] }
 0x8da   :  { %2459 = vmatprep.subr.bf16.mxu1 %v10380_v56  ;;  %2515 = vmatpush1.bf16.msra.mxu0 %v10381_v57 }
 0x8db   :  { %5314 = vmatprep.subr.bf16.mxu0 %v10238_v58 }
 0x8dc   :  { %2377 = vmatmul.mubr.bf16.vlgmr.msra.gmra.mrb[56].mxu1 %v7821_v48  ;;  %v10391_v48 = vld [vmem:[#allocation41_spill] sm:$0xff] }
 0x8dd   :  { %2460 = vmatpush1.bf16.msra.mxu1 %v10382_v29  ;;  %2491 = vmatprep.mubr.bf16.mxu1 %v10109_v60  ;;  %v10414_v29 = vld [vmem:[#allocation52_spill] sm:$0xff] }
 0x8de   :  { %2461 = vmatprep.subr.bf16.mxu1 %v10383_v31 }
 0x8e1   :  { %2462 = vmatpush1.bf16.msra.mxu1 %v10384_v52 }
 0x8e2   :  { %2463 = vmatprep.subr.bf16.mxu1 %v10385_v1 }
 0x8e5   :  { %2464 = vmatpush1.bf16.msra.mxu1 %v10386_v9  ;;  %v10415_v9 = vld [vmem:[#allocation78_spill] sm:$0xff] }
 0x8e6   :  { %2465 = vmatprep.subr.bf16.mxu1 %v10387_v32  ;;  %v10416_v32 = vld [vmem:[#allocation80_spill] sm:$0xff] }
 0x8e9   :  { %2466 = vmatpush1.bf16.msra.mxu1 %v10388_v30  ;;  %v2300_v30 = vmul.f32 %v10416_v32, %v10415_v9 }
 0x8ea   :  { %2467 = vmatprep.subr.bf16.mxu1 %v10389_v49 }
 0x8ed   :  { %2468 = vmatpush1.bf16.msra.mxu1 %v10390_v34 }
 0x8ee   :  { %2469 = vmatprep.subr.bf16.mxu1 %v10391_v48  ;;  %v10417_v48 = vld [vmem:[#allocation77_spill] sm:$0xff] }
 0x8f1   :  { %2470 = vmatpush1.bf16.msra.mxu1 %v10392_v7  ;;  %v2299_v7 = vmul.f32 %v10416_v32, %v10417_v48 }
 0x8f2   :  { %2471 = vmatprep.subr.bf16.mxu1 %v10393_v17 }
 0x8f5   :  { %2472 = vmatpush1.bf16.msra.mxu1 %v10394_v13 }
 0x8f6   :  { %2473 = vmatprep.subr.bf16.mxu1 %v10395_v4 }
 0x8f9   :  { %2474 = vmatpush1.bf16.msra.mxu1 %v10396_v10 }
 0x8fa   :  { %2541 = vmatprep.subr.bf16.mxu1 %v10397_v62  ;;  %v2386_v62 = vadd.f32 %v7952_v15, %v2300_v30 }
 0x8fc   :  { %2492 = vmatmul.mubr.bf16.vlgmr.msra.gmra.mrb[60].mxu1 %v2233_v11  ;;  %v10407_v11 = vld [vmem:[#allocation67_spill] sm:$0xff] }
 0x8fd   :  { %2542 = vmatpush1.bf16.msra.mxu1 %v10398_v54  ;;  %2573 = vmatprep.mubr.bf16.mxu1 %v10109_v60  ;;  %v2385_v54 = vadd.f32 %v7950_v16, %v2299_v7 }
 0x8fe   :  { %2543 = vmatprep.subr.bf16.mxu1 %v10399_v42 }
 0x901   :  { %2544 = vmatpush1.bf16.msra.mxu1 %v10400_v26  ;;  %v2390_v26 = vadd.f32 %v2386_v62, %v6978_v18 }
 0x902   :  { %2545 = vmatprep.subr.bf16.mxu1 %v10401_v33  ;;  %v2389_v33 = vadd.f32 %v2385_v54, %v6973_v22 }
 0x905   :  { %2546 = vmatpush1.bf16.msra.mxu1 %v10402_v0  ;;  %v5094_v0 = vmul.f32 -1.442695, %v2390_v26 }
 0x906   :  { %2547 = vmatprep.subr.bf16.mxu1 %v10403_v3  ;;  %v5093_v3 = vmul.f32 -1.442695, %v2389_v33 }
 0x909   :  { %2548 = vmatpush1.bf16.msra.mxu1 %v10404_v63 }
 0x90a   :  { %2549 = vmatprep.subr.bf16.mxu1 %v10405_v38 }
 0x90d   :  { %2550 = vmatpush1.bf16.msra.mxu1 %v10406_v55 }
 0x90e   :  { %2551 = vmatprep.subr.bf16.mxu1 %v10407_v11 }
 0x911   :  { %2552 = vmatpush1.bf16.msra.mxu1 %v10408_v51 }
 0x912   :  { %2553 = vmatprep.subr.bf16.mxu1 %v10409_v45  ;;  %v10418_v45 = vld [vmem:[#allocation79_spill] sm:$0xff] }
 0x913   :  { %v2301_v15 = vmul.f32 %v10416_v32, %v10418_v45 }
 0x915   :  { %2554 = vmatpush1.bf16.msra.mxu1 %v10410_v41 }
 0x916   :  { %2555 = vmatprep.subr.bf16.mxu1 %v10411_v21 }
 0x919   :  { %2556 = vmatpush1.bf16.msra.mxu1 %v10412_v50  ;;  %v2302_v50 = vmul.f32 %v10416_v32, %v6970_v35 }
 0x91a   :  { %2680 = vmatprep.subr.bf16.mxu1 %v10413_v5 }
 0x98f   :  { %v2268_v56 = vpop.f32.mrb[52].mxu1  ;;  %v8026_v57 = vpop.f32.mrb[60].mxu0 }
 0x990   :  { %v2269_v31 = vadd.f32 %v10414_v29, %v2268_v56  ;;  %v5312_v52 = vpop.f32.mrb[53].mxu1  ;;  %v8029_v1 = vpop.f32.mrb[61].mxu0 }
 0x991   :  { %v2271_v49 = vpop.f32.mrb[54].mxu1  ;;  %v2456_v34 = vpop.f32.mrb[62].mxu0 }
 0x992   :  { %v2275_v17 = vand.u32 2147483647, %v2269_v31  ;;  %v2457_v13 = vpop.f32.mrb[63].mxu0  ;;  %2285 = vrot.lane.b32.xlu0 %v2269_v31, %s6525_s30  ;;  %v5313_v4 = vpop.f32.mrb[55].mxu1  ;;  %v2274_v56 = vmax.f32 %v2269_v31, 0.0 }
 0x994   :  { %v2276_v10 = vsub.f32 0.0, %v2275_v17 }
 0x996   :  { %v2277_v42 = vmul.f32 1.442695, %v2276_v10 }
 0x998   :  { %5789 = vpow2.f32 %v2277_v42 }
 0x999   :  { %5791 = vpow2.f32 %v5094_v0 }
 0x99a   :  { %5793 = vpow2.f32 %v5093_v3 }
 0x9a2   :  { %v5790_v63 = vpop.eup %5789 }
 0x9a3   :  { %v2279_v38 = vadd.f32 1.0, %v5790_v63  ;;  %v5792_v55 = vpop.eup %5791 }
 0x9a4   :  { %v5794_v11 = vpop.eup %5793  ;;  %v2402_v51 = vadd.f32 1.0, %v5792_v55 }
 0x9a5   :  { %5795 = vlog2.f32 %v2279_v38  ;;  %v2396_v41 = vadd.f32 1.0, %v5794_v11 }
 0x9a6   :  { %5797 = vrcp.f32 %v2402_v51 }
 0x9a7   :  { %5799 = vrcp.f32 %v2396_v41 }
 0x9af   :  { %v5796_v16 = vpop.eup %5795  ;;  %v2378_v21 = vpop.f32.mrb[56].mxu1 }
 0x9b0   :  { %v2387_v52 = vadd.f32 %v2378_v21, %v2301_v15  ;;  %v2380_v30 = vpop.f32.mrb[57].mxu1  ;;  %v2281_v49 = vmul.f32 0.6931472, %v5796_v16  ;;  %v5798_v31 = vpop.eup %5797 }
 0x9b1   :  { %v2388_v34 = vadd.f32 %v2380_v30, %v2302_v50  ;;  %v2382_v7 = vpop.f32.mrb[58].mxu1  ;;  %v5800_v32 = vpop.eup %5799  ;;  %v2412_v26 = vmul.f32 %v5798_v31, %v7814_v59  ;;  %v10419_v59 = vld [vmem:[#allocation54_spill] sm:$0xff]  ;;  %v10424_v30 = vld [vmem:[#allocation83_spill] sm:$0xff] }
 0x9b2   :  { %v2391_v17 = vadd.f32 %v2387_v52, %v6992_v24  ;;  %v2383_v13 = vpop.f32.mrb[59].mxu1  ;;  %v2282_v4 = vadd.f32 %v2281_v49, %v2274_v56  ;;  %v10420_v50 = vld [vmem:[#allocation18_spill] sm:$0xff]  ;;  %v10421_v56 = vld [vmem:[#allocation81_spill] sm:$0xff]  ;;  %v10422_v52 = vld [vmem:[#allocation19_spill] sm:$0xff] }
 0x9b3   :  { %v2392_v10 = vadd.f32 %v2388_v34, %v6987_v27  ;;  %v10425_v49 = vld [vmem:[#allocation58_spill] sm:$0xff]  ;;  %v10427_v34 = vld [vmem:[#allocation84_spill] sm:$0xff]  ;;  %v10428_v7 = vld [vmem:[#allocation21_spill] sm:$0xff] }
 0x9b4   :  { %5801 = vtanh.f32 %v2391_v17  ;;  %v2283_v62 = vadd.f32 1e-06, %v2282_v4  ;;  %v10429_v17 = vld [vmem:[#allocation60_spill] sm:$0xff]  ;;  %v10430_v13 = vld [vmem:[#allocation62_spill] sm:$0xff]  ;;  %v10431_v4 = vld [vmem:[#allocation95_spill] sm:$0xff] }
 0x9b5   :  { %v5095_v54 = vmul.f32 -1.442695, %v2392_v10  ;;  %v10432_v10 = vld [vmem:[#allocation96_spill] sm:$0xff]  ;;  %v10435_v31 = vld [vmem:[#allocation99_spill] sm:$0xff] }
 0x9b6   :  { %2291 = vrot.lane.b32.xlu1 %v2283_v62, %s6524_s21  ;;  %v10433_v62 = vld [vmem:[#allocation97_spill] sm:$0xff] }
 0x9b7   :  { %5803 = vpow2.f32 %v5095_v54  ;;  %v10434_v54 = vld [vmem:[#allocation98_spill] sm:$0xff] }
 0x9be   :  { %v5802_v42 = vpop.eup %5801 }
 0x9bf   :  { %v2413_v33 = vmul.f32 %v5802_v42, %v5800_v32  ;;  %v10436_v32 = vld [vmem:[#allocation48_spill] sm:$0xff] }
 0x9c1   :  { %v5804_v0 = vpop.eup %5803  ;;  %v8048_v3 = vadd.f32 %v2413_v33, %v2412_v26  ;;  %v10437_v26 = vld [vmem:[#allocation87_spill] sm:$0xff]  ;;  %v10438_v33 = vld [vmem:[#allocation88_spill] sm:$0xff] }
 0x9c2   :  { %v2409_v63 = vadd.f32 1.0, %v5804_v0  ;;  %v10439_v0 = vld [vmem:[#allocation89_spill] sm:$0xff] }
 0x9c3   :  { %5805 = vtanh.f32 %v8048_v3 }
 0x9c4   :  { %5807 = vrcp.f32 %v2409_v63  ;;  %v10440_v63 = vld [vmem:[#allocation90_spill] sm:$0xff] }
 0x9cd   :  { %v5806_v38 = vpop.eup %5805 }
 0x9ce   :  { %v5808_v55 = vpop.eup %5807 }
 0x9cf   :  { %v8051_v11 = vpop.f32.mrb[60].mxu1  ;;  %v2416_v51 = vmul.f32 %v5808_v55, %v5806_v38  ;;  %v10441_v38 = vld [vmem:[#allocation91_spill] sm:$0xff]  ;;  %v10442_v55 = vld [vmem:[#allocation92_spill] sm:$0xff] }
 0x9d0   :  { %v8053_v15 = vpop.f32.mrb[61].mxu1 }
 0x9d1   :  { %v2497_v16 = vpop.f32.mrb[62].mxu1  ;;  %v8055_v41 = vpack.c.bf16 %v2416_v51, %v2416_v51  ;;  %v10443_v51 = vld [vmem:[#allocation93_spill] sm:$0xff] }
 0x9d2   :  { %v2498_v21 = vpop.f32.mrb[63].mxu1  ;;  %v10444_v16 = vld [vmem:[#allocation94_spill] sm:$0xff] }
 0x9d3   :  { %2533 = vmatmul.mubr.bf16.vlgmr.msra.gmra.mrb[64].mxu0 %v8055_v41  ;;  %2574 = vmatmul.mubr.bf16.vlgmr.msra.gmra.mrb[64].mxu1 %v8055_v41 }
 0x9d4   :  { %2681 = vmatpush1.bf16.msra.mxu1 %v7825_v43  ;;  %2712 = vmatprep.mubr.bf16.mxu1 %v10109_v60 }
 0x9d5   :  { %2682 = vmatprep.subr.bf16.mxu1 %v7829_v20  ;;  %5315 = vmatpush3.bf16.msra.mxu0 %v7835_v44 }
 0x9d6   :  { %5316 = vmatprep.subr.bf16.mxu0 %v10238_v58  ;;  %5330 = vmatprep.mubr.msk.bf16.mxu0 %vm6512_vm0, %v10238_v58 }
 0x9d8   :  { %2683 = vmatpush1.bf16.msra.mxu1 %v7841_v14 }
 0x9d9   :  { %2684 = vmatprep.subr.bf16.mxu1 %v7844_v36  ;;  %5317 = vmatpush3.bf16.msra.mxu0 %v7850_v19 }
 0x9da   :  { %5318 = vmatprep.subr.bf16.mxu0 %v10238_v58 }
 0x9dc   :  { %2685 = vmatpush1.bf16.msra.mxu1 %v7854_v53 }
 0x9dd   :  { %2686 = vmatprep.subr.bf16.mxu1 %v7857_v8  ;;  %5319 = vmatpush3.bf16.msra.mxu0 %v7863_v61 }
 0x9de   :  { %5320 = vmatprep.subr.bf16.mxu0 %v10238_v58 }
 0x9e0   :  { %2687 = vmatpush1.bf16.msra.mxu1 %v7867_v2 }
 0x9e1   :  { %2688 = vmatprep.subr.bf16.mxu1 %v7870_v12  ;;  %5321 = vmatpush3.bf16.msra.mxu0 %v7613_v23  ;;  %v10423_v23 = vld [vmem:[#allocation56_spill] sm:$0xff] }
 0x9e2   :  { %5322 = vmatprep.subr.bf16.mxu0 %v10238_v58 }
 0x9e4   :  { %2689 = vmatpush1.bf16.msra.mxu1 %v7875_v37 }
 0x9e5   :  { %2690 = vmatprep.subr.bf16.mxu1 %v7878_v47  ;;  %5323 = vmatpush3.bf16.msra.mxu0 %v7622_v25  ;;  %v10426_v25 = vld [vmem:[#allocation20_spill] sm:$0xff] }
 0x9e6   :  { %5324 = vmatprep.subr.bf16.mxu0 %v10238_v58 }
 0x9e8   :  { %2691 = vmatpush1.bf16.msra.mxu1 %v10419_v59 }
 0x9e9   :  { %2692 = vmatprep.subr.bf16.mxu1 %v10420_v50  ;;  %5325 = vmatpush3.bf16.msra.mxu0 %v10421_v56 }
 0x9ea   :  { %5326 = vmatprep.subr.bf16.mxu0 %v10238_v58 }
 0x9ec   :  { %2693 = vmatpush1.bf16.msra.mxu1 %v10422_v52 }
 0x9ed   :  { %2694 = vmatprep.subr.bf16.mxu1 %v10423_v23  ;;  %5327 = vmatpush3.bf16.msra.mxu0 %v10424_v30 }
 0x9ee   :  { %5328 = vmatprep.subr.bf16.mxu0 %v10238_v58 }
 0x9f0   :  { %2695 = vmatpush1.bf16.msra.mxu1 %v10425_v49 }
 0x9f1   :  { %2795 = vmatprep.subr.bf16.mxu1 %v10426_v25  ;;  %5329 = vmatpush3.bf16.msra.mxu0 %v10427_v34 }
 0x9f2   :  { %2721 = vmatprep.subr.bf16.mxu0 %v10428_v7 }
 0x9f3   :  { %2713 = vmatmul.mubr.bf16.vlgmr.msra.gmra.mrb[68].mxu1 %v8055_v41 }
 0x9f4   :  { %2796 = vmatpush1.bf16.msra.mxu1 %v10429_v17  ;;  %2827 = vmatprep.mubr.bf16.mxu1 %v10109_v60 }
 0x9f5   :  { %2797 = vmatprep.subr.bf16.mxu1 %v10430_v13 }
 0x9f8   :  { %2798 = vmatpush1.bf16.msra.mxu1 %v10431_v4 }
 0x9f9   :  { %2799 = vmatprep.subr.bf16.mxu1 %v10432_v10 }
 0x9fc   :  { %2800 = vmatpush1.bf16.msra.mxu1 %v10433_v62 }
 0x9fd   :  { %2801 = vmatprep.subr.bf16.mxu1 %v10434_v54 }
 0xa00   :  { %2802 = vmatpush1.bf16.msra.mxu1 %v10435_v31 }
 0xa01   :  { %2803 = vmatprep.subr.bf16.mxu1 %v10436_v32 }
 0xa04   :  { %v2286_v42 = vpop.permute.xlu0 %2285  ;;  %2804 = vmatpush1.bf16.msra.mxu1 %v10437_v26 }
 0xa05   :  { %2289 = vst.msk [vmem:[#allocation8] sm:$0xff] %vm2288_vm4, %v2286_v42  ;;  %2805 = vmatprep.subr.bf16.mxu1 %v10438_v33 }
 0xa08   :  { %2806 = vmatpush1.bf16.msra.mxu1 %v10439_v0 }
 0xa09   :  { %2807 = vmatprep.subr.bf16.mxu1 %v10440_v63 }
 0xa0c   :  { %2808 = vmatpush1.bf16.msra.mxu1 %v10441_v38 }
 0xa0d   :  { %2809 = vmatprep.subr.bf16.mxu1 %v10442_v55 }
 0xa10   :  { %2810 = vmatpush1.bf16.msra.mxu1 %v10443_v51 }
 0xa11   :  { %2877 = vmatprep.subr.bf16.mxu1 %v10444_v16 }
 0xa28   :  { %v2292_v21 = vpop.permute.xlu1 %2291 }
 0xa29   :  { %2294 = vst.msk [vmem:[#allocation9] sm:$0xff] %vm2288_vm4, %v2292_v21 }
 0xaa6   :  { %v2534_v56 = vpop.f32.mrb[64].mxu0  ;;  %v2575_v30 = vpop.f32.mrb[64].mxu1 }
 0xaa7   :  { %v2535_v34 = vadd.f32 %v2534_v56, %v8026_v57  ;;  %v2576_v32 = vadd.f32 %v2575_v30, %v8051_v11  ;;  %v2536_v42 = vpop.f32.mrb[65].mxu0  ;;  %v2577_v26 = vpop.f32.mrb[65].mxu1 }
 0xaa8   :  { %v2537_v33 = vadd.f32 %v2536_v42, %v8029_v1  ;;  %v2578_v0 = vadd.f32 %v2577_v26, %v8053_v15  ;;  %v2538_v63 = vpop.f32.mrb[66].mxu0  ;;  %v2579_v38 = vpop.f32.mrb[66].mxu1 }
 0xaa9   :  { %v2582_v55 = vadd.f32 %v2535_v34, %v7102_v40  ;;  %v2539_v51 = vpop.f32.mrb[67].mxu0  ;;  %v2580_v16 = vpop.f32.mrb[67].mxu1  ;;  %v2584_v56 = vadd.f32 %v2576_v32, %v7114_v39 }
 0xaaa   :  { %v2583_v21 = vadd.f32 %v2537_v33, %v7105_v46  ;;  %v2585_v57 = vadd.f32 %v2578_v0, %v7110_v6 }
 0xaab   :  { %v5096_v31 = vmul.f32 -1.442695, %v2582_v55 }
 0xaac   :  { %v5097_v54 = vmul.f32 -1.442695, %v2583_v21  ;;  %v5098_v11 = vmul.f32 -1.442695, %v2585_v57 }
 0xaad   :  { %5809 = vpow2.f32 %v5096_v31 }
 0xaae   :  { %5811 = vpow2.f32 %v5097_v54 }
 0xaaf   :  { %5813 = vpow2.f32 %v5098_v11 }
 0xab0   :  { %5815 = vtanh.f32 %v2584_v56 }
 0xab7   :  { %v5810_v1 = vpop.eup %5809 }
 0xab8   :  { %v5812_v30 = vpop.eup %5811  ;;  %v2589_v15 = vadd.f32 1.0, %v5810_v1  ;;  %v8136_v1 = vld [vmem:[#allocation2 + $0x2c] ss:$16 sps:$4 sm:$0xff]  }
 0xab9   :  { %v2595_v42 = vadd.f32 1.0, %v5812_v30  ;;  %v5814_v34 = vpop.eup %5813  ;;  %v8139_v30 = vld [vmem:[#allocation5] ss:$16 sps:$4 sm:$0xff]  }
 0xaba   :  { %5817 = vrcp.f32 %v2589_v15  ;;  %v5816_v26 = vpop.eup %5815  ;;  %v2602_v31 = vadd.f32 1.0, %v5814_v34  ;;  %v8142_v15 = vld [vmem:[#allocation5 + $0x24] ss:$16 sps:$4 sm:$0xff]   ;;  %v8149_v34 = vld [vmem:[#allocation2 + $0x4c] ss:$16 sps:$4 sm:$0xff]  }
 0xabb   :  { %5819 = vrcp.f32 %v2595_v42  ;;  %v8146_v42 = vld [vmem:[#allocation2 + $0x28] ss:$16 sps:$4 sm:$0xff]   ;;  %10446 = vst [vmem:[#allocation23_spill] sm:$0xff] %v8149_v34 }
 0xabc   :  { %5821 = vrcp.f32 %v2602_v31  ;;  %10445 = vst [vmem:[#allocation22_spill] sm:$0xff] %v8146_v42  ;;  %v8164_v31 = vld [vmem:[#allocation5 + $0x40] ss:$16 sps:$4 sm:$0xff]  }
 0xabd   :  { %10451 = vst [vmem:[#allocation68_spill] sm:$0xff] %v8164_v31 }
 0xac4   :  { %v5818_v33 = vpop.eup %5817 }
 0xac5   :  { %v5820_v63 = vpop.eup %5819  ;;  %v2606_v38 = vmul.f32 %v5818_v33, %v5816_v26  ;;  %v8152_v26 = vld [vmem:[#allocation5 + $0x20] ss:$16 sps:$4 sm:$0xff]   ;;  %v8155_v33 = vld [vmem:[#allocation5 + $0x44] ss:$16 sps:$4 sm:$0xff]  }
 0xac6   :  { %v2605_v54 = vmul.f32 %v5820_v63, %v7954_v28  ;;  %v8121_v0 = vpop.f32.mrb[68].mxu1  ;;  %v5822_v21 = vpop.eup %5821  ;;  %v8132_v28 = vld [vmem:[#allocation2 + $0x8] ss:$16 sps:$4 sm:$0xff]   ;;  %10447 = vst [vmem:[#allocation64_spill] sm:$0xff] %v8152_v26  ;;  %10448 = vst [vmem:[#allocation66_spill] sm:$0xff] %v8155_v33 }
 0xac7   :  { %v8123_v55 = vpop.f32.mrb[69].mxu1  ;;  %v8158_v63 = vld [vmem:[#allocation2 + $0x48] ss:$16 sps:$4 sm:$0xff]  }
 0xac8   :  { %v8125_v32 = vadd.f32 %v2606_v38, %v2605_v54  ;;  %v2718_v51 = vpop.f32.mrb[70].mxu1  ;;  %10449 = vst [vmem:[#allocation24_spill] sm:$0xff] %v8158_v63  ;;  %v8161_v38 = vld [vmem:[#allocation2 + $0x6c] ss:$16 sps:$4 sm:$0xff]   ;;  %v8167_v54 = vld [vmem:[#allocation5 + $0x64] ss:$16 sps:$4 sm:$0xff]  }
 0xac9   :  { %v2719_v16 = vpop.f32.mrb[71].mxu1  ;;  %10450 = vst [vmem:[#allocation25_spill] sm:$0xff] %v8161_v38  ;;  %10452 = vst [vmem:[#allocation70_spill] sm:$0xff] %v8167_v54  ;;  %v8170_v51 = vld [vmem:[#allocation2 + $0x68] ss:$16 sps:$4 sm:$0xff]  }
 0xaca   :  { %5823 = vtanh.f32 %v8125_v32  ;;  %10453 = vst [vmem:[#allocation27_spill] sm:$0xff] %v8170_v51  ;;  %v8173_v16 = vld [vmem:[#allocation2 + $0x8c] ss:$16 sps:$4 sm:$0xff]  }
 0xacb   :  { %10454 = vst [vmem:[#allocation28_spill] sm:$0xff] %v8173_v16 }
 0xad4   :  { %v5824_v57 = vpop.eup %5823 }
 0xad5   :  { %v2609_v11 = vmul.f32 %v5824_v57, %v5822_v21  ;;  %v8176_v21 = vld [vmem:[#allocation5 + $0x60] ss:$16 sps:$4 sm:$0xff]   ;;  %v8179_v57 = vld [vmem:[#allocation5 + $0x84] ss:$16 sps:$4 sm:$0xff]  }
 0xad6   :  { %10455 = vst [vmem:[#allocation72_spill] sm:$0xff] %v8176_v21  ;;  %10456 = vst [vmem:[#allocation74_spill] sm:$0xff] %v8179_v57 }
 0xad7   :  { %v8128_v56 = vpack.c.bf16 %v2609_v11, %v2609_v11  ;;  %v8182_v11 = vld [vmem:[#allocation2 + $0x88] ss:$16 sps:$4 sm:$0xff]  }
 0xad8   :  { %10457 = vst [vmem:[#allocation29_spill] sm:$0xff] %v8182_v11 }
 0xad9   :  { %5331 = vmatmul.mubr.bf16.vlgmr.msra.gmra.mrb[68].mxu0 %v8128_v56  ;;  %2828 = vmatmul.mubr.bf16.vlgmr.msra.gmra.mrb[72].mxu1 %v8128_v56 }
 0xada   :  { %2722 = vmatpush1.bf16.msra.mxu0 %v8132_v28  ;;  %2753 = vmatprep.mubr.bf16.mxu0 %v10109_v60 }
 0xadb   :  { %2723 = vmatprep.subr.bf16.mxu0 %v8136_v1  ;;  %2878 = vmatpush1.bf16.msra.mxu1 %v8139_v30 }
 0xadc   :  { %2879 = vmatprep.subr.bf16.mxu1 %v8142_v15  ;;  %2909 = vmatprep.mubr.bf16.mxu1 %v10109_v60 }
 0xade   :  { %2724 = vmatpush1.bf16.msra.mxu0 %v8146_v42 }
 0xadf   :  { %2725 = vmatprep.subr.bf16.mxu0 %v8149_v34  ;;  %2880 = vmatpush1.bf16.msra.mxu1 %v8152_v26 }
 0xae0   :  { %2881 = vmatprep.subr.bf16.mxu1 %v8155_v33 }
 0xae2   :  { %2726 = vmatpush1.bf16.msra.mxu0 %v8158_v63 }
 0xae3   :  { %2727 = vmatprep.subr.bf16.mxu0 %v8161_v38  ;;  %2882 = vmatpush1.bf16.msra.mxu1 %v8164_v31 }
 0xae4   :  { %2883 = vmatprep.subr.bf16.mxu1 %v8167_v54  ;;  %v8185_v54 = vld [vmem:[#allocation2 + $0xac] ss:$16 sps:$4 sm:$0xff]  }
 0xae5   :  { %10458 = vst [vmem:[#allocation30_spill] sm:$0xff] %v8185_v54 }
 0xae6   :  { %2728 = vmatpush1.bf16.msra.mxu0 %v8170_v51  ;;  %v8188_v51 = vld [vmem:[#allocation5 + $0x80] ss:$16 sps:$4 sm:$0xff]  }
 0xae7   :  { %2729 = vmatprep.subr.bf16.mxu0 %v8173_v16  ;;  %2884 = vmatpush1.bf16.msra.mxu1 %v8176_v21  ;;  %10459 = vst [vmem:[#allocation76_spill] sm:$0xff] %v8188_v51  ;;  %v8191_v16 = vld [vmem:[#allocation5 + $0xa4] ss:$16 sps:$4 sm:$0xff]   ;;  %v8194_v21 = vld [vmem:[#allocation2 + $0xa8] ss:$16 sps:$4 sm:$0xff]  }
 0xae8   :  { %2885 = vmatprep.subr.bf16.mxu1 %v8179_v57  ;;  %10460 = vst [vmem:[#allocation31_spill] sm:$0xff] %v8191_v16  ;;  %10461 = vst [vmem:[#allocation32_spill] sm:$0xff] %v8194_v21  ;;  %v8197_v57 = vld [vmem:[#allocation2 + $0xcc] ss:$16 sps:$4 sm:$0xff]  }
 0xae9   :  { %10462 = vst [vmem:[#allocation33_spill] sm:$0xff] %v8197_v57 }
 0xaea   :  { %2730 = vmatpush1.bf16.msra.mxu0 %v8182_v11  ;;  %v8200_v11 = vld [vmem:[#allocation5 + $0xa0] ss:$16 sps:$4 sm:$0xff]  }
 0xaeb   :  { %2731 = vmatprep.subr.bf16.mxu0 %v8185_v54  ;;  %2886 = vmatpush1.bf16.msra.mxu1 %v8188_v51  ;;  %10463 = vst [vmem:[#allocation34_spill] sm:$0xff] %v8200_v11  ;;  %v8203_v54 = vld [vmem:[#allocation5 + $0xc4] ss:$16 sps:$4 sm:$0xff]   ;;  %v8206_v51 = vld [vmem:[#allocation2 + $0xc8] ss:$16 sps:$4 sm:$0xff]  }
 0xaec   :  { %2887 = vmatprep.subr.bf16.mxu1 %v8191_v16  ;;  %10464 = vst [vmem:[#allocation35_spill] sm:$0xff] %v8203_v54  ;;  %10465 = vst [vmem:[#allocation36_spill] sm:$0xff] %v8206_v51  ;;  %v8209_v16 = vld [vmem:[#allocation2 + $0xec] ss:$16 sps:$4 sm:$0xff]  }
 0xaed   :  { %10466 = vst [vmem:[#allocation37_spill] sm:$0xff] %v8209_v16 }
 0xaee   :  { %2732 = vmatpush1.bf16.msra.mxu0 %v8194_v21  ;;  %v8212_v21 = vld [vmem:[#allocation5 + $0xc0] ss:$16 sps:$4 sm:$0xff]  }
 0xaef   :  { %2733 = vmatprep.subr.bf16.mxu0 %v8197_v57  ;;  %2888 = vmatpush1.bf16.msra.mxu1 %v8200_v11  ;;  %10467 = vst [vmem:[#allocation38_spill] sm:$0xff] %v8212_v21  ;;  %v8215_v57 = vld [vmem:[#allocation5 + $0xe4] ss:$16 sps:$4 sm:$0xff]   ;;  %v8218_v11 = vld [vmem:[#allocation2 + $0xe8] ss:$16 sps:$4 sm:$0xff]  }
 0xaf0   :  { %2889 = vmatprep.subr.bf16.mxu1 %v8203_v54  ;;  %10468 = vst [vmem:[#allocation39_spill] sm:$0xff] %v8215_v57  ;;  %10469 = vst [vmem:[#allocation40_spill] sm:$0xff] %v8218_v11  ;;  %v8221_v54 = vld [vmem:[#allocation7 + $0xc] ss:$16 sps:$4 sm:$0xff]  }
 0xaf1   :  { %10470 = vst [vmem:[#allocation41_spill] sm:$0xff] %v8221_v54 }
 0xaf2   :  { %2734 = vmatpush1.bf16.msra.mxu0 %v8206_v51  ;;  %v8224_v51 = vld [vmem:[#allocation5 + $0xe0] ss:$16 sps:$4 sm:$0xff]  }
 0xaf3   :  { %2735 = vmatprep.subr.bf16.mxu0 %v8209_v16  ;;  %2890 = vmatpush1.bf16.msra.mxu1 %v8212_v21  ;;  %10471 = vst [vmem:[#allocation42_spill] sm:$0xff] %v8224_v51  ;;  %v8229_v21 = vld [vmem:[#allocation7 + $0x8] ss:$16 sps:$4 sm:$0xff]  }
 0xaf4   :  { %2891 = vmatprep.subr.bf16.mxu1 %v8215_v57  ;;  %10472 = vst [vmem:[#allocation43_spill] sm:$0xff] %v8229_v21  ;;  %v8233_v57 = vld [vmem:[#allocation7 + $0x2c] ss:$16 sps:$4 sm:$0xff]  }
 0xaf5   :  { %10473 = vst [vmem:[#allocation44_spill] sm:$0xff] %v8233_v57 }
 0xaf6   :  { %2736 = vmatpush1.bf16.msra.mxu0 %v8218_v11  ;;  %v8236_v11 = vld [vmem:[#allocation7 + $0x28] ss:$16 sps:$4 sm:$0xff]  }
 0xaf7   :  { %2836 = vmatprep.subr.bf16.mxu0 %v8221_v54  ;;  %2892 = vmatpush1.bf16.msra.mxu1 %v8224_v51  ;;  %10474 = vst [vmem:[#allocation45_spill] sm:$0xff] %v8236_v11  ;;  %v8239_v54 = vld [vmem:[#allocation7 + $0x4c] ss:$16 sps:$4 sm:$0xff]   ;;  %v8242_v51 = vld [vmem:[#allocation7 + $0x48] ss:$16 sps:$4 sm:$0xff]  }
 0xaf8   :  { %5334 = vmatprep.subr.bf16.mxu1 %v10238_v58  ;;  %10475 = vst [vmem:[#allocation46_spill] sm:$0xff] %v8239_v54  ;;  %10476 = vst [vmem:[#allocation47_spill] sm:$0xff] %v8242_v51 }
 0xaf9   :  { %2754 = vmatmul.mubr.bf16.vlgmr.msra.gmra.mrb[72].mxu0 %v8055_v41  ;;  %v8245_v41 = vld [vmem:[#allocation7 + $0x6c] ss:$16 sps:$4 sm:$0xff]  }
 0xafa   :  { %2837 = vmatpush1.bf16.msra.mxu0 %v8229_v21  ;;  %2868 = vmatprep.mubr.bf16.mxu0 %v10109_v60  ;;  %10477 = vst [vmem:[#allocation49_spill] sm:$0xff] %v8245_v41  ;;  %v8248_v21 = vld [vmem:[#allocation7 + $0x68] ss:$16 sps:$4 sm:$0xff]  }
 0xafb   :  { %2838 = vmatprep.subr.bf16.mxu0 %v8233_v57  ;;  %10478 = vst [vmem:[#allocation51_spill] sm:$0xff] %v8248_v21  ;;  %v8251_v57 = vld [vmem:[#allocation7 + $0x8c] ss:$16 sps:$4 sm:$0xff]  }
 0xafc   :  { %10479 = vst [vmem:[#allocation53_spill] sm:$0xff] %v8251_v57 }
 0xafe   :  { %2839 = vmatpush1.bf16.msra.mxu0 %v8236_v11  ;;  %v8254_v11 = vld [vmem:[#allocation7 + $0x88] ss:$16 sps:$4 sm:$0xff]  }
 0xaff   :  { %2840 = vmatprep.subr.bf16.mxu0 %v8239_v54  ;;  %10480 = vst [vmem:[#allocation55_spill] sm:$0xff] %v8254_v11  ;;  %v8257_v54 = vld [vmem:[#allocation7 + $0xac] ss:$16 sps:$4 sm:$0xff]  }
 0xb00   :  { %10481 = vst [vmem:[#allocation57_spill] sm:$0xff] %v8257_v54 }
 0xb02   :  { %2841 = vmatpush1.bf16.msra.mxu0 %v8242_v51  ;;  %v8260_v51 = vld [vmem:[#allocation7 + $0xa8] ss:$16 sps:$4 sm:$0xff]  }
 0xb03   :  { %2842 = vmatprep.subr.bf16.mxu0 %v8245_v41  ;;  %10482 = vst [vmem:[#allocation59_spill] sm:$0xff] %v8260_v51  ;;  %v8263_v41 = vld [vmem:[#allocation7 + $0xcc] ss:$16 sps:$4 sm:$0xff]  }
 0xb04   :  { %10483 = vst [vmem:[#allocation61_spill] sm:$0xff] %v8263_v41 }
 0xb06   :  { %2843 = vmatpush1.bf16.msra.mxu0 %v8248_v21  ;;  %v8266_v21 = vld [vmem:[#allocation7 + $0xc8] ss:$16 sps:$4 sm:$0xff]  }
 0xb07   :  { %2844 = vmatprep.subr.bf16.mxu0 %v8251_v57  ;;  %10484 = vst [vmem:[#allocation63_spill] sm:$0xff] %v8266_v21  ;;  %v8269_v57 = vld [vmem:[#allocation7 + $0xec] ss:$16 sps:$4 sm:$0xff]  }
 0xb08   :  { %10485 = vst [vmem:[#allocation65_spill] sm:$0xff] %v8269_v57 }
 0xb0a   :  { %2845 = vmatpush1.bf16.msra.mxu0 %v8254_v11  ;;  %v8272_v11 = vld [vmem:[#allocation7 + $0xe8] ss:$16 sps:$4 sm:$0xff]  }
 0xb0b   :  { %2846 = vmatprep.subr.bf16.mxu0 %v8257_v54  ;;  %10486 = vst [vmem:[#allocation67_spill] sm:$0xff] %v8272_v11  ;;  %v8275_v54 = vld [vmem:[#allocation5 + $0xc] ss:$16 sps:$4 sm:$0xff]  }
 0xb0c   :  { %10487 = vst [vmem:[#allocation69_spill] sm:$0xff] %v8275_v54 }
 0xb0e   :  { %2847 = vmatpush1.bf16.msra.mxu0 %v8260_v51  ;;  %v8279_v51 = vld [vmem:[#allocation5 + $0x8] ss:$16 sps:$4 sm:$0xff]  }
 0xb0f   :  { %2848 = vmatprep.subr.bf16.mxu0 %v8263_v41  ;;  %10488 = vst [vmem:[#allocation71_spill] sm:$0xff] %v8279_v51 }
 0xb12   :  { %2849 = vmatpush1.bf16.msra.mxu0 %v8266_v21  ;;  %v8283_v21 = vld [vmem:[#allocation5 + $0x2c] ss:$16 sps:$4 sm:$0xff]  }
 0xb13   :  { %2850 = vmatprep.subr.bf16.mxu0 %v8269_v57  ;;  %10489 = vst [vmem:[#allocation73_spill] sm:$0xff] %v8283_v21  ;;  %v8286_v57 = vld [vmem:[#allocation5 + $0x28] ss:$16 sps:$4 sm:$0xff]  }
 0xb14   :  { %10490 = vst [vmem:[#allocation75_spill] sm:$0xff] %v8286_v57 }
 0xb16   :  { %2851 = vmatpush1.bf16.msra.mxu0 %v8272_v11  ;;  %v8289_v11 = vld [vmem:[#allocation5 + $0x4c] ss:$16 sps:$4 sm:$0xff]  }
 0xb17   :  { %2918 = vmatprep.subr.bf16.mxu0 %v8275_v54  ;;  %10491 = vst [vmem:[#allocation26_spill] sm:$0xff] %v8289_v11  ;;  %v8292_v54 = vld [vmem:[#allocation5 + $0x48] ss:$16 sps:$4 sm:$0xff]  }
 0xb18   :  { %10492 = vst [vmem:[#allocation17_spill] sm:$0xff] %v8292_v54 }
 0xb19   :  { %2869 = vmatmul.mubr.bf16.vlgmr.msra.gmra.mrb[76].mxu0 %v8128_v56  ;;  %v8295_v56 = vld [vmem:[#allocation5 + $0x6c] ss:$16 sps:$4 sm:$0xff]  }
 0xb1a   :  { %2919 = vmatpush1.bf16.msra.mxu0 %v8279_v51  ;;  %2950 = vmatprep.mubr.bf16.mxu0 %v10109_v60  ;;  %10493 = vst [vmem:[#allocation52_spill] sm:$0xff] %v8295_v56  ;;  %v8298_v51 = vld [vmem:[#allocation5 + $0x68] ss:$16 sps:$4 sm:$0xff]  }
 0xb1b   :  { %2920 = vmatprep.subr.bf16.mxu0 %v8283_v21  ;;  %10494 = vst [vmem:[#allocation80_spill] sm:$0xff] %v8298_v51  ;;  %v8301_v21 = vld [vmem:[#allocation5 + $0x8c] ss:$16 sps:$4 sm:$0xff]  }
 0xb1c   :  { %10495 = vst [vmem:[#allocation54_spill] sm:$0xff] %v8301_v21 }
 0xb1e   :  { %2921 = vmatpush1.bf16.msra.mxu0 %v8286_v57  ;;  %v8304_v57 = vld [vmem:[#allocation5 + $0x88] ss:$16 sps:$4 sm:$0xff]  }
 0xb1f   :  { %2922 = vmatprep.subr.bf16.mxu0 %v8289_v11  ;;  %10496 = vst [vmem:[#allocation18_spill] sm:$0xff] %v8304_v57  ;;  %v8307_v11 = vld [vmem:[#allocation5 + $0xac] ss:$16 sps:$4 sm:$0xff]  }
 0xb20   :  { %10497 = vst [vmem:[#allocation81_spill] sm:$0xff] %v8307_v11 }
 0xb22   :  { %2923 = vmatpush1.bf16.msra.mxu0 %v8292_v54  ;;  %v8310_v54 = vld [vmem:[#allocation5 + $0xa8] ss:$16 sps:$4 sm:$0xff]  }
 0xb23   :  { %2924 = vmatprep.subr.bf16.mxu0 %v8295_v56  ;;  %10498 = vst [vmem:[#allocation19_spill] sm:$0xff] %v8310_v54  ;;  %v8313_v56 = vld [vmem:[#allocation5 + $0xcc] ss:$16 sps:$4 sm:$0xff]  }
 0xb24   :  { %10499 = vst [vmem:[#allocation56_spill] sm:$0xff] %v8313_v56 }
 0xb26   :  { %2925 = vmatpush1.bf16.msra.mxu0 %v8298_v51  ;;  %v8316_v51 = vld [vmem:[#allocation5 + $0xc8] ss:$16 sps:$4 sm:$0xff]  }
 0xb27   :  { %2926 = vmatprep.subr.bf16.mxu0 %v8301_v21  ;;  %10500 = vst [vmem:[#allocation83_spill] sm:$0xff] %v8316_v51  ;;  %v8319_v21 = vld [vmem:[#allocation5 + $0xec] ss:$16 sps:$4 sm:$0xff]  }
 0xb28   :  { %10501 = vst [vmem:[#allocation58_spill] sm:$0xff] %v8319_v21 }
 0xb2a   :  { %2927 = vmatpush1.bf16.msra.mxu0 %v8304_v57  ;;  %v8322_v57 = vld [vmem:[#allocation5 + $0xe8] ss:$16 sps:$4 sm:$0xff]  }
 0xb2b   :  { %2928 = vmatprep.subr.bf16.mxu0 %v8307_v11  ;;  %10502 = vst [vmem:[#allocation20_spill] sm:$0xff] %v8322_v57 }
 0xb2e   :  { %2929 = vmatpush1.bf16.msra.mxu0 %v8310_v54 }
 0xb2f   :  { %2930 = vmatprep.subr.bf16.mxu0 %v8313_v56 }
 0xb32   :  { %2931 = vmatpush1.bf16.msra.mxu0 %v8316_v51  ;;  %v10503_v51 = vld [vmem:[#allocation50_spill] sm:$0xff] }
 0xb33   :  { %2932 = vmatprep.subr.bf16.mxu0 %v8319_v21  ;;  %v2677_v31 = vmul.f32 %v10503_v51, %v10415_v9  ;;  %v2676_v21 = vmul.f32 %v10503_v51, %v10417_v48 }
 0xb36   :  { %2933 = vmatpush1.bf16.msra.mxu0 %v8322_v57 }
 0xb37   :  { %3057 = vmatprep.subr.bf16.mxu0 %v10413_v5 }
 0xbac   :  { %v2645_v11 = vpop.f32.mrb[68].mxu0  ;;  %v8326_v54 = vpop.f32.mrb[72].mxu1 }
 0xbad   :  { %v2646_v41 = vadd.f32 %v10414_v29, %v2645_v11  ;;  %v5332_v56 = vpop.f32.mrb[69].mxu0  ;;  %v8329_v16 = vpop.f32.mrb[73].mxu1  ;;  %v2763_v29 = vadd.f32 %v8123_v55, %v2677_v31  ;;  %v2762_v11 = vadd.f32 %v8121_v0, %v2676_v21  ;;  %v2678_v55 = vmul.f32 %v10503_v51, %v10418_v45 }
 0xbae   :  { %v2648_v38 = vpop.f32.mrb[70].mxu0  ;;  %v2833_v63 = vpop.f32.mrb[74].mxu1  ;;  %v2679_v21 = vmul.f32 %v10503_v51, %v6970_v35 }
 0xbaf   :  { %v2652_v33 = vand.u32 2147483647, %v2646_v41  ;;  %v2834_v57 = vpop.f32.mrb[75].mxu1  ;;  %2662 = vrot.lane.b32.xlu0 %v2646_v41, %s6526_s2  ;;  %v5333_v5 = vpop.f32.mrb[71].mxu0  ;;  %v2767_v9 = vadd.f32 %v2763_v29, %v6978_v18  ;;  %v2766_v63 = vadd.f32 %v2762_v11, %v6973_v22  ;;  %v2651_v29 = vmax.f32 %v2646_v41, 0.0 }
 0xbb1   :  { %v2653_v26 = vsub.f32 0.0, %v2652_v33  ;;  %v5100_v38 = vmul.f32 -1.442695, %v2767_v9  ;;  %v5099_v34 = vmul.f32 -1.442695, %v2766_v63 }
 0xbb3   :  { %v2654_v56 = vmul.f32 1.442695, %v2653_v26 }
 0xbb5   :  { %5825 = vpow2.f32 %v2654_v56 }
 0xbb6   :  { %5827 = vpow2.f32 %v5100_v38 }
 0xbb7   :  { %5829 = vpow2.f32 %v5099_v34 }
 0xbbf   :  { %v5826_v48 = vpop.eup %5825 }
 0xbc0   :  { %v2656_v57 = vadd.f32 1.0, %v5826_v48  ;;  %v5828_v42 = vpop.eup %5827 }
 0xbc1   :  { %v5830_v5 = vpop.eup %5829  ;;  %v2779_v33 = vadd.f32 1.0, %v5828_v42 }
 0xbc2   :  { %5831 = vlog2.f32 %v2656_v57  ;;  %v2773_v26 = vadd.f32 1.0, %v5830_v5 }
 0xbc3   :  { %5833 = vrcp.f32 %v2779_v33 }
 0xbc4   :  { %5835 = vrcp.f32 %v2773_v26 }
 0xbcc   :  { %v5832_v0 = vpop.eup %5831  ;;  %v2755_v31 = vpop.f32.mrb[72].mxu0 }
 0xbcd   :  { %v2764_v9 = vadd.f32 %v2755_v31, %v2678_v55  ;;  %v2757_v11 = vpop.f32.mrb[73].mxu0  ;;  %v2658_v56 = vmul.f32 0.6931472, %v5832_v0  ;;  %v5834_v51 = vpop.eup %5833 }
 0xbce   :  { %v2765_v63 = vadd.f32 %v2757_v11, %v2679_v21  ;;  %v2759_v34 = vpop.f32.mrb[74].mxu0  ;;  %v5836_v41 = vpop.eup %5835  ;;  %v2789_v0 = vmul.f32 %v5834_v51, %v8048_v3  ;;  %v8444_v3 = vld [vmem:[#allocation7 + $0xc0] ss:$16 sps:$4 sm:$0xff]  }
 0xbcf   :  { %v2768_v48 = vadd.f32 %v2764_v9, %v6992_v24  ;;  %v2760_v38 = vpop.f32.mrb[75].mxu0  ;;  %v2659_v42 = vadd.f32 %v2658_v56, %v2651_v29  ;;  %10514 = vst [vmem:[#allocation87_spill] sm:$0xff] %v8444_v3 }
 0xbd0   :  { %v2769_v57 = vadd.f32 %v2765_v63, %v6987_v27 }
 0xbd1   :  { %5837 = vtanh.f32 %v2768_v48  ;;  %v2660_v5 = vadd.f32 1e-06, %v2659_v42 }
 0xbd2   :  { %v5101_v45 = vmul.f32 -1.442695, %v2769_v57 }
 0xbd3   :  { %2668 = vrot.lane.b32.xlu1 %v2660_v5, %s6525_s30 }
 0xbd4   :  { %5839 = vpow2.f32 %v5101_v45 }
 0xbdb   :  { %v5838_v55 = vpop.eup %5837 }
 0xbdc   :  { %v2790_v31 = vmul.f32 %v5838_v55, %v5836_v41 }
 0xbde   :  { %v5840_v33 = vpop.eup %5839  ;;  %v8348_v21 = vadd.f32 %v2790_v31, %v2789_v0 }
 0xbdf   :  { %v2786_v9 = vadd.f32 1.0, %v5840_v33 }
 0xbe0   :  { %5841 = vtanh.f32 %v8348_v21 }
 0xbe1   :  { %5843 = vrcp.f32 %v2786_v9 }
 0xbea   :  { %v5842_v26 = vpop.eup %5841 }
 0xbeb   :  { %v5844_v29 = vpop.eup %5843 }
 0xbec   :  { %v8351_v11 = vpop.f32.mrb[76].mxu0  ;;  %v2793_v56 = vmul.f32 %v5844_v29, %v5842_v26 }
 0xbed   :  { %v8353_v63 = vpop.f32.mrb[77].mxu0 }
 0xbee   :  { %v2874_v45 = vpop.f32.mrb[78].mxu0  ;;  %v8355_v34 = vpack.c.bf16 %v2793_v56, %v2793_v56 }
 0xbef   :  { %v2875_v48 = vpop.f32.mrb[79].mxu0 }
 0xbf0   :  { %2910 = vmatmul.mubr.bf16.vlgmr.msra.gmra.mrb[76].mxu1 %v8355_v34  ;;  %2951 = vmatmul.mubr.bf16.vlgmr.msra.gmra.mrb[80].mxu0 %v8355_v34 }
 0xbf1   :  { %3058 = vmatpush1.bf16.msra.mxu0 %v7825_v43  ;;  %3089 = vmatprep.mubr.bf16.mxu0 %v10109_v60  ;;  %v8379_v43 = vld [vmem:[%s9545_s7 + $0x18] sm:$0xff]  }
 0xbf2   :  { %3059 = vmatprep.subr.bf16.mxu0 %v7829_v20  ;;  %5335 = vmatpush3.bf16.msra.mxu1 %v7835_v44  ;;  %v8388_v20 = vld [vmem:[%s9545_s7 + $0x20] sm:$0xff]   ;;  %v8397_v44 = vld [vmem:[%s9545_s7 + $0x28] sm:$0xff]  }
 0xbf3   :  { %5336 = vmatprep.subr.bf16.mxu1 %v10238_v58  ;;  %5350 = vmatprep.mubr.msk.bf16.mxu1 %vm6512_vm0, %v10238_v58  ;;  %10504 = vst [vmem:[#allocation84_spill] sm:$0xff] %v8397_v44 }
 0xbf5   :  { %3060 = vmatpush1.bf16.msra.mxu0 %v7841_v14  ;;  %v8406_v14 = vld [vmem:[%s9545_s7 + $0x30] sm:$0xff]  }
 0xbf6   :  { %3061 = vmatprep.subr.bf16.mxu0 %v7844_v36  ;;  %5337 = vmatpush3.bf16.msra.mxu1 %v7850_v19  ;;  %10505 = vst [vmem:[#allocation21_spill] sm:$0xff] %v8406_v14  ;;  %v8415_v36 = vld [vmem:[%s9545_s7 + $0x38] sm:$0xff]   ;;  %v10507_v19 = vld [vmem:[#allocation98_spill] sm:$0xff] }
 0xbf7   :  { %5338 = vmatprep.subr.bf16.mxu1 %v10238_v58  ;;  %10506 = vst [vmem:[#allocation60_spill] sm:$0xff] %v8415_v36 }
 0xbf9   :  { %3062 = vmatpush1.bf16.msra.mxu0 %v7854_v53  ;;  %v10508_v53 = vld [vmem:[#allocation99_spill] sm:$0xff] }
 0xbfa   :  { %3063 = vmatprep.subr.bf16.mxu0 %v7857_v8  ;;  %5339 = vmatpush3.bf16.msra.mxu1 %v7863_v61  ;;  %v8428_v8 = vld [vmem:[#allocation7 + $0x84] ss:$16 sps:$4 sm:$0xff]  }
 0xbfb   :  { %5340 = vmatprep.subr.bf16.mxu1 %v10238_v58  ;;  %10509 = vst [vmem:[#allocation62_spill] sm:$0xff] %v8428_v8 }
 0xbfd   :  { %3064 = vmatpush1.bf16.msra.mxu0 %v7867_v2  ;;  %v8431_v2 = vld [vmem:[#allocation7 + $0x80] ss:$16 sps:$4 sm:$0xff]  }
 0xbfe   :  { %3065 = vmatprep.subr.bf16.mxu0 %v7870_v12  ;;  %5341 = vmatpush3.bf16.msra.mxu1 %v8379_v43  ;;  %10510 = vst [vmem:[#allocation95_spill] sm:$0xff] %v8431_v2  ;;  %v8435_v12 = vld [vmem:[#allocation7 + $0xa4] ss:$16 sps:$4 sm:$0xff]  }
 0xbff   :  { %5342 = vmatprep.subr.bf16.mxu1 %v10238_v58  ;;  %10511 = vst [vmem:[#allocation96_spill] sm:$0xff] %v8435_v12 }
 0xc01   :  { %3066 = vmatpush1.bf16.msra.mxu0 %v7875_v37  ;;  %v8438_v37 = vld [vmem:[#allocation7 + $0xa0] ss:$16 sps:$4 sm:$0xff]  }
 0xc02   :  { %3067 = vmatprep.subr.bf16.mxu0 %v7878_v47  ;;  %5343 = vmatpush3.bf16.msra.mxu1 %v8388_v20  ;;  %10512 = vst [vmem:[#allocation97_spill] sm:$0xff] %v8438_v37  ;;  %v8441_v47 = vld [vmem:[#allocation7 + $0xc4] ss:$16 sps:$4 sm:$0xff]  }
 0xc03   :  { %5344 = vmatprep.subr.bf16.mxu1 %v10238_v58  ;;  %10513 = vst [vmem:[#allocation48_spill] sm:$0xff] %v8441_v47 }
 0xc05   :  { %3068 = vmatpush1.bf16.msra.mxu0 %v10419_v59  ;;  %v8447_v59 = vld [vmem:[#allocation7 + $0xe4] ss:$16 sps:$4 sm:$0xff]  }
 0xc06   :  { %3069 = vmatprep.subr.bf16.mxu0 %v10420_v50  ;;  %5345 = vmatpush3.bf16.msra.mxu1 %v8397_v44  ;;  %10515 = vst [vmem:[#allocation88_spill] sm:$0xff] %v8447_v59  ;;  %v8450_v50 = vld [vmem:[#allocation7 + $0xe0] ss:$16 sps:$4 sm:$0xff]  }
 0xc07   :  { %5346 = vmatprep.subr.bf16.mxu1 %v10238_v58  ;;  %10516 = vst [vmem:[#allocation89_spill] sm:$0xff] %v8450_v50 }
 0xc09   :  { %3070 = vmatpush1.bf16.msra.mxu0 %v10422_v52  ;;  %v8453_v52 = vld [vmem:[#allocation5 + $0x4] ss:$16 sps:$4 sm:$0xff]  }
 0xc0a   :  { %3071 = vmatprep.subr.bf16.mxu0 %v10423_v23  ;;  %5347 = vmatpush3.bf16.msra.mxu1 %v8406_v14  ;;  %10517 = vst [vmem:[#allocation90_spill] sm:$0xff] %v8453_v52 }
 0xc0b   :  { %5348 = vmatprep.subr.bf16.mxu1 %v10238_v58 }
 0xc0d   :  { %3072 = vmatpush1.bf16.msra.mxu0 %v10425_v49 }
 0xc0e   :  { %3172 = vmatprep.subr.bf16.mxu0 %v10426_v25  ;;  %5349 = vmatpush3.bf16.msra.mxu1 %v8415_v36 }
 0xc0f   :  { %3098 = vmatprep.subr.bf16.mxu1 %v10428_v7 }
 0xc10   :  { %3090 = vmatmul.mubr.bf16.vlgmr.msra.gmra.mrb[84].mxu0 %v8355_v34 }
 0xc11   :  { %3173 = vmatpush1.bf16.msra.mxu0 %v10429_v17  ;;  %3204 = vmatprep.mubr.bf16.mxu0 %v10109_v60 }
 0xc12   :  { %3174 = vmatprep.subr.bf16.mxu0 %v10430_v13 }
 0xc15   :  { %3175 = vmatpush1.bf16.msra.mxu0 %v10431_v4 }
 0xc16   :  { %3176 = vmatprep.subr.bf16.mxu0 %v10432_v10 }
 0xc19   :  { %3177 = vmatpush1.bf16.msra.mxu0 %v10433_v62 }
 0xc1a   :  { %3178 = vmatprep.subr.bf16.mxu0 %v10507_v19 }
 0xc1d   :  { %3179 = vmatpush1.bf16.msra.mxu0 %v10508_v53 }
 0xc1e   :  { %3180 = vmatprep.subr.bf16.mxu0 %v8428_v8 }
 0xc21   :  { %v2663_v61 = vpop.permute.xlu0 %2662  ;;  %3181 = vmatpush1.bf16.msra.mxu0 %v8431_v2 }
 0xc22   :  { %2666 = vst.msk [vmem:[#allocation8] sm:$0xff] %vm2665_vm5, %v2663_v61  ;;  %3182 = vmatprep.subr.bf16.mxu0 %v8435_v12 }
 0xc25   :  { %3183 = vmatpush1.bf16.msra.mxu0 %v8438_v37 }
 0xc26   :  { %3184 = vmatprep.subr.bf16.mxu0 %v8441_v47 }
 0xc29   :  { %3185 = vmatpush1.bf16.msra.mxu0 %v8444_v3 }
 0xc2a   :  { %3186 = vmatprep.subr.bf16.mxu0 %v8447_v59 }
 0xc2d   :  { %3187 = vmatpush1.bf16.msra.mxu0 %v8450_v50 }
 0xc2e   :  { %3254 = vmatprep.subr.bf16.mxu0 %v8453_v52 }
 0xc45   :  { %v2669_v23 = vpop.permute.xlu1 %2668 }
 0xc46   :  { %2671 = vst.msk [vmem:[#allocation9] sm:$0xff] %vm2665_vm5, %v2669_v23 }
 0xcc3   :  { %v2911_v49 = vpop.f32.mrb[76].mxu1  ;;  %v2952_v25 = vpop.f32.mrb[80].mxu0 }
 0xcc4   :  { %v2912_v7 = vadd.f32 %v2911_v49, %v8326_v54  ;;  %v2953_v17 = vadd.f32 %v2952_v25, %v8351_v11  ;;  %v2913_v13 = vpop.f32.mrb[77].mxu1  ;;  %v2954_v4 = vpop.f32.mrb[81].mxu0 }
 0xcc5   :  { %v2914_v10 = vadd.f32 %v2913_v13, %v8329_v16  ;;  %v2955_v62 = vadd.f32 %v2954_v4, %v8353_v63  ;;  %v2915_v38 = vpop.f32.mrb[78].mxu1  ;;  %v2956_v42 = vpop.f32.mrb[82].mxu0 }
 0xcc6   :  { %v2959_v57 = vadd.f32 %v2912_v7, %v7102_v40  ;;  %v2916_v5 = vpop.f32.mrb[79].mxu1  ;;  %v2957_v51 = vpop.f32.mrb[83].mxu0  ;;  %v2961_v33 = vadd.f32 %v2953_v17, %v7114_v39  ;;  %v10520_v38 = vld [vmem:[#allocation64_spill] sm:$0xff]  ;;  %v10521_v42 = vld [vmem:[#allocation66_spill] sm:$0xff] }
 0xcc7   :  { %v2960_v41 = vadd.f32 %v2914_v10, %v7105_v46  ;;  %v2962_v54 = vadd.f32 %v2955_v62, %v7110_v6  ;;  %v10519_v62 = vld [vmem:[#allocation23_spill] sm:$0xff]  ;;  %v10523_v5 = vld [vmem:[#allocation25_spill] sm:$0xff]  ;;  %v10524_v51 = vld [vmem:[#allocation68_spill] sm:$0xff] }
 0xcc8   :  { %v5102_v55 = vmul.f32 -1.442695, %v2959_v57  ;;  %v10522_v57 = vld [vmem:[#allocation24_spill] sm:$0xff] }
 0xcc9   :  { %v5103_v0 = vmul.f32 -1.442695, %v2960_v41  ;;  %v5104_v31 = vmul.f32 -1.442695, %v2962_v54  ;;  %v10525_v41 = vld [vmem:[#allocation70_spill] sm:$0xff]  ;;  %v10528_v54 = vld [vmem:[#allocation72_spill] sm:$0xff] }
 0xcca   :  { %5845 = vpow2.f32 %v5102_v55  ;;  %v10526_v55 = vld [vmem:[#allocation27_spill] sm:$0xff] }
 0xccb   :  { %5847 = vpow2.f32 %v5103_v0  ;;  %v10527_v0 = vld [vmem:[#allocation28_spill] sm:$0xff] }
 0xccc   :  { %5849 = vpow2.f32 %v5104_v31  ;;  %v10529_v31 = vld [vmem:[#allocation74_spill] sm:$0xff] }
 0xccd   :  { %5851 = vtanh.f32 %v2961_v33  ;;  %v10530_v33 = vld [vmem:[#allocation29_spill] sm:$0xff] }
 0xcd4   :  { %v5846_v16 = vpop.eup %5845 }
 0xcd5   :  { %v5848_v9 = vpop.eup %5847  ;;  %v2966_v26 = vadd.f32 1.0, %v5846_v16  ;;  %v10531_v16 = vld [vmem:[#allocation30_spill] sm:$0xff] }
 0xcd6   :  { %v2972_v29 = vadd.f32 1.0, %v5848_v9  ;;  %v5850_v11 = vpop.eup %5849  ;;  %v10532_v9 = vld [vmem:[#allocation76_spill] sm:$0xff] }
 0xcd7   :  { %5853 = vrcp.f32 %v2966_v26  ;;  %v5852_v56 = vpop.eup %5851  ;;  %v2979_v19 = vadd.f32 1.0, %v5850_v11  ;;  %v10533_v26 = vld [vmem:[#allocation31_spill] sm:$0xff]  ;;  %v10535_v11 = vld [vmem:[#allocation33_spill] sm:$0xff] }
 0xcd8   :  { %5855 = vrcp.f32 %v2972_v29  ;;  %v10534_v29 = vld [vmem:[#allocation32_spill] sm:$0xff] }
 0xcd9   :  { %5857 = vrcp.f32 %v2979_v19  ;;  %v10540_v19 = vld [vmem:[#allocation38_spill] sm:$0xff] }
 0xce1   :  { %v5854_v63 = vpop.eup %5853 }
 0xce2   :  { %v5856_v45 = vpop.eup %5855  ;;  %v2983_v48 = vmul.f32 %v5854_v63, %v5852_v56  ;;  %v10536_v56 = vld [vmem:[#allocation34_spill] sm:$0xff]  ;;  %v10537_v63 = vld [vmem:[#allocation35_spill] sm:$0xff] }
 0xce3   :  { %v2982_v53 = vmul.f32 %v5856_v45, %v8125_v32  ;;  %v8466_v61 = vpop.f32.mrb[84].mxu0  ;;  %v5858_v17 = vpop.eup %5857  ;;  %v10518_v32 = vld [vmem:[#allocation22_spill] sm:$0xff]  ;;  %v10538_v45 = vld [vmem:[#allocation36_spill] sm:$0xff] }
 0xce4   :  { %v8468_v23 = vpop.f32.mrb[85].mxu0 }
 0xce5   :  { %v8470_v49 = vadd.f32 %v2983_v48, %v2982_v53  ;;  %v3095_v25 = vpop.f32.mrb[86].mxu0  ;;  %v10539_v48 = vld [vmem:[#allocation37_spill] sm:$0xff]  ;;  %v10541_v53 = vld [vmem:[#allocation39_spill] sm:$0xff] }
 0xce6   :  { %v3096_v7 = vpop.f32.mrb[87].mxu0  ;;  %v10542_v25 = vld [vmem:[#allocation40_spill] sm:$0xff] }
 0xce7   :  { %5859 = vtanh.f32 %v8470_v49  ;;  %v10543_v7 = vld [vmem:[#allocation41_spill] sm:$0xff] }
 0xcf1   :  { %v5860_v13 = vpop.eup %5859 }
 0xcf2   :  { %v2986_v4 = vmul.f32 %v5860_v13, %v5858_v17  ;;  %v10544_v17 = vld [vmem:[#allocation42_spill] sm:$0xff]  ;;  %v10545_v13 = vld [vmem:[#allocation43_spill] sm:$0xff] }
 0xcf4   :  { %v2987_v10 = vpack.c.bf16 %v2986_v4, %v2986_v4  ;;  %v10546_v4 = vld [vmem:[#allocation44_spill] sm:$0xff] }
 0xcf6   :  { %5351 = vmatmul.mubr.bf16.vlgmr.msra.gmra.mrb[80].mxu1 %v2987_v10  ;;  %3205 = vmatmul.mubr.bf16.vlgmr.msra.gmra.mrb[88].mxu0 %v2987_v10 }
 0xcf7   :  { %3099 = vmatpush1.bf16.msra.mxu1 %v8132_v28  ;;  %3130 = vmatprep.mubr.bf16.mxu1 %v10109_v60 }
 0xcf8   :  { %3100 = vmatprep.subr.bf16.mxu1 %v8136_v1  ;;  %3255 = vmatpush1.bf16.msra.mxu0 %v8139_v30 }
 0xcf9   :  { %3256 = vmatprep.subr.bf16.mxu0 %v8142_v15  ;;  %3286 = vmatprep.mubr.bf16.mxu0 %v10109_v60 }
 0xcfb   :  { %3101 = vmatpush1.bf16.msra.mxu1 %v10518_v32 }
 0xcfc   :  { %3102 = vmatprep.subr.bf16.mxu1 %v10519_v62  ;;  %3257 = vmatpush1.bf16.msra.mxu0 %v10520_v38 }
 0xcfd   :  { %3258 = vmatprep.subr.bf16.mxu0 %v10521_v42 }
 0xcff   :  { %3103 = vmatpush1.bf16.msra.mxu1 %v10522_v57 }
 0xd00   :  { %3104 = vmatprep.subr.bf16.mxu1 %v10523_v5  ;;  %3259 = vmatpush1.bf16.msra.mxu0 %v10524_v51 }
 0xd01   :  { %3260 = vmatprep.subr.bf16.mxu0 %v10525_v41 }
 0xd03   :  { %3105 = vmatpush1.bf16.msra.mxu1 %v10526_v55 }
 0xd04   :  { %3106 = vmatprep.subr.bf16.mxu1 %v10527_v0  ;;  %3261 = vmatpush1.bf16.msra.mxu0 %v10528_v54 }
 0xd05   :  { %3262 = vmatprep.subr.bf16.mxu0 %v10529_v31  ;;  %v10581_v31 = vld [vmem:[#allocation79_spill] sm:$0xff] }
 0xd07   :  { %3107 = vmatpush1.bf16.msra.mxu1 %v10530_v33 }
 0xd08   :  { %3108 = vmatprep.subr.bf16.mxu1 %v10531_v16  ;;  %3263 = vmatpush1.bf16.msra.mxu0 %v10532_v9 }
 0xd09   :  { %3264 = vmatprep.subr.bf16.mxu0 %v10533_v26 }
 0xd0b   :  { %3109 = vmatpush1.bf16.msra.mxu1 %v10534_v29 }
 0xd0c   :  { %3110 = vmatprep.subr.bf16.mxu1 %v10535_v11  ;;  %3265 = vmatpush1.bf16.msra.mxu0 %v10536_v56  ;;  %v10580_v56 = vld [vmem:[#allocation77_spill] sm:$0xff] }
 0xd0d   :  { %3266 = vmatprep.subr.bf16.mxu0 %v10537_v63  ;;  %v10556_v63 = vld [vmem:[#allocation61_spill] sm:$0xff] }
 0xd0f   :  { %3111 = vmatpush1.bf16.msra.mxu1 %v10538_v45  ;;  %v10553_v45 = vld [vmem:[#allocation55_spill] sm:$0xff] }
 0xd10   :  { %3112 = vmatprep.subr.bf16.mxu1 %v10539_v48  ;;  %3267 = vmatpush1.bf16.msra.mxu0 %v10540_v19  ;;  %v10547_v48 = vld [vmem:[#allocation45_spill] sm:$0xff]  ;;  %v10548_v19 = vld [vmem:[#allocation46_spill] sm:$0xff] }
 0xd11   :  { %3268 = vmatprep.subr.bf16.mxu0 %v10541_v53  ;;  %v10549_v53 = vld [vmem:[#allocation47_spill] sm:$0xff] }
 0xd13   :  { %3113 = vmatpush1.bf16.msra.mxu1 %v10542_v25  ;;  %v10550_v25 = vld [vmem:[#allocation49_spill] sm:$0xff] }
 0xd14   :  { %3213 = vmatprep.subr.bf16.mxu1 %v10543_v7  ;;  %3269 = vmatpush1.bf16.msra.mxu0 %v10544_v17  ;;  %v10551_v7 = vld [vmem:[#allocation51_spill] sm:$0xff]  ;;  %v10552_v17 = vld [vmem:[#allocation53_spill] sm:$0xff] }
 0xd15   :  { %5354 = vmatprep.subr.bf16.mxu0 %v10238_v58 }
 0xd16   :  { %3131 = vmatmul.mubr.bf16.vlgmr.msra.gmra.mrb[84].mxu1 %v8355_v34  ;;  %v10554_v34 = vld [vmem:[#allocation57_spill] sm:$0xff] }
 0xd17   :  { %3214 = vmatpush1.bf16.msra.mxu1 %v10545_v13  ;;  %3245 = vmatprep.mubr.bf16.mxu1 %v10109_v60  ;;  %v10555_v13 = vld [vmem:[#allocation59_spill] sm:$0xff] }
 0xd18   :  { %3215 = vmatprep.subr.bf16.mxu1 %v10546_v4  ;;  %v10557_v4 = vld [vmem:[#allocation63_spill] sm:$0xff] }
 0xd1b   :  { %3216 = vmatpush1.bf16.msra.mxu1 %v10547_v48  ;;  %v10558_v48 = vld [vmem:[#allocation65_spill] sm:$0xff] }
 0xd1c   :  { %3217 = vmatprep.subr.bf16.mxu1 %v10548_v19  ;;  %v10559_v19 = vld [vmem:[#allocation67_spill] sm:$0xff] }
 0xd1f   :  { %3218 = vmatpush1.bf16.msra.mxu1 %v10549_v53  ;;  %v10560_v53 = vld [vmem:[#allocation69_spill] sm:$0xff] }
 0xd20   :  { %3219 = vmatprep.subr.bf16.mxu1 %v10550_v25 }
 0xd23   :  { %3220 = vmatpush1.bf16.msra.mxu1 %v10551_v7  ;;  %v10561_v7 = vld [vmem:[#allocation71_spill] sm:$0xff] }
 0xd24   :  { %3221 = vmatprep.subr.bf16.mxu1 %v10552_v17  ;;  %v10572_v17 = vld [vmem:[#allocation56_spill] sm:$0xff] }
 0xd27   :  { %3222 = vmatpush1.bf16.msra.mxu1 %v10553_v45  ;;  %v10562_v45 = vld [vmem:[#allocation73_spill] sm:$0xff] }
 0xd28   :  { %3223 = vmatprep.subr.bf16.mxu1 %v10554_v34  ;;  %v10563_v34 = vld [vmem:[#allocation75_spill] sm:$0xff] }
 0xd2b   :  { %3224 = vmatpush1.bf16.msra.mxu1 %v10555_v13  ;;  %v10564_v13 = vld [vmem:[#allocation26_spill] sm:$0xff] }
 0xd2c   :  { %3225 = vmatprep.subr.bf16.mxu1 %v10556_v63  ;;  %v10565_v63 = vld [vmem:[#allocation17_spill] sm:$0xff] }
 0xd2f   :  { %3226 = vmatpush1.bf16.msra.mxu1 %v10557_v4  ;;  %v10566_v4 = vld [vmem:[#allocation52_spill] sm:$0xff] }
 0xd30   :  { %3227 = vmatprep.subr.bf16.mxu1 %v10558_v48  ;;  %v10567_v48 = vld [vmem:[#allocation80_spill] sm:$0xff] }
 0xd33   :  { %3228 = vmatpush1.bf16.msra.mxu1 %v10559_v19  ;;  %v10568_v19 = vld [vmem:[#allocation54_spill] sm:$0xff] }
 0xd34   :  { %3295 = vmatprep.subr.bf16.mxu1 %v10560_v53  ;;  %v10569_v53 = vld [vmem:[#allocation18_spill] sm:$0xff] }
 0xd36   :  { %3246 = vmatmul.mubr.bf16.vlgmr.msra.gmra.mrb[88].mxu1 %v2987_v10  ;;  %v10570_v10 = vld [vmem:[#allocation81_spill] sm:$0xff] }
 0xd37   :  { %3296 = vmatpush1.bf16.msra.mxu1 %v10561_v7  ;;  %3327 = vmatprep.mubr.bf16.mxu1 %v10109_v60  ;;  %v10571_v7 = vld [vmem:[#allocation19_spill] sm:$0xff] }
 0xd38   :  { %3297 = vmatprep.subr.bf16.mxu1 %v10562_v45  ;;  %v10573_v45 = vld [vmem:[#allocation83_spill] sm:$0xff] }
 0xd3b   :  { %3298 = vmatpush1.bf16.msra.mxu1 %v10563_v34  ;;  %v10574_v34 = vld [vmem:[#allocation58_spill] sm:$0xff] }
 0xd3c   :  { %3299 = vmatprep.subr.bf16.mxu1 %v10564_v13  ;;  %v10575_v13 = vld [vmem:[#allocation20_spill] sm:$0xff] }
 0xd3f   :  { %3300 = vmatpush1.bf16.msra.mxu1 %v10565_v63  ;;  %v8541_v63 = vld [vmem:[#allocation2 + $0x4] ss:$16 sps:$4 sm:$0xff]  }
 0xd40   :  { %3301 = vmatprep.subr.bf16.mxu1 %v10566_v4  ;;  %10576 = vst [vmem:[#allocation91_spill] sm:$0xff] %v8541_v63 }
 0xd43   :  { %3302 = vmatpush1.bf16.msra.mxu1 %v10567_v48 }
 0xd44   :  { %3303 = vmatprep.subr.bf16.mxu1 %v10568_v19 }
 0xd47   :  { %3304 = vmatpush1.bf16.msra.mxu1 %v10569_v53  ;;  %v10579_v53 = vld [vmem:[#allocation82_spill] sm:$0xff] }
 0xd48   :  { %3305 = vmatprep.subr.bf16.mxu1 %v10570_v10  ;;  %v8549_v10 = vld [vmem:[%s9546_s8] ss:$0 sm:$0xff] }
 0xd49   :  { %10577 = vst [vmem:[#allocation92_spill] sm:$0xff] %v8549_v10 }
 0xd4b   :  { %3306 = vmatpush1.bf16.msra.mxu1 %v10571_v7 }
 0xd4c   :  { %3307 = vmatprep.subr.bf16.mxu1 %v10572_v17 }
 0xd4f   :  { %3308 = vmatpush1.bf16.msra.mxu1 %v10573_v45 }
 0xd50   :  { %3309 = vmatprep.subr.bf16.mxu1 %v10574_v34  ;;  %v10578_v34 = vld [vmem:[#allocation78_spill] sm:$0xff] }
 0xd53   :  { %3310 = vmatpush1.bf16.msra.mxu1 %v10575_v13  ;;  %v3054_v13 = vmul.f32 %v10579_v53, %v10578_v34 }
 0xd54   :  { %3434 = vmatprep.subr.bf16.mxu1 %v8541_v63  ;;  %v3053_v63 = vmul.f32 %v10579_v53, %v10580_v56 }
 0xdc9   :  { %v3022_v48 = vpop.f32.mrb[80].mxu1  ;;  %v8544_v19 = vpop.f32.mrb[88].mxu0 }
 0xdca   :  { %v3023_v17 = vadd.f32 %v8549_v10, %v3022_v48  ;;  %v5352_v7 = vpop.f32.mrb[81].mxu1  ;;  %v8552_v45 = vpop.f32.mrb[89].mxu0  ;;  %v3140_v48 = vadd.f32 %v8468_v23, %v3054_v13  ;;  %v3055_v23 = vmul.f32 %v10579_v53, %v10581_v31  ;;  %v3056_v13 = vmul.f32 %v10579_v53, %v6970_v35 }
 0xdcb   :  { %v3025_v4 = vpop.f32.mrb[82].mxu1  ;;  %v3210_v25 = vpop.f32.mrb[90].mxu0  ;;  %v3139_v7 = vadd.f32 %v8466_v61, %v3053_v63 }
 0xdcc   :  { %v3029_v11 = vand.u32 2147483647, %v3023_v17  ;;  %v3211_v29 = vpop.f32.mrb[91].mxu0  ;;  %3039 = vrot.lane.b32.xlu0 %v3023_v17, %s6527_s17  ;;  %v5353_v26 = vpop.f32.mrb[83].mxu1  ;;  %v3144_v34 = vadd.f32 %v3140_v48, %v6978_v18 }
 0xdcd   :  { %v3143_v25 = vadd.f32 %v3139_v7, %v6973_v22 }
 0xdce   :  { %v3030_v9 = vsub.f32 0.0, %v3029_v11  ;;  %v5106_v4 = vmul.f32 -1.442695, %v3144_v34 }
 0xdcf   :  { %v5105_v16 = vmul.f32 -1.442695, %v3143_v25 }
 0xdd0   :  { %v3031_v10 = vmul.f32 1.442695, %v3030_v9 }
 0xdd2   :  { %5861 = vpow2.f32 %v3031_v10  ;;  %v3028_v10 = vmax.f32 %v3023_v17, 0.0 }
 0xdd3   :  { %5863 = vpow2.f32 %v5106_v4 }
 0xdd4   :  { %5865 = vpow2.f32 %v5105_v16 }
 0xddc   :  { %v5862_v56 = vpop.eup %5861 }
 0xddd   :  { %v3033_v29 = vadd.f32 1.0, %v5862_v56  ;;  %v5864_v33 = vpop.eup %5863 }
 0xdde   :  { %v5866_v26 = vpop.eup %5865  ;;  %v3156_v11 = vadd.f32 1.0, %v5864_v33 }
 0xddf   :  { %5867 = vlog2.f32 %v3033_v29  ;;  %v3150_v9 = vadd.f32 1.0, %v5866_v26 }
 0xde0   :  { %5869 = vrcp.f32 %v3156_v11 }
 0xde1   :  { %5871 = vrcp.f32 %v3150_v9 }
 0xde9   :  { %v5868_v61 = vpop.eup %5867  ;;  %v3132_v63 = vpop.f32.mrb[84].mxu1 }
 0xdea   :  { %v3141_v34 = vadd.f32 %v3132_v63, %v3055_v23  ;;  %v3134_v48 = vpop.f32.mrb[85].mxu1  ;;  %v3035_v7 = vmul.f32 0.6931472, %v5868_v61  ;;  %v5870_v53 = vpop.eup %5869 }
 0xdeb   :  { %v3142_v25 = vadd.f32 %v3134_v48, %v3056_v13  ;;  %v3136_v16 = vpop.f32.mrb[86].mxu1  ;;  %v5872_v17 = vpop.eup %5871  ;;  %v3166_v61 = vmul.f32 %v5870_v53, %v8348_v21  ;;  %v8582_v21 = vld [vmem:[#allocation2] ss:$16 sps:$4 sm:$0xff]   ;;  %v8607_v53 = vld [vmem:[%s9545_s7 + $0x8] sm:$0xff]  }
 0xdec   :  { %v3145_v56 = vadd.f32 %v3141_v34, %v6992_v24  ;;  %v3137_v4 = vpop.f32.mrb[87].mxu1  ;;  %v3036_v33 = vadd.f32 %v3035_v7, %v3028_v10 }
 0xded   :  { %v3146_v29 = vadd.f32 %v3142_v25, %v6987_v27  ;;  %v8586_v4 = vld [vmem:[#allocation2 + $0x24] ss:$16 sps:$4 sm:$0xff]  }
 0xdee   :  { %5873 = vtanh.f32 %v3145_v56  ;;  %v3037_v26 = vadd.f32 1e-06, %v3036_v33  ;;  %v8592_v33 = vld [vmem:[%s9545_s7] sm:$0xff]  }
 0xdef   :  { %v5107_v31 = vmul.f32 -1.442695, %v3146_v29  ;;  %v8598_v29 = vld [vmem:[#allocation2 + $0x20] ss:$16 sps:$4 sm:$0xff]  }
 0xdf0   :  { %3045 = vrot.lane.b32.xlu1 %v3037_v26, %s6526_s2  ;;  %v8601_v26 = vld [vmem:[#allocation2 + $0x44] ss:$16 sps:$4 sm:$0xff]  }
 0xdf1   :  { %5875 = vpow2.f32 %v5107_v31 }
 0xdf8   :  { %v5874_v23 = vpop.eup %5873 }
 0xdf9   :  { %v3167_v63 = vmul.f32 %v5874_v23, %v5872_v17  ;;  %v8611_v17 = vld [vmem:[#allocation2 + $0x40] ss:$16 sps:$4 sm:$0xff]   ;;  %v8614_v23 = vld [vmem:[#allocation2 + $0x64] ss:$16 sps:$4 sm:$0xff]  }
 0xdfb   :  { %v5876_v11 = vpop.eup %5875  ;;  %v8571_v13 = vadd.f32 %v3167_v63, %v3166_v61  ;;  %v8620_v61 = vld [vmem:[%s9545_s7 + $0x10] sm:$0xff]  }
 0xdfc   :  { %v3163_v34 = vadd.f32 1.0, %v5876_v11  ;;  %v8624_v63 = vld [vmem:[#allocation2 + $0x60] ss:$16 sps:$4 sm:$0xff]   ;;  %v8627_v11 = vld [vmem:[#allocation2 + $0x84] ss:$16 sps:$4 sm:$0xff]  }
 0xdfd   :  { %5877 = vtanh.f32 %v8571_v13 }
 0xdfe   :  { %5879 = vrcp.f32 %v3163_v34  ;;  %v8632_v34 = vld [vmem:[#allocation2 + $0x80] ss:$16 sps:$4 sm:$0xff]  }
 0xe07   :  { %v5878_v9 = vpop.eup %5877 }
 0xe08   :  { %v5880_v10 = vpop.eup %5879 }
 0xe09   :  { %v8574_v48 = vpop.f32.mrb[88].mxu1  ;;  %v3170_v7 = vmul.f32 %v5880_v10, %v5878_v9  ;;  %v8635_v9 = vld [vmem:[#allocation2 + $0xa4] ss:$16 sps:$4 sm:$0xff]   ;;  %v8640_v10 = vld [vmem:[#allocation2 + $0xa0] ss:$16 sps:$4 sm:$0xff]  }
 0xe0a   :  { %v8576_v25 = vpop.f32.mrb[89].mxu1  ;;  %10582 = vst [vmem:[#allocation93_spill] sm:$0xff] %v8640_v10 }
 0xe0b   :  { %v3251_v31 = vpop.f32.mrb[90].mxu1  ;;  %v8578_v16 = vpack.c.bf16 %v3170_v7, %v3170_v7  ;;  %v8643_v7 = vld [vmem:[#allocation2 + $0xc4] ss:$16 sps:$4 sm:$0xff]  }
 0xe0c   :  { %v3252_v56 = vpop.f32.mrb[91].mxu1  ;;  %10583 = vst [vmem:[#allocation94_spill] sm:$0xff] %v8643_v7  ;;  %v8648_v31 = vld [vmem:[#allocation2 + $0xc0] ss:$16 sps:$4 sm:$0xff]  }
 0xe0d   :  { %3287 = vmatmul.mubr.bf16.vlgmr.msra.gmra.mrb[92].mxu0 %v8578_v16  ;;  %3328 = vmatmul.mubr.bf16.vlgmr.msra.gmra.mrb[92].mxu1 %v8578_v16  ;;  %10584 = vst [vmem:[#allocation50_spill] sm:$0xff] %v8648_v31  ;;  %v8651_v56 = vld [vmem:[#allocation2 + $0xe4] ss:$16 sps:$4 sm:$0xff]  }
 0xe0e   :  { %3435 = vmatpush1.bf16.msra.mxu1 %v8582_v21  ;;  %3466 = vmatprep.mubr.bf16.mxu1 %v10109_v60  ;;  %10585 = vst [vmem:[#allocation98_spill] sm:$0xff] %v8651_v56 }
 0xe0f   :  { %3436 = vmatprep.subr.bf16.mxu1 %v8586_v4  ;;  %5355 = vmatpush3.bf16.msra.mxu0 %v8592_v33 }
 0xe10   :  { %5356 = vmatprep.subr.bf16.mxu0 %v10238_v58  ;;  %5370 = vmatprep.mubr.msk.bf16.mxu0 %vm6512_vm0, %v10238_v58 }
 0xe12   :  { %3437 = vmatpush1.bf16.msra.mxu1 %v8598_v29 }
 0xe13   :  { %3438 = vmatprep.subr.bf16.mxu1 %v8601_v26  ;;  %5357 = vmatpush3.bf16.msra.mxu0 %v8607_v53 }
 0xe14   :  { %5358 = vmatprep.subr.bf16.mxu0 %v10238_v58 }
 0xe16   :  { %3439 = vmatpush1.bf16.msra.mxu1 %v8611_v17 }
 0xe17   :  { %3440 = vmatprep.subr.bf16.mxu1 %v8614_v23  ;;  %5359 = vmatpush3.bf16.msra.mxu0 %v8620_v61 }
 0xe18   :  { %5360 = vmatprep.subr.bf16.mxu0 %v10238_v58 }
 0xe1a   :  { %3441 = vmatpush1.bf16.msra.mxu1 %v8624_v63 }
 0xe1b   :  { %3442 = vmatprep.subr.bf16.mxu1 %v8627_v11  ;;  %5361 = vmatpush3.bf16.msra.mxu0 %v8379_v43 }
 0xe1c   :  { %5362 = vmatprep.subr.bf16.mxu0 %v10238_v58 }
 0xe1e   :  { %3443 = vmatpush1.bf16.msra.mxu1 %v8632_v34 }
 0xe1f   :  { %3444 = vmatprep.subr.bf16.mxu1 %v8635_v9  ;;  %5363 = vmatpush3.bf16.msra.mxu0 %v8388_v20 }
 0xe20   :  { %5364 = vmatprep.subr.bf16.mxu0 %v10238_v58 }
 0xe22   :  { %3445 = vmatpush1.bf16.msra.mxu1 %v8640_v10  ;;  %v8656_v10 = vld [vmem:[#allocation2 + $0xe0] ss:$16 sps:$4 sm:$0xff]  }
 0xe23   :  { %3446 = vmatprep.subr.bf16.mxu1 %v8643_v7  ;;  %5365 = vmatpush3.bf16.msra.mxu0 %v8397_v44  ;;  %10586 = vst [vmem:[#allocation99_spill] sm:$0xff] %v8656_v10  ;;  %v8659_v7 = vld [vmem:[#allocation7 + $0x4] ss:$16 sps:$4 sm:$0xff]   ;;  %v8663_v44 = vld [vmem:[#allocation2 + $0xc] ss:$16 sps:$4 sm:$0xff]  }
 0xe24   :  { %5366 = vmatprep.subr.bf16.mxu0 %v10238_v58  ;;  %10587 = vst [vmem:[#allocation22_spill] sm:$0xff] %v8659_v7  ;;  %10588 = vst [vmem:[#allocation23_spill] sm:$0xff] %v8663_v44 }
 0xe26   :  { %3447 = vmatpush1.bf16.msra.mxu1 %v8648_v31 }
 0xe27   :  { %3448 = vmatprep.subr.bf16.mxu1 %v8651_v56  ;;  %5367 = vmatpush3.bf16.msra.mxu0 %v8406_v14  ;;  %v8667_v56 = vld [vmem:[#allocation7] ss:$16 sps:$4 sm:$0xff]   ;;  %v8671_v14 = vld [vmem:[#allocation7 + $0x24] ss:$16 sps:$4 sm:$0xff]  }
 0xe28   :  { %5368 = vmatprep.subr.bf16.mxu0 %v10238_v58  ;;  %10589 = vst [vmem:[#allocation64_spill] sm:$0xff] %v8667_v56  ;;  %10590 = vst [vmem:[#allocation66_spill] sm:$0xff] %v8671_v14 }
 0xe2a   :  { %3449 = vmatpush1.bf16.msra.mxu1 %v8656_v10  ;;  %v8674_v10 = vld [vmem:[#allocation7 + $0x20] ss:$16 sps:$4 sm:$0xff]  }
 0xe2b   :  { %3549 = vmatprep.subr.bf16.mxu1 %v8659_v7  ;;  %5369 = vmatpush3.bf16.msra.mxu0 %v8415_v36  ;;  %10591 = vst [vmem:[#allocation24_spill] sm:$0xff] %v8674_v10  ;;  %v8677_v36 = vld [vmem:[#allocation7 + $0x44] ss:$16 sps:$4 sm:$0xff]  }
 0xe2c   :  { %3475 = vmatprep.subr.bf16.mxu0 %v8663_v44  ;;  %10592 = vst [vmem:[#allocation25_spill] sm:$0xff] %v8677_v36  ;;  %v8680_v44 = vld [vmem:[#allocation7 + $0x40] ss:$16 sps:$4 sm:$0xff]   ;;  %v8683_v7 = vld [vmem:[#allocation7 + $0x64] ss:$16 sps:$4 sm:$0xff]  }
 0xe2d   :  { %3467 = vmatmul.mubr.bf16.vlgmr.msra.gmra.mrb[96].mxu1 %v8578_v16  ;;  %10593 = vst [vmem:[#allocation68_spill] sm:$0xff] %v8680_v44  ;;  %10594 = vst [vmem:[#allocation70_spill] sm:$0xff] %v8683_v7 }
 0xe2e   :  { %3550 = vmatpush1.bf16.msra.mxu1 %v8667_v56  ;;  %3581 = vmatprep.mubr.bf16.mxu1 %v10109_v60  ;;  %v8686_v56 = vld [vmem:[#allocation7 + $0x60] ss:$16 sps:$4 sm:$0xff]  }
 0xe2f   :  { %3551 = vmatprep.subr.bf16.mxu1 %v8671_v14  ;;  %10595 = vst [vmem:[#allocation27_spill] sm:$0xff] %v8686_v56 }
 0xe32   :  { %3552 = vmatpush1.bf16.msra.mxu1 %v8674_v10 }
 0xe33   :  { %3553 = vmatprep.subr.bf16.mxu1 %v8677_v36 }
 0xe36   :  { %3554 = vmatpush1.bf16.msra.mxu1 %v8680_v44 }
 0xe37   :  { %3555 = vmatprep.subr.bf16.mxu1 %v8683_v7 }
 0xe3a   :  { %3556 = vmatpush1.bf16.msra.mxu1 %v8686_v56 }
 0xe3b   :  { %3557 = vmatprep.subr.bf16.mxu1 %v8428_v8 }
 0xe3e   :  { %v3040_v10 = vpop.permute.xlu0 %3039  ;;  %3558 = vmatpush1.bf16.msra.mxu1 %v8431_v2 }
 0xe3f   :  { %3043 = vst.msk [vmem:[#allocation8] sm:$0xff] %vm3042_vm6, %v3040_v10  ;;  %3559 = vmatprep.subr.bf16.mxu1 %v8435_v12 }
 0xe42   :  { %3560 = vmatpush1.bf16.msra.mxu1 %v8438_v37 }
 0xe43   :  { %3561 = vmatprep.subr.bf16.mxu1 %v8441_v47 }
 0xe46   :  { %3562 = vmatpush1.bf16.msra.mxu1 %v8444_v3 }
 0xe47   :  { %3563 = vmatprep.subr.bf16.mxu1 %v8447_v59 }
 0xe4a   :  { %3564 = vmatpush1.bf16.msra.mxu1 %v8450_v50 }
 0xe4b   :  { %3631 = vmatprep.subr.bf16.mxu1 %v8453_v52 }
 0xe62   :  { %v3046_v8 = vpop.permute.xlu1 %3045 }
 0xe63   :  { %3048 = vst.msk [vmem:[#allocation9] sm:$0xff] %vm3042_vm6, %v3046_v8 }
 0xee0   :  { %v3288_v56 = vpop.f32.mrb[92].mxu0  ;;  %v3329_v7 = vpop.f32.mrb[92].mxu1 }
 0xee1   :  { %v3289_v10 = vadd.f32 %v3288_v56, %v8544_v19  ;;  %v3330_v12 = vadd.f32 %v3329_v7, %v8574_v48  ;;  %v3290_v2 = vpop.f32.mrb[93].mxu0  ;;  %v3331_v37 = vpop.f32.mrb[93].mxu1 }
 0xee2   :  { %v3291_v47 = vadd.f32 %v3290_v2, %v8552_v45  ;;  %v3332_v3 = vadd.f32 %v3331_v37, %v8576_v25  ;;  %v3292_v44 = vpop.f32.mrb[94].mxu0  ;;  %v3333_v59 = vpop.f32.mrb[94].mxu1 }
 0xee3   :  { %v3336_v50 = vadd.f32 %v3289_v10, %v7102_v40  ;;  %v3293_v36 = vpop.f32.mrb[95].mxu0  ;;  %v3334_v52 = vpop.f32.mrb[95].mxu1  ;;  %v3338_v7 = vadd.f32 %v3330_v12, %v7114_v39 }
 0xee4   :  { %v3337_v8 = vadd.f32 %v3291_v47, %v7105_v46  ;;  %v3339_v19 = vadd.f32 %v3332_v3, %v7110_v6 }
 0xee5   :  { %v5108_v14 = vmul.f32 -1.442695, %v3336_v50 }
 0xee6   :  { %v5109_v31 = vmul.f32 -1.442695, %v3337_v8  ;;  %v5110_v48 = vmul.f32 -1.442695, %v3339_v19 }
 0xee7   :  { %5881 = vpow2.f32 %v5108_v14 }
 0xee8   :  { %5883 = vpow2.f32 %v5109_v31 }
 0xee9   :  { %5885 = vpow2.f32 %v5110_v48 }
 0xeea   :  { %5887 = vtanh.f32 %v3338_v7 }
 0xef1   :  { %v5882_v2 = vpop.eup %5881 }
 0xef2   :  { %v5884_v45 = vpop.eup %5883  ;;  %v3343_v37 = vadd.f32 1.0, %v5882_v2  ;;  %v10612_v2 = vld [vmem:[#allocation43_spill] sm:$0xff] }
 0xef3   :  { %v3349_v44 = vadd.f32 1.0, %v5884_v45  ;;  %v5886_v36 = vpop.eup %5885  ;;  %v10613_v45 = vld [vmem:[#allocation44_spill] sm:$0xff] }
 0xef4   :  { %5889 = vrcp.f32 %v3343_v37  ;;  %v5888_v59 = vpop.eup %5887  ;;  %v3356_v14 = vadd.f32 1.0, %v5886_v36  ;;  %v10614_v37 = vld [vmem:[#allocation45_spill] sm:$0xff]  ;;  %v10616_v36 = vld [vmem:[#allocation47_spill] sm:$0xff] }
 0xef5   :  { %5891 = vrcp.f32 %v3349_v44  ;;  %v10615_v44 = vld [vmem:[#allocation46_spill] sm:$0xff] }
 0xef6   :  { %5893 = vrcp.f32 %v3356_v14  ;;  %v10622_v14 = vld [vmem:[#allocation59_spill] sm:$0xff] }
 0xefe   :  { %v5890_v47 = vpop.eup %5889 }
 0xeff   :  { %v5892_v50 = vpop.eup %5891  ;;  %v3360_v52 = vmul.f32 %v5890_v47, %v5888_v59  ;;  %v10617_v59 = vld [vmem:[#allocation49_spill] sm:$0xff]  ;;  %v10618_v47 = vld [vmem:[#allocation51_spill] sm:$0xff] }
 0xf00   :  { %v3359_v25 = vmul.f32 %v5892_v50, %v8470_v49  ;;  %v8707_v3 = vpop.f32.mrb[96].mxu1  ;;  %v5894_v8 = vpop.eup %5893  ;;  %v10600_v49 = vld [vmem:[#allocation31_spill] sm:$0xff]  ;;  %v10619_v50 = vld [vmem:[#allocation53_spill] sm:$0xff] }
 0xf01   :  { %v8709_v31 = vpop.f32.mrb[97].mxu1 }
 0xf02   :  { %v8711_v12 = vadd.f32 %v3360_v52, %v3359_v25  ;;  %v3472_v56 = vpop.f32.mrb[98].mxu1  ;;  %v10620_v52 = vld [vmem:[#allocation55_spill] sm:$0xff]  ;;  %v10623_v25 = vld [vmem:[#allocation61_spill] sm:$0xff] }
 0xf03   :  { %v3473_v10 = vpop.f32.mrb[99].mxu1  ;;  %v10624_v56 = vld [vmem:[#allocation63_spill] sm:$0xff] }
 0xf04   :  { %5895 = vtanh.f32 %v8711_v12  ;;  %v10625_v10 = vld [vmem:[#allocation65_spill] sm:$0xff] }
 0xf0e   :  { %v5896_v19 = vpop.eup %5895 }
 0xf0f   :  { %v3363_v48 = vmul.f32 %v5896_v19, %v5894_v8  ;;  %v10626_v8 = vld [vmem:[#allocation67_spill] sm:$0xff]  ;;  %v10627_v19 = vld [vmem:[#allocation69_spill] sm:$0xff] }
 0xf11   :  { %v3364_v7 = vpack.c.bf16 %v3363_v48, %v3363_v48  ;;  %v10628_v48 = vld [vmem:[#allocation71_spill] sm:$0xff] }
 0xf13   :  { %5371 = vmatmul.mubr.bf16.vlgmr.msra.gmra.mrb[96].mxu0 %v3364_v7  ;;  %3582 = vmatmul.mubr.bf16.vlgmr.msra.gmra.mrb[100].mxu1 %v3364_v7 }
 0xf14   :  { %3476 = vmatpush1.bf16.msra.mxu0 %v8132_v28  ;;  %3507 = vmatprep.mubr.bf16.mxu0 %v10109_v60  ;;  %v10596_v28 = vld [vmem:[#allocation74_spill] sm:$0xff] }
 0xf15   :  { %3477 = vmatprep.subr.bf16.mxu0 %v8136_v1  ;;  %3632 = vmatpush1.bf16.msra.mxu1 %v8139_v30  ;;  %v10597_v1 = vld [vmem:[#allocation29_spill] sm:$0xff]  ;;  %v10598_v30 = vld [vmem:[#allocation30_spill] sm:$0xff] }
 0xf16   :  { %3633 = vmatprep.subr.bf16.mxu1 %v8142_v15  ;;  %3663 = vmatprep.mubr.bf16.mxu1 %v10109_v60  ;;  %v10599_v15 = vld [vmem:[#allocation76_spill] sm:$0xff] }
 0xf18   :  { %3478 = vmatpush1.bf16.msra.mxu0 %v10518_v32  ;;  %v10601_v32 = vld [vmem:[#allocation32_spill] sm:$0xff] }
 0xf19   :  { %3479 = vmatprep.subr.bf16.mxu0 %v10519_v62  ;;  %3634 = vmatpush1.bf16.msra.mxu1 %v10520_v38  ;;  %v10602_v62 = vld [vmem:[#allocation33_spill] sm:$0xff]  ;;  %v10603_v38 = vld [vmem:[#allocation34_spill] sm:$0xff] }
 0xf1a   :  { %3635 = vmatprep.subr.bf16.mxu1 %v10521_v42  ;;  %v10604_v42 = vld [vmem:[#allocation35_spill] sm:$0xff] }
 0xf1c   :  { %3480 = vmatpush1.bf16.msra.mxu0 %v10522_v57  ;;  %v10605_v57 = vld [vmem:[#allocation36_spill] sm:$0xff] }
 0xf1d   :  { %3481 = vmatprep.subr.bf16.mxu0 %v10523_v5  ;;  %3636 = vmatpush1.bf16.msra.mxu1 %v10524_v51  ;;  %v10606_v5 = vld [vmem:[#allocation37_spill] sm:$0xff]  ;;  %v10607_v51 = vld [vmem:[#allocation38_spill] sm:$0xff] }
 0xf1e   :  { %3637 = vmatprep.subr.bf16.mxu1 %v10525_v41  ;;  %v10608_v41 = vld [vmem:[#allocation39_spill] sm:$0xff] }
 0xf20   :  { %3482 = vmatpush1.bf16.msra.mxu0 %v10526_v55  ;;  %v10609_v55 = vld [vmem:[#allocation40_spill] sm:$0xff] }
 0xf21   :  { %3483 = vmatprep.subr.bf16.mxu0 %v10527_v0  ;;  %3638 = vmatpush1.bf16.msra.mxu1 %v10528_v54  ;;  %v10610_v0 = vld [vmem:[#allocation41_spill] sm:$0xff]  ;;  %v10611_v54 = vld [vmem:[#allocation42_spill] sm:$0xff] }
 0xf22   :  { %3639 = vmatprep.subr.bf16.mxu1 %v10596_v28  ;;  %v10629_v28 = vld [vmem:[#allocation73_spill] sm:$0xff] }
 0xf24   :  { %3484 = vmatpush1.bf16.msra.mxu0 %v10597_v1  ;;  %v10630_v1 = vld [vmem:[#allocation75_spill] sm:$0xff] }
 0xf25   :  { %3485 = vmatprep.subr.bf16.mxu0 %v10598_v30  ;;  %3640 = vmatpush1.bf16.msra.mxu1 %v10599_v15  ;;  %v10631_v30 = vld [vmem:[#allocation26_spill] sm:$0xff]  ;;  %v10632_v15 = vld [vmem:[#allocation17_spill] sm:$0xff] }
 0xf26   :  { %3641 = vmatprep.subr.bf16.mxu1 %v10600_v49  ;;  %v10633_v49 = vld [vmem:[#allocation52_spill] sm:$0xff] }
 0xf28   :  { %3486 = vmatpush1.bf16.msra.mxu0 %v10601_v32  ;;  %v10634_v32 = vld [vmem:[#allocation80_spill] sm:$0xff] }
 0xf29   :  { %3487 = vmatprep.subr.bf16.mxu0 %v10602_v62  ;;  %3642 = vmatpush1.bf16.msra.mxu1 %v10603_v38  ;;  %v10635_v62 = vld [vmem:[#allocation54_spill] sm:$0xff] }
 0xf2a   :  { %3643 = vmatprep.subr.bf16.mxu1 %v10604_v42  ;;  %v10636_v38 = vld [vmem:[#allocation18_spill] sm:$0xff]  ;;  %v10638_v42 = vld [vmem:[#allocation19_spill] sm:$0xff] }
 0xf2c   :  { %3488 = vmatpush1.bf16.msra.mxu0 %v10605_v57  ;;  %v10639_v57 = vld [vmem:[#allocation56_spill] sm:$0xff] }
 0xf2d   :  { %3489 = vmatprep.subr.bf16.mxu0 %v10606_v5  ;;  %3644 = vmatpush1.bf16.msra.mxu1 %v10607_v51  ;;  %v10640_v5 = vld [vmem:[#allocation83_spill] sm:$0xff]  ;;  %v10641_v51 = vld [vmem:[#allocation58_spill] sm:$0xff] }
 0xf2e   :  { %3645 = vmatprep.subr.bf16.mxu1 %v10608_v41  ;;  %v10642_v41 = vld [vmem:[#allocation20_spill] sm:$0xff] }
 0xf30   :  { %3490 = vmatpush1.bf16.msra.mxu0 %v10609_v55  ;;  %v10643_v55 = vld [vmem:[#allocation91_spill] sm:$0xff] }
 0xf31   :  { %3590 = vmatprep.subr.bf16.mxu0 %v10610_v0  ;;  %3646 = vmatpush1.bf16.msra.mxu1 %v10611_v54 }
 0xf32   :  { %5374 = vmatprep.subr.bf16.mxu1 %v10238_v58 }
 0xf33   :  { %3508 = vmatmul.mubr.bf16.vlgmr.msra.gmra.mrb[100].mxu0 %v8578_v16  ;;  %v10621_v16 = vld [vmem:[#allocation57_spill] sm:$0xff] }
 0xf34   :  { %3591 = vmatpush1.bf16.msra.mxu0 %v10612_v2  ;;  %3622 = vmatprep.mubr.bf16.mxu0 %v10109_v60  ;;  %v10644_v2 = vld [vmem:[#allocation92_spill] sm:$0xff] }
 0xf35   :  { %3592 = vmatprep.subr.bf16.mxu0 %v10613_v45 }
 0xf38   :  { %3593 = vmatpush1.bf16.msra.mxu0 %v10614_v37 }
 0xf39   :  { %3594 = vmatprep.subr.bf16.mxu0 %v10615_v44 }
 0xf3c   :  { %3595 = vmatpush1.bf16.msra.mxu0 %v10616_v36  ;;  %v10645_v36 = vld [vmem:[#allocation78_spill] sm:$0xff] }
 0xf3d   :  { %3596 = vmatprep.subr.bf16.mxu0 %v10617_v59  ;;  %v10646_v59 = vld [vmem:[#allocation85_spill] sm:$0xff] }
 0xf40   :  { %3597 = vmatpush1.bf16.msra.mxu0 %v10618_v47  ;;  %v3431_v47 = vmul.f32 %v10646_v59, %v10645_v36 }
 0xf41   :  { %3598 = vmatprep.subr.bf16.mxu0 %v10619_v50 }
 0xf44   :  { %3599 = vmatpush1.bf16.msra.mxu0 %v10620_v52 }
 0xf45   :  { %3600 = vmatprep.subr.bf16.mxu0 %v10621_v16  ;;  %v10647_v16 = vld [vmem:[#allocation77_spill] sm:$0xff] }
 0xf48   :  { %3601 = vmatpush1.bf16.msra.mxu0 %v10622_v14  ;;  %v3430_v14 = vmul.f32 %v10646_v59, %v10647_v16 }
 0xf49   :  { %3602 = vmatprep.subr.bf16.mxu0 %v10623_v25 }
 0xf4c   :  { %3603 = vmatpush1.bf16.msra.mxu0 %v10624_v56 }
 0xf4d   :  { %3604 = vmatprep.subr.bf16.mxu0 %v10625_v10 }
 0xf50   :  { %3605 = vmatpush1.bf16.msra.mxu0 %v10626_v8 }
 0xf51   :  { %3672 = vmatprep.subr.bf16.mxu0 %v10627_v19  ;;  %v3517_v19 = vadd.f32 %v8709_v31, %v3431_v47 }
 0xf53   :  { %3623 = vmatmul.mubr.bf16.vlgmr.msra.gmra.mrb[104].mxu0 %v3364_v7  ;;  %v10637_v7 = vld [vmem:[#allocation81_spill] sm:$0xff] }
 0xf54   :  { %3673 = vmatpush1.bf16.msra.mxu0 %v10628_v48  ;;  %3704 = vmatprep.mubr.bf16.mxu0 %v10109_v60  ;;  %v3516_v48 = vadd.f32 %v8707_v3, %v3430_v14 }
 0xf55   :  { %3674 = vmatprep.subr.bf16.mxu0 %v10629_v28 }
 0xf58   :  { %3675 = vmatpush1.bf16.msra.mxu0 %v10630_v1  ;;  %v3521_v1 = vadd.f32 %v3517_v19, %v6978_v18 }
 0xf59   :  { %3676 = vmatprep.subr.bf16.mxu0 %v10631_v30  ;;  %v3520_v30 = vadd.f32 %v3516_v48, %v6973_v22 }
 0xf5c   :  { %3677 = vmatpush1.bf16.msra.mxu0 %v10632_v15  ;;  %v5112_v15 = vmul.f32 -1.442695, %v3521_v1 }
 0xf5d   :  { %3678 = vmatprep.subr.bf16.mxu0 %v10633_v49  ;;  %v5111_v49 = vmul.f32 -1.442695, %v3520_v30 }
 0xf60   :  { %3679 = vmatpush1.bf16.msra.mxu0 %v10634_v32 }
 0xf61   :  { %3680 = vmatprep.subr.bf16.mxu0 %v10635_v62 }
 0xf64   :  { %3681 = vmatpush1.bf16.msra.mxu0 %v10636_v38 }
 0xf65   :  { %3682 = vmatprep.subr.bf16.mxu0 %v10637_v7 }
 0xf68   :  { %3683 = vmatpush1.bf16.msra.mxu0 %v10638_v42 }
 0xf69   :  { %3684 = vmatprep.subr.bf16.mxu0 %v10639_v57  ;;  %v10648_v57 = vld [vmem:[#allocation79_spill] sm:$0xff] }
 0xf6a   :  { %v3432_v31 = vmul.f32 %v10646_v59, %v10648_v57 }
 0xf6c   :  { %3685 = vmatpush1.bf16.msra.mxu0 %v10640_v5 }
 0xf6d   :  { %3686 = vmatprep.subr.bf16.mxu0 %v10641_v51 }
 0xf70   :  { %3687 = vmatpush1.bf16.msra.mxu0 %v10642_v41  ;;  %v3433_v41 = vmul.f32 %v10646_v59, %v6970_v35 }
 0xf71   :  { %3811 = vmatprep.subr.bf16.mxu0 %v10643_v55 }
 0xfe6   :  { %v3399_v0 = vpop.f32.mrb[96].mxu0  ;;  %v8783_v54 = vpop.f32.mrb[100].mxu1 }
 0xfe7   :  { %v3400_v45 = vadd.f32 %v10644_v2, %v3399_v0  ;;  %v5372_v37 = vpop.f32.mrb[97].mxu0  ;;  %v8786_v44 = vpop.f32.mrb[101].mxu1 }
 0xfe8   :  { %v3402_v50 = vpop.f32.mrb[98].mxu0  ;;  %v3587_v52 = vpop.f32.mrb[102].mxu1 }
 0xfe9   :  { %v3406_v25 = vand.u32 2147483647, %v3400_v45  ;;  %v3588_v56 = vpop.f32.mrb[103].mxu1  ;;  %3416 = vrot.lane.b32.xlu0 %v3400_v45, %s6528_s22  ;;  %v5373_v10 = vpop.f32.mrb[99].mxu0  ;;  %v3405_v0 = vmax.f32 %v3400_v45, 0.0 }
 0xfeb   :  { %v3407_v8 = vsub.f32 0.0, %v3406_v25 }
 0xfed   :  { %v3408_v28 = vmul.f32 1.442695, %v3407_v8 }
 0xfef   :  { %5897 = vpow2.f32 %v3408_v28 }
 0xff0   :  { %5899 = vpow2.f32 %v5112_v15 }
 0xff1   :  { %5901 = vpow2.f32 %v5111_v49 }
 0xff9   :  { %v5898_v32 = vpop.eup %5897 }
 0xffa   :  { %v3410_v62 = vadd.f32 1.0, %v5898_v32  ;;  %v5900_v38 = vpop.eup %5899 }
 0xffb   :  { %v5902_v7 = vpop.eup %5901  ;;  %v3533_v42 = vadd.f32 1.0, %v5900_v38 }
 0xffc   :  { %5903 = vlog2.f32 %v3410_v62  ;;  %v3527_v5 = vadd.f32 1.0, %v5902_v7 }
 0xffd   :  { %5905 = vrcp.f32 %v3533_v42 }
 0xffe   :  { %5907 = vrcp.f32 %v3527_v5 }
0x1006   :  { %v5904_v3 = vpop.eup %5903  ;;  %v3509_v51 = vpop.f32.mrb[100].mxu0 }
0x1007   :  { %v3518_v37 = vadd.f32 %v3509_v51, %v3432_v31  ;;  %v3511_v47 = vpop.f32.mrb[101].mxu0  ;;  %v3412_v50 = vmul.f32 0.6931472, %v5904_v3  ;;  %v5906_v45 = vpop.eup %5905 }
0x1008   :  { %v3519_v52 = vadd.f32 %v3511_v47, %v3433_v41  ;;  %v3513_v14 = vpop.f32.mrb[102].mxu0  ;;  %v5908_v59 = vpop.eup %5907  ;;  %v3543_v1 = vmul.f32 %v5906_v45, %v8571_v13  ;;  %v10649_v13 = vld [vmem:[#allocation93_spill] sm:$0xff]  ;;  %v10650_v41 = vld [vmem:[#allocation94_spill] sm:$0xff]  ;;  %v10665_v45 = vld [vmem:[#allocation27_spill] sm:$0xff] }
0x1009   :  { %v3522_v25 = vadd.f32 %v3518_v37, %v6992_v24  ;;  %v3514_v56 = vpop.f32.mrb[103].mxu0  ;;  %v3413_v10 = vadd.f32 %v3412_v50, %v3405_v0  ;;  %v10651_v0 = vld [vmem:[#allocation84_spill] sm:$0xff]  ;;  %v10652_v37 = vld [vmem:[#allocation50_spill] sm:$0xff]  ;;  %v10654_v47 = vld [vmem:[#allocation21_spill] sm:$0xff] }
0x100a   :  { %v3523_v8 = vadd.f32 %v3519_v52, %v6987_v27  ;;  %v10655_v50 = vld [vmem:[#allocation99_spill] sm:$0xff]  ;;  %v10657_v52 = vld [vmem:[#allocation60_spill] sm:$0xff]  ;;  %v10660_v56 = vld [vmem:[#allocation66_spill] sm:$0xff] }
0x100b   :  { %5909 = vtanh.f32 %v3522_v25  ;;  %v3414_v19 = vadd.f32 1e-06, %v3413_v10  ;;  %v10658_v14 = vld [vmem:[#allocation23_spill] sm:$0xff]  ;;  %v10659_v25 = vld [vmem:[#allocation64_spill] sm:$0xff] }
0x100c   :  { %v5113_v48 = vmul.f32 -1.442695, %v3523_v8  ;;  %v10661_v10 = vld [vmem:[#allocation24_spill] sm:$0xff]  ;;  %v10662_v8 = vld [vmem:[#allocation25_spill] sm:$0xff] }
0x100d   :  { %3422 = vrot.lane.b32.xlu1 %v3414_v19, %s6527_s17  ;;  %v10663_v19 = vld [vmem:[#allocation68_spill] sm:$0xff]  ;;  %s6532_s17 = smov 10  }
0x100e   :  { %5911 = vpow2.f32 %v5113_v48  ;;  %v10664_v48 = vld [vmem:[#allocation70_spill] sm:$0xff] }
0x1015   :  { %v5910_v28 = vpop.eup %5909 }
0x1016   :  { %v3544_v30 = vmul.f32 %v5910_v28, %v5908_v59  ;;  %v10666_v59 = vld [vmem:[#allocation62_spill] sm:$0xff] }
0x1018   :  { %v5912_v15 = vpop.eup %5911  ;;  %v8805_v49 = vadd.f32 %v3544_v30, %v3543_v1  ;;  %v10667_v1 = vld [vmem:[#allocation95_spill] sm:$0xff]  ;;  %v10668_v30 = vld [vmem:[#allocation96_spill] sm:$0xff] }
0x1019   :  { %v3540_v32 = vadd.f32 1.0, %v5912_v15  ;;  %v10669_v15 = vld [vmem:[#allocation97_spill] sm:$0xff] }
0x101a   :  { %5913 = vtanh.f32 %v8805_v49 }
0x101b   :  { %5915 = vrcp.f32 %v3540_v32  ;;  %v10670_v32 = vld [vmem:[#allocation48_spill] sm:$0xff] }
0x1024   :  { %v5914_v62 = vpop.eup %5913 }
0x1025   :  { %v5916_v38 = vpop.eup %5915 }
0x1026   :  { %v8808_v7 = vpop.f32.mrb[104].mxu0  ;;  %v3547_v42 = vmul.f32 %v5916_v38, %v5914_v62  ;;  %v10671_v62 = vld [vmem:[#allocation87_spill] sm:$0xff]  ;;  %v10672_v38 = vld [vmem:[#allocation88_spill] sm:$0xff] }
0x1027   :  { %v8810_v31 = vpop.f32.mrb[105].mxu0 }
0x1028   :  { %v3628_v3 = vpop.f32.mrb[106].mxu0  ;;  %v8812_v5 = vpack.c.bf16 %v3547_v42, %v3547_v42  ;;  %v10673_v42 = vld [vmem:[#allocation89_spill] sm:$0xff] }
0x1029   :  { %v3629_v51 = vpop.f32.mrb[107].mxu0  ;;  %v10674_v3 = vld [vmem:[#allocation90_spill] sm:$0xff] }
0x102a   :  { %3664 = vmatmul.mubr.bf16.vlgmr.msra.gmra.mrb[104].mxu1 %v8812_v5  ;;  %3705 = vmatmul.mubr.bf16.vlgmr.msra.gmra.mrb[108].mxu0 %v8812_v5 }
0x102b   :  { %3812 = vmatpush1.bf16.msra.mxu0 %v8582_v21  ;;  %3843 = vmatprep.mubr.bf16.mxu0 %v10109_v60 }
0x102c   :  { %3813 = vmatprep.subr.bf16.mxu0 %v8586_v4  ;;  %5375 = vmatpush3.bf16.msra.mxu1 %v8592_v33 }
0x102d   :  { %5376 = vmatprep.subr.bf16.mxu1 %v10238_v58  ;;  %5390 = vmatprep.mubr.msk.bf16.mxu1 %vm6512_vm0, %v10238_v58 }
0x102f   :  { %3814 = vmatpush1.bf16.msra.mxu0 %v8598_v29 }
0x1030   :  { %3815 = vmatprep.subr.bf16.mxu0 %v8601_v26  ;;  %5377 = vmatpush3.bf16.msra.mxu1 %v8607_v53 }
0x1031   :  { %5378 = vmatprep.subr.bf16.mxu1 %v10238_v58 }
0x1033   :  { %3816 = vmatpush1.bf16.msra.mxu0 %v8611_v17 }
0x1034   :  { %3817 = vmatprep.subr.bf16.mxu0 %v8614_v23  ;;  %5379 = vmatpush3.bf16.msra.mxu1 %v8620_v61 }
0x1035   :  { %5380 = vmatprep.subr.bf16.mxu1 %v10238_v58 }
0x1037   :  { %3818 = vmatpush1.bf16.msra.mxu0 %v8624_v63 }
0x1038   :  { %3819 = vmatprep.subr.bf16.mxu0 %v8627_v11  ;;  %5381 = vmatpush3.bf16.msra.mxu1 %v8379_v43  ;;  %v10653_v43 = vld [vmem:[#allocation98_spill] sm:$0xff] }
0x1039   :  { %5382 = vmatprep.subr.bf16.mxu1 %v10238_v58 }
0x103b   :  { %3820 = vmatpush1.bf16.msra.mxu0 %v8632_v34 }
0x103c   :  { %3821 = vmatprep.subr.bf16.mxu0 %v8635_v9  ;;  %5383 = vmatpush3.bf16.msra.mxu1 %v8388_v20  ;;  %v10656_v20 = vld [vmem:[#allocation22_spill] sm:$0xff] }
0x103d   :  { %5384 = vmatprep.subr.bf16.mxu1 %v10238_v58 }
0x103f   :  { %3822 = vmatpush1.bf16.msra.mxu0 %v10649_v13 }
0x1040   :  { %3823 = vmatprep.subr.bf16.mxu0 %v10650_v41  ;;  %5385 = vmatpush3.bf16.msra.mxu1 %v10651_v0 }
0x1041   :  { %5386 = vmatprep.subr.bf16.mxu1 %v10238_v58 }
0x1043   :  { %3824 = vmatpush1.bf16.msra.mxu0 %v10652_v37 }
0x1044   :  { %3825 = vmatprep.subr.bf16.mxu0 %v10653_v43  ;;  %5387 = vmatpush3.bf16.msra.mxu1 %v10654_v47 }
0x1045   :  { %5388 = vmatprep.subr.bf16.mxu1 %v10238_v58 }
0x1047   :  { %3826 = vmatpush1.bf16.msra.mxu0 %v10655_v50 }
0x1048   :  { %3926 = vmatprep.subr.bf16.mxu0 %v10656_v20  ;;  %5389 = vmatpush3.bf16.msra.mxu1 %v10657_v52 }
0x1049   :  { %3852 = vmatprep.subr.bf16.mxu1 %v10658_v14 }
0x104a   :  { %3844 = vmatmul.mubr.bf16.vlgmr.msra.gmra.mrb[112].mxu0 %v8812_v5 }
0x104b   :  { %3927 = vmatpush1.bf16.msra.mxu0 %v10659_v25  ;;  %3958 = vmatprep.mubr.bf16.mxu0 %v10109_v60 }
0x104c   :  { %3928 = vmatprep.subr.bf16.mxu0 %v10660_v56 }
0x104f   :  { %3929 = vmatpush1.bf16.msra.mxu0 %v10661_v10 }
0x1050   :  { %3930 = vmatprep.subr.bf16.mxu0 %v10662_v8 }
0x1053   :  { %3931 = vmatpush1.bf16.msra.mxu0 %v10663_v19 }
0x1054   :  { %3932 = vmatprep.subr.bf16.mxu0 %v10664_v48 }
0x1057   :  { %3933 = vmatpush1.bf16.msra.mxu0 %v10665_v45 }
0x1058   :  { %3934 = vmatprep.subr.bf16.mxu0 %v10666_v59 }
0x105b   :  { %v3417_v28 = vpop.permute.xlu0 %3416  ;;  %3935 = vmatpush1.bf16.msra.mxu0 %v10667_v1 }
0x105c   :  { %3420 = vst.msk [vmem:[#allocation8] sm:$0xff] %vm3419_vm7, %v3417_v28  ;;  %3936 = vmatprep.subr.bf16.mxu0 %v10668_v30 }
0x105f   :  { %3937 = vmatpush1.bf16.msra.mxu0 %v10669_v15 }
0x1060   :  { %3938 = vmatprep.subr.bf16.mxu0 %v10670_v32 }
0x1063   :  { %3939 = vmatpush1.bf16.msra.mxu0 %v10671_v62 }
0x1064   :  { %3940 = vmatprep.subr.bf16.mxu0 %v10672_v38 }
0x1067   :  { %3941 = vmatpush1.bf16.msra.mxu0 %v10673_v42 }
0x1068   :  { %4008 = vmatprep.subr.bf16.mxu0 %v10674_v3 }
0x107f   :  { %v3423_v51 = vpop.permute.xlu1 %3422 }
0x1080   :  { %3425 = vst.msk [vmem:[#allocation9] sm:$0xff] %vm3419_vm7, %v3423_v51 }
0x10fd   :  { %v3665_v0 = vpop.f32.mrb[104].mxu1  ;;  %v3706_v47 = vpop.f32.mrb[108].mxu0 }
0x10fe   :  { %v3666_v52 = vadd.f32 %v3665_v0, %v8783_v54  ;;  %v3707_v59 = vadd.f32 %v3706_v47, %v8808_v7  ;;  %v3667_v28 = vpop.f32.mrb[105].mxu1  ;;  %v3708_v1 = vpop.f32.mrb[109].mxu0 }
0x10ff   :  { %v3668_v30 = vadd.f32 %v3667_v28, %v8786_v44  ;;  %v3709_v15 = vadd.f32 %v3708_v1, %v8810_v31  ;;  %v3669_v32 = vpop.f32.mrb[106].mxu1  ;;  %v3710_v62 = vpop.f32.mrb[110].mxu0 }
0x1100   :  { %v3713_v38 = vadd.f32 %v3666_v52, %v7102_v40  ;;  %v3670_v42 = vpop.f32.mrb[107].mxu1  ;;  %v3711_v3 = vpop.f32.mrb[111].mxu0  ;;  %v3715_v0 = vadd.f32 %v3707_v59, %v7114_v39 }
0x1101   :  { %v3714_v51 = vadd.f32 %v3668_v30, %v7105_v46  ;;  %v3716_v54 = vadd.f32 %v3709_v15, %v7110_v6 }
0x1102   :  { %v5114_v45 = vmul.f32 -1.442695, %v3713_v38 }
0x1103   :  { %v5115_v48 = vmul.f32 -1.442695, %v3714_v51  ;;  %v5116_v7 = vmul.f32 -1.442695, %v3716_v54 }
0x1104   :  { %5917 = vpow2.f32 %v5114_v45 }
0x1105   :  { %5919 = vpow2.f32 %v5115_v48 }
0x1106   :  { %5921 = vpow2.f32 %v5116_v7 }
0x1107   :  { %5923 = vtanh.f32 %v3715_v0 }
0x110e   :  { %v5918_v44 = vpop.eup %5917 }
0x110f   :  { %v5920_v47 = vpop.eup %5919  ;;  %v3720_v31 = vadd.f32 1.0, %v5918_v44  ;;  %v8893_v44 = vld [vmem:[#allocation2 + $0x2c] ss:$16 sps:$4 sm:$0xff]  }
0x1110   :  { %v3726_v28 = vadd.f32 1.0, %v5920_v47  ;;  %v5922_v52 = vpop.eup %5921  ;;  %v8896_v47 = vld [vmem:[#allocation5] ss:$16 sps:$4 sm:$0xff]  }
0x1111   :  { %5925 = vrcp.f32 %v3720_v31  ;;  %v5924_v1 = vpop.eup %5923  ;;  %v3733_v45 = vadd.f32 1.0, %v5922_v52  ;;  %v8899_v31 = vld [vmem:[#allocation5 + $0x24] ss:$16 sps:$4 sm:$0xff]   ;;  %v8906_v52 = vld [vmem:[#allocation2 + $0x4c] ss:$16 sps:$4 sm:$0xff]  }
0x1112   :  { %5927 = vrcp.f32 %v3726_v28  ;;  %v8903_v28 = vld [vmem:[#allocation2 + $0x28] ss:$16 sps:$4 sm:$0xff]   ;;  %10676 = vst [vmem:[#allocation72_spill] sm:$0xff] %v8906_v52 }
0x1113   :  { %5929 = vrcp.f32 %v3733_v45  ;;  %10675 = vst [vmem:[#allocation28_spill] sm:$0xff] %v8903_v28  ;;  %v8921_v45 = vld [vmem:[#allocation5 + $0x40] ss:$16 sps:$4 sm:$0xff]  }
0x1114   :  { %10681 = vst [vmem:[#allocation76_spill] sm:$0xff] %v8921_v45 }
0x111b   :  { %v5926_v30 = vpop.eup %5925 }
0x111c   :  { %v5928_v32 = vpop.eup %5927  ;;  %v3737_v62 = vmul.f32 %v5926_v30, %v5924_v1  ;;  %v8909_v1 = vld [vmem:[#allocation5 + $0x20] ss:$16 sps:$4 sm:$0xff]   ;;  %v8912_v30 = vld [vmem:[#allocation5 + $0x44] ss:$16 sps:$4 sm:$0xff]  }
0x111d   :  { %v3736_v48 = vmul.f32 %v5928_v32, %v8711_v12  ;;  %v8878_v15 = vpop.f32.mrb[112].mxu0  ;;  %v5930_v51 = vpop.eup %5929  ;;  %v8889_v12 = vld [vmem:[#allocation2 + $0x8] ss:$16 sps:$4 sm:$0xff]   ;;  %10677 = vst [vmem:[#allocation82_spill] sm:$0xff] %v8909_v1  ;;  %10678 = vst [vmem:[#allocation74_spill] sm:$0xff] %v8912_v30 }
0x111e   :  { %v8880_v38 = vpop.f32.mrb[113].mxu0  ;;  %v8915_v32 = vld [vmem:[#allocation2 + $0x48] ss:$16 sps:$4 sm:$0xff]  }
0x111f   :  { %v8882_v59 = vadd.f32 %v3737_v62, %v3736_v48  ;;  %v3849_v42 = vpop.f32.mrb[114].mxu0  ;;  %10679 = vst [vmem:[#allocation29_spill] sm:$0xff] %v8915_v32  ;;  %v8918_v62 = vld [vmem:[#allocation2 + $0x6c] ss:$16 sps:$4 sm:$0xff]   ;;  %v8924_v48 = vld [vmem:[#allocation5 + $0x64] ss:$16 sps:$4 sm:$0xff]  }
0x1120   :  { %v3850_v3 = vpop.f32.mrb[115].mxu0  ;;  %10680 = vst [vmem:[#allocation30_spill] sm:$0xff] %v8918_v62  ;;  %10682 = vst [vmem:[#allocation31_spill] sm:$0xff] %v8924_v48  ;;  %v8927_v42 = vld [vmem:[#allocation2 + $0x68] ss:$16 sps:$4 sm:$0xff]  }
0x1121   :  { %5931 = vtanh.f32 %v8882_v59  ;;  %10683 = vst [vmem:[#allocation32_spill] sm:$0xff] %v8927_v42  ;;  %v8930_v3 = vld [vmem:[#allocation2 + $0x8c] ss:$16 sps:$4 sm:$0xff]  }
0x1122   :  { %10684 = vst [vmem:[#allocation33_spill] sm:$0xff] %v8930_v3 }
0x112b   :  { %v5932_v54 = vpop.eup %5931 }
0x112c   :  { %v3740_v7 = vmul.f32 %v5932_v54, %v5930_v51  ;;  %v8933_v51 = vld [vmem:[#allocation5 + $0x60] ss:$16 sps:$4 sm:$0xff]   ;;  %v8936_v54 = vld [vmem:[#allocation5 + $0x84] ss:$16 sps:$4 sm:$0xff]  }
0x112d   :  { %10685 = vst [vmem:[#allocation34_spill] sm:$0xff] %v8933_v51  ;;  %10686 = vst [vmem:[#allocation35_spill] sm:$0xff] %v8936_v54 }
0x112e   :  { %v8885_v0 = vpack.c.bf16 %v3740_v7, %v3740_v7  ;;  %v8939_v7 = vld [vmem:[#allocation2 + $0x88] ss:$16 sps:$4 sm:$0xff]  }
0x112f   :  { %10687 = vst [vmem:[#allocation36_spill] sm:$0xff] %v8939_v7 }
0x1130   :  { %5391 = vmatmul.mubr.bf16.vlgmr.msra.gmra.mrb[108].mxu1 %v8885_v0  ;;  %3959 = vmatmul.mubr.bf16.vlgmr.msra.gmra.mrb[116].mxu0 %v8885_v0 }
0x1131   :  { %3853 = vmatpush1.bf16.msra.mxu1 %v8889_v12  ;;  %3884 = vmatprep.mubr.bf16.mxu1 %v10109_v60 }
0x1132   :  { %3854 = vmatprep.subr.bf16.mxu1 %v8893_v44  ;;  %4009 = vmatpush1.bf16.msra.mxu0 %v8896_v47 }
0x1133   :  { %4010 = vmatprep.subr.bf16.mxu0 %v8899_v31  ;;  %4040 = vmatprep.mubr.bf16.mxu0 %v10109_v60 }
0x1135   :  { %3855 = vmatpush1.bf16.msra.mxu1 %v8903_v28 }
0x1136   :  { %3856 = vmatprep.subr.bf16.mxu1 %v8906_v52  ;;  %4011 = vmatpush1.bf16.msra.mxu0 %v8909_v1 }
0x1137   :  { %4012 = vmatprep.subr.bf16.mxu0 %v8912_v30 }
0x1139   :  { %3857 = vmatpush1.bf16.msra.mxu1 %v8915_v32 }
0x113a   :  { %3858 = vmatprep.subr.bf16.mxu1 %v8918_v62  ;;  %4013 = vmatpush1.bf16.msra.mxu0 %v8921_v45 }
0x113b   :  { %4014 = vmatprep.subr.bf16.mxu0 %v8924_v48  ;;  %v8942_v48 = vld [vmem:[#allocation2 + $0xac] ss:$16 sps:$4 sm:$0xff]  }
0x113c   :  { %10688 = vst [vmem:[#allocation37_spill] sm:$0xff] %v8942_v48 }
0x113d   :  { %3859 = vmatpush1.bf16.msra.mxu1 %v8927_v42  ;;  %v8945_v42 = vld [vmem:[#allocation5 + $0x80] ss:$16 sps:$4 sm:$0xff]  }
0x113e   :  { %3860 = vmatprep.subr.bf16.mxu1 %v8930_v3  ;;  %4015 = vmatpush1.bf16.msra.mxu0 %v8933_v51  ;;  %10689 = vst [vmem:[#allocation38_spill] sm:$0xff] %v8945_v42  ;;  %v8948_v3 = vld [vmem:[#allocation5 + $0xa4] ss:$16 sps:$4 sm:$0xff]   ;;  %v8951_v51 = vld [vmem:[#allocation2 + $0xa8] ss:$16 sps:$4 sm:$0xff]  }
0x113f   :  { %4016 = vmatprep.subr.bf16.mxu0 %v8936_v54  ;;  %10690 = vst [vmem:[#allocation39_spill] sm:$0xff] %v8948_v3  ;;  %10691 = vst [vmem:[#allocation40_spill] sm:$0xff] %v8951_v51  ;;  %v8954_v54 = vld [vmem:[#allocation2 + $0xcc] ss:$16 sps:$4 sm:$0xff]  }
0x1140   :  { %10692 = vst [vmem:[#allocation41_spill] sm:$0xff] %v8954_v54 }
0x1141   :  { %3861 = vmatpush1.bf16.msra.mxu1 %v8939_v7  ;;  %v8957_v7 = vld [vmem:[#allocation5 + $0xa0] ss:$16 sps:$4 sm:$0xff]  }
0x1142   :  { %3862 = vmatprep.subr.bf16.mxu1 %v8942_v48  ;;  %4017 = vmatpush1.bf16.msra.mxu0 %v8945_v42  ;;  %10693 = vst [vmem:[#allocation42_spill] sm:$0xff] %v8957_v7  ;;  %v8960_v48 = vld [vmem:[#allocation5 + $0xc4] ss:$16 sps:$4 sm:$0xff]   ;;  %v8963_v42 = vld [vmem:[#allocation2 + $0xc8] ss:$16 sps:$4 sm:$0xff]  }
0x1143   :  { %4018 = vmatprep.subr.bf16.mxu0 %v8948_v3  ;;  %10694 = vst [vmem:[#allocation43_spill] sm:$0xff] %v8960_v48  ;;  %10695 = vst [vmem:[#allocation44_spill] sm:$0xff] %v8963_v42  ;;  %v8966_v3 = vld [vmem:[#allocation2 + $0xec] ss:$16 sps:$4 sm:$0xff]  }
0x1144   :  { %10696 = vst [vmem:[#allocation45_spill] sm:$0xff] %v8966_v3 }
0x1145   :  { %3863 = vmatpush1.bf16.msra.mxu1 %v8951_v51  ;;  %v8969_v51 = vld [vmem:[#allocation5 + $0xc0] ss:$16 sps:$4 sm:$0xff]  }
0x1146   :  { %3864 = vmatprep.subr.bf16.mxu1 %v8954_v54  ;;  %4019 = vmatpush1.bf16.msra.mxu0 %v8957_v7  ;;  %10697 = vst [vmem:[#allocation46_spill] sm:$0xff] %v8969_v51  ;;  %v8972_v54 = vld [vmem:[#allocation5 + $0xe4] ss:$16 sps:$4 sm:$0xff]   ;;  %v8975_v7 = vld [vmem:[#allocation2 + $0xe8] ss:$16 sps:$4 sm:$0xff]  }
0x1147   :  { %4020 = vmatprep.subr.bf16.mxu0 %v8960_v48  ;;  %10698 = vst [vmem:[#allocation47_spill] sm:$0xff] %v8972_v54  ;;  %10699 = vst [vmem:[#allocation49_spill] sm:$0xff] %v8975_v7  ;;  %v8978_v48 = vld [vmem:[#allocation7 + $0xc] ss:$16 sps:$4 sm:$0xff]  }
0x1148   :  { %10700 = vst [vmem:[#allocation51_spill] sm:$0xff] %v8978_v48 }
0x1149   :  { %3865 = vmatpush1.bf16.msra.mxu1 %v8963_v42  ;;  %v8981_v42 = vld [vmem:[#allocation5 + $0xe0] ss:$16 sps:$4 sm:$0xff]  }
0x114a   :  { %3866 = vmatprep.subr.bf16.mxu1 %v8966_v3  ;;  %4021 = vmatpush1.bf16.msra.mxu0 %v8969_v51  ;;  %10701 = vst [vmem:[#allocation53_spill] sm:$0xff] %v8981_v42  ;;  %v8986_v51 = vld [vmem:[#allocation7 + $0x8] ss:$16 sps:$4 sm:$0xff]  }
0x114b   :  { %4022 = vmatprep.subr.bf16.mxu0 %v8972_v54  ;;  %10702 = vst [vmem:[#allocation55_spill] sm:$0xff] %v8986_v51  ;;  %v8990_v54 = vld [vmem:[#allocation7 + $0x2c] ss:$16 sps:$4 sm:$0xff]  }
0x114c   :  { %10703 = vst [vmem:[#allocation57_spill] sm:$0xff] %v8990_v54 }
0x114d   :  { %3867 = vmatpush1.bf16.msra.mxu1 %v8975_v7  ;;  %v8993_v7 = vld [vmem:[#allocation7 + $0x28] ss:$16 sps:$4 sm:$0xff]  }
0x114e   :  { %3967 = vmatprep.subr.bf16.mxu1 %v8978_v48  ;;  %4023 = vmatpush1.bf16.msra.mxu0 %v8981_v42  ;;  %10704 = vst [vmem:[#allocation59_spill] sm:$0xff] %v8993_v7  ;;  %v8996_v48 = vld [vmem:[#allocation7 + $0x4c] ss:$16 sps:$4 sm:$0xff]   ;;  %v8999_v42 = vld [vmem:[#allocation7 + $0x48] ss:$16 sps:$4 sm:$0xff]  }
0x114f   :  { %5394 = vmatprep.subr.bf16.mxu0 %v10238_v58  ;;  %10705 = vst [vmem:[#allocation61_spill] sm:$0xff] %v8996_v48  ;;  %10706 = vst [vmem:[#allocation63_spill] sm:$0xff] %v8999_v42 }
0x1150   :  { %3885 = vmatmul.mubr.bf16.vlgmr.msra.gmra.mrb[112].mxu1 %v8812_v5  ;;  %v9002_v5 = vld [vmem:[#allocation7 + $0x6c] ss:$16 sps:$4 sm:$0xff]  }
0x1151   :  { %3968 = vmatpush1.bf16.msra.mxu1 %v8986_v51  ;;  %3999 = vmatprep.mubr.bf16.mxu1 %v10109_v60  ;;  %10707 = vst [vmem:[#allocation65_spill] sm:$0xff] %v9002_v5  ;;  %v9005_v51 = vld [vmem:[#allocation7 + $0x68] ss:$16 sps:$4 sm:$0xff]  }
0x1152   :  { %3969 = vmatprep.subr.bf16.mxu1 %v8990_v54  ;;  %10708 = vst [vmem:[#allocation67_spill] sm:$0xff] %v9005_v51  ;;  %v9008_v54 = vld [vmem:[#allocation7 + $0x8c] ss:$16 sps:$4 sm:$0xff]  }
0x1153   :  { %10709 = vst [vmem:[#allocation69_spill] sm:$0xff] %v9008_v54 }
0x1155   :  { %3970 = vmatpush1.bf16.msra.mxu1 %v8993_v7  ;;  %v9011_v7 = vld [vmem:[#allocation7 + $0x88] ss:$16 sps:$4 sm:$0xff]  }
0x1156   :  { %3971 = vmatprep.subr.bf16.mxu1 %v8996_v48  ;;  %10710 = vst [vmem:[#allocation71_spill] sm:$0xff] %v9011_v7  ;;  %v9014_v48 = vld [vmem:[#allocation7 + $0xac] ss:$16 sps:$4 sm:$0xff]  }
0x1157   :  { %10711 = vst [vmem:[#allocation73_spill] sm:$0xff] %v9014_v48 }
0x1159   :  { %3972 = vmatpush1.bf16.msra.mxu1 %v8999_v42  ;;  %v9017_v42 = vld [vmem:[#allocation7 + $0xa8] ss:$16 sps:$4 sm:$0xff]  }
0x115a   :  { %3973 = vmatprep.subr.bf16.mxu1 %v9002_v5  ;;  %10712 = vst [vmem:[#allocation75_spill] sm:$0xff] %v9017_v42  ;;  %v9020_v5 = vld [vmem:[#allocation7 + $0xcc] ss:$16 sps:$4 sm:$0xff]  }
0x115b   :  { %10713 = vst [vmem:[#allocation26_spill] sm:$0xff] %v9020_v5 }
0x115d   :  { %3974 = vmatpush1.bf16.msra.mxu1 %v9005_v51  ;;  %v9023_v51 = vld [vmem:[#allocation7 + $0xc8] ss:$16 sps:$4 sm:$0xff]  }
0x115e   :  { %3975 = vmatprep.subr.bf16.mxu1 %v9008_v54  ;;  %10714 = vst [vmem:[#allocation17_spill] sm:$0xff] %v9023_v51  ;;  %v9026_v54 = vld [vmem:[#allocation7 + $0xec] ss:$16 sps:$4 sm:$0xff]  }
0x115f   :  { %10715 = vst [vmem:[#allocation52_spill] sm:$0xff] %v9026_v54 }
0x1161   :  { %3976 = vmatpush1.bf16.msra.mxu1 %v9011_v7  ;;  %v9029_v7 = vld [vmem:[#allocation7 + $0xe8] ss:$16 sps:$4 sm:$0xff]  }
0x1162   :  { %3977 = vmatprep.subr.bf16.mxu1 %v9014_v48  ;;  %10716 = vst [vmem:[#allocation80_spill] sm:$0xff] %v9029_v7  ;;  %v9032_v48 = vld [vmem:[#allocation5 + $0xc] ss:$16 sps:$4 sm:$0xff]  }
0x1163   :  { %10717 = vst [vmem:[#allocation54_spill] sm:$0xff] %v9032_v48 }
0x1165   :  { %3978 = vmatpush1.bf16.msra.mxu1 %v9017_v42  ;;  %v9036_v42 = vld [vmem:[#allocation5 + $0x8] ss:$16 sps:$4 sm:$0xff]  }
0x1166   :  { %3979 = vmatprep.subr.bf16.mxu1 %v9020_v5  ;;  %10718 = vst [vmem:[#allocation18_spill] sm:$0xff] %v9036_v42 }
0x1169   :  { %3980 = vmatpush1.bf16.msra.mxu1 %v9023_v51  ;;  %v9040_v51 = vld [vmem:[#allocation5 + $0x2c] ss:$16 sps:$4 sm:$0xff]  }
0x116a   :  { %3981 = vmatprep.subr.bf16.mxu1 %v9026_v54  ;;  %10719 = vst [vmem:[#allocation81_spill] sm:$0xff] %v9040_v51  ;;  %v9043_v54 = vld [vmem:[#allocation5 + $0x28] ss:$16 sps:$4 sm:$0xff]  }
0x116b   :  { %10720 = vst [vmem:[#allocation19_spill] sm:$0xff] %v9043_v54 }
0x116d   :  { %3982 = vmatpush1.bf16.msra.mxu1 %v9029_v7  ;;  %v9046_v7 = vld [vmem:[#allocation5 + $0x4c] ss:$16 sps:$4 sm:$0xff]  }
0x116e   :  { %4049 = vmatprep.subr.bf16.mxu1 %v9032_v48  ;;  %10721 = vst [vmem:[#allocation56_spill] sm:$0xff] %v9046_v7  ;;  %v9049_v48 = vld [vmem:[#allocation5 + $0x48] ss:$16 sps:$4 sm:$0xff]  }
0x116f   :  { %10722 = vst [vmem:[#allocation83_spill] sm:$0xff] %v9049_v48 }
0x1170   :  { %4000 = vmatmul.mubr.bf16.vlgmr.msra.gmra.mrb[116].mxu1 %v8885_v0  ;;  %v9052_v0 = vld [vmem:[#allocation5 + $0x6c] ss:$16 sps:$4 sm:$0xff]  }
0x1171   :  { %4050 = vmatpush1.bf16.msra.mxu1 %v9036_v42  ;;  %4081 = vmatprep.mubr.bf16.mxu1 %v10109_v60  ;;  %10723 = vst [vmem:[#allocation58_spill] sm:$0xff] %v9052_v0  ;;  %v9055_v42 = vld [vmem:[#allocation5 + $0x68] ss:$16 sps:$4 sm:$0xff]  }
0x1172   :  { %4051 = vmatprep.subr.bf16.mxu1 %v9040_v51  ;;  %10724 = vst [vmem:[#allocation20_spill] sm:$0xff] %v9055_v42  ;;  %v9058_v51 = vld [vmem:[#allocation5 + $0x8c] ss:$16 sps:$4 sm:$0xff]  }
0x1173   :  { %10725 = vst [vmem:[#allocation91_spill] sm:$0xff] %v9058_v51 }
0x1175   :  { %4052 = vmatpush1.bf16.msra.mxu1 %v9043_v54  ;;  %v9061_v54 = vld [vmem:[#allocation5 + $0x88] ss:$16 sps:$4 sm:$0xff]  }
0x1176   :  { %4053 = vmatprep.subr.bf16.mxu1 %v9046_v7  ;;  %10726 = vst [vmem:[#allocation92_spill] sm:$0xff] %v9061_v54  ;;  %v9064_v7 = vld [vmem:[#allocation5 + $0xac] ss:$16 sps:$4 sm:$0xff]  }
0x1177   :  { %10727 = vst [vmem:[#allocation85_spill] sm:$0xff] %v9064_v7 }
0x1179   :  { %4054 = vmatpush1.bf16.msra.mxu1 %v9049_v48  ;;  %v9067_v48 = vld [vmem:[#allocation5 + $0xa8] ss:$16 sps:$4 sm:$0xff]  }
0x117a   :  { %4055 = vmatprep.subr.bf16.mxu1 %v9052_v0  ;;  %10728 = vst [vmem:[#allocation93_spill] sm:$0xff] %v9067_v48  ;;  %v9070_v0 = vld [vmem:[#allocation5 + $0xcc] ss:$16 sps:$4 sm:$0xff]  }
0x117b   :  { %10729 = vst [vmem:[#allocation94_spill] sm:$0xff] %v9070_v0 }
0x117d   :  { %4056 = vmatpush1.bf16.msra.mxu1 %v9055_v42  ;;  %v9073_v42 = vld [vmem:[#allocation5 + $0xc8] ss:$16 sps:$4 sm:$0xff]  }
0x117e   :  { %4057 = vmatprep.subr.bf16.mxu1 %v9058_v51  ;;  %10730 = vst [vmem:[#allocation84_spill] sm:$0xff] %v9073_v42  ;;  %v9076_v51 = vld [vmem:[#allocation5 + $0xec] ss:$16 sps:$4 sm:$0xff]  }
0x117f   :  { %10731 = vst [vmem:[#allocation50_spill] sm:$0xff] %v9076_v51 }
0x1181   :  { %4058 = vmatpush1.bf16.msra.mxu1 %v9061_v54  ;;  %v9079_v54 = vld [vmem:[#allocation5 + $0xe8] ss:$16 sps:$4 sm:$0xff]  }
0x1182   :  { %4059 = vmatprep.subr.bf16.mxu1 %v9064_v7  ;;  %10732 = vst [vmem:[#allocation98_spill] sm:$0xff] %v9079_v54 }
0x1185   :  { %4060 = vmatpush1.bf16.msra.mxu1 %v9067_v48 }
0x1186   :  { %4061 = vmatprep.subr.bf16.mxu1 %v9070_v0 }
0x1189   :  { %4062 = vmatpush1.bf16.msra.mxu1 %v9073_v42  ;;  %v10733_v42 = vld [vmem:[#allocation16_spill] sm:$0xff] }
0x118a   :  { %4063 = vmatprep.subr.bf16.mxu1 %v9076_v51  ;;  %v3808_v45 = vmul.f32 %v10733_v42, %v10645_v36  ;;  %v3807_v51 = vmul.f32 %v10733_v42, %v10647_v16 }
0x118d   :  { %4064 = vmatpush1.bf16.msra.mxu1 %v9079_v54 }
0x118e   :  { %4188 = vmatprep.subr.bf16.mxu1 %v10643_v55 }
0x1203   :  { %v3776_v7 = vpop.f32.mrb[108].mxu1  ;;  %v9083_v48 = vpop.f32.mrb[116].mxu0 }
0x1204   :  { %v3777_v5 = vadd.f32 %v10644_v2, %v3776_v7  ;;  %v5392_v0 = vpop.f32.mrb[109].mxu1  ;;  %v9086_v3 = vpop.f32.mrb[117].mxu0  ;;  %v3894_v2 = vadd.f32 %v8880_v38, %v3808_v45  ;;  %v3893_v7 = vadd.f32 %v8878_v15, %v3807_v51  ;;  %v3809_v38 = vmul.f32 %v10733_v42, %v10648_v57 }
0x1205   :  { %v3779_v62 = vpop.f32.mrb[110].mxu1  ;;  %v3964_v32 = vpop.f32.mrb[118].mxu0  ;;  %v3810_v51 = vmul.f32 %v10733_v42, %v6970_v35 }
0x1206   :  { %v3783_v30 = vand.u32 2147483647, %v3777_v5  ;;  %v3965_v54 = vpop.f32.mrb[119].mxu0  ;;  %3793 = vrot.lane.b32.xlu0 %v3777_v5, %s6529_s23  ;;  %v5393_v55 = vpop.f32.mrb[111].mxu1  ;;  %v3898_v36 = vadd.f32 %v3894_v2, %v6978_v18  ;;  %v3897_v32 = vadd.f32 %v3893_v7, %v6973_v22  ;;  %v3782_v2 = vmax.f32 %v3777_v5, 0.0 }
0x1208   :  { %v3784_v1 = vsub.f32 0.0, %v3783_v30  ;;  %v5118_v62 = vmul.f32 -1.442695, %v3898_v36  ;;  %v5117_v52 = vmul.f32 -1.442695, %v3897_v32 }
0x120a   :  { %v3785_v0 = vmul.f32 1.442695, %v3784_v1 }
0x120c   :  { %5933 = vpow2.f32 %v3785_v0 }
0x120d   :  { %5935 = vpow2.f32 %v5118_v62 }
0x120e   :  { %5937 = vpow2.f32 %v5117_v52 }
0x1216   :  { %v5934_v16 = vpop.eup %5933 }
0x1217   :  { %v3787_v54 = vadd.f32 1.0, %v5934_v16  ;;  %v5936_v28 = vpop.eup %5935 }
0x1218   :  { %v5938_v55 = vpop.eup %5937  ;;  %v3910_v30 = vadd.f32 1.0, %v5936_v28 }
0x1219   :  { %5939 = vlog2.f32 %v3787_v54  ;;  %v3904_v1 = vadd.f32 1.0, %v5938_v55 }
0x121a   :  { %5941 = vrcp.f32 %v3910_v30 }
0x121b   :  { %5943 = vrcp.f32 %v3904_v1 }
0x1223   :  { %v5940_v15 = vpop.eup %5939  ;;  %v3886_v45 = vpop.f32.mrb[112].mxu1 }
0x1224   :  { %v3895_v36 = vadd.f32 %v3886_v45, %v3809_v38  ;;  %v3888_v7 = vpop.f32.mrb[113].mxu1  ;;  %v3789_v0 = vmul.f32 0.6931472, %v5940_v15  ;;  %v5942_v42 = vpop.eup %5941 }
0x1225   :  { %v3896_v32 = vadd.f32 %v3888_v7, %v3810_v51  ;;  %v3890_v52 = vpop.f32.mrb[114].mxu1  ;;  %v5944_v5 = vpop.eup %5943  ;;  %v3920_v15 = vmul.f32 %v5942_v42, %v8805_v49  ;;  %v9201_v49 = vld [vmem:[#allocation7 + $0xc0] ss:$16 sps:$4 sm:$0xff]  }
0x1226   :  { %v3899_v16 = vadd.f32 %v3895_v36, %v6992_v24  ;;  %v3891_v62 = vpop.f32.mrb[115].mxu1  ;;  %v3790_v28 = vadd.f32 %v3789_v0, %v3782_v2 }
0x1227   :  { %v3900_v54 = vadd.f32 %v3896_v32, %v6987_v27 }
0x1228   :  { %5945 = vtanh.f32 %v3899_v16  ;;  %v3791_v55 = vadd.f32 1e-06, %v3790_v28 }
0x1229   :  { %v5119_v57 = vmul.f32 -1.442695, %v3900_v54 }
0x122a   :  { %3799 = vrot.lane.b32.xlu1 %v3791_v55, %s6528_s22 }
0x122b   :  { %5947 = vpow2.f32 %v5119_v57 }
0x1232   :  { %v5946_v38 = vpop.eup %5945 }
0x1233   :  { %v3921_v45 = vmul.f32 %v5946_v38, %v5944_v5 }
0x1235   :  { %v5948_v30 = vpop.eup %5947  ;;  %v9105_v51 = vadd.f32 %v3921_v45, %v3920_v15 }
0x1236   :  { %v3917_v36 = vadd.f32 1.0, %v5948_v30 }
0x1237   :  { %5949 = vtanh.f32 %v9105_v51 }
0x1238   :  { %5951 = vrcp.f32 %v3917_v36 }
0x1241   :  { %v5950_v1 = vpop.eup %5949 }
0x1242   :  { %v5952_v2 = vpop.eup %5951 }
0x1243   :  { %v9108_v7 = vpop.f32.mrb[116].mxu1  ;;  %v3924_v0 = vmul.f32 %v5952_v2, %v5950_v1 }
0x1244   :  { %v9110_v32 = vpop.f32.mrb[117].mxu1 }
0x1245   :  { %v4005_v57 = vpop.f32.mrb[118].mxu1  ;;  %v9112_v52 = vpack.c.bf16 %v3924_v0, %v3924_v0 }
0x1246   :  { %v4006_v16 = vpop.f32.mrb[119].mxu1 }
0x1247   :  { %4041 = vmatmul.mubr.bf16.vlgmr.msra.gmra.mrb[120].mxu0 %v9112_v52  ;;  %4082 = vmatmul.mubr.bf16.vlgmr.msra.gmra.mrb[120].mxu1 %v9112_v52 }
0x1248   :  { %4189 = vmatpush1.bf16.msra.mxu1 %v8582_v21  ;;  %4220 = vmatprep.mubr.bf16.mxu1 %v10109_v60  ;;  %v9136_v21 = vld [vmem:[%s9545_s7 + $0x18] sm:$0xff]  }
0x1249   :  { %4190 = vmatprep.subr.bf16.mxu1 %v8586_v4  ;;  %5395 = vmatpush3.bf16.msra.mxu0 %v8592_v33  ;;  %v9145_v4 = vld [vmem:[%s9545_s7 + $0x20] sm:$0xff]   ;;  %v9154_v33 = vld [vmem:[%s9545_s7 + $0x28] sm:$0xff]  }
0x124a   :  { %5396 = vmatprep.subr.bf16.mxu0 %v10238_v58  ;;  %5410 = vmatprep.mubr.msk.bf16.mxu0 %vm6512_vm0, %v10238_v58 }
0x124c   :  { %4191 = vmatpush1.bf16.msra.mxu1 %v8598_v29  ;;  %v9163_v29 = vld [vmem:[%s9545_s7 + $0x30] sm:$0xff]  }
0x124d   :  { %4192 = vmatprep.subr.bf16.mxu1 %v8601_v26  ;;  %5397 = vmatpush3.bf16.msra.mxu0 %v8607_v53  ;;  %v9172_v26 = vld [vmem:[%s9545_s7 + $0x38] sm:$0xff]   ;;  %v10734_v53 = vld [vmem:[#allocation70_spill] sm:$0xff] }
0x124e   :  { %5398 = vmatprep.subr.bf16.mxu0 %v10238_v58 }
0x1250   :  { %4193 = vmatpush1.bf16.msra.mxu1 %v8611_v17  ;;  %v10735_v17 = vld [vmem:[#allocation27_spill] sm:$0xff] }
0x1251   :  { %4194 = vmatprep.subr.bf16.mxu1 %v8614_v23  ;;  %5399 = vmatpush3.bf16.msra.mxu0 %v8620_v61  ;;  %v9185_v23 = vld [vmem:[#allocation7 + $0x84] ss:$16 sps:$4 sm:$0xff]  }
0x1252   :  { %5400 = vmatprep.subr.bf16.mxu0 %v10238_v58 }
0x1254   :  { %4195 = vmatpush1.bf16.msra.mxu1 %v8624_v63  ;;  %v9188_v63 = vld [vmem:[#allocation7 + $0x80] ss:$16 sps:$4 sm:$0xff]  }
0x1255   :  { %4196 = vmatprep.subr.bf16.mxu1 %v8627_v11  ;;  %5401 = vmatpush3.bf16.msra.mxu0 %v9136_v21  ;;  %v9192_v11 = vld [vmem:[#allocation7 + $0xa4] ss:$16 sps:$4 sm:$0xff]  }
0x1256   :  { %5402 = vmatprep.subr.bf16.mxu0 %v10238_v58 }
0x1258   :  { %4197 = vmatpush1.bf16.msra.mxu1 %v8632_v34  ;;  %v9195_v34 = vld [vmem:[#allocation7 + $0xa0] ss:$16 sps:$4 sm:$0xff]  }
0x1259   :  { %4198 = vmatprep.subr.bf16.mxu1 %v8635_v9  ;;  %5403 = vmatpush3.bf16.msra.mxu0 %v9145_v4  ;;  %v9198_v9 = vld [vmem:[#allocation7 + $0xc4] ss:$16 sps:$4 sm:$0xff]  }
0x125a   :  { %5404 = vmatprep.subr.bf16.mxu0 %v10238_v58 }
0x125c   :  { %4199 = vmatpush1.bf16.msra.mxu1 %v10649_v13  ;;  %v9204_v13 = vld [vmem:[#allocation7 + $0xe4] ss:$16 sps:$4 sm:$0xff]  }
0x125d   :  { %4200 = vmatprep.subr.bf16.mxu1 %v10650_v41  ;;  %5405 = vmatpush3.bf16.msra.mxu0 %v9154_v33  ;;  %v9207_v41 = vld [vmem:[#allocation7 + $0xe0] ss:$16 sps:$4 sm:$0xff]  }
0x125e   :  { %5406 = vmatprep.subr.bf16.mxu0 %v10238_v58 }
0x1260   :  { %4201 = vmatpush1.bf16.msra.mxu1 %v10652_v37  ;;  %v9210_v37 = vld [vmem:[#allocation5 + $0x4] ss:$16 sps:$4 sm:$0xff]  }
0x1261   :  { %4202 = vmatprep.subr.bf16.mxu1 %v10653_v43  ;;  %5407 = vmatpush3.bf16.msra.mxu0 %v9163_v29 }
0x1262   :  { %5408 = vmatprep.subr.bf16.mxu0 %v10238_v58 }
0x1264   :  { %4203 = vmatpush1.bf16.msra.mxu1 %v10655_v50 }
0x1265   :  { %4303 = vmatprep.subr.bf16.mxu1 %v10656_v20  ;;  %5409 = vmatpush3.bf16.msra.mxu0 %v9172_v26 }
0x1266   :  { %4229 = vmatprep.subr.bf16.mxu0 %v10658_v14 }
0x1267   :  { %4221 = vmatmul.mubr.bf16.vlgmr.msra.gmra.mrb[124].mxu1 %v9112_v52 }
0x1268   :  { %4304 = vmatpush1.bf16.msra.mxu1 %v10659_v25  ;;  %4335 = vmatprep.mubr.bf16.mxu1 %v10109_v60 }
0x1269   :  { %4305 = vmatprep.subr.bf16.mxu1 %v10660_v56 }
0x126c   :  { %4306 = vmatpush1.bf16.msra.mxu1 %v10661_v10 }
0x126d   :  { %4307 = vmatprep.subr.bf16.mxu1 %v10662_v8 }
0x1270   :  { %4308 = vmatpush1.bf16.msra.mxu1 %v10663_v19 }
0x1271   :  { %4309 = vmatprep.subr.bf16.mxu1 %v10734_v53 }
0x1274   :  { %4310 = vmatpush1.bf16.msra.mxu1 %v10735_v17 }
0x1275   :  { %4311 = vmatprep.subr.bf16.mxu1 %v9185_v23 }
0x1278   :  { %v3794_v61 = vpop.permute.xlu0 %3793  ;;  %4312 = vmatpush1.bf16.msra.mxu1 %v9188_v63 }
0x1279   :  { %3797 = vst.msk [vmem:[#allocation8] sm:$0xff] %vm3796_vm8, %v3794_v61  ;;  %4313 = vmatprep.subr.bf16.mxu1 %v9192_v11 }
0x127c   :  { %4314 = vmatpush1.bf16.msra.mxu1 %v9195_v34 }
0x127d   :  { %4315 = vmatprep.subr.bf16.mxu1 %v9198_v9 }
0x1280   :  { %4316 = vmatpush1.bf16.msra.mxu1 %v9201_v49 }
0x1281   :  { %4317 = vmatprep.subr.bf16.mxu1 %v9204_v13 }
0x1284   :  { %4318 = vmatpush1.bf16.msra.mxu1 %v9207_v41 }
0x1285   :  { %4385 = vmatprep.subr.bf16.mxu1 %v9210_v37 }
0x129c   :  { %v3800_v43 = vpop.permute.xlu1 %3799 }
0x129d   :  { %3802 = vst.msk [vmem:[#allocation9] sm:$0xff] %vm3796_vm8, %v3800_v43 }
0x131a   :  { %v4042_v50 = vpop.f32.mrb[120].mxu0  ;;  %v4083_v20 = vpop.f32.mrb[120].mxu1 }
0x131b   :  { %v4043_v14 = vadd.f32 %v4042_v50, %v9083_v48  ;;  %v4084_v25 = vadd.f32 %v4083_v20, %v9108_v7  ;;  %v4044_v56 = vpop.f32.mrb[121].mxu0  ;;  %v4085_v10 = vpop.f32.mrb[121].mxu1 }
0x131c   :  { %v4045_v8 = vadd.f32 %v4044_v56, %v9086_v3  ;;  %v4086_v19 = vadd.f32 %v4085_v10, %v9110_v32  ;;  %v4046_v62 = vpop.f32.mrb[122].mxu0  ;;  %v4087_v28 = vpop.f32.mrb[122].mxu1 }
0x131d   :  { %v4090_v54 = vadd.f32 %v4043_v14, %v7102_v40  ;;  %v4047_v55 = vpop.f32.mrb[123].mxu0  ;;  %v4088_v42 = vpop.f32.mrb[123].mxu1  ;;  %v4092_v30 = vadd.f32 %v4084_v25, %v7114_v39  ;;  %v10738_v62 = vld [vmem:[#allocation82_spill] sm:$0xff] }
0x131e   :  { %v4091_v5 = vadd.f32 %v4045_v8, %v7105_v46  ;;  %v4093_v48 = vadd.f32 %v4086_v19, %v7110_v6  ;;  %v10737_v19 = vld [vmem:[#allocation72_spill] sm:$0xff]  ;;  %v10739_v28 = vld [vmem:[#allocation74_spill] sm:$0xff] }
0x131f   :  { %v5120_v38 = vmul.f32 -1.442695, %v4090_v54  ;;  %v10740_v54 = vld [vmem:[#allocation29_spill] sm:$0xff]  ;;  %v10741_v55 = vld [vmem:[#allocation30_spill] sm:$0xff]  ;;  %v10742_v42 = vld [vmem:[#allocation76_spill] sm:$0xff] }
0x1320   :  { %v5121_v15 = vmul.f32 -1.442695, %v4091_v5  ;;  %v5122_v45 = vmul.f32 -1.442695, %v4093_v48  ;;  %v10743_v5 = vld [vmem:[#allocation31_spill] sm:$0xff]  ;;  %v10746_v48 = vld [vmem:[#allocation34_spill] sm:$0xff] }
0x1321   :  { %5953 = vpow2.f32 %v5120_v38  ;;  %v10744_v38 = vld [vmem:[#allocation32_spill] sm:$0xff] }
0x1322   :  { %5955 = vpow2.f32 %v5121_v15  ;;  %v10745_v15 = vld [vmem:[#allocation33_spill] sm:$0xff] }
0x1323   :  { %5957 = vpow2.f32 %v5122_v45  ;;  %v10747_v45 = vld [vmem:[#allocation35_spill] sm:$0xff] }
0x1324   :  { %5959 = vtanh.f32 %v4092_v30  ;;  %v10748_v30 = vld [vmem:[#allocation36_spill] sm:$0xff] }
0x132b   :  { %v5954_v3 = vpop.eup %5953 }
0x132c   :  { %v5956_v36 = vpop.eup %5955  ;;  %v4097_v1 = vadd.f32 1.0, %v5954_v3  ;;  %v10749_v3 = vld [vmem:[#allocation37_spill] sm:$0xff] }
0x132d   :  { %v4103_v2 = vadd.f32 1.0, %v5956_v36  ;;  %v5958_v7 = vpop.eup %5957  ;;  %v10750_v36 = vld [vmem:[#allocation38_spill] sm:$0xff] }
0x132e   :  { %5961 = vrcp.f32 %v4097_v1  ;;  %v5960_v0 = vpop.eup %5959  ;;  %v4110_v53 = vadd.f32 1.0, %v5958_v7  ;;  %v10751_v1 = vld [vmem:[#allocation39_spill] sm:$0xff]  ;;  %v10753_v7 = vld [vmem:[#allocation41_spill] sm:$0xff] }
0x132f   :  { %5963 = vrcp.f32 %v4103_v2  ;;  %v10752_v2 = vld [vmem:[#allocation40_spill] sm:$0xff] }
0x1330   :  { %5965 = vrcp.f32 %v4110_v53  ;;  %v10758_v53 = vld [vmem:[#allocation46_spill] sm:$0xff] }
0x1338   :  { %v5962_v32 = vpop.eup %5961 }
0x1339   :  { %v5964_v57 = vpop.eup %5963  ;;  %v4114_v16 = vmul.f32 %v5962_v32, %v5960_v0  ;;  %v10754_v0 = vld [vmem:[#allocation42_spill] sm:$0xff]  ;;  %v10755_v32 = vld [vmem:[#allocation43_spill] sm:$0xff] }
0x133a   :  { %v4113_v17 = vmul.f32 %v5964_v57, %v8882_v59  ;;  %v9223_v61 = vpop.f32.mrb[124].mxu1  ;;  %v5966_v25 = vpop.eup %5965  ;;  %v10736_v59 = vld [vmem:[#allocation28_spill] sm:$0xff] }
0x133b   :  { %v9225_v43 = vpop.f32.mrb[125].mxu1  ;;  %v10756_v57 = vld [vmem:[#allocation44_spill] sm:$0xff] }
0x133c   :  { %v9227_v50 = vadd.f32 %v4114_v16, %v4113_v17  ;;  %v4226_v20 = vpop.f32.mrb[126].mxu1  ;;  %v10757_v16 = vld [vmem:[#allocation45_spill] sm:$0xff]  ;;  %v10759_v17 = vld [vmem:[#allocation47_spill] sm:$0xff] }
0x133d   :  { %v4227_v14 = vpop.f32.mrb[127].mxu1  ;;  %v10760_v20 = vld [vmem:[#allocation49_spill] sm:$0xff] }
0x133e   :  { %5967 = vtanh.f32 %v9227_v50  ;;  %v10761_v14 = vld [vmem:[#allocation51_spill] sm:$0xff] }
0x1348   :  { %v5968_v56 = vpop.eup %5967 }
0x1349   :  { %v4117_v10 = vmul.f32 %v5968_v56, %v5966_v25  ;;  %v10762_v25 = vld [vmem:[#allocation53_spill] sm:$0xff]  ;;  %v10763_v56 = vld [vmem:[#allocation55_spill] sm:$0xff] }
0x134b   :  { %v4118_v8 = vpack.c.bf16 %v4117_v10, %v4117_v10  ;;  %v10764_v10 = vld [vmem:[#allocation57_spill] sm:$0xff] }
0x134d   :  { %5411 = vmatmul.mubr.bf16.vlgmr.msra.gmra.mrb[124].mxu0 %v4118_v8  ;;  %4336 = vmatmul.mubr.bf16.vlgmr.msra.gmra.mrb[128].mxu1 %v4118_v8 }
0x134e   :  { %4230 = vmatpush1.bf16.msra.mxu0 %v8889_v12  ;;  %4261 = vmatprep.mubr.bf16.mxu0 %v10109_v60 }
0x134f   :  { %4231 = vmatprep.subr.bf16.mxu0 %v8893_v44  ;;  %4386 = vmatpush1.bf16.msra.mxu1 %v8896_v47 }
0x1350   :  { %4387 = vmatprep.subr.bf16.mxu1 %v8899_v31  ;;  %4417 = vmatprep.mubr.bf16.mxu1 %v10109_v60 }
0x1352   :  { %4232 = vmatpush1.bf16.msra.mxu0 %v10736_v59 }
0x1353   :  { %4233 = vmatprep.subr.bf16.mxu0 %v10737_v19  ;;  %4388 = vmatpush1.bf16.msra.mxu1 %v10738_v62 }
0x1354   :  { %4389 = vmatprep.subr.bf16.mxu1 %v10739_v28 }
0x1356   :  { %4234 = vmatpush1.bf16.msra.mxu0 %v10740_v54 }
0x1357   :  { %4235 = vmatprep.subr.bf16.mxu0 %v10741_v55  ;;  %4390 = vmatpush1.bf16.msra.mxu1 %v10742_v42 }
0x1358   :  { %4391 = vmatprep.subr.bf16.mxu1 %v10743_v5 }
0x135a   :  { %4236 = vmatpush1.bf16.msra.mxu0 %v10744_v38 }
0x135b   :  { %4237 = vmatprep.subr.bf16.mxu0 %v10745_v15  ;;  %4392 = vmatpush1.bf16.msra.mxu1 %v10746_v48 }
0x135c   :  { %4393 = vmatprep.subr.bf16.mxu1 %v10747_v45  ;;  %v10798_v45 = vld [vmem:[#allocation79_spill] sm:$0xff] }
0x135e   :  { %4238 = vmatpush1.bf16.msra.mxu0 %v10748_v30 }
0x135f   :  { %4239 = vmatprep.subr.bf16.mxu0 %v10749_v3  ;;  %4394 = vmatpush1.bf16.msra.mxu1 %v10750_v36 }
0x1360   :  { %4395 = vmatprep.subr.bf16.mxu1 %v10751_v1 }
0x1362   :  { %4240 = vmatpush1.bf16.msra.mxu0 %v10752_v2 }
0x1363   :  { %4241 = vmatprep.subr.bf16.mxu0 %v10753_v7  ;;  %4396 = vmatpush1.bf16.msra.mxu1 %v10754_v0  ;;  %v10797_v0 = vld [vmem:[#allocation77_spill] sm:$0xff] }
0x1364   :  { %4397 = vmatprep.subr.bf16.mxu1 %v10755_v32  ;;  %v10774_v32 = vld [vmem:[#allocation26_spill] sm:$0xff] }
0x1366   :  { %4242 = vmatpush1.bf16.msra.mxu0 %v10756_v57  ;;  %v10771_v57 = vld [vmem:[#allocation71_spill] sm:$0xff] }
0x1367   :  { %4243 = vmatprep.subr.bf16.mxu0 %v10757_v16  ;;  %4398 = vmatpush1.bf16.msra.mxu1 %v10758_v53  ;;  %v10765_v16 = vld [vmem:[#allocation59_spill] sm:$0xff]  ;;  %v10766_v53 = vld [vmem:[#allocation61_spill] sm:$0xff] }
0x1368   :  { %4399 = vmatprep.subr.bf16.mxu1 %v10759_v17  ;;  %v10767_v17 = vld [vmem:[#allocation63_spill] sm:$0xff] }
0x136a   :  { %4244 = vmatpush1.bf16.msra.mxu0 %v10760_v20  ;;  %v10768_v20 = vld [vmem:[#allocation65_spill] sm:$0xff] }
0x136b   :  { %4344 = vmatprep.subr.bf16.mxu0 %v10761_v14  ;;  %4400 = vmatpush1.bf16.msra.mxu1 %v10762_v25  ;;  %v10769_v14 = vld [vmem:[#allocation67_spill] sm:$0xff]  ;;  %v10770_v25 = vld [vmem:[#allocation69_spill] sm:$0xff] }
0x136c   :  { %5414 = vmatprep.subr.bf16.mxu1 %v10238_v58 }
0x136d   :  { %4262 = vmatmul.mubr.bf16.vlgmr.msra.gmra.mrb[128].mxu0 %v9112_v52  ;;  %v10772_v52 = vld [vmem:[#allocation73_spill] sm:$0xff] }
0x136e   :  { %4345 = vmatpush1.bf16.msra.mxu0 %v10763_v56  ;;  %4376 = vmatprep.mubr.bf16.mxu0 %v10109_v60  ;;  %v10773_v56 = vld [vmem:[#allocation75_spill] sm:$0xff] }
0x136f   :  { %4346 = vmatprep.subr.bf16.mxu0 %v10764_v10  ;;  %v10775_v10 = vld [vmem:[#allocation17_spill] sm:$0xff] }
0x1372   :  { %4347 = vmatpush1.bf16.msra.mxu0 %v10765_v16  ;;  %v10776_v16 = vld [vmem:[#allocation52_spill] sm:$0xff] }
0x1373   :  { %4348 = vmatprep.subr.bf16.mxu0 %v10766_v53  ;;  %v10777_v53 = vld [vmem:[#allocation80_spill] sm:$0xff] }
0x1376   :  { %4349 = vmatpush1.bf16.msra.mxu0 %v10767_v17  ;;  %v10778_v17 = vld [vmem:[#allocation54_spill] sm:$0xff] }
0x1377   :  { %4350 = vmatprep.subr.bf16.mxu0 %v10768_v20 }
0x137a   :  { %4351 = vmatpush1.bf16.msra.mxu0 %v10769_v14  ;;  %v10779_v14 = vld [vmem:[#allocation18_spill] sm:$0xff] }
0x137b   :  { %4352 = vmatprep.subr.bf16.mxu0 %v10770_v25  ;;  %v10790_v25 = vld [vmem:[#allocation94_spill] sm:$0xff] }
0x137e   :  { %4353 = vmatpush1.bf16.msra.mxu0 %v10771_v57  ;;  %v10780_v57 = vld [vmem:[#allocation81_spill] sm:$0xff] }
0x137f   :  { %4354 = vmatprep.subr.bf16.mxu0 %v10772_v52  ;;  %v10781_v52 = vld [vmem:[#allocation19_spill] sm:$0xff] }
0x1382   :  { %4355 = vmatpush1.bf16.msra.mxu0 %v10773_v56  ;;  %v10782_v56 = vld [vmem:[#allocation56_spill] sm:$0xff] }
0x1383   :  { %4356 = vmatprep.subr.bf16.mxu0 %v10774_v32  ;;  %v10783_v32 = vld [vmem:[#allocation83_spill] sm:$0xff] }
0x1386   :  { %4357 = vmatpush1.bf16.msra.mxu0 %v10775_v10  ;;  %v10784_v10 = vld [vmem:[#allocation58_spill] sm:$0xff] }
0x1387   :  { %4358 = vmatprep.subr.bf16.mxu0 %v10776_v16  ;;  %v10785_v16 = vld [vmem:[#allocation20_spill] sm:$0xff] }
0x138a   :  { %4359 = vmatpush1.bf16.msra.mxu0 %v10777_v53  ;;  %v10786_v53 = vld [vmem:[#allocation91_spill] sm:$0xff] }
0x138b   :  { %4426 = vmatprep.subr.bf16.mxu0 %v10778_v17  ;;  %v10787_v17 = vld [vmem:[#allocation92_spill] sm:$0xff] }
0x138d   :  { %4377 = vmatmul.mubr.bf16.vlgmr.msra.gmra.mrb[132].mxu0 %v4118_v8  ;;  %v10788_v8 = vld [vmem:[#allocation85_spill] sm:$0xff] }
0x138e   :  { %4427 = vmatpush1.bf16.msra.mxu0 %v10779_v14  ;;  %4458 = vmatprep.mubr.bf16.mxu0 %v10109_v60  ;;  %v10789_v14 = vld [vmem:[#allocation93_spill] sm:$0xff] }
0x138f   :  { %4428 = vmatprep.subr.bf16.mxu0 %v10780_v57  ;;  %v10791_v57 = vld [vmem:[#allocation84_spill] sm:$0xff] }
0x1392   :  { %4429 = vmatpush1.bf16.msra.mxu0 %v10781_v52  ;;  %v10792_v52 = vld [vmem:[#allocation50_spill] sm:$0xff] }
0x1393   :  { %4430 = vmatprep.subr.bf16.mxu0 %v10782_v56  ;;  %v10793_v56 = vld [vmem:[#allocation98_spill] sm:$0xff] }
0x1396   :  { %4431 = vmatpush1.bf16.msra.mxu0 %v10783_v32  ;;  %v6357_v32 = vld [vmem:[#allocation2 + $0x4] ss:$16 sps:$4 sm:$0xff]  }
0x1397   :  { %4432 = vmatprep.subr.bf16.mxu0 %v10784_v10 }
0x139a   :  { %4433 = vmatpush1.bf16.msra.mxu0 %v10785_v16 }
0x139b   :  { %4434 = vmatprep.subr.bf16.mxu0 %v10786_v53  ;;  %v10796_v53 = vld [vmem:[#allocation86_spill] sm:$0xff] }
0x139e   :  { %4435 = vmatpush1.bf16.msra.mxu0 %v10787_v17  ;;  %v9303_v17 = vld [vmem:[%s9546_s8] ss:$0 sm:$0xff] }
0x139f   :  { %4436 = vmatprep.subr.bf16.mxu0 %v10788_v8  ;;  %10794 = vst [vmem:[#allocation21_spill] sm:$0xff] %v9303_v17 }
0x13a2   :  { %4437 = vmatpush1.bf16.msra.mxu0 %v10789_v14 }
0x13a3   :  { %4438 = vmatprep.subr.bf16.mxu0 %v10790_v25 }
0x13a6   :  { %4439 = vmatpush1.bf16.msra.mxu0 %v10791_v57  ;;  %v10795_v57 = vld [vmem:[#allocation78_spill] sm:$0xff] }
0x13a7   :  { %4440 = vmatprep.subr.bf16.mxu0 %v10792_v52  ;;  %v4185_v52 = vmul.f32 %v10796_v53, %v10795_v57 }
0x13aa   :  { %4441 = vmatpush1.bf16.msra.mxu0 %v10793_v56 }
0x13ab   :  { %4565 = vmatprep.subr.bf16.mxu0 %v6357_v32  ;;  %v4184_v32 = vmul.f32 %v10796_v53, %v10797_v0 }
0x1420   :  { %v4153_v10 = vpop.f32.mrb[124].mxu0  ;;  %v9298_v16 = vpop.f32.mrb[128].mxu1 }
0x1421   :  { %v4154_v14 = vadd.f32 %v9303_v17, %v4153_v10  ;;  %v5412_v8 = vpop.f32.mrb[125].mxu0  ;;  %v9306_v25 = vpop.f32.mrb[129].mxu1  ;;  %v4271_v10 = vadd.f32 %v9225_v43, %v4185_v52  ;;  %v4186_v43 = vmul.f32 %v10796_v53, %v10798_v45  ;;  %v4187_v52 = vmul.f32 %v10796_v53, %v6970_v35 }
0x1422   :  { %v4156_v20 = vpop.f32.mrb[126].mxu0  ;;  %v4341_v56 = vpop.f32.mrb[130].mxu1  ;;  %v4270_v8 = vadd.f32 %v9223_v61, %v4184_v32 }
0x1423   :  { %v4160_v7 = vand.u32 2147483647, %v4154_v14  ;;  %v4342_v2 = vpop.f32.mrb[131].mxu1  ;;  %4170 = vrot.lane.b32.xlu0 %v4154_v14, %s6530_s11  ;;  %v5413_v1 = vpop.f32.mrb[127].mxu0  ;;  %v4275_v57 = vadd.f32 %v4271_v10, %v6978_v18  ;;  %v4159_v32 = vmax.f32 %v4154_v14, 0.0 }
0x1424   :  { %v4274_v20 = vadd.f32 %v4270_v8, %v6973_v22 }
0x1425   :  { %v4161_v36 = vsub.f32 0.0, %v4160_v7  ;;  %v5124_v56 = vmul.f32 -1.442695, %v4275_v57 }
0x1426   :  { %v5123_v3 = vmul.f32 -1.442695, %v4274_v20 }
0x1427   :  { %v4162_v17 = vmul.f32 1.442695, %v4161_v36 }
0x1429   :  { %5969 = vpow2.f32 %v4162_v17 }
0x142a   :  { %5971 = vpow2.f32 %v5124_v56 }
0x142b   :  { %5973 = vpow2.f32 %v5123_v3 }
0x1433   :  { %v5970_v0 = vpop.eup %5969 }
0x1434   :  { %v4164_v2 = vadd.f32 1.0, %v5970_v0  ;;  %v5972_v30 = vpop.eup %5971 }
0x1435   :  { %v5974_v1 = vpop.eup %5973  ;;  %v4287_v7 = vadd.f32 1.0, %v5972_v30 }
0x1436   :  { %5975 = vlog2.f32 %v4164_v2  ;;  %v4281_v36 = vadd.f32 1.0, %v5974_v1 }
0x1437   :  { %5977 = vrcp.f32 %v4287_v7 }
0x1438   :  { %5979 = vrcp.f32 %v4281_v36 }
0x1440   :  { %v5976_v61 = vpop.eup %5975  ;;  %v4263_v17 = vpop.f32.mrb[128].mxu0 }
0x1441   :  { %v4272_v57 = vadd.f32 %v4263_v17, %v4186_v43  ;;  %v4265_v10 = vpop.f32.mrb[129].mxu0  ;;  %v4166_v8 = vmul.f32 0.6931472, %v5976_v61  ;;  %v5978_v53 = vpop.eup %5977 }
0x1442   :  { %v4273_v20 = vadd.f32 %v4265_v10, %v4187_v52  ;;  %v4267_v3 = vpop.f32.mrb[130].mxu0  ;;  %v5980_v14 = vpop.eup %5979  ;;  %v4297_v61 = vmul.f32 %v5978_v53, %v9105_v51  ;;  %v6359_v51 = vld [vmem:[#allocation2] ss:$16 sps:$4 sm:$0xff]   ;;  %v9349_v53 = vld [vmem:[%s9545_s7 + $0x8] sm:$0xff]  }
0x1443   :  { %v4276_v0 = vadd.f32 %v4272_v57, %v6992_v24  ;;  %v4268_v56 = vpop.f32.mrb[131].mxu0  ;;  %v4167_v30 = vadd.f32 %v4166_v8, %v4159_v32 }
0x1444   :  { %v4277_v2 = vadd.f32 %v4273_v20, %v6987_v27  ;;  %v6360_v56 = vld [vmem:[#allocation2 + $0x24] ss:$16 sps:$4 sm:$0xff]  }
0x1445   :  { %5981 = vtanh.f32 %v4276_v0  ;;  %v4168_v1 = vadd.f32 1e-06, %v4167_v30  ;;  %v9340_v30 = vld [vmem:[%s9545_s7] sm:$0xff]  }
0x1446   :  { %v5125_v45 = vmul.f32 -1.442695, %v4277_v2  ;;  %v6362_v2 = vld [vmem:[#allocation2 + $0x20] ss:$16 sps:$4 sm:$0xff]  }
0x1447   :  { %4176 = vrot.lane.b32.xlu1 %v4168_v1, %s6529_s23  ;;  %v6363_v1 = vld [vmem:[#allocation2 + $0x44] ss:$16 sps:$4 sm:$0xff]  }
0x1448   :  { %5983 = vpow2.f32 %v5125_v45 }
0x144f   :  { %v5982_v43 = vpop.eup %5981 }
0x1450   :  { %v4298_v17 = vmul.f32 %v5982_v43, %v5980_v14  ;;  %v6365_v14 = vld [vmem:[#allocation2 + $0x40] ss:$16 sps:$4 sm:$0xff]   ;;  %v6366_v43 = vld [vmem:[#allocation2 + $0x64] ss:$16 sps:$4 sm:$0xff]  }
0x1452   :  { %v5984_v7 = vpop.eup %5983  ;;  %v9325_v52 = vadd.f32 %v4298_v17, %v4297_v61  ;;  %v9356_v61 = vld [vmem:[%s9545_s7 + $0x10] sm:$0xff]   ;;  %s6531_s7 = smov 9  }
0x1453   :  { %v4294_v57 = vadd.f32 1.0, %v5984_v7  ;;  %v6368_v17 = vld [vmem:[#allocation2 + $0x60] ss:$16 sps:$4 sm:$0xff]   ;;  %v6369_v7 = vld [vmem:[#allocation2 + $0x84] ss:$16 sps:$4 sm:$0xff]  }
0x1454   :  { %5985 = vtanh.f32 %v9325_v52 }
0x1455   :  { %5987 = vrcp.f32 %v4294_v57  ;;  %v6370_v57 = vld [vmem:[#allocation2 + $0x80] ss:$16 sps:$4 sm:$0xff]  }
0x145e   :  { %v5986_v36 = vpop.eup %5985 }
0x145f   :  { %v5988_v32 = vpop.eup %5987 }
0x1460   :  { %v9328_v10 = vpop.f32.mrb[132].mxu0  ;;  %v4301_v8 = vmul.f32 %v5988_v32, %v5986_v36  ;;  %v6371_v36 = vld [vmem:[#allocation2 + $0xa4] ss:$16 sps:$4 sm:$0xff]   ;;  %v6372_v32 = vld [vmem:[#allocation2 + $0xa0] ss:$16 sps:$4 sm:$0xff]  }
0x1461   :  { %v9330_v20 = vpop.f32.mrb[133].mxu0 }
0x1462   :  { %v4382_v45 = vpop.f32.mrb[134].mxu0  ;;  %v9332_v3 = vpack.c.bf16 %v4301_v8, %v4301_v8  ;;  %v6373_v8 = vld [vmem:[#allocation2 + $0xc4] ss:$16 sps:$4 sm:$0xff]  }
0x1463   :  { %v4383_v0 = vpop.f32.mrb[135].mxu0  ;;  %v6374_v45 = vld [vmem:[#allocation2 + $0xc0] ss:$16 sps:$4 sm:$0xff]  }
0x1464   :  { %4418 = vmatmul.mubr.bf16.vlgmr.msra.gmra.mrb[132].mxu1 %v9332_v3  ;;  %4459 = vmatmul.mubr.bf16.vlgmr.msra.gmra.mrb[136].mxu0 %v9332_v3  ;;  %v6375_v0 = vld [vmem:[#allocation2 + $0xe4] ss:$16 sps:$4 sm:$0xff]  }
0x1465   :  { %4566 = vmatpush1.bf16.msra.mxu0 %v6359_v51  ;;  %4597 = vmatprep.mubr.bf16.mxu0 %v10109_v60  ;;  %v6376_v51 = vld [vmem:[#allocation2 + $0xe0] ss:$16 sps:$4 sm:$0xff]  }
0x1466   :  { %4567 = vmatprep.subr.bf16.mxu0 %v6360_v56  ;;  %5415 = vmatpush3.bf16.msra.mxu1 %v9340_v30  ;;  %v6377_v56 = vld [vmem:[#allocation7 + $0x4] ss:$16 sps:$4 sm:$0xff]  }
0x1467   :  { %5416 = vmatprep.subr.bf16.mxu1 %v10238_v58  ;;  %5430 = vmatprep.mubr.msk.bf16.mxu1 %vm6512_vm0, %v10238_v58 }
0x1469   :  { %4568 = vmatpush1.bf16.msra.mxu0 %v6362_v2  ;;  %v6378_v2 = vld [vmem:[#allocation2 + $0xc] ss:$16 sps:$4 sm:$0xff]  }
0x146a   :  { %4569 = vmatprep.subr.bf16.mxu0 %v6363_v1  ;;  %5417 = vmatpush3.bf16.msra.mxu1 %v9349_v53  ;;  %v6379_v1 = vld [vmem:[#allocation7] ss:$16 sps:$4 sm:$0xff]  }
0x146b   :  { %5418 = vmatprep.subr.bf16.mxu1 %v10238_v58 }
0x146d   :  { %4570 = vmatpush1.bf16.msra.mxu0 %v6365_v14  ;;  %v6380_v14 = vld [vmem:[#allocation7 + $0x24] ss:$16 sps:$4 sm:$0xff]  }
0x146e   :  { %4571 = vmatprep.subr.bf16.mxu0 %v6366_v43  ;;  %5419 = vmatpush3.bf16.msra.mxu1 %v9356_v61  ;;  %v6381_v43 = vld [vmem:[#allocation7 + $0x20] ss:$16 sps:$4 sm:$0xff]  }
0x146f   :  { %5420 = vmatprep.subr.bf16.mxu1 %v10238_v58 }
0x1471   :  { %4572 = vmatpush1.bf16.msra.mxu0 %v6368_v17  ;;  %v6382_v17 = vld [vmem:[#allocation7 + $0x44] ss:$16 sps:$4 sm:$0xff]  }
0x1472   :  { %4573 = vmatprep.subr.bf16.mxu0 %v6369_v7  ;;  %5421 = vmatpush3.bf16.msra.mxu1 %v9136_v21  ;;  %v6383_v7 = vld [vmem:[#allocation7 + $0x40] ss:$16 sps:$4 sm:$0xff]  }
0x1473   :  { %5422 = vmatprep.subr.bf16.mxu1 %v10238_v58 }
0x1475   :  { %4574 = vmatpush1.bf16.msra.mxu0 %v6370_v57  ;;  %v6384_v57 = vld [vmem:[#allocation7 + $0x64] ss:$16 sps:$4 sm:$0xff]  }
0x1476   :  { %4575 = vmatprep.subr.bf16.mxu0 %v6371_v36  ;;  %5423 = vmatpush3.bf16.msra.mxu1 %v9145_v4  ;;  %v6385_v36 = vld [vmem:[#allocation7 + $0x60] ss:$16 sps:$4 sm:$0xff]  }
0x1477   :  { %5424 = vmatprep.subr.bf16.mxu1 %v10238_v58 }
0x1479   :  { %4576 = vmatpush1.bf16.msra.mxu0 %v6372_v32 }
0x147a   :  { %4577 = vmatprep.subr.bf16.mxu0 %v6373_v8  ;;  %5425 = vmatpush3.bf16.msra.mxu1 %v9154_v33 }
0x147b   :  { %5426 = vmatprep.subr.bf16.mxu1 %v10238_v58 }
0x147d   :  { %4578 = vmatpush1.bf16.msra.mxu0 %v6374_v45 }
0x147e   :  { %4579 = vmatprep.subr.bf16.mxu0 %v6375_v0  ;;  %5427 = vmatpush3.bf16.msra.mxu1 %v9163_v29 }
0x147f   :  { %5428 = vmatprep.subr.bf16.mxu1 %v10238_v58 }
0x1481   :  { %4580 = vmatpush1.bf16.msra.mxu0 %v6376_v51 }
0x1482   :  { %4680 = vmatprep.subr.bf16.mxu0 %v6377_v56  ;;  %5429 = vmatpush3.bf16.msra.mxu1 %v9172_v26 }
0x1483   :  { %4606 = vmatprep.subr.bf16.mxu1 %v6378_v2 }
0x1484   :  { %4598 = vmatmul.mubr.bf16.vlgmr.msra.gmra.mrb[140].mxu0 %v9332_v3 }
0x1485   :  { %4681 = vmatpush1.bf16.msra.mxu0 %v6379_v1  ;;  %4712 = vmatprep.mubr.bf16.mxu0 %v10109_v60 }
0x1486   :  { %4682 = vmatprep.subr.bf16.mxu0 %v6380_v14 }
0x1489   :  { %4683 = vmatpush1.bf16.msra.mxu0 %v6381_v43 }
0x148a   :  { %4684 = vmatprep.subr.bf16.mxu0 %v6382_v17 }
0x148d   :  { %4685 = vmatpush1.bf16.msra.mxu0 %v6383_v7 }
0x148e   :  { %4686 = vmatprep.subr.bf16.mxu0 %v6384_v57 }
0x1491   :  { %4687 = vmatpush1.bf16.msra.mxu0 %v6385_v36 }
0x1492   :  { %4688 = vmatprep.subr.bf16.mxu0 %v9185_v23 }
0x1495   :  { %v4171_v32 = vpop.permute.xlu0 %4170  ;;  %4689 = vmatpush1.bf16.msra.mxu0 %v9188_v63 }
0x1496   :  { %4174 = vst.msk [vmem:[#allocation8] sm:$0xff] %vm4173_vm9, %v4171_v32  ;;  %4690 = vmatprep.subr.bf16.mxu0 %v9192_v11 }
0x1499   :  { %4691 = vmatpush1.bf16.msra.mxu0 %v9195_v34 }
0x149a   :  { %4692 = vmatprep.subr.bf16.mxu0 %v9198_v9 }
0x149d   :  { %4693 = vmatpush1.bf16.msra.mxu0 %v9201_v49 }
0x149e   :  { %4694 = vmatprep.subr.bf16.mxu0 %v9204_v13 }
0x14a1   :  { %4695 = vmatpush1.bf16.msra.mxu0 %v9207_v41 }
0x14a2   :  { %4762 = vmatprep.subr.bf16.mxu0 %v9210_v37 }
0x14b9   :  { %v4177_v23 = vpop.permute.xlu1 %4176 }
0x14ba   :  { %4179 = vst.msk [vmem:[#allocation9] sm:$0xff] %vm4173_vm9, %v4177_v23 }
0x1537   :  { %v4419_v8 = vpop.f32.mrb[132].mxu1  ;;  %v4460_v45 = vpop.f32.mrb[136].mxu0 }
0x1538   :  { %v4420_v63 = vadd.f32 %v4419_v8, %v9298_v16  ;;  %v4461_v11 = vadd.f32 %v4460_v45, %v9328_v10  ;;  %v4421_v0 = vpop.f32.mrb[133].mxu1  ;;  %v4462_v34 = vpop.f32.mrb[137].mxu0 }
0x1539   :  { %v4422_v9 = vadd.f32 %v4421_v0, %v9306_v25  ;;  %v4463_v49 = vadd.f32 %v4462_v34, %v9330_v20  ;;  %v4423_v51 = vpop.f32.mrb[134].mxu1  ;;  %v4464_v13 = vpop.f32.mrb[138].mxu0 }
0x153a   :  { %v4467_v41 = vadd.f32 %v4420_v63, %v7102_v40  ;;  %v4424_v56 = vpop.f32.mrb[135].mxu1  ;;  %v4465_v37 = vpop.f32.mrb[139].mxu0  ;;  %v4469_v43 = vadd.f32 %v4461_v11, %v7114_v39 }
0x153b   :  { %v4468_v2 = vadd.f32 %v4422_v9, %v7105_v46  ;;  %v4470_v16 = vadd.f32 %v4463_v49, %v7110_v6  ;;  %v10815_v37 = vld [vmem:[#allocation55_spill] sm:$0xff] }
0x153c   :  { %v5126_v1 = vmul.f32 -1.442695, %v4467_v41 }
0x153d   :  { %v5127_v14 = vmul.f32 -1.442695, %v4468_v2  ;;  %v5128_v10 = vmul.f32 -1.442695, %v4470_v16  ;;  %v10816_v2 = vld [vmem:[#allocation57_spill] sm:$0xff]  ;;  %v10819_v16 = vld [vmem:[#allocation63_spill] sm:$0xff] }
0x153e   :  { %5989 = vpow2.f32 %v5126_v1  ;;  %v10817_v1 = vld [vmem:[#allocation59_spill] sm:$0xff] }
0x153f   :  { %5991 = vpow2.f32 %v5127_v14  ;;  %v10818_v14 = vld [vmem:[#allocation61_spill] sm:$0xff] }
0x1540   :  { %5993 = vpow2.f32 %v5128_v10  ;;  %v10820_v10 = vld [vmem:[#allocation65_spill] sm:$0xff] }
0x1541   :  { %5995 = vtanh.f32 %v4469_v43  ;;  %v10821_v43 = vld [vmem:[#allocation67_spill] sm:$0xff] }
0x1548   :  { %v5990_v25 = vpop.eup %5989 }
0x1549   :  { %v5992_v17 = vpop.eup %5991  ;;  %v4474_v20 = vadd.f32 1.0, %v5990_v25  ;;  %v10822_v25 = vld [vmem:[#allocation69_spill] sm:$0xff] }
0x154a   :  { %v4480_v7 = vadd.f32 1.0, %v5992_v17  ;;  %v5994_v57 = vpop.eup %5993  ;;  %v10823_v17 = vld [vmem:[#allocation71_spill] sm:$0xff] }
0x154b   :  { %5997 = vrcp.f32 %v4474_v20  ;;  %v5996_v36 = vpop.eup %5995  ;;  %v4487_v45 = vadd.f32 1.0, %v5994_v57  ;;  %v10825_v20 = vld [vmem:[#allocation75_spill] sm:$0xff]  ;;  %v10827_v57 = vld [vmem:[#allocation17_spill] sm:$0xff] }
0x154c   :  { %5999 = vrcp.f32 %v4480_v7  ;;  %v10826_v7 = vld [vmem:[#allocation26_spill] sm:$0xff] }
0x154d   :  { %6001 = vrcp.f32 %v4487_v45  ;;  %v10832_v45 = vld [vmem:[#allocation81_spill] sm:$0xff] }
0x1555   :  { %v5998_v32 = vpop.eup %5997 }
0x1556   :  { %v6000_v23 = vpop.eup %5999  ;;  %v4491_v8 = vmul.f32 %v5998_v32, %v5996_v36  ;;  %v10828_v36 = vld [vmem:[#allocation52_spill] sm:$0xff] }
0x1557   :  { %v4490_v63 = vmul.f32 %v6000_v23, %v9227_v50  ;;  %v9389_v0 = vpop.f32.mrb[140].mxu0  ;;  %v6002_v51 = vpop.eup %6001  ;;  %v10803_v50 = vld [vmem:[#allocation39_spill] sm:$0xff]  ;;  %v10829_v32 = vld [vmem:[#allocation80_spill] sm:$0xff]  ;;  %v10830_v23 = vld [vmem:[#allocation54_spill] sm:$0xff] }
0x1558   :  { %v9391_v34 = vpop.f32.mrb[141].mxu0 }
0x1559   :  { %v9393_v11 = vadd.f32 %v4491_v8, %v4490_v63  ;;  %v4603_v9 = vpop.f32.mrb[142].mxu0  ;;  %v10831_v8 = vld [vmem:[#allocation18_spill] sm:$0xff]  ;;  %v10833_v63 = vld [vmem:[#allocation19_spill] sm:$0xff] }
0x155a   :  { %v4604_v49 = vpop.f32.mrb[143].mxu0  ;;  %v10834_v9 = vld [vmem:[#allocation56_spill] sm:$0xff] }
0x155b   :  { %6003 = vtanh.f32 %v9393_v11  ;;  %v10835_v49 = vld [vmem:[#allocation83_spill] sm:$0xff] }
0x1565   :  { %v6004_v13 = vpop.eup %6003 }
0x1566   :  { %v4494_v41 = vmul.f32 %v6004_v13, %v6002_v51  ;;  %v10836_v51 = vld [vmem:[#allocation58_spill] sm:$0xff]  ;;  %v10837_v13 = vld [vmem:[#allocation20_spill] sm:$0xff] }
0x1568   :  { %v4495_v56 = vpack.c.bf16 %v4494_v41, %v4494_v41  ;;  %v10838_v41 = vld [vmem:[#allocation91_spill] sm:$0xff] }
0x156a   :  { %5431 = vmatmul.mubr.bf16.vlgmr.msra.gmra.mrb[136].mxu1 %v4495_v56  ;;  %4713 = vmatmul.mubr.bf16.vlgmr.msra.gmra.mrb[144].mxu0 %v4495_v56 }
0x156b   :  { %4607 = vmatpush1.bf16.msra.mxu1 %v8889_v12  ;;  %4638 = vmatprep.mubr.bf16.mxu1 %v10109_v60  ;;  %v10799_v12 = vld [vmem:[#allocation35_spill] sm:$0xff] }
0x156c   :  { %4608 = vmatprep.subr.bf16.mxu1 %v8893_v44  ;;  %4763 = vmatpush1.bf16.msra.mxu0 %v8896_v47  ;;  %v10800_v44 = vld [vmem:[#allocation36_spill] sm:$0xff]  ;;  %v10801_v47 = vld [vmem:[#allocation37_spill] sm:$0xff] }
0x156d   :  { %4764 = vmatprep.subr.bf16.mxu0 %v8899_v31  ;;  %4794 = vmatprep.mubr.bf16.mxu0 %v10109_v60  ;;  %v10802_v31 = vld [vmem:[#allocation38_spill] sm:$0xff] }
0x156f   :  { %4609 = vmatpush1.bf16.msra.mxu1 %v10736_v59  ;;  %v10804_v59 = vld [vmem:[#allocation40_spill] sm:$0xff] }
0x1570   :  { %4610 = vmatprep.subr.bf16.mxu1 %v10737_v19  ;;  %4765 = vmatpush1.bf16.msra.mxu0 %v10738_v62  ;;  %v10805_v19 = vld [vmem:[#allocation41_spill] sm:$0xff]  ;;  %v10806_v62 = vld [vmem:[#allocation42_spill] sm:$0xff] }
0x1571   :  { %4766 = vmatprep.subr.bf16.mxu0 %v10739_v28  ;;  %v10807_v28 = vld [vmem:[#allocation43_spill] sm:$0xff] }
0x1573   :  { %4611 = vmatpush1.bf16.msra.mxu1 %v10740_v54  ;;  %v10808_v54 = vld [vmem:[#allocation44_spill] sm:$0xff] }
0x1574   :  { %4612 = vmatprep.subr.bf16.mxu1 %v10741_v55  ;;  %4767 = vmatpush1.bf16.msra.mxu0 %v10742_v42  ;;  %v10809_v55 = vld [vmem:[#allocation45_spill] sm:$0xff]  ;;  %v10810_v42 = vld [vmem:[#allocation46_spill] sm:$0xff] }
0x1575   :  { %4768 = vmatprep.subr.bf16.mxu0 %v10743_v5  ;;  %v10811_v5 = vld [vmem:[#allocation47_spill] sm:$0xff] }
0x1577   :  { %4613 = vmatpush1.bf16.msra.mxu1 %v10744_v38  ;;  %v10812_v38 = vld [vmem:[#allocation49_spill] sm:$0xff] }
0x1578   :  { %4614 = vmatprep.subr.bf16.mxu1 %v10745_v15  ;;  %4769 = vmatpush1.bf16.msra.mxu0 %v10746_v48  ;;  %v10813_v15 = vld [vmem:[#allocation51_spill] sm:$0xff]  ;;  %v10814_v48 = vld [vmem:[#allocation53_spill] sm:$0xff] }
0x1579   :  { %4770 = vmatprep.subr.bf16.mxu0 %v10799_v12  ;;  %v10839_v12 = vld [vmem:[#allocation92_spill] sm:$0xff] }
0x157b   :  { %4615 = vmatpush1.bf16.msra.mxu1 %v10800_v44  ;;  %v10841_v44 = vld [vmem:[#allocation93_spill] sm:$0xff] }
0x157c   :  { %4616 = vmatprep.subr.bf16.mxu1 %v10801_v47  ;;  %4771 = vmatpush1.bf16.msra.mxu0 %v10802_v31  ;;  %v10843_v47 = vld [vmem:[#allocation84_spill] sm:$0xff]  ;;  %v10844_v31 = vld [vmem:[#allocation50_spill] sm:$0xff] }
0x157d   :  { %4772 = vmatprep.subr.bf16.mxu0 %v10803_v50  ;;  %v10845_v50 = vld [vmem:[#allocation98_spill] sm:$0xff] }
0x157f   :  { %4617 = vmatpush1.bf16.msra.mxu1 %v10804_v59 }
0x1580   :  { %4618 = vmatprep.subr.bf16.mxu1 %v10805_v19  ;;  %4773 = vmatpush1.bf16.msra.mxu0 %v10806_v62  ;;  %v10846_v62 = vld [vmem:[#allocation21_spill] sm:$0xff] }
0x1581   :  { %4774 = vmatprep.subr.bf16.mxu0 %v10807_v28 }
0x1583   :  { %4619 = vmatpush1.bf16.msra.mxu1 %v10808_v54 }
0x1584   :  { %4620 = vmatprep.subr.bf16.mxu1 %v10809_v55  ;;  %4775 = vmatpush1.bf16.msra.mxu0 %v10810_v42  ;;  %v10847_v42 = vld [vmem:[#allocation78_spill] sm:$0xff] }
0x1585   :  { %4776 = vmatprep.subr.bf16.mxu0 %v10811_v5  ;;  %v10848_v5 = vld [vmem:[#allocation15_spill] sm:$0xff] }
0x1587   :  { %4621 = vmatpush1.bf16.msra.mxu1 %v10812_v38  ;;  %v4562_v38 = vmul.f32 %v10848_v5, %v10847_v42 }
0x1588   :  { %4721 = vmatprep.subr.bf16.mxu1 %v10813_v15  ;;  %4777 = vmatpush1.bf16.msra.mxu0 %v10814_v48 }
0x1589   :  { %5434 = vmatprep.subr.bf16.mxu0 %v10238_v58 }
0x158a   :  { %4639 = vmatmul.mubr.bf16.vlgmr.msra.gmra.mrb[140].mxu1 %v9332_v3  ;;  %v10824_v3 = vld [vmem:[#allocation73_spill] sm:$0xff] }
0x158b   :  { %4722 = vmatpush1.bf16.msra.mxu1 %v10815_v37  ;;  %4753 = vmatprep.mubr.bf16.mxu1 %v10109_v60  ;;  %v10849_v37 = vld [vmem:[#allocation77_spill] sm:$0xff] }
0x158c   :  { %4723 = vmatprep.subr.bf16.mxu1 %v10816_v2  ;;  %v4561_v2 = vmul.f32 %v10848_v5, %v10849_v37 }
0x158f   :  { %4724 = vmatpush1.bf16.msra.mxu1 %v10817_v1 }
0x1590   :  { %4725 = vmatprep.subr.bf16.mxu1 %v10818_v14 }
0x1593   :  { %4726 = vmatpush1.bf16.msra.mxu1 %v10819_v16 }
0x1594   :  { %4727 = vmatprep.subr.bf16.mxu1 %v10820_v10 }
0x1597   :  { %4728 = vmatpush1.bf16.msra.mxu1 %v10821_v43  ;;  %v4648_v43 = vadd.f32 %v9391_v34, %v4562_v38 }
0x1598   :  { %4729 = vmatprep.subr.bf16.mxu1 %v10822_v25  ;;  %v4647_v25 = vadd.f32 %v9389_v0, %v4561_v2 }
0x159b   :  { %4730 = vmatpush1.bf16.msra.mxu1 %v10823_v17 }
0x159c   :  { %4731 = vmatprep.subr.bf16.mxu1 %v10824_v3  ;;  %v4652_v3 = vadd.f32 %v4648_v43, %v6978_v18  ;;  %v4564_v18 = vmul.f32 %v10848_v5, %v6970_v35 }
0x159f   :  { %4732 = vmatpush1.bf16.msra.mxu1 %v10825_v20  ;;  %v4651_v20 = vadd.f32 %v4647_v25, %v6973_v22 }
0x15a0   :  { %4733 = vmatprep.subr.bf16.mxu1 %v10826_v7  ;;  %v5130_v7 = vmul.f32 -1.442695, %v4652_v3 }
0x15a3   :  { %4734 = vmatpush1.bf16.msra.mxu1 %v10827_v57  ;;  %v5129_v57 = vmul.f32 -1.442695, %v4651_v20 }
0x15a4   :  { %4735 = vmatprep.subr.bf16.mxu1 %v10828_v36 }
0x15a7   :  { %4736 = vmatpush1.bf16.msra.mxu1 %v10829_v32 }
0x15a8   :  { %4803 = vmatprep.subr.bf16.mxu1 %v10830_v23 }
0x15aa   :  { %4754 = vmatmul.mubr.bf16.vlgmr.msra.gmra.mrb[144].mxu1 %v4495_v56  ;;  %v10840_v56 = vld [vmem:[#allocation85_spill] sm:$0xff] }
0x15ab   :  { %4804 = vmatpush1.bf16.msra.mxu1 %v10831_v8  ;;  %4835 = vmatprep.mubr.bf16.mxu1 %v10109_v60  ;;  %v10842_v60 = vld [vmem:[#allocation94_spill] sm:$0xff] }
0x15ac   :  { %4805 = vmatprep.subr.bf16.mxu1 %v10832_v45 }
0x15af   :  { %4806 = vmatpush1.bf16.msra.mxu1 %v10833_v63  ;;  %v10850_v63 = vld [vmem:[#allocation79_spill] sm:$0xff] }
0x15b0   :  { %4807 = vmatprep.subr.bf16.mxu1 %v10834_v9  ;;  %v4563_v34 = vmul.f32 %v10848_v5, %v10850_v63 }
0x15b3   :  { %4808 = vmatpush1.bf16.msra.mxu1 %v10835_v49 }
0x15b4   :  { %4809 = vmatprep.subr.bf16.mxu1 %v10836_v51 }
0x15b7   :  { %4810 = vmatpush1.bf16.msra.mxu1 %v10837_v13 }
0x15b8   :  { %4811 = vmatprep.subr.bf16.mxu1 %v10838_v41 }
0x15bb   :  { %4812 = vmatpush1.bf16.msra.mxu1 %v10839_v12 }
0x15bc   :  { %4813 = vmatprep.subr.bf16.mxu1 %v10840_v56 }
0x15bf   :  { %4814 = vmatpush1.bf16.msra.mxu1 %v10841_v44 }
0x15c0   :  { %4815 = vmatprep.subr.bf16.mxu1 %v10842_v60 }
0x15c3   :  { %4816 = vmatpush1.bf16.msra.mxu1 %v10843_v47 }
0x15c4   :  { %4817 = vmatprep.subr.bf16.mxu1 %v10844_v31 }
0x15c7   :  { %4818 = vmatpush1.bf16.msra.mxu1 %v10845_v50 }
0x163d   :  { %v4530_v59 = vpop.f32.mrb[136].mxu1  ;;  %v9464_v19 = vpop.f32.mrb[144].mxu0 }
0x163e   :  { %v4531_v28 = vadd.f32 %v10846_v62, %v4530_v59  ;;  %v5432_v54 = vpop.f32.mrb[137].mxu1  ;;  %v9467_v55 = vpop.f32.mrb[145].mxu0 }
0x163f   :  { %v4533_v15 = vpop.f32.mrb[138].mxu1  ;;  %v4718_v48 = vpop.f32.mrb[146].mxu0 }
0x1640   :  { %v4537_v1 = vand.u32 2147483647, %v4531_v28  ;;  %v4719_v14 = vpop.f32.mrb[147].mxu0  ;;  %4547 = vrot.lane.b32.xlu0 %v4531_v28, %s6531_s7  ;;  %v5433_v16 = vpop.f32.mrb[139].mxu1  ;;  %v4536_v22 = vmax.f32 %v4531_v28, 0.0 }
0x1642   :  { %v4538_v10 = vsub.f32 0.0, %v4537_v1 }
0x1644   :  { %v4539_v17 = vmul.f32 1.442695, %v4538_v10 }
0x1646   :  { %6005 = vpow2.f32 %v4539_v17 }
0x1647   :  { %6007 = vpow2.f32 %v5130_v7 }
0x1648   :  { %6009 = vpow2.f32 %v5129_v57 }
0x1650   :  { %v6006_v36 = vpop.eup %6005 }
0x1651   :  { %v4541_v32 = vadd.f32 1.0, %v6006_v36  ;;  %v6008_v23 = vpop.eup %6007 }
0x1652   :  { %v6010_v8 = vpop.eup %6009  ;;  %v4664_v45 = vadd.f32 1.0, %v6008_v23 }
0x1653   :  { %6011 = vlog2.f32 %v4541_v32  ;;  %v4658_v9 = vadd.f32 1.0, %v6010_v8 }
0x1654   :  { %6013 = vrcp.f32 %v4664_v45 }
0x1655   :  { %6015 = vrcp.f32 %v4658_v9 }
0x165d   :  { %v6012_v0 = vpop.eup %6011  ;;  %v4640_v49 = vpop.f32.mrb[140].mxu1 }
0x165e   :  { %v4649_v51 = vadd.f32 %v4640_v49, %v4563_v34  ;;  %v4642_v13 = vpop.f32.mrb[141].mxu1  ;;  %v4543_v41 = vmul.f32 0.6931472, %v6012_v0  ;;  %v6014_v35 = vpop.eup %6013 }
0x165f   :  { %v4650_v12 = vadd.f32 %v4642_v13, %v4564_v18  ;;  %v4644_v56 = vpop.f32.mrb[142].mxu1  ;;  %v6016_v28 = vpop.eup %6015  ;;  %v4674_v42 = vmul.f32 %v6014_v35, %v9325_v52 }
0x1660   :  { %v4653_v44 = vadd.f32 %v4649_v51, %v6992_v24  ;;  %v4645_v60 = vpop.f32.mrb[143].mxu1  ;;  %v4544_v47 = vadd.f32 %v4543_v41, %v4536_v22 }
0x1661   :  { %v4654_v31 = vadd.f32 %v4650_v12, %v6987_v27 }
0x1662   :  { %6017 = vtanh.f32 %v4653_v44  ;;  %v4545_v50 = vadd.f32 1e-06, %v4544_v47 }
0x1663   :  { %v5131_v59 = vmul.f32 -1.442695, %v4654_v31 }
0x1664   :  { %4553 = vrot.lane.b32.xlu1 %v4545_v50, %s6530_s11 }
0x1665   :  { %6019 = vpow2.f32 %v5131_v59 }
0x166c   :  { %v6018_v54 = vpop.eup %6017 }
0x166d   :  { %v4675_v5 = vmul.f32 %v6018_v54, %v6016_v28 }
0x166f   :  { %v6020_v38 = vpop.eup %6019  ;;  %v4676_v15 = vadd.f32 %v4675_v5, %v4674_v42 }
0x1670   :  { %v4671_v24 = vadd.f32 1.0, %v6020_v38 }
0x1671   :  { %6021 = vtanh.f32 %v4676_v15 }
0x1672   :  { %6023 = vrcp.f32 %v4671_v24 }
0x167b   :  { %v6022_v48 = vpop.eup %6021 }
0x167c   :  { %v6024_v37 = vpop.eup %6023 }
0x167d   :  { %v4755_v27 = vpop.f32.mrb[144].mxu1  ;;  %v4678_v2 = vmul.f32 %v6024_v37, %v6022_v48 }
0x167e   :  { %v4757_v1 = vpop.f32.mrb[145].mxu1 }
0x167f   :  { %v4759_v14 = vpop.f32.mrb[146].mxu1  ;;  %v4679_v16 = vpack.c.bf16 %v4678_v2, %v4678_v2 }
0x1680   :  { %v4760_v10 = vpop.f32.mrb[147].mxu1 }
0x1681   :  { %4795 = vmatmul.mubr.bf16.vlgmr.msra.gmra.mrb[148].mxu0 %v4679_v16  ;;  %4836 = vmatmul.mubr.bf16.vlgmr.msra.gmra.mrb[148].mxu1 %v4679_v16 }
0x1682   :  { %5435 = vmatpush3.bf16.msra.mxu0 %v9340_v30  ;;  %5450 = vmatprep.mubr.msk.bf16.mxu0 %vm6512_vm0, %v10238_v58 }
0x1683   :  { %5436 = vmatprep.subr.bf16.mxu0 %v10238_v58 }
0x1686   :  { %5437 = vmatpush3.bf16.msra.mxu0 %v9349_v53 }
0x1687   :  { %5438 = vmatprep.subr.bf16.mxu0 %v10238_v58 }
0x168a   :  { %5439 = vmatpush3.bf16.msra.mxu0 %v9356_v61 }
0x168b   :  { %5440 = vmatprep.subr.bf16.mxu0 %v10238_v58 }
0x168e   :  { %5441 = vmatpush3.bf16.msra.mxu0 %v9136_v21 }
0x168f   :  { %5442 = vmatprep.subr.bf16.mxu0 %v10238_v58 }
0x1692   :  { %5443 = vmatpush3.bf16.msra.mxu0 %v9145_v4 }
0x1693   :  { %5444 = vmatprep.subr.bf16.mxu0 %v10238_v58 }
0x1696   :  { %5445 = vmatpush3.bf16.msra.mxu0 %v9154_v33 }
0x1697   :  { %5446 = vmatprep.subr.bf16.mxu0 %v10238_v58 }
0x169a   :  { %5447 = vmatpush3.bf16.msra.mxu0 %v9163_v29 }
0x169b   :  { %5448 = vmatprep.subr.bf16.mxu0 %v10238_v58 }
0x169e   :  { %5449 = vmatpush3.bf16.msra.mxu0 %v9172_v26 }
0x16b2   :  { %v4548_v52 = vpop.permute.xlu0 %4547 }
0x16b3   :  { %4551 = vst.msk [vmem:[#allocation8] sm:$0xff] %vm4550_vm10, %v4548_v52 }
0x16d6   :  { %v4554_v21 = vpop.permute.xlu1 %4553 }
0x16d7   :  { %4556 = vst.msk [vmem:[#allocation9] sm:$0xff] %vm4550_vm10, %v4554_v21 }
0x1754   :  { %v4796_v30 = vpop.f32.mrb[148].mxu0  ;;  %v4837_v53 = vpop.f32.mrb[148].mxu1 }
0x1755   :  { %v4797_v4 = vadd.f32 %v4796_v30, %v9464_v19  ;;  %v4838_v61 = vadd.f32 %v4837_v53, %v4755_v27  ;;  %v4798_v43 = vpop.f32.mrb[149].mxu0  ;;  %v4839_v33 = vpop.f32.mrb[149].mxu1 }
0x1756   :  { %v4799_v25 = vadd.f32 %v4798_v43, %v9467_v55  ;;  %v4840_v17 = vadd.f32 %v4839_v33, %v4757_v1  ;;  %v4800_v29 = vpop.f32.mrb[150].mxu0  ;;  %v4841_v3 = vpop.f32.mrb[150].mxu1 }
0x1757   :  { %v4844_v58 = vadd.f32 %v4797_v4, %v7102_v40  ;;  %v4801_v26 = vpop.f32.mrb[151].mxu0  ;;  %v4842_v20 = vpop.f32.mrb[151].mxu1  ;;  %v4846_v23 = vadd.f32 %v4838_v61, %v7114_v39 }
0x1758   :  { %v4845_v7 = vadd.f32 %v4799_v25, %v7105_v46  ;;  %v4847_v19 = vadd.f32 %v4840_v17, %v7110_v6 }
0x1759   :  { %v5132_v57 = vmul.f32 -1.442695, %v4844_v58 }
0x175a   :  { %v5133_v36 = vmul.f32 -1.442695, %v4845_v7  ;;  %v5134_v32 = vmul.f32 -1.442695, %v4847_v19 }
0x175b   :  { %6025 = vpow2.f32 %v5132_v57 }
0x175c   :  { %6027 = vpow2.f32 %v5133_v36 }
0x175d   :  { %6029 = vpow2.f32 %v5134_v32 }
0x175e   :  { %6031 = vtanh.f32 %v4846_v23 }
0x1765   :  { %v6026_v8 = vpop.eup %6025 }
0x1766   :  { %v6028_v55 = vpop.eup %6027  ;;  %v4851_v45 = vadd.f32 1.0, %v6026_v8 }
0x1767   :  { %v4857_v63 = vadd.f32 1.0, %v6028_v55  ;;  %v6030_v40 = vpop.eup %6029 }
0x1768   :  { %6033 = vrcp.f32 %v4851_v45  ;;  %v6032_v34 = vpop.eup %6031  ;;  %v4864_v49 = vadd.f32 1.0, %v6030_v40 }
0x1769   :  { %6035 = vrcp.f32 %v4857_v63 }
0x176a   :  { %6037 = vrcp.f32 %v4864_v49 }
0x1772   :  { %v6034_v46 = vpop.eup %6033 }
0x1773   :  { %v6036_v0 = vpop.eup %6035  ;;  %v4868_v9 = vmul.f32 %v6034_v46, %v6032_v34 }
0x1774   :  { %v4867_v18 = vmul.f32 %v6036_v0, %v9393_v11  ;;  %v6038_v39 = vpop.eup %6037 }
0x1776   :  { %v4869_v6 = vadd.f32 %v4868_v9, %v4867_v18 }
0x1778   :  { %6039 = vtanh.f32 %v4869_v6 }
0x1782   :  { %v6040_v22 = vpop.eup %6039 }
0x1783   :  { %v4871_v51 = vmul.f32 %v6040_v22, %v6038_v39 }
0x1785   :  { %v4872_v13 = vpack.c.bf16 %v4871_v51, %v4871_v51 }
0x1787   :  { %5451 = vmatmul.mubr.bf16.vlgmr.msra.gmra.mrb[152].mxu0 %v4872_v13 }
0x185a   :  { %v4907_v41 = vpop.f32.mrb[152].mxu0 }
0x185b   :  { %v4908_v12 = vadd.f32 %v10846_v62, %v4907_v41  ;;  %v5452_v56 = vpop.f32.mrb[153].mxu0 }
0x185c   :  { %v4910_v44 = vpop.f32.mrb[154].mxu0 }
0x185d   :  { %v4914_v60 = vand.u32 2147483647, %v4908_v12  ;;  %4924 = vrot.lane.b32.xlu0 %v4908_v12, %s6532_s17  ;;  %v5453_v47 = vpop.f32.mrb[155].mxu0  ;;  %v4913_v28 = vmax.f32 %v4908_v12, 0.0 }
0x185f   :  { %v4915_v31 = vsub.f32 0.0, %v4914_v60 }
0x1861   :  { %v4916_v50 = vmul.f32 1.442695, %v4915_v31 }
0x1863   :  { %6041 = vpow2.f32 %v4916_v50 }
0x186d   :  { %v6042_v11 = vpop.eup %6041 }
0x186e   :  { %v4918_v59 = vadd.f32 1.0, %v6042_v11 }
0x1870   :  { %6043 = vlog2.f32 %v4918_v59 }
0x187a   :  { %v6044_v35 = vpop.eup %6043 }
0x187b   :  { %v4920_v54 = vmul.f32 0.6931472, %v6044_v35 }
0x187d   :  { %v4921_v42 = vadd.f32 %v4920_v54, %v4913_v28 }
0x187f   :  { %v4922_v5 = vadd.f32 1e-06, %v4921_v42 }
0x1881   :  { %4930 = vrot.lane.b32.xlu1 %v4922_v5, %s6531_s7 }
0x18cf   :  { %v4925_v62 = vpop.permute.xlu0 %4924 }
0x18d0   :  { %4928 = vst.msk [vmem:[#allocation8] sm:$0xff] %vm4927_vm11, %v4925_v62 }
0x18d1   :  { %6463 = shalt.err (!%p6460_p0)
}
0x18d2   :  { %s6464_s21 = scalar_lea.hbm %s9547_s9, 128 }
0x18d3   :  { %p6465_p1 = scmp.ne.s32.totalorder %s9547_s9, %s6464_s21  ;;  %p6468_p2 = scmp.lt.u32.totalorder %s6464_s21, %s9547_s9 }
0x18d5   :  { %p6470_p3 = pnand %p6468_p2, %p6465_p1 }
0x18d7   :  { %6473 = shalt.err (!%p6470_p3)
}
0x18d8   :  { %4943 = dma.vmem_to_hbm [thread:$0]  %s4941_s4, 128, %s9547_s9, [#allocation4]  }
0x18d9   :  { %s6534_s30 = smov [#allocation9]  }
0x18da   :  { %s4950_s2 = sshll.u32 %s6534_s30, 4  ;;  %s4951_s2 = int_to_ptr.vmem [resolvable:$true] %s4950_s2 }
0x18db   :  { %s6474_s6 = scalar_lea.vmem %s4951_s2, 128  ;;  %p6479_p5 = scmp.lt.s32.totalorder %s4951_s2, %s4951_s2 }
0x18dc   :  { %p6475_p4 = scmp.ne.s32.totalorder %s4951_s2, %s6474_s6  ;;  %p6480_p6 = scmp.lt.s32.totalorder %s6474_s6, %s6474_s6 }
0x18de   :  { %p6481_p7 = por %p6480_p6, %p6479_p5 }
0x18e0   :  { %p6482_p8 = pnand %p6481_p7, %p6475_p4 }
0x18f3   :  { %v4931_v38 = vpop.permute.xlu1 %4930 }
0x18f4   :  { %4933 = vst.msk [vmem:[#allocation9] sm:$0xff] %vm4927_vm11, %v4931_v38 }
0x18f5   :  { %6485 = shalt.err (!%p6482_p8)
}
0x18f6   :  { %s6486_s25 = scalar_lea.hbm %s9548_s10, 128 }
0x18f7   :  { %p6487_p9 = scmp.ne.s32.totalorder %s9548_s10, %s6486_s25  ;;  %p6490_p10 = scmp.lt.u32.totalorder %s6486_s25, %s9548_s10 }
0x18f9   :  { %p6492_p11 = pnand %p6490_p10, %p6487_p9 }
0x18fb   :  { %6495 = shalt.err (!%p6492_p11)
}
0x18fc   :  { %4953 = dma.vmem_to_hbm [thread:$0]  %s4951_s2, 128, %s9548_s10, [#allocation10]  }
0x18fd   :  { %6500 = dma.done.wait [#allocation4], 128  }
0x18fe   :  { %6501 = vsyncadd [#allocation4], 4294967168 }
0x18ff   :  { %6502 = dma.done.wait [#allocation10], 128  }
0x1900   :  { %6503 = vsyncadd [#allocation10], 4294967168 }
0x1901   :  { %4960 = vsyncpa [#allocation3], 1 }
0x1902   :  { %4961 = vsyncpa [#allocation6], 1 }
0x1903   :  { %4962 = vsyncpa [#allocation4], 1 }
0x1904   :  { %4963 = vsyncpa [#allocation10], 1 }

</bundles_post_ra>
